<compile_context>
chip_gen: v5e
topology: v5e:2x2
jax: 0.10.0
libtpu: 0.0.40
codegen_flags: <defaults>
</compile_context>

<pallas_src>
import functools

import jax
import jax.numpy as jnp
from jax.experimental import pallas as pl
from jax.experimental.pallas import tpu as pltpu

_SQRT_2_OVER_PI = 0.7978845608028654
_INV_SQRT2 = 0.7071067811865476


def alignment_kernel(x_ref, w1_ref, w2_ref, p_ref, o_ref, *, approximate_gelu):
    # x_ref:  (TB, D)  native / compute dtype (f32 or bf16)
    # w1_ref: (D, P), w2_ref: (P, P) compute dtype (resident, single-buffered)
    # p_ref:  (4, P) f32 packed params: [b1; b2; gamma; beta]
    x = x_ref[...]
    w1 = w1_ref[...]
    w2 = w2_ref[...]
    b1 = p_ref[0:1, :]
    b2 = p_ref[1:2, :]
    gamma = p_ref[2:3, :]
    beta = p_ref[3:4, :]

    # linear_layer1 — MXU in native dtype, f32 accumulation.
    h = jnp.dot(x, w1, preferred_element_type=jnp.float32) + b1

    if approximate_gelu:
        # tanh GELU: transcendental goes to the (otherwise idle) EUP slot instead of a long
        # VALU erf polynomial — a win when the matmuls are small.
        h3 = h * h * h
        h = 0.5 * h * (1.0 + jnp.tanh(
            jnp.float32(_SQRT_2_OVER_PI) * (h + jnp.float32(0.044715) * h3)))
    else:
        # exact erf GELU — matches torch.nn.GELU() default (approximate='none').
        h = 0.5 * h * (1.0 + jax.lax.erf(h * jnp.float32(_INV_SQRT2)))

    # linear_layer2 — feed MXU in the weight dtype (bf16 path = full MXU rate on v6e/v7x).
    y = jnp.dot(h.astype(w2.dtype), w2, preferred_element_type=jnp.float32) + b2

    # dropout: identity at inference (PyTorch eval mode).

    # LayerNorm over the feature dim, eps = 1e-5 (PyTorch default). Single pass
    # (sum + sum-of-squares) -> one fewer cross-lane reduction; rsqrt once per row.
    n = jnp.float32(y.shape[-1])
    s1 = jnp.sum(y, axis=-1, keepdims=True)
    s2 = jnp.sum(y * y, axis=-1, keepdims=True)
    mean = s1 / n
    var = s2 / n - mean * mean
    inv = jax.lax.rsqrt(var + jnp.float32(1e-5))
    o_ref[...] = ((y - mean) * inv * gamma + beta).astype(o_ref.dtype)


def _round_up(n, m):
    return ((n + m - 1) // m) * m


def alignment_layer(x, w1, b1, w2, b2, gamma, beta, *, tb=256,
                    compute_dtype=None, approximate_gelu=False, out_dtype=None):
    """x: [B, D]; w1: [D, P]; w2: [P, P] (transposed vs. torch's [out, in]);
    b1/b2/gamma/beta: [1, P]."""
    B, D = x.shape
    P = w1.shape[1]
    out_dtype = out_dtype or x.dtype

    # Optional bf16 MXU path: cast activations + weights, keep f32 accumulation & epilogue.
    if compute_dtype is not None:
        x = x.astype(compute_dtype)
        w1 = w1.astype(compute_dtype)
        w2 = w2.astype(compute_dtype)

    # Pack the four (1, P) vectors into one (4, P) f32 slab -> single small resident buffer.
    params = jnp.concatenate(
        [b1.astype(jnp.float32), b2.astype(jnp.float32),
         gamma.astype(jnp.float32), beta.astype(jnp.float32)], axis=0)

    # Batch tile: multiple of 8, large (default 256) to amortize the ~0.35us/step overhead and
    # fill the 256x256 MXU, but capped so ceil(B/tb) >= 2 -> the "parallel" grid axis actually
    # splits across both v7x TensorCores.
    tb = max(8, _round_up(min(tb, B), 8))
    if B >= 16:
        tb = min(tb, _round_up(pl.cdiv(B, 2), 8))
    grid = (pl.cdiv(B, tb),)

    x_bytes = jnp.dtype(x.dtype).itemsize
    w_bytes = jnp.dtype(w1.dtype).itemsize
    o_bytes = jnp.dtype(out_dtype).itemsize
    n_wbuf = 1  # weights single-buffered (constant index_map -> no re-DMA across steps)
    est = (2 * tb * D * x_bytes + 2 * tb * P * o_bytes          # streamed x / out (double-buffered)
           + n_wbuf * (D * P + P * P) * w_bytes                  # resident W1, W2
           + n_wbuf * 4 * P * 4                                  # packed [b1; b2; gamma; beta]
           + 4 * tb * P * 4)                                     # f32 temporaries (h, y, stats)
    vmem_limit = int(min(64 << 20, max(32 << 20, 2 * est)))      # headroom, capped at v7x VMEM

    cost = pl.CostEstimate(
        flops=2 * B * P * (D + P),
        transcendentals=B * P,
        bytes_accessed=(B * D * x_bytes + (D * P + P * P) * w_bytes
                        + 4 * P * 4 + B * P * o_bytes))

    kernel = functools.partial(alignment_kernel, approximate_gelu=approximate_gelu)

    def build(weight_pipeline_mode):
        wkw = {} if weight_pipeline_mode is None else {"pipeline_mode": weight_pipeline_mode}
        return pl.pallas_call(
            kernel,
            out_shape=jax.ShapeDtypeStruct((B, P), out_dtype),
            grid=grid,
            in_specs=[
                pl.BlockSpec((tb, D), lambda i: (i, 0)),          # x: streamed per batch tile
                pl.BlockSpec((D, P), lambda i: (0, 0), **wkw),    # W1: resident across steps
                pl.BlockSpec((P, P), lambda i: (0, 0), **wkw),    # W2: resident across steps
                pl.BlockSpec((4, P), lambda i: (0, 0), **wkw),    # packed [b1; b2; gamma; beta]
            ],
            out_specs=pl.BlockSpec((tb, P), lambda i: (i, 0)),
            compiler_params=pltpu.CompilerParams(
                dimension_semantics=("parallel",),
                vmem_limit_bytes=vmem_limit),
            cost_estimate=cost,
        )

    try:
        # Single-buffer the resident weights (pure VMEM saving: constant index_map).
        return build(pl.Buffered(1))(x, w1, w2, params)
    except Exception:
        # Fallback if this JAX build rejects pipeline_mode=Buffered(1) on a pallas_call BlockSpec.
        return build(None)(x, w1, w2, params)


def reference_jax(x, w1, b1, w2, b2, gamma, beta, approximate_gelu=False):
    h = x.astype(jnp.float32) @ w1.astype(jnp.float32) + b1
    if approximate_gelu:
        h = 0.5 * h * (1.0 + jnp.tanh(_SQRT_2_OVER_PI * (h + 0.044715 * h ** 3)))
    else:
        h = 0.5 * h * (1.0 + jax.lax.erf(h / jnp.sqrt(2.0)))
    y = h @ w2.astype(jnp.float32) + b2
    mean = jnp.mean(y, axis=-1, keepdims=True)
    var = jnp.mean((y - mean) ** 2, axis=-1, keepdims=True)
    return (y - mean) / jnp.sqrt(var + 1e-5) * gamma + beta


if __name__ == "__main__":
    # input_dim == projection_dim == 128 (lane-aligned), as in AlignmentLayer.__init__.
    D = 128
    key = jax.random.PRNGKey(0)
    k_x, k_w1, k_b1, k_w2, k_b2 = jax.random.split(key, 5)

    w1 = jax.random.normal(k_w1, (D, D), dtype=jnp.float32) * 0.02   # linear_layer1.weight.T
    b1 = jax.random.normal(k_b1, (1, D), dtype=jnp.float32) * 0.02   # linear_layer1.bias
    w2 = jax.random.normal(k_w2, (D, D), dtype=jnp.float32) * 0.02   # linear_layer2.weight.T
    b2 = jax.random.normal(k_b2, (1, D), dtype=jnp.float32) * 0.02   # linear_layer2.bias
    gamma = jnp.ones((1, D), dtype=jnp.float32)                      # LayerNorm.weight
    beta = jnp.zeros((1, D), dtype=jnp.float32)                      # LayerNorm.bias

    # (1) f32 + exact erf GELU: strict torch parity. B=512 with tb=256 -> 2-step "parallel" grid.
    B = 512
    x = jax.random.normal(k_x, (B, D), dtype=jnp.float32)
    out = jax.block_until_ready(alignment_layer(x, w1, b1, w2, b2, gamma, beta))
    ref = reference_jax(x, w1, b1, w2, b2, gamma, beta)
    assert out.shape == (B, D)
    assert jnp.allclose(out, ref, atol=1e-4, rtol=1e-4)

    # (2) performance config: bf16 into the MXU + tanh GELU (loose parity expected).
    out_bf = jax.block_until_ready(alignment_layer(
        x, w1, b1, w2, b2, gamma, beta,
        compute_dtype=jnp.bfloat16, approximate_gelu=True))
    ref_bf = reference_jax(x, w1, b1, w2, b2, gamma, beta, approximate_gelu=True)
    assert out_bf.shape == (B, D)
    assert bool(jnp.all(jnp.isfinite(out_bf)))
    assert jnp.allclose(out_bf, ref_bf, atol=1e-1, rtol=1e-1)

    # (3) ragged batch: B not a multiple of tb exercises partial-block padding/masked writeback.
    B2 = 200
    x2 = jax.random.normal(k_x, (B2, D), dtype=jnp.float32)
    out2 = jax.block_until_ready(alignment_layer(x2, w1, b1, w2, b2, gamma, beta))
    ref2 = reference_jax(x2, w1, b1, w2, b2, gamma, beta)
    assert out2.shape == (B2, D)
    assert jnp.allclose(out2, ref2, atol=1e-4, rtol=1e-4)

    print("KERNEL_OK")
</pallas_src>

<mosaic_0001>
module attributes {stable_mosaic.version = 11 : i64} {
  func.func @alignment_kernel(%arg0: i32, %arg1: memref<256x128xf32, #tpu.memory_space<vmem>>, %arg2: memref<128x128xf32, #tpu.memory_space<vmem>>, %arg3: memref<128x128xf32, #tpu.memory_space<vmem>>, %arg4: memref<4x128xf32, #tpu.memory_space<vmem>>, %arg5: memref<256x128xf32, #tpu.memory_space<vmem>>) attributes {dimension_semantics = [#tpu.dimension_semantics<parallel>], iteration_bounds = array<i64: 2>, scalar_prefetch = 0 : i64, scratch_operands = 0 : i64, tpu.core_type = #tpu.core_type<tc>, window_params = [{transform_indices = @transform_0, window_bounds = array<i64: 256, 128>}, {pipeline_mode = #tpu.pipeline_mode<synchronous>, transform_indices = @transform_1, window_bounds = array<i64: 128, 128>}, {pipeline_mode = #tpu.pipeline_mode<synchronous>, transform_indices = @transform_2, window_bounds = array<i64: 128, 128>}, {pipeline_mode = #tpu.pipeline_mode<synchronous>, transform_indices = @transform_3, window_bounds = array<i64: 4, 128>}, {transform_indices = @transform_4, window_bounds = array<i64: 256, 128>}]} {
    %c0 = arith.constant 0 : index
    %c0_0 = arith.constant 0 : index
    %0 = vector.load %arg1[%c0, %c0_0] : memref<256x128xf32, #tpu.memory_space<vmem>>, vector<256x128xf32>
    %c0_1 = arith.constant 0 : index
    %c0_2 = arith.constant 0 : index
    %1 = vector.load %arg2[%c0_1, %c0_2] : memref<128x128xf32, #tpu.memory_space<vmem>>, vector<128x128xf32>
    %c0_3 = arith.constant 0 : index
    %c0_4 = arith.constant 0 : index
    %2 = vector.load %arg3[%c0_3, %c0_4] : memref<128x128xf32, #tpu.memory_space<vmem>>, vector<128x128xf32>
    %c0_5 = arith.constant 0 : index
    %c0_6 = arith.constant 0 : index
    %3 = vector.load %arg4[%c0_5, %c0_6] : memref<4x128xf32, #tpu.memory_space<vmem>>, vector<1x128xf32>
    %c1 = arith.constant 1 : index
    %c0_7 = arith.constant 0 : index
    %4 = vector.load %arg4[%c1, %c0_7] : memref<4x128xf32, #tpu.memory_space<vmem>>, vector<1x128xf32>
    %c2 = arith.constant 2 : index
    %c0_8 = arith.constant 0 : index
    %5 = vector.load %arg4[%c2, %c0_8] : memref<4x128xf32, #tpu.memory_space<vmem>>, vector<1x128xf32>
    %c3 = arith.constant 3 : index
    %c0_9 = arith.constant 0 : index
    %6 = vector.load %arg4[%c3, %c0_9] : memref<4x128xf32, #tpu.memory_space<vmem>>, vector<1x128xf32>
    %cst = arith.constant dense<0.000000e+00> : vector<256x128xf32>
    %7 = tpu.matmul %0, %1, %cst {dimension_numbers = #tpu.dot_dimension_numbers<[1], [0], [0], [1], [0, 0, 1, 1], [], []>} : vector<256x128xf32>, vector<128x128xf32>, vector<256x128xf32> -> vector<256x128xf32>
    %8 = vector.broadcast %3 : vector<1x128xf32> to vector<256x128xf32>
    %9 = arith.addf %7, %8 : vector<256x128xf32>
    %cst_10 = arith.constant 5.000000e-01 : f32
    %10 = vector.broadcast %cst_10 : f32 to vector<256x128xf32>
    %11 = arith.mulf %10, %9 : vector<256x128xf32>
    %cst_11 = arith.constant 0.707106769 : f32
    %12 = vector.broadcast %cst_11 : f32 to vector<256x128xf32>
    %13 = arith.mulf %9, %12 : vector<256x128xf32>
    %14 = math.erf %13 : vector<256x128xf32>
    %cst_12 = arith.constant 1.000000e+00 : f32
    %15 = vector.broadcast %cst_12 : f32 to vector<256x128xf32>
    %16 = arith.addf %15, %14 : vector<256x128xf32>
    %17 = arith.mulf %11, %16 : vector<256x128xf32>
    %cst_13 = arith.constant dense<0.000000e+00> : vector<256x128xf32>
    %18 = tpu.matmul %17, %2, %cst_13 {dimension_numbers = #tpu.dot_dimension_numbers<[1], [0], [0], [1], [0, 0, 1, 1], [], []>} : vector<256x128xf32>, vector<128x128xf32>, vector<256x128xf32> -> vector<256x128xf32>
    %19 = vector.broadcast %4 : vector<1x128xf32> to vector<256x128xf32>
    %20 = arith.addf %18, %19 : vector<256x128xf32>
    %cst_14 = arith.constant dense<0.000000e+00> : vector<256xf32>
    %21 = vector.multi_reduction <add>, %20, %cst_14 [1] : vector<256x128xf32> to vector<256xf32>
    %22 = vector.shape_cast %21 : vector<256xf32> to vector<256x1xf32>
    %23 = arith.mulf %20, %20 : vector<256x128xf32>
    %cst_15 = arith.constant dense<0.000000e+00> : vector<256xf32>
    %24 = vector.multi_reduction <add>, %23, %cst_15 [1] : vector<256x128xf32> to vector<256xf32>
    %25 = vector.shape_cast %24 : vector<256xf32> to vector<256x1xf32>
    %cst_16 = arith.constant 1.280000e+02 : f32
    %26 = vector.broadcast %cst_16 : f32 to vector<256x1xf32>
    %27 = arith.divf %22, %26 : vector<256x1xf32>
    %cst_17 = arith.constant 1.280000e+02 : f32
    %28 = vector.broadcast %cst_17 : f32 to vector<256x1xf32>
    %29 = arith.divf %25, %28 : vector<256x1xf32>
    %30 = arith.mulf %27, %27 : vector<256x1xf32>
    %31 = arith.subf %29, %30 : vector<256x1xf32>
    %cst_18 = arith.constant 9.99999974E-6 : f32
    %32 = vector.broadcast %cst_18 : f32 to vector<256x1xf32>
    %33 = arith.addf %31, %32 : vector<256x1xf32>
    %34 = math.rsqrt %33 : vector<256x1xf32>
    %35 = vector.broadcast %27 : vector<256x1xf32> to vector<256x128xf32>
    %36 = arith.subf %20, %35 : vector<256x128xf32>
    %37 = vector.broadcast %34 : vector<256x1xf32> to vector<256x128xf32>
    %38 = arith.mulf %36, %37 : vector<256x128xf32>
    %39 = vector.broadcast %5 : vector<1x128xf32> to vector<256x128xf32>
    %40 = arith.mulf %38, %39 : vector<256x128xf32>
    %41 = vector.broadcast %6 : vector<1x128xf32> to vector<256x128xf32>
    %42 = arith.addf %40, %41 : vector<256x128xf32>
    %c0_19 = arith.constant 0 : index
    %c0_20 = arith.constant 0 : index
    %43 = vector.load %arg5[%c0_19, %c0_20] : memref<256x128xf32, #tpu.memory_space<vmem>>, vector<256x128xf32>
    tpu.vector_store %arg5[%c0_19, %c0_20], %42 {strides = array<i32>} : memref<256x128xf32, #tpu.memory_space<vmem>>, vector<256x128xf32>,
    return
  }
  func.func @transform_0(%arg0: i32) -> (i32, i32) {
    %c0_i32 = arith.constant 0 : i32
    %c0_i32_0 = arith.constant 0 : i32
    return %arg0, %c0_i32 : i32, i32
  }
  func.func @transform_1(%arg0: i32) -> (i32, i32) {
    %c0_i32 = arith.constant 0 : i32
    %c0_i32_0 = arith.constant 0 : i32
    %c0_i32_1 = arith.constant 0 : i32
    return %c0_i32, %c0_i32_0 : i32, i32
  }
  func.func @transform_2(%arg0: i32) -> (i32, i32) {
    %c0_i32 = arith.constant 0 : i32
    %c0_i32_0 = arith.constant 0 : i32
    %c0_i32_1 = arith.constant 0 : i32
    return %c0_i32, %c0_i32_0 : i32, i32
  }
  func.func @transform_3(%arg0: i32) -> (i32, i32) {
    %c0_i32 = arith.constant 0 : i32
    %c0_i32_0 = arith.constant 0 : i32
    %c0_i32_1 = arith.constant 0 : i32
    return %c0_i32, %c0_i32_0 : i32, i32
  }
  func.func @transform_4(%arg0: i32) -> (i32, i32) {
    %c0_i32 = arith.constant 0 : i32
    %c0_i32_0 = arith.constant 0 : i32
    return %arg0, %c0_i32 : i32, i32
  }
}

module attributes {stable_mosaic.version = 11 : i64} {
  func.func @alignment_kernel(%arg0: i32, %arg1: memref<256x128xf32, #tpu.memory_space<vmem>>, %arg2: memref<128x128xf32, #tpu.memory_space<vmem>>, %arg3: memref<128x128xf32, #tpu.memory_space<vmem>>, %arg4: memref<4x128xf32, #tpu.memory_space<vmem>>, %arg5: memref<256x128xf32, #tpu.memory_space<vmem>>) attributes {dimension_semantics = [#tpu.dimension_semantics<parallel>], iteration_bounds = array<i64: 2>, scalar_prefetch = 0 : i64, scratch_operands = 0 : i64, tpu.core_type = #tpu.core_type<tc>, window_params = [{transform_indices = @transform_0, window_bounds = array<i64: 256, 128>}, {pipeline_mode = #tpu.pipeline_mode<synchronous>, transform_indices = @transform_1, window_bounds = array<i64: 128, 128>}, {pipeline_mode = #tpu.pipeline_mode<synchronous>, transform_indices = @transform_2, window_bounds = array<i64: 128, 128>}, {pipeline_mode = #tpu.pipeline_mode<synchronous>, transform_indices = @transform_3, window_bounds = array<i64: 4, 128>}, {transform_indices = @transform_4, window_bounds = array<i64: 256, 128>}]} {
    %c0 = arith.constant 0 : index
    %c0_0 = arith.constant 0 : index
    %0 = vector.load %arg1[%c0, %c0_0] : memref<256x128xf32, #tpu.memory_space<vmem>>, vector<256x128xf32>
    %c0_1 = arith.constant 0 : index
    %c0_2 = arith.constant 0 : index
    %1 = vector.load %arg2[%c0_1, %c0_2] : memref<128x128xf32, #tpu.memory_space<vmem>>, vector<128x128xf32>
    %c0_3 = arith.constant 0 : index
    %c0_4 = arith.constant 0 : index
    %2 = vector.load %arg3[%c0_3, %c0_4] : memref<128x128xf32, #tpu.memory_space<vmem>>, vector<128x128xf32>
    %c0_5 = arith.constant 0 : index
    %c0_6 = arith.constant 0 : index
    %3 = vector.load %arg4[%c0_5, %c0_6] : memref<4x128xf32, #tpu.memory_space<vmem>>, vector<1x128xf32>
    %c1 = arith.constant 1 : index
    %c0_7 = arith.constant 0 : index
    %4 = vector.load %arg4[%c1, %c0_7] : memref<4x128xf32, #tpu.memory_space<vmem>>, vector<1x128xf32>
    %c2 = arith.constant 2 : index
    %c0_8 = arith.constant 0 : index
    %5 = vector.load %arg4[%c2, %c0_8] : memref<4x128xf32, #tpu.memory_space<vmem>>, vector<1x128xf32>
    %c3 = arith.constant 3 : index
    %c0_9 = arith.constant 0 : index
    %6 = vector.load %arg4[%c3, %c0_9] : memref<4x128xf32, #tpu.memory_space<vmem>>, vector<1x128xf32>
    %cst = arith.constant dense<0.000000e+00> : vector<256x128xf32>
    %7 = tpu.matmul %0, %1, %cst {dimension_numbers = #tpu.dot_dimension_numbers<[1], [0], [0], [1], [0, 0, 1, 1], [], []>} : vector<256x128xf32>, vector<128x128xf32>, vector<256x128xf32> -> vector<256x128xf32>
    %8 = vector.broadcast %3 : vector<1x128xf32> to vector<256x128xf32>
    %9 = arith.addf %7, %8 : vector<256x128xf32>
    %cst_10 = arith.constant 5.000000e-01 : f32
    %10 = vector.broadcast %cst_10 : f32 to vector<256x128xf32>
    %11 = arith.mulf %10, %9 : vector<256x128xf32>
    %cst_11 = arith.constant 0.707106769 : f32
    %12 = vector.broadcast %cst_11 : f32 to vector<256x128xf32>
    %13 = arith.mulf %9, %12 : vector<256x128xf32>
    %14 = math.erf %13 : vector<256x128xf32>
    %cst_12 = arith.constant 1.000000e+00 : f32
    %15 = vector.broadcast %cst_12 : f32 to vector<256x128xf32>
    %16 = arith.addf %15, %14 : vector<256x128xf32>
    %17 = arith.mulf %11, %16 : vector<256x128xf32>
    %cst_13 = arith.constant dense<0.000000e+00> : vector<256x128xf32>
    %18 = tpu.matmul %17, %2, %cst_13 {dimension_numbers = #tpu.dot_dimension_numbers<[1], [0], [0], [1], [0, 0, 1, 1], [], []>} : vector<256x128xf32>, vector<128x128xf32>, vector<256x128xf32> -> vector<256x128xf32>
    %19 = vector.broadcast %4 : vector<1x128xf32> to vector<256x128xf32>
    %20 = arith.addf %18, %19 : vector<256x128xf32>
    %cst_14 = arith.constant dense<0.000000e+00> : vector<256xf32>
    %21 = vector.multi_reduction <add>, %20, %cst_14 [1] : vector<256x128xf32> to vector<256xf32>
    %22 = vector.shape_cast %21 : vector<256xf32> to vector<256x1xf32>
    %23 = arith.mulf %20, %20 : vector<256x128xf32>
    %cst_15 = arith.constant dense<0.000000e+00> : vector<256xf32>
    %24 = vector.multi_reduction <add>, %23, %cst_15 [1] : vector<256x128xf32> to vector<256xf32>
    %25 = vector.shape_cast %24 : vector<256xf32> to vector<256x1xf32>
    %cst_16 = arith.constant 1.280000e+02 : f32
    %26 = vector.broadcast %cst_16 : f32 to vector<256x1xf32>
    %27 = arith.divf %22, %26 : vector<256x1xf32>
    %cst_17 = arith.constant 1.280000e+02 : f32
    %28 = vector.broadcast %cst_17 : f32 to vector<256x1xf32>
    %29 = arith.divf %25, %28 : vector<256x1xf32>
    %30 = arith.mulf %27, %27 : vector<256x1xf32>
    %31 = arith.subf %29, %30 : vector<256x1xf32>
    %cst_18 = arith.constant 9.99999974E-6 : f32
    %32 = vector.broadcast %cst_18 : f32 to vector<256x1xf32>
    %33 = arith.addf %31, %32 : vector<256x1xf32>
    %34 = math.rsqrt %33 : vector<256x1xf32>
    %35 = vector.broadcast %27 : vector<256x1xf32> to vector<256x128xf32>
    %36 = arith.subf %20, %35 : vector<256x128xf32>
    %37 = vector.broadcast %34 : vector<256x1xf32> to vector<256x128xf32>
    %38 = arith.mulf %36, %37 : vector<256x128xf32>
    %39 = vector.broadcast %5 : vector<1x128xf32> to vector<256x128xf32>
    %40 = arith.mulf %38, %39 : vector<256x128xf32>
    %41 = vector.broadcast %6 : vector<1x128xf32> to vector<256x128xf32>
    %42 = arith.addf %40, %41 : vector<256x128xf32>
    %c0_19 = arith.constant 0 : index
    %c0_20 = arith.constant 0 : index
    %43 = vector.load %arg5[%c0_19, %c0_20] : memref<256x128xf32, #tpu.memory_space<vmem>>, vector<256x128xf32>
    tpu.vector_store %arg5[%c0_19, %c0_20], %42 {strides = array<i32>} : memref<256x128xf32, #tpu.memory_space<vmem>>, vector<256x128xf32>,
    return
  }
  func.func @transform_0(%arg0: i32) -> (i32, i32) {
    %c0_i32 = arith.constant 0 : i32
    %c0_i32_0 = arith.constant 0 : i32
    return %arg0, %c0_i32 : i32, i32
  }
  func.func @transform_1(%arg0: i32) -> (i32, i32) {
    %c0_i32 = arith.constant 0 : i32
    %c0_i32_0 = arith.constant 0 : i32
    %c0_i32_1 = arith.constant 0 : i32
    return %c0_i32, %c0_i32_0 : i32, i32
  }
  func.func @transform_2(%arg0: i32) -> (i32, i32) {
    %c0_i32 = arith.constant 0 : i32
    %c0_i32_0 = arith.constant 0 : i32
    %c0_i32_1 = arith.constant 0 : i32
    return %c0_i32, %c0_i32_0 : i32, i32
  }
  func.func @transform_3(%arg0: i32) -> (i32, i32) {
    %c0_i32 = arith.constant 0 : i32
    %c0_i32_0 = arith.constant 0 : i32
    %c0_i32_1 = arith.constant 0 : i32
    return %c0_i32, %c0_i32_0 : i32, i32
  }
  func.func @transform_4(%arg0: i32) -> (i32, i32) {
    %c0_i32 = arith.constant 0 : i32
    %c0_i32_0 = arith.constant 0 : i32
    return %arg0, %c0_i32 : i32, i32
  }
}

</mosaic_0001>

<bundles_post_ra>
// kernel: tpu_custom_call.1
= control target key start
LH: loop header
LB: loop body
LE: loop exit
PB: predicated region body
PF: predicated region fallthrough
CT: control target
= control target key end

     0   :  { %9 = vsyncpa [#allocation3], 0  ;;  %s5730_s0 = inlined_call_operand.hbm [shape: f32[512,128], index: 0, kind: input, shape index: {}]   ;;  %s5731_s1 = inlined_call_operand.hbm [shape: f32[128,128], index: 1, kind: input, shape index: {}]   ;;  %s5732_s2 = inlined_call_operand.hbm [shape: f32[128,128], index: 2, kind: input, shape index: {}]   ;;  %s5733_s3 = inlined_call_operand.hbm [shape: f32[4,128], index: 3, kind: input, shape index: {}]   ;;  %s5734_s4 = inlined_call_operand.hbm [shape: f32[512,128], index: 4, kind: output, shape index: {}]  }
   0x1   :  { %11 = vsyncpa [#allocation3 + $0x1], 0 }
   0x2   :  { %12 = vsyncpa [#allocation6], 0 }
   0x3   :  { %13 = vsyncpa [#allocation9], 0 }
   0x4   :  { %14 = vsyncpa [#allocation4], 0 }
   0x5   :  { %16 = vsyncpa [#allocation4 + $0x1], 0  ;;  %s3434_s15 = smov 0   ;;  %s3436_s16 = smov 0  }
   0x6   :  { %s3438_s17 = smov 0   ;;  %s3440_s18 = smov 0  }
   0x7 LB: > { %s3455_s19 = sadd.s32 4294967295, %s3399_s18   ;;  %s2899_s20 = sadd.s32 4294967294, %s3399_s18   ;;  %s3399_s18 = sphi %s3440_s18, %s5854_s18   ;;  %s3395_s17 = sphi %s3438_s17, %s5853_s17   ;;  %s3391_s16 = sphi %s3436_s16, %s5852_s16   ;;  %s3387_s15 = sphi %s3434_s15, %s5851_s15  }
   0x8   : > { %p42_p0 = scmp.ne.s32.totalorder %s3391_s16, %s3387_s15  ;;  %p43_p1 = scmp.eq.s32.totalorder %s3455_s19, 0 }
   0x9   : > { %p129_p2 = scmp.eq.s32.totalorder %s3455_s19, 1  ;;  %p135_p3 = scmp.eq.s32.totalorder %s2899_s20, 1 }
   0xa   : > { %p3464_p4 = por %p43_p1, %p42_p0  ;;  %p2900_p5 = scmp.ge.s32.totalorder %s3399_s18, 1 }
   0xb   : > { %p3469_p6 = por %p135_p3, %p42_p0  ;;  %p142_p7 = scmp.lt.s32.totalorder %s3399_s18, 3 }
   0xc   : > { %s153_s25 = sshll.u32 %s5731_s1, 4  ;;  %s3401_s27 = smov [#allocation5]   ;;  %s154_s25 = int_to_ptr.hbm [resolvable:$true] %s153_s25 }
   0xd   : > { %p3477_p8 = pnand %p2900_p5, %p142_p7  ;;  %s155_s28 = sshll.u32 %s3401_s27, 4  ;;  %s156_s28 = int_to_ptr.vmem [resolvable:$true] %s155_s28 }
   0xe   : > { %s167_s6 = sshll.u32 %s5732_s2, 4  ;;  %s3402_s7 = smov 128   ;;  %s168_s6 = int_to_ptr.hbm [resolvable:$true] %s167_s6 }
   0xf   : > { %p3001_p9 = pneg %p3477_p8  ;;  %s3403_s8 = smov 8  }
  0x10   : > { %s3404_s9 = smov [#allocation7]   ;;  %s182_s13 = sshll.u32 %s5733_s3, 4  ;;  %s183_s13 = int_to_ptr.hbm [resolvable:$true] %s182_s13 }
  0x11   : > { %p3485_p10 = pnand %p3001_p9, %p43_p1  ;;  %s169_s10 = sshll.u32 %s3404_s9, 4  ;;  %s170_s10 = int_to_ptr.vmem [resolvable:$true] %s169_s10 }
  0x12   : > { %s3405_s14 = smov [#allocation8]   ;;  %s3507_s23 = sadd.s32 1, %s3399_s18  }
  0x13   : > { %3004 = dma.hbm_to_vmem [thread:$0]  (!%p3485_p10), %s154_s25, 2048, %s156_s28, [#allocation6], %s3402_s7, %s3402_s7, %s3403_s8  }
  0x14   : > { %3007 = dma.hbm_to_vmem [thread:$0]  (!%p3485_p10), %s168_s6, 2048, %s170_s10, [#allocation6], %s3402_s7, %s3402_s7, %s3403_s8  }
  0x15   : > { %s184_s20 = sshll.u32 %s3405_s14, 4  ;;  %s26_s24 = ssub.s32 %s3399_s18, %s3507_s23  ;;  %s185_s20 = int_to_ptr.vmem [resolvable:$true] %s184_s20 }
  0x16   : > { %3010 = dma.hbm_to_vmem [thread:$0]  (!%p3485_p10), %s183_s13, 64, %s185_s20, [#allocation9]  }
  0x17   : > { %s29_s25 = sadd.s32 1, %s3395_s17  ;;  %p27_p12 = scmp.eq.s32.totalorder %s26_s24, 0 }
  0x18   : > { %p36_p13 = scmp.ne.s32.totalorder %s3395_s17, %s3391_s16  ;;  %p37_p0 = scmp.eq.s32.totalorder %s3399_s18, 0 }
  0x19   : > { %s3518_s27 = scalar_select %p27_p12, %s3395_s17, %s29_s25  }
  0x1a   : > { %p3522_p3 = por %p129_p2, %p36_p13  ;;  %p3022_p5 = scmp.lt.s32.totalorder %s3399_s18, 2 }
  0x1b   : > { %s195_s30 = sand.u32 1, %s3395_s17   ;;  %s2951_s5 = sshll.u32 %s3399_s18, 8 }
  0x1c   : > { %p38_p7 = por %p37_p0, %p36_p13  ;;  %s2905_s6 = sshll.u32 %s195_s30, 8 }
  0x1d   : > { %s204_s10 = scalar_lea.hbm %s5730_s0, %s2951_s5  ;;  %s199_s12 = scalar_lea.vmem [#allocation2], %s2905_s6 }
  0x1e   : > { %s205_s11 = sshll.u32 %s204_s10, 4  ;;  %s207_s13 = sshll.u32 %s199_s12, 4  ;;  %s206_s11 = int_to_ptr.hbm [resolvable:$true] %s205_s11  ;;  %s208_s13 = int_to_ptr.vmem [resolvable:$true] %s207_s13 }
  0x1f   : > { %p3532_p9 = pnand %p3022_p5, %p38_p7  ;;  %s196_s20 = scalar_lea.sflag [#allocation3], %s195_s30 }
  0x20   : > { %s3295_s24 = sshra.s32 %s206_s11, 4  ;;  %s3302_s6 = scalar_lea.hbm %s5730_s0, 512  ;;  %s3296_s24 = int_to_ptr.hbm [resolvable:$true] %s3295_s24 }
  0x21   : > { %s3297_s25 = scalar_lea.hbm %s3296_s24, 256  ;;  %p3299_p10 = pneg %p3532_p9 }
  0x22   : > { %p3298_p2 = scmp.ne.s32.totalorder %s3296_s24, %s3297_s25  ;;  %p3303_p0 = scmp.lt.s32.totalorder %s3296_s24, %s5730_s0 }
  0x23   : > { %p3304_p5 = scmp.lt.s32.totalorder %s3302_s6, %s3297_s25 }
  0x24   : > { %p3300_p12 = pnand %p3299_p10, %p3298_p2 }
  0x25   : > { %p3305_p7 = por %p3304_p5, %p3303_p0 }
  0x26   : > { %p3301_p13 = pneg %p3300_p12 }
  0x28   : > { %p3306_p11 = pnand %p3305_p7, %p3301_p13 }
  0x2a   : > { %3309 = shalt.err (!%p3306_p11)
}
  0x2b   : > { %3014 = dma.hbm_to_vmem [thread:$0]  (!%p3532_p9), %s206_s11, 4096, %s208_s13, %s196_s20, %s3402_s7, %s3402_s7, %s3403_s8  }
  0x2c   : > { %219 = sbr.rel (%p3477_p8) target bundleno = 876 (0x36c), region = 36 }
  0x31   : > { %s3552_s30 = sand.u32 1, %s3391_s16  }
  0x32   : > { %s2909_s12 = sshll.u32 %s3552_s30, 8  ;;  %s222_s24 = scalar_lea.sflag [#allocation3], %s3552_s30 }
  0x33   : > { %s3558_s25 = scalar_lea.vmem [#allocation2], %s2909_s12 }
  0x34   : > { %3370 = dma.done.wait (%p3464_p4), %s222_s24, 4096  }
  0x35   : > { %3372 = vsyncadd (%p3464_p4), %s222_s24, 4294963200 }
  0x36   : > { %3374 = dma.done.wait (%p43_p1), [#allocation6], 4096  }
  0x37   : > { %3376 = vsyncadd (%p43_p1), [#allocation6], 4294963200 }
  0x38   : > { %3378 = dma.done.wait (%p43_p1), [#allocation9], 64  }
  0x39   : > { %3380 = vsyncadd (%p43_p1), [#allocation9], 4294967232  ;;  %v315_v0 = vld [vmem:[#allocation5 + $0x78] sm:$0xff]  ;;  %v314_v1 = vld [vmem:[#allocation5 + $0x70] sm:$0xff]  ;;  %s5189_s21 = scalar_lea.vmem [#allocation10], %s2909_s12  ;;  %s2952_s26 = sshll.u32 %s3455_s19, 8 }
  0x3a   : > { %337 = vmatpush.msra.mxu0 %v315_v0  ;;  %2953 = vmatpush.msra.mxu2 %v315_v0  ;;  %v313_v2 = vld [vmem:[#allocation5 + $0x68] sm:$0xff]  ;;  %v312_v3 = vld [vmem:[#allocation5 + $0x60] sm:$0xff]  ;;  %v311_v4 = vld [vmem:[#allocation5 + $0x58] sm:$0xff]  ;;  %s2793_s19 = scalar_lea.hbm %s5734_s4, %s2952_s26  ;;  %s2794_s11 = sshll.u32 %s5189_s21, 4  ;;  %s2795_s11 = int_to_ptr.vmem [resolvable:$true] %s2794_s11 }
  0x3b   : > { %v310_v5 = vld [vmem:[#allocation5 + $0x50] sm:$0xff]  ;;  %v309_v6 = vld [vmem:[#allocation5 + $0x48] sm:$0xff]  ;;  %v308_v7 = vld [vmem:[#allocation5 + $0x40] sm:$0xff]  ;;  %s2796_s13 = sshll.u32 %s2793_s19, 4  ;;  %s2782_s14 = scalar_lea.sflag [#allocation4], %s3552_s30  ;;  %s2797_s13 = int_to_ptr.hbm [resolvable:$true] %s2796_s13 }
  0x3c   : > { %338 = vmatpush.msra.mxu0 %v314_v1  ;;  %2954 = vmatpush.msra.mxu2 %v314_v1  ;;  %v307_v8 = vld [vmem:[#allocation5 + $0x38] sm:$0xff]  ;;  %v306_v9 = vld [vmem:[#allocation5 + $0x30] sm:$0xff]  ;;  %v305_v10 = vld [vmem:[#allocation5 + $0x28] sm:$0xff]  ;;  %s3339_s20 = sshra.s32 %s2797_s13, 4  ;;  %s3345_s9 = scalar_lea.hbm %s5734_s4, 512  ;;  %s3340_s20 = int_to_ptr.hbm [resolvable:$true] %s3339_s20 }
  0x3d   : > { %v304_v11 = vld [vmem:[#allocation5 + $0x20] sm:$0xff]  ;;  %v303_v12 = vld [vmem:[#allocation5 + $0x18] sm:$0xff]  ;;  %v302_v13 = vld [vmem:[#allocation5 + $0x10] sm:$0xff]  ;;  %s3341_s5 = scalar_lea.hbm %s3340_s20, 256  ;;  %p3346_p11 = scmp.lt.s32.totalorder %s3340_s20, %s5734_s4 }
  0x3e   : > { %339 = vmatpush.msra.mxu0 %v313_v2  ;;  %2955 = vmatpush.msra.mxu2 %v313_v2  ;;  %v301_v14 = vld [vmem:[#allocation5 + $0x8] sm:$0xff]  ;;  %v300_v15 = vld [vmem:[#allocation5] sm:$0xff]  ;;  %v270_v20 = vld [vmem:[%s3558_s25 + $0x10] sm:$0xff]  ;;  %p3342_p1 = scmp.ne.s32.totalorder %s3340_s20, %s3341_s5  ;;  %p3347_p9 = scmp.lt.s32.totalorder %s3345_s9, %s3341_s5 }
  0x3f   : > { %v268_v16 = vld [vmem:[%s3558_s25] sm:$0xff]  ;;  %v269_v18 = vld [vmem:[%s3558_s25 + $0x8] sm:$0xff]  ;;  %v286_v21 = vld [vmem:[%s3558_s25 + $0x90] sm:$0xff] }
  0x40   : > { %340 = vmatpush.msra.mxu0 %v312_v3  ;;  %2956 = vmatpush.msra.mxu2 %v312_v3  ;;  %v284_v17 = vld [vmem:[%s3558_s25 + $0x80] sm:$0xff]  ;;  %v285_v19 = vld [vmem:[%s3558_s25 + $0x88] sm:$0xff]  ;;  %v271_v22 = vld [vmem:[%s3558_s25 + $0x18] sm:$0xff]  ;;  %p3343_p4 = pnand %p3342_p1, %p3522_p3  ;;  %p3348_p2 = por %p3347_p9, %p3346_p11 }
  0x41   : > { %v287_v23 = vld [vmem:[%s3558_s25 + $0x98] sm:$0xff]  ;;  %v272_v24 = vld [vmem:[%s3558_s25 + $0x20] sm:$0xff]  ;;  %v273_v26 = vld [vmem:[%s3558_s25 + $0x28] sm:$0xff] }
  0x42   : > { %341 = vmatpush.msra.mxu0 %v311_v4  ;;  %2957 = vmatpush.msra.mxu2 %v311_v4  ;;  %v288_v25 = vld [vmem:[%s3558_s25 + $0xa0] sm:$0xff]  ;;  %v289_v27 = vld [vmem:[%s3558_s25 + $0xa8] sm:$0xff]  ;;  %v274_v28 = vld [vmem:[%s3558_s25 + $0x30] sm:$0xff]  ;;  %p3344_p8 = pneg %p3343_p4 }
  0x43   : > { %v290_v29 = vld [vmem:[%s3558_s25 + $0xb0] sm:$0xff]  ;;  %v275_v30 = vld [vmem:[%s3558_s25 + $0x38] sm:$0xff]  ;;  %v276_v32 = vld [vmem:[%s3558_s25 + $0x40] sm:$0xff] }
  0x44   : > { %342 = vmatpush.msra.mxu0 %v310_v5  ;;  %2958 = vmatpush.msra.mxu2 %v310_v5  ;;  %v291_v31 = vld [vmem:[%s3558_s25 + $0xb8] sm:$0xff]  ;;  %v292_v33 = vld [vmem:[%s3558_s25 + $0xc0] sm:$0xff]  ;;  %v277_v34 = vld [vmem:[%s3558_s25 + $0x48] sm:$0xff]  ;;  %p3349_p10 = pnand %p3348_p2, %p3344_p8 }
  0x45   : > { %v293_v35 = vld [vmem:[%s3558_s25 + $0xc8] sm:$0xff]  ;;  %v278_v36 = vld [vmem:[%s3558_s25 + $0x50] sm:$0xff]  ;;  %v279_v38 = vld [vmem:[%s3558_s25 + $0x58] sm:$0xff] }
  0x46   : > { %343 = vmatpush.msra.mxu0 %v309_v6  ;;  %2959 = vmatpush.msra.mxu2 %v309_v6  ;;  %v294_v37 = vld [vmem:[%s3558_s25 + $0xd0] sm:$0xff]  ;;  %v295_v39 = vld [vmem:[%s3558_s25 + $0xd8] sm:$0xff]  ;;  %v280_v40 = vld [vmem:[%s3558_s25 + $0x60] sm:$0xff] }
  0x47   : > { %v296_v41 = vld [vmem:[%s3558_s25 + $0xe0] sm:$0xff]  ;;  %v281_v42 = vld [vmem:[%s3558_s25 + $0x68] sm:$0xff]  ;;  %v282_v44 = vld [vmem:[%s3558_s25 + $0x70] sm:$0xff] }
  0x48   : > { %344 = vmatpush.msra.mxu0 %v308_v7  ;;  %2960 = vmatpush.msra.mxu2 %v308_v7  ;;  %v297_v43 = vld [vmem:[%s3558_s25 + $0xe8] sm:$0xff]  ;;  %v298_v45 = vld [vmem:[%s3558_s25 + $0xf0] sm:$0xff]  ;;  %v331_v46 = vld [vmem:[#allocation7 + $0x78] sm:$0xff] }
  0x49   : > { %v283_v47 = vld [vmem:[%s3558_s25 + $0x78] sm:$0xff]  ;;  %1859 = vmatpush.msra.mxu1 %v331_v46  ;;  %2969 = vmatpush.msra.mxu3 %v331_v46  ;;  %v330_v49 = vld [vmem:[#allocation7 + $0x70] sm:$0xff]  ;;  %v329_v50 = vld [vmem:[#allocation7 + $0x68] sm:$0xff] }
  0x4a   : > { %345 = vmatpush.msra.mxu0 %v307_v8  ;;  %2961 = vmatpush.msra.mxu2 %v307_v8  ;;  %v299_v48 = vld [vmem:[%s3558_s25 + $0xf8] sm:$0xff]  ;;  %v3604_v51 = vld [vmem:[#allocation8] ss:$0 sm:$0xff]  ;;  %v326_v56 = vld [vmem:[#allocation7 + $0x50] sm:$0xff] }
  0x4b   : > { %1860 = vmatpush.msra.mxu1 %v330_v49  ;;  %2970 = vmatpush.msra.mxu3 %v330_v49  ;;  %v328_v52 = vld [vmem:[#allocation7 + $0x60] sm:$0xff]  ;;  %v327_v54 = vld [vmem:[#allocation7 + $0x58] sm:$0xff]  ;;  %v325_v58 = vld [vmem:[#allocation7 + $0x48] sm:$0xff] }
  0x4c   : > { %346 = vmatpush.msra.mxu0 %v306_v9  ;;  %2962 = vmatpush.msra.mxu2 %v306_v9  ;;  %v324_v61 = vld [vmem:[#allocation7 + $0x40] sm:$0xff]  ;;  %v323_v1 = vld [vmem:[#allocation7 + $0x38] sm:$0xff]  ;;  %v322_v7 = vld [vmem:[#allocation7 + $0x30] sm:$0xff] }
  0x4d   : > { %1861 = vmatpush.msra.mxu1 %v329_v50  ;;  %2971 = vmatpush.msra.mxu3 %v329_v50 }
  0x4e   : > { %347 = vmatpush.msra.mxu0 %v305_v10  ;;  %2963 = vmatpush.msra.mxu2 %v305_v10 }
  0x4f   : > { %1862 = vmatpush.msra.mxu1 %v328_v52  ;;  %2972 = vmatpush.msra.mxu3 %v328_v52 }
  0x50   : > { %348 = vmatpush.msra.mxu0 %v304_v11  ;;  %2964 = vmatpush.msra.mxu2 %v304_v11 }
  0x51   : > { %1863 = vmatpush.msra.mxu1 %v327_v54  ;;  %2973 = vmatpush.msra.mxu3 %v327_v54 }
  0x52   : > { %349 = vmatpush.msra.mxu0 %v303_v12  ;;  %2965 = vmatpush.msra.mxu2 %v303_v12  ;;  %v321_v12 = vld [vmem:[#allocation7 + $0x28] sm:$0xff] }
  0x53   : > { %1864 = vmatpush.msra.mxu1 %v326_v56  ;;  %2974 = vmatpush.msra.mxu3 %v326_v56 }
  0x54   : > { %350 = vmatpush.msra.mxu0 %v302_v13  ;;  %2966 = vmatpush.msra.mxu2 %v302_v13 }
  0x55   : > { %1865 = vmatpush.msra.mxu1 %v325_v58  ;;  %2975 = vmatpush.msra.mxu3 %v325_v58 }
  0x56   : > { %351 = vmatpush.msra.mxu0 %v301_v14  ;;  %2967 = vmatpush.msra.mxu2 %v301_v14 }
  0x57   : > { %1866 = vmatpush.msra.mxu1 %v324_v61  ;;  %2976 = vmatpush.msra.mxu3 %v324_v61 }
  0x58   : > { %352 = vmatpush.msra.mxu0 %v300_v15  ;;  %2968 = vmatpush.msra.mxu2 %v300_v15 }
  0x59   : > { %353 = vmatmul.f32.vlgmr.msra.gmra.mxu0 %v268_v16  ;;  %401 = vmatmul.f32.vlgmr.msra.gmra.mxu2 %v284_v17 }
  0x5a   : > { %1867 = vmatpush.msra.mxu1 %v323_v1  ;;  %2977 = vmatpush.msra.mxu3 %v323_v1 }
  0x5c   : > { %1868 = vmatpush.msra.mxu1 %v322_v7  ;;  %2978 = vmatpush.msra.mxu3 %v322_v7 }
  0x5e   : > { %1869 = vmatpush.msra.mxu1 %v321_v12  ;;  %2979 = vmatpush.msra.mxu3 %v321_v12 }
  0x61   : > { %356 = vmatmul.f32.gmra.mxu0 %v269_v18  ;;  %404 = vmatmul.f32.gmra.mxu2 %v285_v19  ;;  %v320_v18 = vld [vmem:[#allocation7 + $0x20] sm:$0xff] }
  0x62   : > { %1870 = vmatpush.msra.mxu1 %v320_v18  ;;  %2980 = vmatpush.msra.mxu3 %v320_v18 }
  0x69   : > { %359 = vmatmul.f32.gmra.mxu0 %v270_v20  ;;  %407 = vmatmul.f32.gmra.mxu2 %v286_v21 }
  0x71   : > { %362 = vmatmul.f32.gmra.mxu0 %v271_v22  ;;  %410 = vmatmul.f32.gmra.mxu2 %v287_v23  ;;  %v319_v23 = vld [vmem:[#allocation7 + $0x18] sm:$0xff] }
  0x72   : > { %1871 = vmatpush.msra.mxu1 %v319_v23  ;;  %2981 = vmatpush.msra.mxu3 %v319_v23 }
  0x79   : > { %365 = vmatmul.f32.gmra.mxu0 %v272_v24  ;;  %413 = vmatmul.f32.gmra.mxu2 %v288_v25 }
  0x81   : > { %368 = vmatmul.f32.gmra.mxu0 %v273_v26  ;;  %416 = vmatmul.f32.gmra.mxu2 %v289_v27 }
  0x89   : > { %371 = vmatmul.f32.gmra.mxu0 %v274_v28  ;;  %419 = vmatmul.f32.gmra.mxu2 %v290_v29  ;;  %v318_v28 = vld [vmem:[#allocation7 + $0x10] sm:$0xff] }
  0x8a   : > { %1872 = vmatpush.msra.mxu1 %v318_v28  ;;  %2982 = vmatpush.msra.mxu3 %v318_v28 }
  0x91   : > { %374 = vmatmul.f32.gmra.mxu0 %v275_v30  ;;  %422 = vmatmul.f32.gmra.mxu2 %v291_v31 }
  0x99   : > { %377 = vmatmul.f32.gmra.mxu0 %v276_v32  ;;  %425 = vmatmul.f32.gmra.mxu2 %v292_v33 }
  0xa1   : > { %380 = vmatmul.f32.gmra.mxu0 %v277_v34  ;;  %428 = vmatmul.f32.gmra.mxu2 %v293_v35  ;;  %v317_v34 = vld [vmem:[#allocation7 + $0x8] sm:$0xff] }
  0xa2   : > { %1873 = vmatpush.msra.mxu1 %v317_v34  ;;  %2983 = vmatpush.msra.mxu3 %v317_v34 }
  0xa9   : > { %383 = vmatmul.f32.gmra.mxu0 %v278_v36  ;;  %431 = vmatmul.f32.gmra.mxu2 %v294_v37 }
  0xb1   : > { %386 = vmatmul.f32.gmra.mxu0 %v279_v38  ;;  %434 = vmatmul.f32.gmra.mxu2 %v295_v39 }
  0xb9   : > { %389 = vmatmul.f32.gmra.mxu0 %v280_v40  ;;  %437 = vmatmul.f32.gmra.mxu2 %v296_v41  ;;  %v316_v40 = vld [vmem:[#allocation7] sm:$0xff] }
  0xba   : > { %1874 = vmatpush.msra.mxu1 %v316_v40  ;;  %2984 = vmatpush.msra.mxu3 %v316_v40 }
  0xc1   : > { %392 = vmatmul.f32.gmra.mxu0 %v281_v42  ;;  %440 = vmatmul.f32.gmra.mxu2 %v297_v43 }
  0xc9   : > { %395 = vmatmul.f32.gmra.mxu0 %v282_v44  ;;  %443 = vmatmul.f32.gmra.mxu2 %v298_v45 }
  0xd1   : > { %398 = vmatmul.f32.gmra.mxu0 %v283_v47  ;;  %446 = vmatmul.f32.gmra.mxu2 %v299_v48 }
  0xd6   : > { %v354_v53 = vpop.f32.mrf.mxu0 }
  0xd7   : > { %v3607_v55 = vadd.f32 %v3604_v51, %v354_v53 }
  0xd9   : > { %v3610_v57 = vmul.f32 0.70710677, %v3607_v55 }
  0xdb   : > { %v514_v59 = vmul.f32 %v3610_v57, %v3610_v57 }
  0xdc   : > { %v402_v60 = vpop.f32.mrf.mxu2 }
  0xdd   : > { %v3614_v62 = vmin.f32 %v514_v59, 16.0  ;;  %v3617_v63 = vadd.f32 %v3604_v51, %v402_v60 }
  0xde   : > { %v357_v0 = vpop.f32.mrf.mxu0 }
  0xdf   : > { %v3620_v2 = vmul.f32 0.70710677, %v3617_v63  ;;  %v3623_v3 = vadd.f32 %v3604_v51, %v357_v0  ;;  %v527_v4 = vmul.f32 3.8918573e-05, %v3614_v62  ;;  %v516_v9 = vmul.f32 2.1237322e-06, %v3614_v62 }
  0xe1   : > { %v1154_v5 = vmul.f32 %v3620_v2, %v3620_v2  ;;  %v3629_v6 = vmul.f32 0.70710677, %v3623_v3  ;;  %v528_v8 = vadd.f32 0.001143296, %v527_v4  ;;  %v517_v21 = vadd.f32 0.00028619796, %v516_v9 }
  0xe3   : > { %v3632_v10 = vmin.f32 %v1154_v5, 16.0  ;;  %v554_v11 = vmul.f32 %v3629_v6, %v3629_v6  ;;  %v529_v14 = vmul.f32 %v528_v8, %v3614_v62  ;;  %v518_v33 = vmul.f32 %v517_v21, %v3614_v62 }
  0xe4   : > { %v405_v13 = vpop.f32.mrf.mxu2 }
  0xe5   : > { %v1156_v15 = vmul.f32 2.1237322e-06, %v3632_v10  ;;  %v3638_v16 = vmin.f32 %v554_v11, 16.0  ;;  %v3641_v17 = vadd.f32 %v3604_v51, %v405_v13  ;;  %v530_v20 = vadd.f32 0.014752088, %v529_v14 }
  0xe6   : > { %v360_v19 = vpop.f32.mrf.mxu0  ;;  %v519_v46 = vadd.f32 0.0036580483, %v518_v33 }
  0xe7   : > { %v556_v22 = vmul.f32 2.1237322e-06, %v3638_v16  ;;  %v3645_v24 = vmul.f32 0.70710677, %v3641_v17  ;;  %v3648_v25 = vadd.f32 %v3604_v51, %v360_v19  ;;  %v531_v26 = vmul.f32 %v530_v20, %v3614_v62 }
  0xe8   : > { %v1157_v27 = vadd.f32 0.00028619796, %v1156_v15  ;;  %v520_v60 = vmul.f32 %v519_v46, %v3614_v62 }
  0xe9   : > { %v557_v29 = vadd.f32 0.00028619796, %v556_v22  ;;  %v1194_v30 = vmul.f32 %v3645_v24, %v3645_v24  ;;  %v3654_v31 = vmul.f32 0.70710677, %v3648_v25  ;;  %v532_v32 = vadd.f32 0.112945676, %v531_v26 }
  0xea   : > { %v1158_v38 = vmul.f32 %v1157_v27, %v3632_v10  ;;  %v521_v14 = vadd.f32 0.05243302, %v520_v60 }
  0xeb   : > { %v3657_v35 = vmin.f32 %v1194_v30, 16.0  ;;  %v594_v36 = vmul.f32 %v3654_v31, %v3654_v31  ;;  %v558_v41 = vmul.f32 %v557_v29, %v3638_v16  ;;  %v533_v45 = vmul.f32 %v532_v32, %v3614_v62 }
  0xec   : > { %v408_v37 = vpop.f32.mrf.mxu2  ;;  %v1159_v52 = vadd.f32 0.0036580483, %v1158_v38  ;;  %v3713_v30 = vmul.f32 0.5, %v3607_v55  ;;  %v522_v32 = vmul.f32 %v521_v14, %v3614_v62 }
  0xed   : > { %v3663_v39 = vadd.f32 %v3604_v51, %v408_v37  ;;  %v1196_v42 = vmul.f32 2.1237322e-06, %v3657_v35  ;;  %v3667_v43 = vmin.f32 %v594_v36, 16.0  ;;  %v559_v53 = vadd.f32 0.0036580483, %v558_v41 }
  0xee   : > { %v363_v44 = vpop.f32.mrf.mxu0  ;;  %v534_v56 = vadd.f32 0.4994258, %v533_v45  ;;  %v1160_v7 = vmul.f32 %v1159_v52, %v3632_v10  ;;  %v3725_v41 = vmul.f32 0.5, %v3617_v63  ;;  %v523_v52 = vadd.f32 0.18741608, %v522_v32 }
  0xef   : > { %v1197_v47 = vadd.f32 0.00028619796, %v1196_v42  ;;  %v596_v48 = vmul.f32 2.1237322e-06, %v3667_v43  ;;  %v3672_v49 = vmul.f32 0.70710677, %v3663_v39  ;;  %v3675_v50 = vadd.f32 %v3604_v51, %v363_v44 }
  0xf0   : > { %v560_v8 = vmul.f32 %v559_v53, %v3638_v16  ;;  %v535_v11 = vmul.f32 %v534_v56, %v3614_v62  ;;  %v1161_v21 = vadd.f32 0.05243302, %v1160_v7  ;;  %v3737_v53 = vmul.f32 0.5, %v3623_v3 }
  0xf1   : > { %v1234_v54 = vmul.f32 %v3672_v49, %v3672_v49  ;;  %v1198_v58 = vmul.f32 %v1197_v47, %v3657_v35  ;;  %v3681_v59 = vmul.f32 0.70710677, %v3675_v50  ;;  %v597_v61 = vadd.f32 0.00028619796, %v596_v48 }
  0xf2   : > { %v561_v22 = vadd.f32 0.05243302, %v560_v8  ;;  %v3706_v26 = vadd.f32 1.0, %v535_v11  ;;  %v1162_v55 = vmul.f32 %v1161_v21, %v3632_v10  ;;  %v3740_v63 = vmul.f32 0.5, %v3641_v17 }
  0xf3   : > { %v3684_v0 = vmin.f32 %v1234_v54, 16.0  ;;  %v634_v4 = vmul.f32 %v3681_v59, %v3681_v59  ;;  %v1199_v12 = vadd.f32 0.0036580483, %v1198_v58  ;;  %v598_v15 = vmul.f32 %v597_v61, %v3667_v43 }
  0xf4   : > { %v411_v1 = vpop.f32.mrf.mxu2  ;;  %v562_v42 = vmul.f32 %v561_v22, %v3638_v16  ;;  %3071 = vrcp.f32 %v3706_v26  ;;  %v3752_v17 = vmul.f32 0.5, %v3648_v25  ;;  %v3763_v21 = vmul.f32 3.8918573e-05, %v3632_v10 }
  0xf5   : > { %v3689_v5 = vadd.f32 %v3604_v51, %v411_v1  ;;  %v1236_v13 = vmul.f32 2.1237322e-06, %v3684_v0  ;;  %v3699_v19 = vmin.f32 %v634_v4, 16.0  ;;  %v1200_v27 = vmul.f32 %v1199_v12, %v3657_v35 }
  0xf6   : > { %v366_v9 = vpop.f32.mrf.mxu0  ;;  %v599_v33 = vadd.f32 0.0036580483, %v598_v15  ;;  %v1163_v1 = vadd.f32 0.18741608, %v1162_v55  ;;  %v563_v4 = vadd.f32 0.18741608, %v562_v42  ;;  %v524_v12 = vmul.f32 %v523_v52, %v3614_v62 }
  0xf7   : > { %v3697_v18 = vmul.f32 0.70710677, %v3689_v5  ;;  %v3702_v20 = vadd.f32 %v3604_v51, %v366_v9  ;;  %v1237_v28 = vadd.f32 0.00028619796, %v1236_v13  ;;  %v636_v36 = vmul.f32 2.1237322e-06, %v3699_v19 }
  0xf8   : > { %v1201_v45 = vadd.f32 0.05243302, %v1200_v27  ;;  %v600_v54 = vmul.f32 %v599_v33, %v3667_v43  ;;  %v564_v62 = vmul.f32 %v563_v4, %v3638_v16  ;;  %vm542_vm1 = vweird.f32 %v3706_v26 }
  0xf9   : > { %v1274_v23 = vmul.f32 %v3697_v18, %v3697_v18  ;;  %v3710_v29 = vmul.f32 0.70710677, %v3702_v20  ;;  %v1238_v46 = vmul.f32 %v1237_v28, %v3684_v0  ;;  %v637_v56 = vadd.f32 0.00028619796, %v636_v36 }
  0xfa   : > { %v1202_v3 = vmul.f32 %v1201_v45, %v3657_v35  ;;  %v3756_v11 = vpop.eup %3071  ;;  %v601_v13 = vadd.f32 0.05243302, %v600_v54  ;;  %v1164_v28 = vmul.f32 %v1163_v1, %v3632_v10  ;;  %v525_v54 = vadd.f32 1.1283791, %v524_v12 }
  0xfb   : > { %v3717_v37 = vmin.f32 %v1274_v23, 16.0  ;;  %v674_v38 = vmul.f32 %v3710_v29, %v3710_v29  ;;  %v1239_v8 = vadd.f32 0.0036580483, %v1238_v46  ;;  %v638_v22 = vmul.f32 %v637_v56, %v3699_v19 }
  0xfc   : > { %v414_v34 = vpop.f32.mrf.mxu2  ;;  %v1203_v36 = vadd.f32 0.18741608, %v1202_v3  ;;  %v538_v52 = vmul.f32 %v3756_v11, %v3706_v26  ;;  %v565_v1 = vadd.f32 1.1283791, %v564_v62  ;;  %v3803_v62 = vmul.f32 %v525_v54, %v3610_v57 }
  0xfd   : > { %v3722_v40 = vadd.f32 %v3604_v51, %v414_v34  ;;  %v3731_v47 = vmin.f32 %v674_v38, 16.0  ;;  %v1276_v58 = vmul.f32 2.1237322e-06, %v3717_v37  ;;  %v3775_v38 = vmul.f32 0.5, %v3663_v39 }
  0xfe   : > { %v369_v44 = vpop.f32.mrf.mxu0  ;;  %v1240_v55 = vmul.f32 %v1239_v8, %v3684_v0  ;;  %v639_v56 = vadd.f32 0.0036580483, %v638_v22  ;;  %v1204_v3 = vmul.f32 %v1203_v36, %v3657_v35  ;;  %v3797_v22 = vmul.f32 0.5, %v3675_v50 }
  0xff   : > { %v3734_v48 = vmul.f32 0.70710677, %v3722_v40  ;;  %v3747_v61 = vadd.f32 %v3604_v51, %v369_v44  ;;  %v676_v7 = vmul.f32 2.1237322e-06, %v3731_v47  ;;  %v1277_v23 = vadd.f32 0.00028619796, %v1276_v58 }
 0x100   : > { %5746 = vst [vmem:[#allocation15_spill] sm:$0xff] %v3775_v38  ;;  %v602_v44 = vmul.f32 %v601_v13, %v3667_v43  ;;  %v1241_v8 = vadd.f32 0.05243302, %v1240_v55  ;;  %v3807_v36 = vmul.f32 0.5, %v3689_v5  ;;  %vm543_vm0 = vweird.f32 %v3756_v11 }
 0x101   : > { %v1314_v60 = vmul.f32 %v3734_v48, %v3734_v48  ;;  %v3760_v14 = vmul.f32 0.70710677, %v3747_v61  ;;  %v677_v32 = vadd.f32 0.00028619796, %v676_v7  ;;  %v1278_v58 = vmul.f32 %v1277_v23, %v3717_v37  ;;  %5747 = vst [vmem:[#allocation16_spill] sm:$0xff] %v3797_v22  ;;  %vm3856_vm2 = vmor %vm542_vm1, %vm543_vm0 }
 0x102   : > { %5748 = vst [vmem:[#allocation17_spill] sm:$0xff] %v3807_v36  ;;  %v1242_v22 = vmul.f32 %v1241_v8, %v3684_v0 }
 0x103   : > { %v3754_v9 = vmin.f32 %v1314_v60, 16.0  ;;  %v714_v33 = vmul.f32 %v3760_v14, %v3760_v14  ;;  %v1165_v60 = vadd.f32 1.1283791, %v1164_v28  ;;  %v678_v4 = vmul.f32 %v677_v32, %v3731_v47 }
 0x104   : > { %v417_v15 = vpop.f32.mrf.mxu2  ;;  %v539_v28 = vsub.f32 1.0, %v538_v52  ;;  %v640_v32 = vmul.f32 %v639_v56, %v3699_v19  ;;  %v3821_v56 = vmul.f32 %v565_v1, %v3629_v6  ;;  %v3835_v6 = vmul.f32 0.5, %v3722_v40 }
 0x105   : > { %v1316_v25 = vmul.f32 2.1237322e-06, %v3754_v9  ;;  %v3768_v27 = vadd.f32 %v3604_v51, %v417_v15  ;;  %v3779_v45 = vmin.f32 %v714_v33, 16.0  ;;  %v603_v15 = vadd.f32 0.18741608, %v602_v44 }
 0x106   : > { %v372_v34 = vpop.f32.mrf.mxu0  ;;  %v1279_v33 = vadd.f32 0.0036580483, %v1278_v58  ;;  %v679_v55 = vadd.f32 0.0036580483, %v678_v4  ;;  %v1205_v44 = vadd.f32 1.1283791, %v1204_v3  ;;  %v3818_v54 = vmul.f32 %v1165_v60, %v3620_v2 }
 0x107   : > { %v1317_v42 = vadd.f32 0.00028619796, %v1316_v25  ;;  %v3782_v46 = vadd.f32 %v3604_v51, %v372_v34  ;;  %v3788_v39 = vmul.f32 0.70710677, %v3768_v27  ;;  %v716_v7 = vmul.f32 2.1237322e-06, %v3779_v45 }
 0x108   : > { %v604_v5 = vmul.f32 %v603_v15, %v3667_v43  ;;  %v540_v58 = vmul.f32 %v3756_v11, %v539_v28  ;;  %v641_v4 = vadd.f32 0.05243302, %v640_v32  ;;  %v680_v2 = vmul.f32 %v679_v55, %v3731_v47  ;;  %5750 = vst [vmem:[#allocation19_spill] sm:$0xff] %v3835_v6 }
 0x109   : > { %v1318_v13 = vmul.f32 %v1317_v42, %v3754_v9  ;;  %v1354_v12 = vmul.f32 %v3788_v39, %v3788_v39  ;;  %v3800_v23 = vmul.f32 0.70710677, %v3782_v46  ;;  %v717_v34 = vadd.f32 0.00028619796, %v716_v7 }
 0x10a   : > { %v1280_v7 = vmul.f32 %v1279_v33, %v3717_v37  ;;  %v3839_v1 = vmul.f32 %v1205_v44, %v3645_v24  ;;  %v605_v28 = vadd.f32 1.1283791, %v604_v5  ;;  %v541_v32 = vadd.f32 %v3756_v11, %v540_v58 }
 0x10b   : > { %v3809_v42 = vmin.f32 %v1354_v12, 16.0  ;;  %v1319_v52 = vadd.f32 0.0036580483, %v1318_v13  ;;  %v754_v57 = vmul.f32 %v3800_v23, %v3800_v23  ;;  %v718_v3 = vmul.f32 %v717_v34, %v3779_v45 }
 0x10c   : > { %v420_v25 = vpop.f32.mrf.mxu2  ;;  %v3831_v13 = vmul.f32 0.5, %v3702_v20  ;;  %v1243_v12 = vadd.f32 0.18741608, %v1242_v22  ;;  %v642_v40 = vmul.f32 %v641_v4, %v3699_v19  ;;  %v1281_v33 = vadd.f32 0.05243302, %v1280_v7 }
 0x10d   : > { %v3812_v50 = vadd.f32 %v3604_v51, %v420_v25  ;;  %v1356_v60 = vmul.f32 2.1237322e-06, %v3809_v42  ;;  %v1320_v15 = vmul.f32 %v1319_v52, %v3754_v9  ;;  %v3842_v25 = vmin.f32 %v754_v57, 16.0 }
 0x10e   : > { %5749 = vst [vmem:[#allocation18_spill] sm:$0xff] %v3831_v13  ;;  %v3850_v34 = vmul.f32 0.5, %v3747_v61  ;;  %v719_v24 = vadd.f32 0.0036580483, %v718_v3  ;;  %v375_v22 = vpop.f32.mrf.mxu0  ;;  %v681_v55 = vadd.f32 0.05243302, %v680_v2  ;;  %v1244_v57 = vmul.f32 %v1243_v12, %v3684_v0 }
 0x10f   : > { %v3828_v8 = vmul.f32 0.70710677, %v3812_v50  ;;  %v1357_v44 = vadd.f32 0.00028619796, %v1356_v60  ;;  %v546_v52 = vand.u32 2147483647, %v3706_v26  ;;  %v545_v7 = vsel %vm3856_vm2, %v3756_v11, %v541_v32 }
 0x110   : > { %5751 = vst [vmem:[#allocation20_spill] sm:$0xff] %v3850_v34  ;;  %v1321_v5 = vadd.f32 0.05243302, %v1320_v15  ;;  %v756_v58 = vmul.f32 2.1237322e-06, %v3842_v25  ;;  %v548_v61 = vand.u32 2147483648, %v3706_v26  ;;  %v3867_v3 = vadd.f32 %v3604_v51, %v375_v22 }
 0x111   : > { %v1394_v20 = vmul.f32 %v3828_v8, %v3828_v8  ;;  %v1168_v2 = vadd.f32 0.001143296, %v3763_v21  ;;  %v643_v60 = vadd.f32 0.18741608, %v642_v40  ;;  %v1282_v12 = vmul.f32 %v1281_v33, %v3717_v37 }
 0x112   : > { %v720_v15 = vmul.f32 %v719_v24, %v3779_v45  ;;  %v549_v34 = vor.u32 1.1754944e-38, %v548_v61  ;;  %v682_v13 = vmul.f32 %v681_v55, %v3731_v47  ;;  %v1358_v26 = vmul.f32 %v1357_v44, %v3809_v42 }
 0x113   : > { %v3861_v4 = vmin.f32 %v1394_v20, 16.0  ;;  %vm547_vm3 = vcmp.eq.f32.partialorder %v546_v52, 8.507059e+37  ;;  %v3875_v20 = vmul.f32 0.70710677, %v3867_v3  ;;  %v1322_v11 = vmul.f32 %v1321_v5, %v3754_v9 }
 0x114   : > { %v757_v6 = vadd.f32 0.00028619796, %v756_v58  ;;  %v550_v32 = vsel %vm547_vm3, %v549_v34, %v545_v7  ;;  %v1169_v21 = vmul.f32 %v1168_v2, %v3632_v10  ;;  %v1245_v40 = vadd.f32 1.1283791, %v1244_v57 }
 0x115   : > { %v1396_v33 = vmul.f32 2.1237322e-06, %v3861_v4  ;;  %v551_v24 = vmul.f32 %v550_v32, %v3803_v62  ;;  %v794_v22 = vmul.f32 %v3875_v20, %v3875_v20  ;;  %v644_v55 = vmul.f32 %v643_v60, %v3699_v19 }
 0x116   : > { %v1283_v44 = vadd.f32 0.18741608, %v1282_v12  ;;  %v721_v52 = vadd.f32 0.05243302, %v720_v15  ;;  %v1170_v61 = vadd.f32 0.014752088, %v1169_v21  ;;  %v3885_v36 = vmul.f32 %v605_v28, %v3654_v31 }
 0x117   : > { %v683_v5 = vadd.f32 0.18741608, %v682_v13  ;;  %v1359_v34 = vadd.f32 0.0036580483, %v1358_v26  ;;  %v2914_v58 = vclamps-f32 %v551_v24, 1.0  ;;  %v758_v57 = vmul.f32 %v757_v6, %v3842_v25 }
 0x118   : > { %v1323_v7 = vadd.f32 0.18741608, %v1322_v11  ;;  %v1171_v2 = vmul.f32 %v1170_v61, %v3632_v10  ;;  %v567_v62 = vmul.f32 3.8918573e-05, %v3638_v16  ;;  %v3891_v32 = vmul.f32 0.5, %v3768_v27 }
 0x119   : > { %v1397_v60 = vadd.f32 0.00028619796, %v1396_v33  ;;  %v1794_v12 = vadd.f32 1.0, %v2914_v58  ;;  %v3893_v15 = vmin.f32 %v794_v22, 16.0  ;;  %v645_v21 = vadd.f32 1.1283791, %v644_v55 }
 0x11a   : > { %5754 = vst [vmem:[#allocation21_spill] sm:$0xff] %v3891_v32  ;;  %v1284_v31 = vmul.f32 %v1283_v44, %v3717_v37  ;;  %v722_v13 = vmul.f32 %v721_v52, %v3779_v45  ;;  %v1172_v28 = vadd.f32 0.112945676, %v1171_v2  ;;  %v684_v26 = vmul.f32 %v683_v5, %v3731_v47  ;;  %v423_v52 = vpop.f32.mrf.mxu2 }
 0x11b   : > { %v1360_v11 = vmul.f32 %v1359_v34, %v3809_v42  ;;  %v1826_v6 = vmul.f32 %v1794_v12, %v3713_v30  ;;  %v568_v24 = vadd.f32 0.001143296, %v567_v62  ;;  %v1324_v27 = vmul.f32 %v1323_v7, %v3754_v9 }
 0x11c   : > { %v759_v61 = vadd.f32 0.0036580483, %v758_v57  ;;  %v1173_v33 = vmul.f32 %v1172_v28, %v3632_v10  ;;  %v1207_v22 = vmul.f32 3.8918573e-05, %v3657_v35  ;;  %v1398_v55 = vmul.f32 %v1397_v60, %v3861_v4 }
 0x11d   : > { %1875 = vmatmul.f32.vlgmr.msra.gmra.mxu1 %v1826_v6  ;;  %v796_v44 = vmul.f32 2.1237322e-06, %v3893_v15  ;;  %v569_v5 = vmul.f32 %v568_v24, %v3638_v16  ;;  %v607_v34 = vmul.f32 3.8918573e-05, %v3667_v43  ;;  %v723_v58 = vadd.f32 0.18741608, %v722_v13 }
 0x11e   : > { %v1174_v30 = vadd.f32 0.4994258, %v1173_v33  ;;  %v3908_v2 = vadd.f32 %v3604_v51, %v423_v52  ;;  %v1208_v7 = vadd.f32 0.001143296, %v1207_v22  ;;  %v3911_v57 = vmul.f32 %v1245_v40, %v3672_v49 }
 0x11f   : > { %v1361_v62 = vadd.f32 0.05243302, %v1360_v11  ;;  %v570_v12 = vadd.f32 0.014752088, %v569_v5  ;;  %v608_v60 = vadd.f32 0.001143296, %v607_v34  ;;  %v760_v6 = vmul.f32 %v759_v61, %v3842_v25 }
 0x120   : > { %v1285_v28 = vadd.f32 1.1283791, %v1284_v31  ;;  %v1175_v32 = vmul.f32 %v1174_v30, %v3632_v10  ;;  %v3916_v24 = vmul.f32 0.70710677, %v3908_v2  ;;  %v1399_v13 = vadd.f32 0.0036580483, %v1398_v55 }
 0x121   : > { %v797_v33 = vadd.f32 0.00028619796, %v796_v44  ;;  %v571_v52 = vmul.f32 %v570_v12, %v3638_v16  ;;  %v1209_v22 = vmul.f32 %v1208_v7, %v3657_v35  ;;  %v685_v38 = vadd.f32 1.1283791, %v684_v26 }
 0x122   : > { %v1325_v49 = vadd.f32 1.1283791, %v1324_v27  ;;  %v724_v40 = vmul.f32 %v723_v58, %v3779_v45  ;;  %v3921_v11 = vadd.f32 1.0, %v1175_v32  ;;  %v1362_v31 = vmul.f32 %v1361_v62, %v3809_v42 }
 0x123   : > { %v572_v61 = vadd.f32 0.112945676, %v571_v52  ;;  %v1210_v5 = vadd.f32 0.014752088, %v1209_v22  ;;  %v609_v10 = vmul.f32 %v608_v60, %v3667_v43  ;;  %v3926_v34 = vmul.f32 %v645_v21, %v3681_v59  ;;  %v378_v60 = vpop.f32.mrf.mxu0 }
 0x124   : > { %v3929_v55 = vmul.f32 0.5, %v3782_v46  ;;  %3073 = vrcp.f32 %v3921_v11  ;;  %v1434_v26 = vmul.f32 %v3916_v24, %v3916_v24  ;;  %v761_v27 = vadd.f32 0.05243302, %v760_v6 }
 0x125   : > { %v1400_v32 = vmul.f32 %v1399_v13, %v3861_v4  ;;  %v798_v44 = vmul.f32 %v797_v33, %v3893_v15  ;;  %v573_v58 = vmul.f32 %v572_v61, %v3638_v16  ;;  %v3938_v30 = vmul.f32 %v1285_v28, %v3697_v18 }
 0x126   : > { %5755 = vst [vmem:[#allocation22_spill] sm:$0xff] %v3929_v55  ;;  %v725_v59 = vadd.f32 1.1283791, %v724_v40  ;;  %v3941_v21 = vmul.f32 0.5, %v3812_v50  ;;  %v1211_v46 = vmul.f32 %v1210_v5, %v3657_v35  ;;  %v3945_v7 = vmul.f32 %v685_v38, %v3710_v29 }
 0x127   : > { %v3948_v62 = vmul.f32 %v1325_v49, %v3734_v48  ;;  %v1363_v12 = vadd.f32 0.18741608, %v1362_v31  ;;  %v610_v6 = vadd.f32 0.014752088, %v609_v10  ;;  %v3950_v13 = vmin.f32 %v1434_v26, 16.0 }
 0x128   : > { %5756 = vst [vmem:[#allocation23_spill] sm:$0xff] %v3941_v21  ;;  %v574_v33 = vadd.f32 0.4994258, %v573_v58  ;;  %v3953_v18 = vadd.f32 %v3604_v51, %v378_v60  ;;  %v1212_v28 = vadd.f32 0.112945676, %v1211_v46  ;;  %v762_v50 = vmul.f32 %v761_v27, %v3842_v25  ;;  %v426_v46 = vpop.f32.mrf.mxu2 }
 0x129   : > { %v1401_v52 = vadd.f32 0.05243302, %v1400_v32  ;;  %v3957_v22 = vmul.f32 0.5, %v3867_v3  ;;  %v799_v29 = vadd.f32 0.0036580483, %v798_v44  ;;  %v3960_v48 = vmul.f32 %v725_v59, %v3760_v14 }
 0x12a   : > { %v3074_v38 = vpop.eup %3073  ;;  %v575_v49 = vmul.f32 %v574_v33, %v3638_v16  ;;  %v3964_v40 = vmul.f32 0.70710677, %v3953_v18  ;;  %v1213_v31 = vmul.f32 %v1212_v28, %v3657_v35  ;;  %v1364_v61 = vmul.f32 %v1363_v12, %v3809_v42 }
 0x12b   : > { %5757 = vst [vmem:[#allocation24_spill] sm:$0xff] %v3957_v22  ;;  %v1178_v5 = vmul.f32 %v3074_v38, %v3921_v11  ;;  %v611_v10 = vmul.f32 %v610_v6, %v3667_v43  ;;  %v1247_v3 = vmul.f32 3.8918573e-05, %v3684_v0  ;;  %v1436_v26 = vmul.f32 2.1237322e-06, %v3950_v13 }
 0x12c   : > { %5758 = vst [vmem:[#allocation25_spill] sm:$0xff] %v3960_v48  ;;  %v3972_v27 = vadd.f32 1.0, %v575_v49  ;;  %v834_v16 = vmul.f32 %v3964_v40, %v3964_v40  ;;  %v1214_v14 = vadd.f32 0.4994258, %v1213_v31  ;;  %v763_v32 = vadd.f32 0.18741608, %v762_v50 }
 0x12d   : > { %v1402_v44 = vmul.f32 %v1401_v52, %v3861_v4  ;;  %v800_v58 = vmul.f32 %v799_v29, %v3893_v15  ;;  %v1179_v59 = vsub.f32 1.0, %v1178_v5  ;;  %vm1183_vm4 = vweird.f32 %v3074_v38 }
 0x12e   : > { %v1186_v12 = vand.u32 2147483647, %v3921_v11  ;;  %v1188_v60 = vand.u32 2147483648, %v3921_v11  ;;  %3075 = vrcp.f32 %v3972_v27  ;;  %v3981_v33 = vmin.f32 %v834_v16, 16.0 }
 0x12f   : > { %v1180_v6 = vmul.f32 %v3074_v38, %v1179_v59  ;;  %v1215_v28 = vmul.f32 %v1214_v14, %v3657_v35  ;;  %v612_v49 = vadd.f32 0.112945676, %v611_v10  ;;  %v1365_v50 = vadd.f32 1.1283791, %v1364_v61 }
 0x130   : > { %v1437_v31 = vadd.f32 0.00028619796, %v1436_v26  ;;  %v3985_v52 = vadd.f32 %v3604_v51, %v426_v46  ;;  %v1248_v29 = vadd.f32 0.001143296, %v1247_v3  ;;  %v1403_v5 = vadd.f32 0.18741608, %v1402_v44 }
 0x131   : > { %v1181_v22 = vadd.f32 %v3074_v38, %v1180_v6  ;;  %vm1182_vm5 = vweird.f32 %v3921_v11  ;;  %v3988_v21 = vadd.f32 1.0, %v1215_v28  ;;  %v3991_v55 = vmul.f32 %v763_v32, %v3842_v25 }
 0x132   : > { %v801_v16 = vadd.f32 0.05243302, %v800_v58  ;;  %vm1184_vm6 = vmor %vm1182_vm5, %vm1183_vm4  ;;  %v1189_v35 = vor.u32 1.1754944e-38, %v1188_v60  ;;  %v836_v61 = vmul.f32 2.1237322e-06, %v3981_v33  ;;  %vm1187_vm7 = vcmp.eq.f32.partialorder %v1186_v12, 8.507059e+37 }
 0x133   : > { %v1185_v10 = vsel %vm1184_vm6, %v3074_v38, %v1181_v22  ;;  %3077 = vrcp.f32 %v3988_v21  ;;  %v613_v3 = vmul.f32 %v612_v49, %v3667_v43  ;;  %v1438_v11 = vmul.f32 %v1437_v31, %v3950_v13 }
 0x134   : > { %v3076_v26 = vpop.eup %3075  ;;  %v1190_v14 = vsel %vm1187_vm7, %v1189_v35, %v1185_v10  ;;  %v3999_v44 = vmul.f32 0.70710677, %v3985_v52  ;;  %v1249_v32 = vmul.f32 %v1248_v29, %v3684_v0  ;;  %v4003_v58 = vmul.f32 %v1365_v50, %v3788_v39  ;;  %v381_v29 = vpop.f32.mrf.mxu0 }
 0x135   : > { %v4006_v59 = vmul.f32 %v1403_v5, %v3861_v4  ;;  %v1191_v22 = vmul.f32 %v1190_v14, %v3818_v54  ;;  %v578_v38 = vmul.f32 %v3076_v26, %v3972_v27  ;;  %v802_v46 = vmul.f32 %v801_v16, %v3893_v15 }
 0x136   : > { %5759 = vst [vmem:[#allocation26_spill] sm:$0xff] %v4003_v58  ;;  %v586_v12 = vand.u32 2147483647, %v3972_v27  ;;  %v588_v60 = vand.u32 2147483648, %v3972_v27  ;;  %v837_v6 = vadd.f32 0.00028619796, %v836_v61  ;;  %vm582_vm8 = vweird.f32 %v3972_v27 }
 0x137   : > { %v2930_v28 = vclamps-f32 %v1191_v22, 1.0  ;;  %v579_v49 = vsub.f32 1.0, %v578_v38  ;;  %v614_v31 = vadd.f32 0.4994258, %v613_v3  ;;  %v647_v39 = vmul.f32 3.8918573e-05, %v3699_v19 }
 0x138   : > { %v1439_v50 = vadd.f32 0.0036580483, %v1438_v11  ;;  %v1474_v54 = vmul.f32 %v3999_v44, %v3999_v44  ;;  %v1250_v5 = vadd.f32 0.014752088, %v1249_v32  ;;  %vm583_vm9 = vweird.f32 %v3076_v26 }
 0x139   : > { %v3078_v35 = vpop.eup %3077  ;;  %v1810_v16 = vadd.f32 1.0, %v2930_v28  ;;  %v580_v10 = vmul.f32 %v3076_v26, %v579_v49  ;;  %v615_v14 = vmul.f32 %v614_v31, %v3667_v43  ;;  %vm4018_vm10 = vcmp.eq.f32.partialorder %v586_v12, 8.507059e+37  ;;  %vm584_vm11 = vmor %vm582_vm8, %vm583_vm9 }
 0x13a   : > { %v589_v3 = vor.u32 1.1754944e-38, %v588_v60  ;;  %v838_v11 = vmul.f32 %v837_v6, %v3981_v33  ;;  %v1218_v22 = vmul.f32 %v3078_v35, %v3988_v21  ;;  %v4028_v32 = vadd.f32 %v3604_v51, %v381_v29 }
 0x13b   : > { %v1842_v38 = vmul.f32 %v1810_v16, %v3725_v41  ;;  %v581_v58 = vadd.f32 %v3076_v26, %v580_v10  ;;  %v4025_v48 = vadd.f32 1.0, %v615_v14  ;;  %v1228_v12 = vand.u32 2147483648, %v3988_v21 }
 0x13c   : > { %v1219_v43 = vsub.f32 1.0, %v1218_v22  ;;  %v1251_v60 = vmul.f32 %v1250_v5, %v3684_v0  ;;  %v648_v28 = vadd.f32 0.001143296, %v647_v39  ;;  %v1226_v49 = vand.u32 2147483647, %v3988_v21 }
 0x13d   : > { %1923 = vmatmul.f32.vlgmr.msra.gmra.mxu3 %v1842_v38  ;;  %v585_v6 = vsel %vm584_vm11, %v3076_v26, %v581_v58  ;;  %v4035_v41 = vmin.f32 %v1474_v54, 16.0  ;;  %3079 = vrcp.f32 %v4025_v48  ;;  %v839_v29 = vadd.f32 0.0036580483, %v838_v11 }
 0x13e   : > { %v590_v31 = vsel %vm4018_vm10, %v589_v3, %v585_v6  ;;  %v1220_v27 = vmul.f32 %v3078_v35, %v1219_v43  ;;  %vm1223_vm12 = vweird.f32 %v3078_v35  ;;  %v803_v16 = vadd.f32 0.18741608, %v802_v46 }
 0x13f   : > { %v1440_v10 = vmul.f32 %v1439_v50, %v3950_v13  ;;  %v591_v5 = vmul.f32 %v590_v31, %v3821_v56  ;;  %v4043_v39 = vmul.f32 0.70710677, %v4028_v32  ;;  %vm1222_vm13 = vweird.f32 %v3988_v21 }
 0x140   : > { %v1221_v26 = vadd.f32 %v3078_v35, %v1220_v27  ;;  %v1229_v58 = vor.u32 1.1754944e-38, %v1228_v12  ;;  %v1252_v54 = vadd.f32 0.112945676, %v1251_v60  ;;  %vm1224_vm14 = vmor %vm1222_vm13, %vm1223_vm12  ;;  %v1476_v61 = vmul.f32 2.1237322e-06, %v4035_v41 }
 0x141   : > { %v2915_v14 = vclamps-f32 %v591_v5, 1.0  ;;  %v874_v3 = vmul.f32 %v4043_v39, %v4043_v39  ;;  %v649_v46 = vmul.f32 %v648_v28, %v3699_v19  ;;  %v840_v50 = vmul.f32 %v839_v29, %v3981_v33 }
 0x142   : > { %v1225_v56 = vsel %vm1224_vm14, %v3078_v35, %v1221_v26  ;;  %vm1227_vm15 = vcmp.eq.f32.partialorder %v1226_v49, 8.507059e+37  ;;  %v1253_v11 = vmul.f32 %v1252_v54, %v3684_v0  ;;  %v765_v60 = vadd.f32 1.1283791, %v3991_v55 }
 0x143   : > { %v3080_v22 = vpop.eup %3079  ;;  %v1795_v38 = vadd.f32 1.0, %v2915_v14  ;;  %v1230_v21 = vsel %vm1227_vm15, %v1229_v58, %v1225_v56  ;;  %v4052_v43 = vmin.f32 %v874_v3, 16.0  ;;  %v650_v12 = vadd.f32 0.014752088, %v649_v46  ;;  %v429_v14 = vpop.f32.mrf.mxu2 }
 0x144   : > { %v1405_v6 = vadd.f32 1.1283791, %v4006_v59  ;;  %v1231_v31 = vmul.f32 %v1230_v21, %v3839_v1  ;;  %v618_v28 = vmul.f32 %v3080_v22, %v4025_v48  ;;  %v804_v29 = vmul.f32 %v803_v16, %v3893_v15 }
 0x145   : > { %v1827_v35 = vmul.f32 %v1795_v38, %v3737_v53  ;;  %v1477_v49 = vadd.f32 0.00028619796, %v1476_v61  ;;  %v1254_v27 = vadd.f32 0.4994258, %v1253_v11  ;;  %v1441_v5 = vadd.f32 0.05243302, %v1440_v10 }
 0x146   : > { %v841_v26 = vadd.f32 0.05243302, %v840_v50  ;;  %v2931_v58 = vclamps-f32 %v1231_v31, 1.0  ;;  %v619_v54 = vsub.f32 1.0, %v618_v28  ;;  %v628_v55 = vand.u32 2147483648, %v4025_v48 }
 0x147   : > { %1878 = vmatmul.f32.gmra.mxu1 %v1827_v35  ;;  %v876_v59 = vmul.f32 2.1237322e-06, %v4052_v43  ;;  %v1255_v1 = vmul.f32 %v1254_v27, %v3684_v0  ;;  %v651_v3 = vmul.f32 %v650_v12, %v3699_v19  ;;  %vm623_vm0 = vweird.f32 %v3080_v22 }
 0x148   : > { %v1811_v46 = vadd.f32 1.0, %v2931_v58  ;;  %v620_v16 = vmul.f32 %v3080_v22, %v619_v54  ;;  %v626_v53 = vand.u32 2147483647, %v4025_v48  ;;  %v1478_v10 = vmul.f32 %v1477_v49, %v4035_v41 }
 0x149   : > { %vm622_vm1 = vweird.f32 %v4025_v48  ;;  %v4067_v61 = vadd.f32 1.0, %v1255_v1  ;;  %v4070_v50 = vadd.f32 %v3604_v51, %v429_v14  ;;  %v652_v0 = vadd.f32 0.112945676, %v651_v3 }
 0x14a   : > { %v1843_v56 = vmul.f32 %v1811_v46, %v3740_v63  ;;  %v621_v11 = vadd.f32 %v3080_v22, %v620_v16  ;;  %v1287_v38 = vmul.f32 3.8918573e-05, %v3717_v37  ;;  %v1442_v21 = vmul.f32 %v1441_v5, %v3950_v13  ;;  %vm624_vm2 = vmor %vm622_vm1, %vm623_vm0 }
 0x14b   : > { %v629_v12 = vor.u32 1.1754944e-38, %v628_v55  ;;  %v877_v31 = vadd.f32 0.00028619796, %v876_v59  ;;  %3081 = vrcp.f32 %v4067_v61  ;;  %v4077_v48 = vmul.f32 %v765_v60, %v3800_v23  ;;  %v384_v23 = vpop.f32.mrf.mxu0 }
 0x14c   : > { %v4080_v28 = vmul.f32 0.5, %v3908_v2  ;;  %1926 = vmatmul.f32.gmra.mxu3 %v1843_v56  ;;  %v625_v51 = vsel %vm624_vm2, %v3080_v22, %v621_v11  ;;  %vm627_vm3 = vcmp.eq.f32.partialorder %v626_v53, 8.507059e+37  ;;  %v805_v63 = vadd.f32 1.1283791, %v804_v29 }
 0x14d   : > { %v1479_v35 = vadd.f32 0.0036580483, %v1478_v10  ;;  %v630_v49 = vsel %vm627_vm3, %v629_v12, %v625_v51  ;;  %v653_v27 = vmul.f32 %v652_v0, %v3699_v19  ;;  %v842_v5 = vmul.f32 %v841_v26, %v3981_v33 }
 0x14e   : > { %v631_v58 = vmul.f32 %v630_v49, %v3885_v36  ;;  %v4086_v54 = vmul.f32 0.70710677, %v4070_v50  ;;  %v1288_v60 = vadd.f32 0.001143296, %v1287_v38  ;;  %v4089_v2 = vmul.f32 %v1405_v6, %v3828_v8  ;;  %v4102_v6 = vld [vmem:[#allocation8] ss:$0 sm:$0xff] }
 0x14f   : > { %v1443_v14 = vadd.f32 0.18741608, %v1442_v21  ;;  %v878_v22 = vmul.f32 %v877_v31, %v4052_v43  ;;  %v654_v29 = vadd.f32 0.4994258, %v653_v27  ;;  %v4093_v55 = vmul.f32 0.5, %v3953_v18 }
 0x150   : > { %v2916_v59 = vclamps-f32 %v631_v58, 1.0  ;;  %v1289_v26 = vmul.f32 %v1288_v60, %v3717_v37  ;;  %v687_v36 = vmul.f32 3.8918573e-05, %v3731_v47  ;;  %v4098_v3 = vmul.f32 %v805_v63, %v3875_v20 }
 0x151   : > { %v3082_v1 = vpop.eup %3081  ;;  %v1480_v46 = vmul.f32 %v1479_v35, %v4035_v41  ;;  %v655_v8 = vmul.f32 %v654_v29, %v3699_v19  ;;  %v4105_v16 = vadd.f32 %v4102_v6, %v384_v23  ;;  %v843_v18 = vadd.f32 0.18741608, %v842_v5 }
 0x152   : > { %v1796_v53 = vadd.f32 1.0, %v2916_v59  ;;  %v1258_v10 = vmul.f32 %v3082_v1, %v4067_v61  ;;  %v1514_v56 = vmul.f32 %v4086_v54, %v4086_v54  ;;  %v1444_v11 = vmul.f32 %v1443_v14, %v3950_v13 }
 0x153   : > { %v879_v20 = vadd.f32 0.0036580483, %v878_v22  ;;  %v4111_v0 = vadd.f32 1.0, %v655_v8  ;;  %v1290_v38 = vadd.f32 0.014752088, %v1289_v26  ;;  %v1268_v12 = vand.u32 2147483648, %v4067_v61 }
 0x154   : > { %v1828_v19 = vmul.f32 %v1796_v53, %v3752_v17  ;;  %v1259_v21 = vsub.f32 1.0, %v1258_v10  ;;  %v688_v31 = vadd.f32 0.001143296, %v687_v36  ;;  %v1481_v51 = vadd.f32 0.05243302, %v1480_v46 }
 0x155   : > { %3083 = vrcp.f32 %v4111_v0  ;;  %v4117_v63 = vmul.f32 0.70710677, %v4105_v16  ;;  %v1327_v35 = vmul.f32 3.8918573e-05, %v3754_v9  ;;  %vm1263_vm4 = vweird.f32 %v3082_v1 }
 0x156   : > { %1881 = vmatmul.f32.gmra.mxu1 %v1828_v19  ;;  %v1260_v49 = vmul.f32 %v3082_v1, %v1259_v21  ;;  %v1266_v27 = vand.u32 2147483647, %v4067_v61  ;;  %v4121_v5 = vmin.f32 %v1514_v56, 16.0  ;;  %v1445_v17 = vadd.f32 1.1283791, %v1444_v11 }
 0x157   : > { %v880_v58 = vmul.f32 %v879_v20, %v4052_v43  ;;  %v1291_v23 = vmul.f32 %v1290_v38, %v3717_v37  ;;  %v689_v60 = vmul.f32 %v688_v31, %v3731_v47  ;;  %vm1262_vm5 = vweird.f32 %v4067_v61  ;;  %v432_v31 = vpop.f32.mrf.mxu2 }
 0x158   : > { %v1261_v14 = vadd.f32 %v3082_v1, %v1260_v49  ;;  %v1269_v22 = vor.u32 1.1754944e-38, %v1268_v12  ;;  %v1516_v29 = vmul.f32 2.1237322e-06, %v4121_v5  ;;  %vm1264_vm6 = vmor %vm1262_vm5, %vm1263_vm4  ;;  %v914_v59 = vmul.f32 %v4117_v63, %v4117_v63 }
 0x159   : > { %v1292_v26 = vadd.f32 0.112945676, %v1291_v23  ;;  %v690_v36 = vadd.f32 0.014752088, %v689_v60  ;;  %v1328_v46 = vadd.f32 0.001143296, %v1327_v35  ;;  %v844_v8 = vmul.f32 %v843_v18, %v3981_v33 }
 0x15a   : > { %v1482_v53 = vmul.f32 %v1481_v51, %v4035_v41  ;;  %v1265_v10 = vsel %vm1264_vm6, %v3082_v1, %v1261_v14  ;;  %vm1267_vm7 = vcmp.eq.f32.partialorder %v1266_v27, 8.507059e+37  ;;  %v881_v11 = vadd.f32 0.05243302, %v880_v58 }
 0x15b   : > { %v3084_v56 = vpop.eup %3083  ;;  %v1270_v20 = vsel %vm1267_vm7, %v1269_v22, %v1265_v10  ;;  %v1293_v61 = vmul.f32 %v1292_v26, %v3717_v37  ;;  %v691_v38 = vmul.f32 %v690_v36, %v3731_v47  ;;  %v1517_v21 = vadd.f32 0.00028619796, %v1516_v29 }
 0x15c   : > { %v1271_v19 = vmul.f32 %v1270_v20, %v3911_v57  ;;  %v658_v12 = vmul.f32 %v3084_v56, %v4111_v0  ;;  %v1329_v35 = vmul.f32 %v1328_v46, %v3754_v9  ;;  %v4137_v18 = vmin.f32 %v914_v59, 16.0 }
 0x15d   : > { %v1294_v51 = vadd.f32 0.4994258, %v1293_v61  ;;  %v4140_v1 = vadd.f32 %v4102_v6, %v432_v31  ;;  %v692_v49 = vadd.f32 0.112945676, %v691_v38  ;;  %v666_v23 = vand.u32 2147483647, %v4111_v0 }
 0x15e   : > { %v2932_v27 = vclamps-f32 %v1271_v19, 1.0  ;;  %v659_v58 = vsub.f32 1.0, %v658_v12  ;;  %v668_v60 = vand.u32 2147483648, %v4111_v0  ;;  %vm663_vm8 = vweird.f32 %v3084_v56  ;;  %v5762_v38 = vld [vmem:[#allocation15_spill] sm:$0xff] }
 0x15f   : > { %v916_v57 = vmul.f32 2.1237322e-06, %v4137_v18  ;;  %v1295_v14 = vmul.f32 %v1294_v51, %v3717_v37  ;;  %v4147_v22 = vmul.f32 0.70710677, %v4140_v1  ;;  %v693_v26 = vmul.f32 %v692_v49, %v3731_v47 }
 0x160   : > { %v1812_v29 = vadd.f32 1.0, %v2932_v27  ;;  %v660_v59 = vmul.f32 %v3084_v56, %v659_v58  ;;  %v1330_v36 = vadd.f32 0.014752088, %v1329_v35  ;;  %v1483_v46 = vadd.f32 0.18741608, %v1482_v53 }
 0x161   : > { %v882_v10 = vmul.f32 %v881_v11, %v4052_v43  ;;  %v1518_v20 = vmul.f32 %v1517_v21, %v4121_v5  ;;  %v4152_v61 = vadd.f32 1.0, %v1295_v14  ;;  %vm662_vm9 = vweird.f32 %v4111_v0  ;;  %v387_v11 = vpop.f32.mrf.mxu0 }
 0x162   : > { %v1844_v19 = vmul.f32 %v1812_v29, %v5762_v38  ;;  %v661_v12 = vadd.f32 %v3084_v56, %v660_v59  ;;  %v694_v37 = vadd.f32 0.4994258, %v693_v26  ;;  %vm664_vm10 = vmor %vm662_vm9, %vm663_vm8  ;;  %v669_v31 = vor.u32 1.1754944e-38, %v668_v60 }
 0x163   : > { %v917_v51 = vadd.f32 0.00028619796, %v916_v57  ;;  %3085 = vrcp.f32 %v4152_v61  ;;  %v1554_v53 = vmul.f32 %v4147_v22, %v4147_v22  ;;  %v4161_v21 = vmul.f32 0.5, %v3985_v52 }
 0x164   : > { %1929 = vmatmul.f32.gmra.mxu3 %v1844_v19  ;;  %v665_v35 = vsel %vm664_vm10, %v3084_v56, %v661_v12  ;;  %vm667_vm11 = vcmp.eq.f32.partialorder %v666_v23, 8.507059e+37  ;;  %v1331_v49 = vmul.f32 %v1330_v36, %v3754_v9  ;;  %v4165_v0 = vmul.f32 %v1445_v17, %v3916_v24 }
 0x165   : > { %v845_v27 = vadd.f32 1.1283791, %v844_v8  ;;  %v670_v58 = vsel %vm667_vm11, %v669_v31, %v665_v35  ;;  %v695_v60 = vmul.f32 %v694_v37, %v3731_v47  ;;  %v1484_v57 = vmul.f32 %v1483_v46, %v4035_v41 }
 0x166   : > { %v1519_v14 = vadd.f32 0.0036580483, %v1518_v20  ;;  %v671_v29 = vmul.f32 %v670_v58, %v3926_v34  ;;  %v4171_v52 = vadd.f32 %v4102_v6, %v387_v11  ;;  %v883_v59 = vadd.f32 0.18741608, %v882_v10 }
 0x167   : > { %v918_v56 = vmul.f32 %v917_v51, %v4137_v18  ;;  %v4174_v23 = vmin.f32 %v1554_v53, 16.0  ;;  %v4176_v26 = vadd.f32 1.0, %v695_v60  ;;  %v4179_v24 = vmul.f32 0.5, %v4028_v32  ;;  %v5765_v51 = vld [vmem:[#allocation16_spill] sm:$0xff] }
 0x168   : > { %v2917_v17 = vclamps-f32 %v671_v29, 1.0  ;;  %v4182_v47 = vmul.f32 0.70710677, %v4171_v52  ;;  %v1332_v8 = vadd.f32 0.112945676, %v1331_v49  ;;  %v4185_v34 = vmul.f32 %v845_v27, %v3964_v40 }
 0x169   : > { %5763 = vst [vmem:[#allocation15_spill] sm:$0xff] %v4179_v24  ;;  %v3086_v36 = vpop.eup %3085  ;;  %v1556_v46 = vmul.f32 2.1237322e-06, %v4174_v23  ;;  %3087 = vrcp.f32 %v4176_v26  ;;  %v727_v10 = vmul.f32 3.8918573e-05, %v3779_v45  ;;  %v4191_v20 = vmul.f32 0.5, %v4070_v50 }
 0x16a   : > { %v1520_v32 = vmul.f32 %v1519_v14, %v4121_v5  ;;  %v1797_v38 = vadd.f32 1.0, %v2917_v17  ;;  %v1298_v19 = vmul.f32 %v3086_v36, %v4152_v61  ;;  %v4195_v12 = vadd.f32 1.1283791, %v1484_v57 }
 0x16b   : > { %5764 = vst [vmem:[#allocation27_spill] sm:$0xff] %v4191_v20  ;;  %v884_v37 = vmul.f32 %v883_v59, %v4052_v43  ;;  %v919_v40 = vadd.f32 0.0036580483, %v918_v56  ;;  %v954_v31 = vmul.f32 %v4182_v47, %v4182_v47  ;;  %v1306_v35 = vand.u32 2147483647, %v4152_v61  ;;  %v435_v59 = vpop.f32.mrf.mxu2 }
 0x16c   : > { %v1829_v53 = vmul.f32 %v1797_v38, %v5765_v51  ;;  %v1299_v11 = vsub.f32 1.0, %v1298_v19  ;;  %v1333_v50 = vmul.f32 %v1332_v8, %v3754_v9  ;;  %v1308_v49 = vand.u32 2147483648, %v4152_v61 }
 0x16d   : > { %v1557_v27 = vadd.f32 0.00028619796, %v1556_v46  ;;  %v4204_v58 = vmin.f32 %v954_v31, 16.0  ;;  %v728_v60 = vadd.f32 0.001143296, %v727_v10  ;;  %vm1303_vm12 = vweird.f32 %v3086_v36 }
 0x16e   : > { %v1521_v57 = vadd.f32 0.05243302, %v1520_v32  ;;  %1884 = vmatmul.f32.gmra.mxu1 %v1829_v53  ;;  %v1300_v14 = vmul.f32 %v3086_v36, %v1299_v11  ;;  %v1334_v29 = vadd.f32 0.4994258, %v1333_v50  ;;  %v920_v17 = vmul.f32 %v919_v40, %v4137_v18 }
 0x16f   : > { %v3088_v56 = vpop.eup %3087  ;;  %v956_v38 = vmul.f32 2.1237322e-06, %v4204_v58  ;;  %v4209_v19 = vadd.f32 %v4102_v6, %v435_v59  ;;  %v729_v8 = vmul.f32 %v728_v60, %v3779_v45  ;;  %vm1302_vm13 = vweird.f32 %v4152_v61 }
 0x170   : > { %v1301_v46 = vadd.f32 %v3086_v36, %v1300_v14  ;;  %vm1307_vm14 = vcmp.eq.f32.partialorder %v1306_v35, 8.507059e+37  ;;  %v698_v10 = vmul.f32 %v3088_v56, %v4176_v26  ;;  %vm1304_vm15 = vmor %vm1302_vm13, %vm1303_vm12  ;;  %v1309_v32 = vor.u32 1.1754944e-38, %v1308_v49 }
 0x171   : > { %v1558_v31 = vmul.f32 %v1557_v27, %v4174_v23  ;;  %v706_v51 = vand.u32 2147483647, %v4176_v26  ;;  %v1335_v40 = vmul.f32 %v1334_v29, %v3754_v9  ;;  %v708_v50 = vand.u32 2147483648, %v4176_v26 }
 0x172   : > { %v1305_v53 = vsel %vm1304_vm15, %v3086_v36, %v1301_v46  ;;  %v699_v11 = vsub.f32 1.0, %v698_v10  ;;  %v730_v59 = vadd.f32 0.014752088, %v729_v8  ;;  %v957_v14 = vadd.f32 0.00028619796, %v956_v38 }
 0x173   : > { %v1310_v60 = vsel %vm1307_vm14, %v1309_v32, %v1305_v53  ;;  %v4218_v20 = vadd.f32 1.0, %v1335_v40  ;;  %v4221_v61 = vmul.f32 0.70710677, %v4209_v19  ;;  %vm703_vm0 = vweird.f32 %v3088_v56 }
 0x174   : > { %v1311_v35 = vmul.f32 %v1310_v60, %v3938_v30  ;;  %v700_v49 = vmul.f32 %v3088_v56, %v699_v11  ;;  %v731_v27 = vmul.f32 %v730_v59, %v3779_v45  ;;  %v885_v24 = vadd.f32 1.1283791, %v884_v37  ;;  %v5766_v59 = vld [vmem:[#allocation17_spill] sm:$0xff] }
 0x175   : > { %v1522_v9 = vmul.f32 %v1521_v57, %v4121_v5  ;;  %v1559_v36 = vadd.f32 0.0036580483, %v1558_v31  ;;  %3089 = vrcp.f32 %v4218_v20  ;;  %vm702_vm1 = vweird.f32 %v4176_v26 }
 0x176   : > { %v2933_v29 = vclamps-f32 %v1311_v35, 1.0  ;;  %v701_v8 = vadd.f32 %v3088_v56, %v700_v49  ;;  %v1367_v38 = vmul.f32 3.8918573e-05, %v3809_v42  ;;  %vm704_vm2 = vmor %vm702_vm1, %vm703_vm0  ;;  %v709_v46 = vor.u32 1.1754944e-38, %v708_v50 }
 0x177   : > { %v958_v30 = vmul.f32 %v957_v14, %v4204_v58  ;;  %v1594_v10 = vmul.f32 %v4221_v61, %v4221_v61  ;;  %v732_v32 = vadd.f32 0.112945676, %v731_v27  ;;  %v921_v37 = vadd.f32 0.05243302, %v920_v17 }
 0x178   : > { %v1813_v40 = vadd.f32 1.0, %v2933_v29  ;;  %v705_v57 = vsel %vm704_vm2, %v3088_v56, %v701_v8  ;;  %vm707_vm3 = vcmp.eq.f32.partialorder %v706_v51, 8.507059e+37  ;;  %v1523_v31 = vadd.f32 0.18741608, %v1522_v9  ;;  %v390_v9 = vpop.f32.mrf.mxu0 }
 0x179   : > { %v1560_v53 = vmul.f32 %v1559_v36, %v4174_v23  ;;  %v710_v11 = vsel %vm707_vm3, %v709_v46, %v705_v57  ;;  %v733_v26 = vmul.f32 %v732_v32, %v3779_v45  ;;  %v1368_v35 = vadd.f32 0.001143296, %v1367_v38 }
 0x17a   : > { %v1845_v60 = vmul.f32 %v1813_v40, %v5766_v59  ;;  %v711_v50 = vmul.f32 %v710_v11, %v3945_v7  ;;  %v767_v14 = vmul.f32 3.8918573e-05, %v3842_v25  ;;  %v4239_v17 = vmul.f32 %v4195_v12, %v3999_v44 }
 0x17b   : > { %v3090_v49 = vpop.eup %3089  ;;  %v959_v56 = vadd.f32 0.0036580483, %v958_v30  ;;  %v4241_v51 = vmin.f32 %v1594_v10, 16.0  ;;  %v734_v27 = vadd.f32 0.4994258, %v733_v26  ;;  %v922_v36 = vmul.f32 %v921_v37, %v4137_v18 }
 0x17c   : > { %1932 = vmatmul.f32.gmra.mxu3 %v1845_v60  ;;  %v2918_v29 = vclamps-f32 %v711_v50, 1.0  ;;  %v1338_v8 = vmul.f32 %v3090_v49, %v4218_v20  ;;  %v1369_v7 = vmul.f32 %v1368_v35, %v3809_v42  ;;  %v1561_v38 = vadd.f32 0.05243302, %v1560_v53  ;;  %v5767_v53 = vld [vmem:[#allocation18_spill] sm:$0xff] }
 0x17d   : > { %v1346_v46 = vand.u32 2147483647, %v4218_v20  ;;  %v1596_v32 = vmul.f32 2.1237322e-06, %v4241_v51  ;;  %v735_v44 = vmul.f32 %v734_v27, %v3779_v45  ;;  %v4250_v10 = vadd.f32 %v4102_v6, %v390_v9 }
 0x17e   : > { %v1798_v12 = vadd.f32 1.0, %v2918_v29  ;;  %v1339_v30 = vsub.f32 1.0, %v1338_v8  ;;  %v1370_v40 = vadd.f32 0.014752088, %v1369_v7  ;;  %v960_v37 = vmul.f32 %v959_v56, %v4204_v58 }
 0x17f   : > { %v1348_v57 = vand.u32 2147483648, %v4218_v20  ;;  %v4254_v11 = vadd.f32 1.0, %v735_v44  ;;  %v768_v26 = vadd.f32 0.001143296, %v767_v14  ;;  %vm1343_vm4 = vweird.f32 %v3090_v49 }
 0x180   : > { %v1830_v59 = vmul.f32 %v1798_v12, %v5767_v53  ;;  %v1340_v60 = vmul.f32 %v3090_v49, %v1339_v30  ;;  %v1371_v50 = vmul.f32 %v1370_v40, %v3809_v42  ;;  %v4259_v45 = vmul.f32 %v885_v24, %v4043_v39 }
 0x181   : > { %v4262_v35 = vmul.f32 0.5, %v4105_v16  ;;  %v1597_v27 = vadd.f32 0.00028619796, %v1596_v32  ;;  %3091 = vrcp.f32 %v4254_v11  ;;  %v1524_v56 = vmul.f32 %v1523_v31, %v4121_v5 }
 0x182   : > { %1887 = vmatmul.f32.gmra.mxu1 %v1830_v59  ;;  %v1341_v9 = vadd.f32 %v3090_v49, %v1340_v60  ;;  %vm1342_vm5 = vweird.f32 %v4218_v20  ;;  %v4268_v14 = vmul.f32 0.70710677, %v4250_v10  ;;  %v923_v29 = vadd.f32 0.18741608, %v922_v36 }
 0x183   : > { %5768 = vst [vmem:[#allocation16_spill] sm:$0xff] %v4262_v35  ;;  %vm1344_vm6 = vmor %vm1342_vm5, %vm1343_vm4  ;;  %v1349_v8 = vor.u32 1.1754944e-38, %v1348_v57  ;;  %v1372_v39 = vadd.f32 0.112945676, %v1371_v50  ;;  %v769_v24 = vmul.f32 %v768_v26, %v3842_v25  ;;  %v1562_v16 = vmul.f32 %v1561_v38, %v4174_v23  ;;  %v438_v26 = vpop.f32.mrf.mxu2 }
 0x184   : > { %v961_v7 = vadd.f32 0.05243302, %v960_v37  ;;  %v1345_v32 = vsel %vm1344_vm6, %v3090_v49, %v1341_v9  ;;  %vm1347_vm7 = vcmp.eq.f32.partialorder %v1346_v46, 8.507059e+37  ;;  %v1598_v31 = vmul.f32 %v1597_v27, %v4241_v51 }
 0x185   : > { %v1350_v44 = vsel %vm1347_vm7, %v1349_v8, %v1345_v32  ;;  %v1373_v12 = vmul.f32 %v1372_v39, %v3809_v42  ;;  %v770_v20 = vadd.f32 0.014752088, %v769_v24  ;;  %v1525_v30 = vadd.f32 1.1283791, %v1524_v56 }
 0x186   : > { %v4275_v40 = vmul.f32 0.5, %v4140_v1  ;;  %v1351_v36 = vmul.f32 %v1350_v44, %v3948_v62  ;;  %v994_v57 = vmul.f32 %v4268_v14, %v4268_v14  ;;  %v4281_v49 = vadd.f32 %v4102_v6, %v438_v26 }
 0x187   : > { %v3092_v38 = vpop.eup %3091  ;;  %v1374_v37 = vadd.f32 0.4994258, %v1373_v12  ;;  %v771_v46 = vmul.f32 %v770_v20, %v3842_v25  ;;  %v1407_v53 = vmul.f32 3.8918573e-05, %v3861_v4  ;;  %v924_v59 = vmul.f32 %v923_v29, %v4137_v18  ;;  %v5770_v20 = vld [vmem:[#allocation19_spill] sm:$0xff] }
 0x188   : > { %5769 = vst [vmem:[#allocation17_spill] sm:$0xff] %v4275_v40  ;;  %v1563_v60 = vadd.f32 0.18741608, %v1562_v16  ;;  %v2934_v1 = vclamps-f32 %v1351_v36, 1.0  ;;  %v738_v50 = vmul.f32 %v3092_v38, %v4254_v11  ;;  %v962_v62 = vmul.f32 %v961_v7, %v4204_v58 }
 0x189   : > { %v1599_v27 = vadd.f32 0.0036580483, %v1598_v31  ;;  %v746_v56 = vand.u32 2147483647, %v4254_v11  ;;  %v1375_v9 = vmul.f32 %v1374_v37, %v3809_v42  ;;  %v4291_v24 = vmul.f32 0.70710677, %v4281_v49 }
 0x18a   : > { %v1814_v8 = vadd.f32 1.0, %v2934_v1  ;;  %v739_v39 = vsub.f32 1.0, %v738_v50  ;;  %v772_v32 = vadd.f32 0.112945676, %v771_v46  ;;  %v748_v44 = vand.u32 2147483648, %v4254_v11  ;;  %v393_v1 = vpop.f32.mrf.mxu0 }
 0x18b   : > { %v4294_v29 = vmin.f32 %v994_v57, 16.0  ;;  %v4296_v16 = vadd.f32 1.0, %v1375_v9  ;;  %v1408_v12 = vadd.f32 0.001143296, %v1407_v53  ;;  %vm743_vm8 = vweird.f32 %v3092_v38  ;;  %v441_v40 = vpop.f32.mrf.mxu2 }
 0x18c   : > { %v1846_v7 = vmul.f32 %v1814_v8, %v5770_v20  ;;  %v740_v31 = vmul.f32 %v3092_v38, %v739_v39  ;;  %v773_v36 = vmul.f32 %v772_v32, %v3842_v25  ;;  %v4301_v42 = vmul.f32 %v1525_v30, %v4086_v54 }
 0x18d   : > { %v925_v26 = vadd.f32 1.1283791, %v924_v59  ;;  %v4304_v37 = vmul.f32 0.5, %v4171_v52  ;;  %3093 = vrcp.f32 %v4296_v16  ;;  %vm742_vm9 = vweird.f32 %v4254_v11 }
 0x18e   : > { %1935 = vmatmul.f32.gmra.mxu3 %v1846_v7  ;;  %v741_v57 = vadd.f32 %v3092_v38, %v740_v31  ;;  %v996_v46 = vmul.f32 2.1237322e-06, %v4294_v29  ;;  %v1634_v53 = vmul.f32 %v4291_v24, %v4291_v24  ;;  %v963_v50 = vadd.f32 0.18741608, %v962_v62  ;;  %vm744_vm10 = vmor %vm742_vm9, %vm743_vm8 }
 0x18f   : > { %5771 = vst [vmem:[#allocation18_spill] sm:$0xff] %v4304_v37  ;;  %v749_v54 = vor.u32 1.1754944e-38, %v748_v44  ;;  %v774_v30 = vadd.f32 0.4994258, %v773_v36  ;;  %v1409_v59 = vmul.f32 %v1408_v12, %v3861_v4  ;;  %v1564_v52 = vmul.f32 %v1563_v60, %v4174_v23  ;;  %v5772_v44 = vld [vmem:[#allocation25_spill] sm:$0xff] }
 0x190   : > { %v1600_v9 = vmul.f32 %v1599_v27, %v4241_v51  ;;  %v745_v8 = vsel %vm744_vm10, %v3092_v38, %v741_v57  ;;  %vm747_vm11 = vcmp.eq.f32.partialorder %v746_v56, 8.507059e+37  ;;  %v4316_v32 = vadd.f32 %v4102_v6, %v393_v1 }
 0x191   : > { %v750_v39 = vsel %vm747_vm11, %v749_v54, %v745_v8  ;;  %v775_v11 = vmul.f32 %v774_v30, %v3842_v25  ;;  %v807_v20 = vmul.f32 3.8918573e-05, %v3893_v15  ;;  %v4320_v62 = vmul.f32 %v925_v26, %v4117_v63 }
 0x192   : > { %v751_v7 = vmul.f32 %v750_v39, %v5772_v44  ;;  %v997_v12 = vadd.f32 0.00028619796, %v996_v46  ;;  %v4323_v31 = vmin.f32 %v1634_v53, 16.0  ;;  %v964_v38 = vmul.f32 %v963_v50, %v4204_v58  ;;  %v5774_v39 = vld [vmem:[#allocation20_spill] sm:$0xff] }
 0x193   : > { %v3094_v60 = vpop.eup %3093  ;;  %v4327_v27 = vmul.f32 0.5, %v4209_v19  ;;  %v4329_v25 = vadd.f32 1.0, %v775_v11  ;;  %v1410_v56 = vadd.f32 0.014752088, %v1409_v59  ;;  %v4331_v36 = vadd.f32 1.1283791, %v1564_v52 }
 0x194   : > { %v2919_v57 = vclamps-f32 %v751_v7, 1.0  ;;  %v1378_v63 = vmul.f32 %v3094_v60, %v4296_v16  ;;  %v1636_v26 = vmul.f32 2.1237322e-06, %v4323_v31  ;;  %v1601_v1 = vadd.f32 0.05243302, %v1600_v9 }
 0x195   : > { %5773 = vst [vmem:[#allocation19_spill] sm:$0xff] %v4327_v27  ;;  %3095 = vrcp.f32 %v4329_v25  ;;  %v4337_v46 = vmul.f32 0.70710677, %v4316_v32  ;;  %v808_v53 = vadd.f32 0.001143296, %v807_v20  ;;  %v998_v19 = vmul.f32 %v997_v12, %v4294_v29 }
 0x196   : > { %v1799_v50 = vadd.f32 1.0, %v2919_v57  ;;  %v1379_v54 = vsub.f32 1.0, %v1378_v63  ;;  %v1447_v30 = vmul.f32 3.8918573e-05, %v3950_v13  ;;  %v4341_v59 = vadd.f32 1.1283791, %v964_v38 }
 0x197   : > { %v1386_v52 = vand.u32 2147483647, %v4296_v16  ;;  %v1388_v8 = vand.u32 2147483648, %v4296_v16  ;;  %v1411_v9 = vmul.f32 %v1410_v56, %v3861_v4  ;;  %vm1383_vm12 = vweird.f32 %v3094_v60 }
 0x198   : > { %v1831_v11 = vmul.f32 %v1799_v50, %v5774_v39  ;;  %v1380_v44 = vmul.f32 %v3094_v60, %v1379_v54  ;;  %v1637_v7 = vadd.f32 0.00028619796, %v1636_v26  ;;  %v1602_v20 = vmul.f32 %v1601_v1, %v4241_v51 }
 0x199   : > { %v1034_v12 = vmul.f32 %v4337_v46, %v4337_v46  ;;  %v1412_v57 = vadd.f32 0.112945676, %v1411_v9  ;;  %v809_v38 = vmul.f32 %v808_v53, %v3893_v15  ;;  %v999_v63 = vadd.f32 0.0036580483, %v998_v19 }
 0x19a   : > { %1890 = vmatmul.f32.gmra.mxu1 %v1831_v11  ;;  %v1381_v27 = vadd.f32 %v3094_v60, %v1380_v44  ;;  %vm1382_vm13 = vweird.f32 %v4296_v16  ;;  %v1448_v37 = vadd.f32 0.001143296, %v1447_v30  ;;  %vm1387_vm15 = vcmp.eq.f32.partialorder %v1386_v52, 8.507059e+37  ;;  %v5775_v44 = vld [vmem:[#allocation26_spill] sm:$0xff] }
 0x19b   : > { %v3096_v56 = vpop.eup %3095  ;;  %vm1384_vm14 = vmor %vm1382_vm13, %vm1383_vm12  ;;  %v1389_v50 = vor.u32 1.1754944e-38, %v1388_v8  ;;  %v1413_v26 = vmul.f32 %v1412_v57, %v3861_v4  ;;  %v810_v54 = vadd.f32 0.014752088, %v809_v38  ;;  %v1638_v39 = vmul.f32 %v1637_v7, %v4323_v31 }
 0x19c   : > { %v1385_v1 = vsel %vm1384_vm14, %v3094_v60, %v1381_v27  ;;  %v778_v9 = vmul.f32 %v3096_v56, %v4329_v25  ;;  %v1449_v53 = vmul.f32 %v1448_v37, %v3950_v13  ;;  %v786_v11 = vand.u32 2147483647, %v4329_v25 }
 0x19d   : > { %v1390_v19 = vsel %vm1387_vm15, %v1389_v50, %v1385_v1  ;;  %v4357_v16 = vmin.f32 %v1034_v12, 16.0  ;;  %v1414_v30 = vadd.f32 0.4994258, %v1413_v26  ;;  %v4361_v57 = vadd.f32 %v4102_v6, %v441_v40 }
 0x19e   : > { %v1391_v52 = vmul.f32 %v1390_v19, %v5775_v44  ;;  %v779_v8 = vsub.f32 1.0, %v778_v9  ;;  %v811_v60 = vmul.f32 %v810_v54, %v3893_v15  ;;  %v788_v27 = vand.u32 2147483648, %v4329_v25 }
 0x19f   : > { %v1036_v7 = vmul.f32 2.1237322e-06, %v4357_v16  ;;  %v1415_v37 = vmul.f32 %v1414_v30, %v3861_v4  ;;  %v1450_v38 = vadd.f32 0.014752088, %v1449_v53  ;;  %vm783_vm0 = vweird.f32 %v3096_v56 }
 0x1a0   : > { %v2935_v50 = vclamps-f32 %v1391_v52, 1.0  ;;  %v780_v1 = vmul.f32 %v3096_v56, %v779_v8  ;;  %v4368_v12 = vmul.f32 0.70710677, %v4361_v57  ;;  %v1603_v26 = vadd.f32 0.18741608, %v1602_v20  ;;  %v5777_v52 = vld [vmem:[#allocation21_spill] sm:$0xff] }
 0x1a1   : > { %v1000_v9 = vmul.f32 %v999_v63, %v4294_v29  ;;  %vm782_vm1 = vweird.f32 %v4329_v25  ;;  %v4372_v40 = vadd.f32 1.0, %v1415_v37  ;;  %v1639_v19 = vadd.f32 0.0036580483, %v1638_v39 }
 0x1a2   : > { %5776 = vst [vmem:[#allocation25_spill] sm:$0xff] %v4368_v12  ;;  %v1815_v54 = vadd.f32 1.0, %v2935_v50  ;;  %v781_v44 = vadd.f32 %v3096_v56, %v780_v1  ;;  %v812_v35 = vadd.f32 0.112945676, %v811_v60  ;;  %vm784_vm2 = vmor %vm782_vm1, %vm783_vm0  ;;  %v789_v4 = vor.u32 1.1754944e-38, %v788_v27 }
 0x1a3   : > { %v1037_v53 = vadd.f32 0.00028619796, %v1036_v7  ;;  %3097 = vrcp.f32 %v4372_v40  ;;  %v1451_v30 = vmul.f32 %v1450_v38, %v3950_v13  ;;  %vm787_vm3 = vcmp.eq.f32.partialorder %v786_v11, 8.507059e+37 }
 0x1a4   : > { %v1847_v8 = vmul.f32 %v1815_v54, %v5777_v52  ;;  %v785_v20 = vsel %vm784_vm2, %v3096_v56, %v781_v44  ;;  %v1674_v25 = vmul.f32 %v4368_v12, %v4368_v12  ;;  %v4381_v63 = vmul.f32 %v4331_v36, %v4147_v22  ;;  %v396_v36 = vpop.f32.mrf.mxu0 }
 0x1a5   : > { %v4384_v39 = vmul.f32 0.5, %v4250_v10  ;;  %v1001_v60 = vadd.f32 0.05243302, %v1000_v9  ;;  %v790_v27 = vsel %vm787_vm3, %v789_v4, %v785_v20  ;;  %v4388_v7 = vmul.f32 %v4341_v59, %v4182_v47  ;;  %v5782_v20 = vld [vmem:[#allocation22_spill] sm:$0xff] }
 0x1a6   : > { %v1604_v37 = vmul.f32 %v1603_v26, %v4241_v51  ;;  %1938 = vmatmul.f32.gmra.mxu3 %v1847_v8  ;;  %v791_v56 = vmul.f32 %v790_v27, %v4077_v48  ;;  %v813_v11 = vmul.f32 %v812_v35, %v3893_v15  ;;  %v4394_v38 = vmul.f32 0.5, %v4281_v49 }
 0x1a7   : > { %5778 = vst [vmem:[#allocation20_spill] sm:$0xff] %v4384_v39  ;;  %v1640_v22 = vmul.f32 %v1639_v19, %v4323_v31  ;;  %v1038_v10 = vmul.f32 %v1037_v53, %v4357_v16  ;;  %v1452_v50 = vadd.f32 0.112945676, %v1451_v30  ;;  %v4398_v9 = vmin.f32 %v1674_v25, 16.0 }
 0x1a8   : > { %5779 = vst [vmem:[#allocation26_spill] sm:$0xff] %v4388_v7  ;;  %v2920_v1 = vclamps-f32 %v791_v56, 1.0  ;;  %v814_v47 = vadd.f32 0.4994258, %v813_v11  ;;  %v4401_v59 = vadd.f32 %v4102_v6, %v396_v36  ;;  %v1002_v48 = vmul.f32 %v1001_v60, %v4294_v29  ;;  %v444_v11 = vpop.f32.mrf.mxu2 }
 0x1a9   : > { %5780 = vst [vmem:[#allocation21_spill] sm:$0xff] %v4394_v38  ;;  %v3098_v26 = vpop.eup %3097  ;;  %v1453_v35 = vmul.f32 %v1452_v50, %v3950_v13  ;;  %v847_v49 = vmul.f32 3.8918573e-05, %v3981_v33  ;;  %v1487_v54 = vmul.f32 3.8918573e-05, %v4035_v41  ;;  %vm1422_vm4 = vweird.f32 %v4372_v40 }
 0x1aa   : > { %v1800_v19 = vadd.f32 1.0, %v2920_v1  ;;  %v1418_v44 = vmul.f32 %v3098_v26, %v4372_v40  ;;  %v1676_v4 = vmul.f32 2.1237322e-06, %v4398_v9  ;;  %v815_v53 = vmul.f32 %v814_v47, %v3893_v15 }
 0x1ab   : > { %v1641_v30 = vadd.f32 0.05243302, %v1640_v22  ;;  %v1039_v52 = vadd.f32 0.0036580483, %v1038_v10  ;;  %v4412_v8 = vmul.f32 0.70710677, %v4401_v59  ;;  %v4422_v22 = vadd.f32 %v4102_v6, %v444_v11 }
 0x1ac   : > { %v1832_v25 = vmul.f32 %v1800_v19, %v5782_v20  ;;  %v1419_v60 = vsub.f32 1.0, %v1418_v44  ;;  %v4415_v27 = vadd.f32 1.0, %v815_v53  ;;  %v1454_v56 = vadd.f32 0.4994258, %v1453_v35 }
 0x1ad   : > { %5781 = vst [vmem:[#allocation28_spill] sm:$0xff] %v4412_v8  ;;  %v1426_v36 = vand.u32 2147483647, %v4372_v40  ;;  %v1428_v50 = vand.u32 2147483648, %v4372_v40  ;;  %v1074_v15 = vmul.f32 %v4412_v8, %v4412_v8  ;;  %vm1423_vm5 = vweird.f32 %v3098_v26 }
 0x1ae   : > { %5783 = vst [vmem:[#allocation22_spill] sm:$0xff] %v4422_v22  ;;  %1893 = vmatmul.f32.gmra.mxu1 %v1832_v25  ;;  %v1420_v10 = vmul.f32 %v3098_v26, %v1419_v60  ;;  %v1677_v1 = vadd.f32 0.00028619796, %v1676_v4  ;;  %3099 = vrcp.f32 %v4415_v27  ;;  %v1003_v47 = vadd.f32 0.18741608, %v1002_v48  ;;  %vm1424_vm6 = vmor %vm1422_vm4, %vm1423_vm5 }
 0x1af   : > { %v4425_v19 = vmin.f32 %v1074_v15, 16.0  ;;  %v1455_v35 = vmul.f32 %v1454_v56, %v3950_v13  ;;  %v848_v44 = vadd.f32 0.001143296, %v847_v49  ;;  %v1040_v53 = vmul.f32 %v1039_v52, %v4357_v16 }
 0x1b0   : > { %v1421_v20 = vadd.f32 %v3098_v26, %v1420_v10  ;;  %v4430_v8 = vmul.f32 0.70710677, %v4422_v22  ;;  %v1488_v11 = vadd.f32 0.001143296, %v1487_v54  ;;  %v1642_v25 = vmul.f32 %v1641_v30, %v4323_v31 }
 0x1b1   : > { %v1429_v4 = vor.u32 1.1754944e-38, %v1428_v50  ;;  %v1076_v48 = vmul.f32 2.1237322e-06, %v4425_v19  ;;  %v4436_v60 = vadd.f32 1.0, %v1455_v35  ;;  %vm1427_vm7 = vcmp.eq.f32.partialorder %v1426_v36, 8.507059e+37 }
 0x1b2   : > { %5784 = vst [vmem:[#allocation29_spill] sm:$0xff] %v4430_v8  ;;  %v1425_v15 = vsel %vm1424_vm6, %v3098_v26, %v1421_v20  ;;  %v1678_v13 = vmul.f32 %v1677_v1, %v4398_v9  ;;  %v1714_v49 = vmul.f32 %v4430_v8, %v4430_v8  ;;  %v849_v54 = vmul.f32 %v848_v44, %v3981_v33 }
 0x1b3   : > { %v1430_v52 = vsel %vm1427_vm7, %v1429_v4, %v1425_v15  ;;  %v1077_v56 = vadd.f32 0.00028619796, %v1076_v48  ;;  %3101 = vrcp.f32 %v4436_v60  ;;  %v4443_v30 = vadd.f32 1.1283791, %v1604_v37 }
 0x1b4   : > { %v3100_v40 = vpop.eup %3099  ;;  %v1041_v50 = vadd.f32 0.05243302, %v1040_v53  ;;  %v1431_v10 = vmul.f32 %v1430_v52, %v4089_v2  ;;  %v1489_v26 = vmul.f32 %v1488_v11, %v4035_v41  ;;  %v4448_v36 = vmul.f32 %v1003_v47, %v4294_v29 }
 0x1b5   : > { %v4450_v1 = vadd.f32 0.18741608, %v1642_v25  ;;  %v818_v35 = vmul.f32 %v3100_v40, %v4415_v27  ;;  %v1078_v20 = vmul.f32 %v1077_v56, %v4425_v19  ;;  %v1679_v48 = vadd.f32 0.0036580483, %v1678_v13 }
 0x1b6   : > { %v2936_v4 = vclamps-f32 %v1431_v10, 1.0  ;;  %v826_v44 = vand.u32 2147483647, %v4415_v27  ;;  %v4455_v37 = vmin.f32 %v1714_v49, 16.0  ;;  %v828_v2 = vand.u32 2147483648, %v4415_v27  ;;  %v5785_v49 = vld [vmem:[#allocation23_spill] sm:$0xff] }
 0x1b7   : > { %v819_v53 = vsub.f32 1.0, %v818_v35  ;;  %v1079_v15 = vadd.f32 0.0036580483, %v1078_v20  ;;  %v850_v11 = vadd.f32 0.014752088, %v849_v54  ;;  %v1042_v47 = vmul.f32 %v1041_v50, %v4357_v16 }
 0x1b8   : > { %v1816_v52 = vadd.f32 1.0, %v2936_v4  ;;  %v1716_v25 = vmul.f32 2.1237322e-06, %v4455_v37  ;;  %v1490_v22 = vadd.f32 0.014752088, %v1489_v26  ;;  %vm822_vm8 = vweird.f32 %v4415_v27 }
 0x1b9   : > { %v3102_v8 = vpop.eup %3101  ;;  %v820_v12 = vmul.f32 %v3100_v40, %v819_v53  ;;  %vm823_vm9 = vweird.f32 %v3100_v40  ;;  %v851_v13 = vmul.f32 %v850_v11, %v3981_v33  ;;  %v1680_v10 = vmul.f32 %v1679_v48, %v4398_v9 }
 0x1ba   : > { %v1848_v56 = vmul.f32 %v1816_v52, %v5785_v49  ;;  %vm4464_vm10 = vcmp.eq.f32.partialorder %v826_v44, 8.507059e+37  ;;  %v1458_v54 = vmul.f32 %v3102_v8, %v4436_v60  ;;  %v829_v20 = vor.u32 1.1754944e-38, %v828_v2  ;;  %vm824_vm11 = vmor %vm822_vm8, %vm823_vm9 }
 0x1bb   : > { %v821_v50 = vadd.f32 %v3100_v40, %v820_v12  ;;  %v1468_v26 = vand.u32 2147483648, %v4436_v60  ;;  %v852_v4 = vadd.f32 0.112945676, %v851_v13  ;;  %v1080_v27 = vmul.f32 %v1079_v15, %v4425_v19  ;;  %v399_v13 = vpop.f32.mrf.mxu0 }
 0x1bc   : > { %1941 = vmatmul.f32.gmra.mxu3 %v1848_v56  ;;  %v1459_v53 = vsub.f32 1.0, %v1458_v54  ;;  %v1717_v11 = vadd.f32 0.00028619796, %v1716_v25  ;;  %v1491_v52 = vmul.f32 %v1490_v22, %v4035_v41  ;;  %vm1462_vm12 = vweird.f32 %v4436_v60 }
 0x1bd   : > { %v825_v48 = vsel %vm824_vm11, %v3100_v40, %v821_v50  ;;  %v1466_v44 = vand.u32 2147483647, %v4436_v60  ;;  %v853_v49 = vmul.f32 %v852_v4, %v3981_v33  ;;  %vm1463_vm13 = vweird.f32 %v3102_v8 }
 0x1be   : > { %v830_v12 = vsel %vm4464_vm10, %v829_v20, %v825_v48  ;;  %v1460_v2 = vmul.f32 %v3102_v8, %v1459_v53  ;;  %v1492_v56 = vadd.f32 0.112945676, %v1491_v52  ;;  %v1681_v38 = vadd.f32 0.05243302, %v1680_v10  ;;  %vm1464_vm14 = vmor %vm1462_vm12, %vm1463_vm13 }
 0x1bf   : > { %v831_v15 = vmul.f32 %v830_v12, %v4098_v3  ;;  %v1469_v25 = vor.u32 1.1754944e-38, %v1468_v26  ;;  %v854_v54 = vadd.f32 0.4994258, %v853_v49  ;;  %v1081_v22 = vadd.f32 0.05243302, %v1080_v27  ;;  %v447_v49 = vpop.f32.mrf.mxu2  ;;  %v5788_v12 = vld [vmem:[#allocation24_spill] sm:$0xff] }
 0x1c0   : > { %v1461_v40 = vadd.f32 %v3102_v8, %v1460_v2  ;;  %v1718_v50 = vmul.f32 %v1717_v11, %v4455_v37  ;;  %v1493_v39 = vmul.f32 %v1492_v56, %v4035_v41  ;;  %v4484_v20 = vadd.f32 %v4102_v6, %v399_v13  ;;  %v3202_v56 = vld [vmem:[#allocation8] ss:$0 sm:$0xff] }
 0x1c1   : > { %v2921_v7 = vclamps-f32 %v831_v15, 1.0  ;;  %v855_v35 = vmul.f32 %v854_v54, %v3981_v33  ;;  %v887_v10 = vmul.f32 3.8918573e-05, %v4052_v43  ;;  %v1043_v3 = vadd.f32 0.18741608, %v1042_v47 }
 0x1c2   : > { %v1465_v26 = vsel %vm1464_vm14, %v3102_v8, %v1461_v40  ;;  %vm1467_vm15 = vcmp.eq.f32.partialorder %v1466_v44, 8.507059e+37  ;;  %v1494_v4 = vadd.f32 0.4994258, %v1493_v39  ;;  %v1682_v27 = vmul.f32 %v1681_v38, %v4398_v9 }
 0x1c3   : > { %v1801_v53 = vadd.f32 1.0, %v2921_v7  ;;  %v1470_v11 = vsel %vm1467_vm15, %v1469_v25, %v1465_v26  ;;  %v4488_v52 = vadd.f32 1.0, %v855_v35  ;;  %v1082_v60 = vmul.f32 %v1081_v22, %v4425_v19 }
 0x1c4   : > { %v1471_v48 = vmul.f32 %v1470_v11, %v4165_v0  ;;  %v1719_v33 = vadd.f32 0.0036580483, %v1718_v50  ;;  %v1495_v6 = vmul.f32 %v1494_v4, %v4035_v41  ;;  %v4496_v39 = vmul.f32 0.70710677, %v4484_v20 }
 0x1c5   : > { %v1833_v2 = vmul.f32 %v1801_v53, %v5788_v12  ;;  %3103 = vrcp.f32 %v4488_v52  ;;  %v888_v38 = vadd.f32 0.001143296, %v887_v10  ;;  %v4500_v7 = vmul.f32 %v4443_v30, %v4221_v61 }
 0x1c6   : > { %v1005_v8 = vadd.f32 1.1283791, %v4448_v36  ;;  %v1644_v0 = vmul.f32 %v4450_v1, %v4323_v31  ;;  %v2937_v47 = vclamps-f32 %v1471_v48, 1.0  ;;  %v1044_v41 = vmul.f32 %v1043_v3, %v4357_v16 }
 0x1c7   : > { %v1683_v44 = vadd.f32 0.18741608, %v1682_v27  ;;  %1896 = vmatmul.f32.gmra.mxu1 %v1833_v2  ;;  %v4506_v13 = vadd.f32 1.0, %v1495_v6  ;;  %v4508_v15 = vadd.f32 %v3202_v56, %v447_v49  ;;  %v1083_v25 = vadd.f32 0.18741608, %v1082_v60 }
 0x1c8   : > { %v1817_v54 = vadd.f32 1.0, %v2937_v47  ;;  %v1720_v61 = vmul.f32 %v1719_v33, %v4455_v37  ;;  %v1527_v30 = vmul.f32 3.8918573e-05, %v4121_v5  ;;  %v866_v36 = vand.u32 2147483647, %v4488_v52 }
 0x1c9   : > { %5789 = vst [vmem:[#allocation23_spill] sm:$0xff] %v4508_v15  ;;  %v1114_v1 = vmul.f32 %v4496_v39, %v4496_v39  ;;  %3105 = vrcp.f32 %v4506_v13  ;;  %v889_v22 = vmul.f32 %v888_v38, %v4052_v43  ;;  %v4518_v40 = vmul.f32 %v1005_v8, %v4268_v14 }
 0x1ca   : > { %v4521_v50 = vmul.f32 0.5, %v4316_v32  ;;  %v1849_v35 = vmul.f32 %v1817_v54, %v4080_v28  ;;  %v868_v10 = vand.u32 2147483648, %v4488_v52  ;;  %v4525_v26 = vadd.f32 1.1283791, %v1644_v0 }
 0x1cb   : > { %v3104_v3 = vpop.eup %3103  ;;  %v4527_v4 = vadd.f32 1.1283791, %v1044_v41  ;;  %v4530_v27 = vmul.f32 %v1683_v44, %v4398_v9  ;;  %v4533_v53 = vmul.f32 0.70710677, %v4508_v15  ;;  %v4536_v14 = vmul.f32 %v1083_v25, %v4425_v19 }
 0x1cc   : > { %1944 = vmatmul.f32.gmra.mxu3 %v1849_v35  ;;  %v4538_v32 = vadd.f32 0.05243302, %v1720_v61  ;;  %v858_v28 = vmul.f32 %v3104_v3, %v4488_v52  ;;  %vm862_vm0 = vweird.f32 %v4488_v52  ;;  %vm4542_vm1 = vcmp.eq.f32.partialorder %v866_v36, 8.507059e+37 }
 0x1cd   : > { %v4546_v60 = vmin.f32 %v1114_v1, 16.0  ;;  %v890_v48 = vadd.f32 0.014752088, %v889_v22  ;;  %v1528_v33 = vadd.f32 0.001143296, %v1527_v30  ;;  %v869_v49 = vor.u32 1.1754944e-38, %v868_v10 }
 0x1ce   : > { %v859_v6 = vsub.f32 1.0, %v858_v28  ;;  %v927_v12 = vmul.f32 3.8918573e-05, %v4137_v18  ;;  %v1567_v2 = vmul.f32 3.8918573e-05, %v4174_v23  ;;  %v1754_v0 = vmul.f32 %v4533_v53, %v4533_v53 }
 0x1cf   : > { %v3106_v38 = vpop.eup %3105  ;;  %v1116_v8 = vmul.f32 2.1237322e-06, %v4546_v60  ;;  %v891_v47 = vmul.f32 %v890_v48, %v4052_v43  ;;  %v1529_v41 = vmul.f32 %v1528_v33, %v4121_v5  ;;  %vm863_vm2 = vweird.f32 %v3104_v3 }
 0x1d0   : > { %v860_v44 = vmul.f32 %v3104_v3, %v859_v6  ;;  %v1498_v56 = vmul.f32 %v3106_v38, %v4506_v13  ;;  %v928_v25 = vadd.f32 0.001143296, %v927_v12  ;;  %vm1502_vm3 = vweird.f32 %v4506_v13  ;;  %vm864_vm4 = vmor %vm862_vm0, %vm863_vm2 }
 0x1d1   : > { %v1506_v54 = vand.u32 2147483647, %v4506_v13  ;;  %v892_v61 = vadd.f32 0.112945676, %v891_v47  ;;  %v1530_v30 = vadd.f32 0.014752088, %v1529_v41  ;;  %vm1503_vm5 = vweird.f32 %v3106_v38 }
 0x1d2   : > { %v861_v36 = vadd.f32 %v3104_v3, %v860_v44  ;;  %v1499_v1 = vsub.f32 1.0, %v1498_v56  ;;  %v929_v22 = vmul.f32 %v928_v25, %v4137_v18  ;;  %v1568_v35 = vadd.f32 0.001143296, %v1567_v2  ;;  %vm1504_vm6 = vmor %vm1502_vm3, %vm1503_vm5 }
 0x1d3   : > { %v1508_v10 = vand.u32 2147483648, %v4506_v13  ;;  %v4562_v28 = vmin.f32 %v1754_v0, 16.0  ;;  %v893_v48 = vmul.f32 %v892_v61, %v4052_v43  ;;  %v1531_v33 = vmul.f32 %v1530_v30, %v4121_v5 }
 0x1d4   : > { %v865_v6 = vsel %vm864_vm4, %v3104_v3, %v861_v36  ;;  %v1500_v12 = vmul.f32 %v3106_v38, %v1499_v1  ;;  %v930_v47 = vadd.f32 0.014752088, %v929_v22  ;;  %v1569_v52 = vmul.f32 %v1568_v35, %v4174_v23 }
 0x1d5   : > { %v870_v41 = vsel %vm4542_vm1, %v869_v49, %v865_v6  ;;  %v1756_v2 = vmul.f32 2.1237322e-06, %v4562_v28  ;;  %v894_v44 = vadd.f32 0.4994258, %v893_v48  ;;  %v1532_v25 = vadd.f32 0.112945676, %v1531_v33 }
 0x1d6   : > { %v871_v56 = vmul.f32 %v870_v41, %v4185_v34  ;;  %v1501_v0 = vadd.f32 %v3106_v38, %v1500_v12  ;;  %v931_v61 = vmul.f32 %v930_v47, %v4137_v18  ;;  %v1117_v15 = vadd.f32 0.00028619796, %v1116_v8 }
 0x1d7   : > { %vm1507_vm7 = vcmp.eq.f32.partialorder %v1506_v54, 8.507059e+37  ;;  %v1509_v3 = vor.u32 1.1754944e-38, %v1508_v10  ;;  %v895_v11 = vmul.f32 %v894_v44, %v4052_v43  ;;  %v1533_v36 = vmul.f32 %v1532_v25, %v4121_v5 }
 0x1d8   : > { %v2922_v49 = vclamps-f32 %v871_v56, 1.0  ;;  %v1505_v30 = vsel %vm1504_vm6, %v3106_v38, %v1501_v0  ;;  %v932_v1 = vadd.f32 0.112945676, %v931_v61  ;;  %v1757_v35 = vadd.f32 0.00028619796, %v1756_v2 }
 0x1d9   : > { %v1510_v22 = vsel %vm1507_vm7, %v1509_v3, %v1505_v30  ;;  %v4576_v34 = vadd.f32 1.0, %v895_v11  ;;  %v1570_v48 = vadd.f32 0.014752088, %v1569_v52  ;;  %v1534_v6 = vadd.f32 0.4994258, %v1533_v36 }
 0x1da   : > { %v1802_v33 = vadd.f32 1.0, %v2922_v49  ;;  %v1511_v8 = vmul.f32 %v1510_v22, %v4239_v17  ;;  %v933_v13 = vmul.f32 %v932_v1, %v4137_v18  ;;  %v4582_v54 = vmul.f32 %v4525_v26, %v4291_v24 }
 0x1db   : > { %v4585_v43 = vmul.f32 0.5, %v4361_v57  ;;  %v1722_v38 = vmul.f32 %v4538_v32, %v4455_v37  ;;  %3107 = vrcp.f32 %v4576_v34  ;;  %v4592_v10 = vmul.f32 %v4527_v4, %v4337_v46 }
 0x1dc   : > { %v4595_v17 = vmul.f32 0.5, %v4401_v59  ;;  %v1834_v12 = vmul.f32 %v1802_v33, %v4093_v55  ;;  %v2938_v47 = vclamps-f32 %v1511_v8, 1.0  ;;  %v1118_v24 = vmul.f32 %v1117_v15, %v4546_v60 }
 0x1dd   : > { %v1758_v57 = vmul.f32 %v1757_v35, %v4562_v28  ;;  %v1535_v26 = vmul.f32 %v1534_v6, %v4121_v5  ;;  %v934_v41 = vadd.f32 0.4994258, %v933_v13  ;;  %v4602_v32 = vadd.f32 1.1283791, %v4530_v27 }
 0x1de   : > { %v4605_v2 = vadd.f32 1.1283791, %v4536_v14  ;;  %1899 = vmatmul.f32.gmra.mxu1 %v1834_v12  ;;  %v1818_v46 = vadd.f32 1.0, %v2938_v47  ;;  %v1571_v59 = vmul.f32 %v1570_v48, %v4174_v23  ;;  %v4608_v4 = vadd.f32 0.18741608, %v1722_v38 }
 0x1df   : > { %v1536_v55 = vadd.f32 1.0, %v1535_v26  ;;  %v935_v15 = vmul.f32 %v934_v41, %v4137_v18  ;;  %v967_v44 = vmul.f32 3.8918573e-05, %v4204_v58  ;;  %v906_v52 = vand.u32 2147483647, %v4576_v34 }
 0x1e0   : > { %v1850_v5 = vmul.f32 %v1818_v46, %v4161_v21  ;;  %v908_v27 = vand.u32 2147483648, %v4576_v34  ;;  %v1572_v56 = vadd.f32 0.112945676, %v1571_v59  ;;  %v4615_v0 = vadd.f32 0.0036580483, %v1118_v24 }
 0x1e1   : > { %v3108_v14 = vpop.eup %3107  ;;  %v4617_v25 = vadd.f32 0.0036580483, %v1758_v57  ;;  %3109 = vrcp.f32 %v1536_v55  ;;  %v1607_v61 = vmul.f32 3.8918573e-05, %v4241_v51  ;;  %v1546_v3 = vand.u32 2147483647, %v1536_v55 }
 0x1e2   : > { %1947 = vmatmul.f32.gmra.mxu3 %v1850_v5  ;;  %v898_v18 = vmul.f32 %v3108_v14, %v4576_v34  ;;  %v4621_v11 = vadd.f32 1.0, %v935_v15  ;;  %v1007_v21 = vmul.f32 3.8918573e-05, %v4294_v29  ;;  %vm902_vm8 = vweird.f32 %v4576_v34 }
 0x1e3   : > { %v1548_v49 = vand.u32 2147483648, %v1536_v55  ;;  %v1573_v30 = vmul.f32 %v1572_v56, %v4174_v23  ;;  %v968_v36 = vadd.f32 0.001143296, %v967_v44  ;;  %vm4626_vm9 = vcmp.eq.f32.partialorder %v906_v52, 8.507059e+37 }
 0x1e4   : > { %v899_v1 = vsub.f32 1.0, %v898_v18  ;;  %v909_v35 = vor.u32 1.1754944e-38, %v908_v27  ;;  %3111 = vrcp.f32 %v4621_v11  ;;  %vm903_vm10 = vweird.f32 %v3108_v14 }
 0x1e5   : > { %vm1542_vm11 = vweird.f32 %v1536_v55  ;;  %v948_v48 = vand.u32 2147483648, %v4621_v11  ;;  %v1574_v33 = vadd.f32 0.4994258, %v1573_v30  ;;  %vm4632_vm12 = vcmp.eq.f32.partialorder %v1546_v3, 8.507059e+37  ;;  %vm904_vm14 = vmor %vm902_vm8, %vm903_vm10 }
 0x1e6   : > { %v900_v8 = vmul.f32 %v3108_v14, %v899_v1  ;;  %v969_v13 = vmul.f32 %v968_v36, %v4204_v58  ;;  %v1608_v38 = vadd.f32 0.001143296, %v1607_v61  ;;  %v1008_v12 = vadd.f32 0.001143296, %v1007_v21 }
 0x1e7   : > { %v3110_v47 = vpop.eup %3109  ;;  %v1549_v24 = vor.u32 1.1754944e-38, %v1548_v49  ;;  %v946_v57 = vand.u32 2147483647, %v4621_v11  ;;  %v1575_v26 = vmul.f32 %v1574_v33, %v4174_v23  ;;  %v1647_v41 = vmul.f32 3.8918573e-05, %v4323_v31 }
 0x1e8   : > { %v901_v46 = vadd.f32 %v3108_v14, %v900_v8  ;;  %v1538_v59 = vmul.f32 %v3110_v47, %v1536_v55  ;;  %vm942_vm13 = vweird.f32 %v4621_v11  ;;  %v970_v15 = vadd.f32 0.014752088, %v969_v13 }
 0x1e9   : > { %vm1543_vm15 = vweird.f32 %v3110_v47  ;;  %v949_v44 = vor.u32 1.1754944e-38, %v948_v48  ;;  %v4644_v5 = vadd.f32 1.0, %v1575_v26  ;;  %v1609_v52 = vmul.f32 %v1608_v38, %v4241_v51 }
 0x1ea   : > { %v3112_v27 = vpop.eup %3111  ;;  %v905_v56 = vsel %vm904_vm14, %v3108_v14, %v901_v46  ;;  %v1539_v23 = vsub.f32 1.0, %v1538_v59  ;;  %v971_v61 = vmul.f32 %v970_v15, %v4204_v58  ;;  %v1009_v18 = vmul.f32 %v1008_v12, %v4294_v29  ;;  %vm4661_vm2 = vmor %vm1542_vm11, %vm1543_vm15 }
 0x1eb   : > { %v910_v3 = vsel %vm4626_vm9, %v909_v35, %v905_v56  ;;  %v938_v21 = vmul.f32 %v3112_v27, %v4621_v11  ;;  %vm4652_vm0 = vcmp.eq.f32.partialorder %v946_v57, 8.507059e+37  ;;  %3113 = vrcp.f32 %v4644_v5 }
 0x1ec   : > { %v1648_v49 = vadd.f32 0.001143296, %v1647_v41  ;;  %v911_v30 = vmul.f32 %v910_v3, %v4259_v45  ;;  %v1540_v14 = vmul.f32 %v3110_v47, %v1539_v23  ;;  %vm943_vm1 = vweird.f32 %v3112_v27 }
 0x1ed   : > { %v1047_v36 = vmul.f32 3.8918573e-05, %v4357_v16  ;;  %v939_v22 = vsub.f32 1.0, %v938_v21  ;;  %vm1582_vm3 = vweird.f32 %v4644_v5  ;;  %v972_v35 = vadd.f32 0.112945676, %v971_v61  ;;  %vm944_vm4 = vmor %vm942_vm13, %vm943_vm1 }
 0x1ee   : > { %v1610_v48 = vadd.f32 0.014752088, %v1609_v52  ;;  %v2923_v33 = vclamps-f32 %v911_v30, 1.0  ;;  %v1541_v8 = vadd.f32 %v3110_v47, %v1540_v14  ;;  %v1586_v13 = vand.u32 2147483647, %v4644_v5 }
 0x1ef   : > { %v1010_v45 = vadd.f32 0.014752088, %v1009_v18  ;;  %v940_v38 = vmul.f32 %v3112_v27, %v939_v22  ;;  %v1588_v12 = vand.u32 2147483648, %v4644_v5  ;;  %v973_v57 = vmul.f32 %v972_v35, %v4204_v58  ;;  %v5800_v18 = vld [vmem:[#allocation15_spill] sm:$0xff] }
 0x1f0   : > { %v1611_v55 = vmul.f32 %v1610_v48, %v4241_v51  ;;  %v1803_v26 = vadd.f32 1.0, %v2923_v33  ;;  %v1545_v41 = vsel %vm4661_vm2, %v3110_v47, %v1541_v8  ;;  %v1649_v59 = vmul.f32 %v1648_v49, %v4323_v31 }
 0x1f1   : > { %v1011_v46 = vmul.f32 %v1010_v45, %v4294_v29  ;;  %v3114_v15 = vpop.eup %3113  ;;  %v1550_v52 = vsel %vm4632_vm12, %v1549_v24, %v1545_v41  ;;  %v941_v56 = vadd.f32 %v3112_v27, %v940_v38  ;;  %v974_v23 = vadd.f32 0.4994258, %v973_v57  ;;  %v5805_v57 = vld [vmem:[#allocation27_spill] sm:$0xff] }
 0x1f2   : > { %v1612_v61 = vadd.f32 0.112945676, %v1611_v55  ;;  %v1835_v3 = vmul.f32 %v1803_v26, %v5800_v18  ;;  %v1551_v21 = vmul.f32 %v1550_v52, %v4301_v42  ;;  %v1578_v47 = vmul.f32 %v3114_v15, %v4644_v5 }
 0x1f3   : > { %vm1583_vm5 = vweird.f32 %v3114_v15  ;;  %v945_v30 = vsel %vm944_vm4, %v3112_v27, %v941_v56  ;;  %v975_v49 = vmul.f32 %v974_v23, %v4204_v58  ;;  %v1012_v24 = vadd.f32 0.112945676, %v1011_v46 }
 0x1f4   : > { %v1613_v6 = vmul.f32 %v1612_v61, %v4241_v51  ;;  %1902 = vmatmul.f32.gmra.mxu1 %v1835_v3  ;;  %v2939_v14 = vclamps-f32 %v1551_v21, 1.0  ;;  %v950_v1 = vsel %vm4652_vm0, %v949_v44, %v945_v30  ;;  %v1579_v22 = vsub.f32 1.0, %v1578_v47  ;;  %vm4692_vm6 = vmor %vm1582_vm3, %vm1583_vm5  ;;  %v5806_v61 = vld [vmem:[#allocation16_spill] sm:$0xff] }
 0x1f5   : > { %v1650_v42 = vadd.f32 0.014752088, %v1649_v59  ;;  %v951_v35 = vmul.f32 %v950_v1, %v4320_v62  ;;  %v976_v11 = vadd.f32 1.0, %v975_v49  ;;  %v1013_v33 = vmul.f32 %v1012_v24, %v4294_v29 }
 0x1f6   : > { %v1614_v48 = vadd.f32 0.4994258, %v1613_v6  ;;  %v1819_v8 = vadd.f32 1.0, %v2939_v14  ;;  %v1580_v27 = vmul.f32 %v3114_v15, %v1579_v22  ;;  %v1048_v45 = vadd.f32 0.001143296, %v1047_v36 }
 0x1f7   : > { %v1651_v58 = vmul.f32 %v1650_v42, %v4323_v31  ;;  %v2924_v38 = vclamps-f32 %v951_v35, 1.0  ;;  %vm4696_vm7 = vcmp.eq.f32.partialorder %v1586_v13, 8.507059e+37  ;;  %v1589_v62 = vor.u32 1.1754944e-38, %v1588_v12 }
 0x1f8   : > { %3115 = vrcp.f32 %v976_v11  ;;  %v1851_v55 = vmul.f32 %v1819_v8, %v5805_v57  ;;  %v1581_v26 = vadd.f32 %v3114_v15, %v1580_v27  ;;  %v986_v41 = vand.u32 2147483647, %v976_v11 }
 0x1f9   : > { %v1615_v36 = vmul.f32 %v1614_v48, %v4241_v51  ;;  %v4704_v46 = vmul.f32 %v4615_v0, %v4546_v60  ;;  %v1804_v5 = vadd.f32 1.0, %v2924_v38  ;;  %v1014_v59 = vadd.f32 0.4994258, %v1013_v33  ;;  %v5811_v38 = vld [vmem:[#allocation17_spill] sm:$0xff] }
 0x1fa   : > { %v1652_v52 = vadd.f32 0.112945676, %v1651_v58  ;;  %1950 = vmatmul.f32.gmra.mxu3 %v1851_v55  ;;  %v1585_v13 = vsel %vm4692_vm6, %v3114_v15, %v1581_v26  ;;  %v988_v56 = vand.u32 2147483648, %v976_v11  ;;  %v1049_v23 = vmul.f32 %v1048_v45, %v4357_v16 }
 0x1fb   : > { %v4708_v12 = vadd.f32 1.0, %v1615_v36  ;;  %v1836_v18 = vmul.f32 %v1804_v5, %v5806_v61  ;;  %v1590_v51 = vsel %vm4696_vm7, %v1589_v62, %v1585_v13  ;;  %v1015_v0 = vmul.f32 %v1014_v59, %v4294_v29 }
 0x1fc   : > { %v1653_v3 = vmul.f32 %v1652_v52, %v4323_v31  ;;  %v4718_v21 = vmul.f32 %v4617_v25, %v4562_v28  ;;  %v1591_v15 = vmul.f32 %v1590_v51, %v4381_v63  ;;  %v1050_v29 = vadd.f32 0.014752088, %v1049_v23 }
 0x1fd   : > { %3117 = vrcp.f32 %v4708_v12  ;;  %v1626_v47 = vand.u32 2147483647, %v4708_v12  ;;  %1905 = vmatmul.f32.gmra.mxu1 %v1836_v18  ;;  %v1628_v49 = vand.u32 2147483648, %v4708_v12  ;;  %v4724_v6 = vadd.f32 1.0, %v1015_v0 }
 0x1fe   : > { %v3116_v30 = vpop.eup %3115  ;;  %v1654_v24 = vadd.f32 0.4994258, %v1653_v3  ;;  %v2940_v14 = vclamps-f32 %v1591_v15, 1.0  ;;  %vm982_vm8 = vweird.f32 %v976_v11  ;;  %vm4726_vm9 = vcmp.eq.f32.partialorder %v986_v41, 8.507059e+37 }
 0x1ff   : > { %v978_v1 = vmul.f32 %v3116_v30, %v976_v11  ;;  %vm983_vm10 = vweird.f32 %v3116_v30  ;;  %v989_v63 = vor.u32 1.1754944e-38, %v988_v56  ;;  %vm1622_vm11 = vweird.f32 %v4708_v12 }
 0x200   : > { %3119 = vrcp.f32 %v4724_v6  ;;  %v1820_v22 = vadd.f32 1.0, %v2940_v14  ;;  %v1026_v35 = vand.u32 2147483647, %v4724_v6  ;;  %v1655_v48 = vmul.f32 %v1654_v24, %v4323_v31  ;;  %vm4745_vm14 = vmor %vm982_vm8, %vm983_vm10 }
 0x201   : > { %v979_v42 = vsub.f32 1.0, %v978_v1  ;;  %vm4734_vm12 = vcmp.eq.f32.partialorder %v1626_v47, 8.507059e+37  ;;  %v1629_v8 = vor.u32 1.1754944e-38, %v1628_v49  ;;  %vm1022_vm13 = vweird.f32 %v4724_v6  ;;  %v5816_v49 = vld [vmem:[#allocation26_spill] sm:$0xff] }
 0x202   : > { %v1051_v27 = vmul.f32 %v1050_v29, %v4357_v16  ;;  %v1687_v58 = vmul.f32 3.8918573e-05, %v4398_v9  ;;  %v1852_v34 = vmul.f32 %v1820_v22, %v5811_v38  ;;  %v1028_v62 = vand.u32 2147483648, %v4724_v6  ;;  %v5826_v29 = vld [vmem:[#allocation19_spill] sm:$0xff] }
 0x203   : > { %v3118_v45 = vpop.eup %3117  ;;  %v980_v44 = vmul.f32 %v3116_v30, %v979_v42  ;;  %v1656_v57 = vadd.f32 1.0, %v1655_v48  ;;  %v1087_v36 = vmul.f32 3.8918573e-05, %v4425_v19  ;;  %vm4751_vm0 = vcmp.eq.f32.partialorder %v1026_v35, 8.507059e+37 }
 0x204   : > { %v1618_v55 = vmul.f32 %v3118_v45, %v4708_v12  ;;  %v1052_v26 = vadd.f32 0.112945676, %v1051_v27  ;;  %v1688_v41 = vadd.f32 0.001143296, %v1687_v58  ;;  %1953 = vmatmul.f32.gmra.mxu3 %v1852_v34  ;;  %vm1623_vm15 = vweird.f32 %v3118_v45 }
 0x205   : > { %v981_v5 = vadd.f32 %v3116_v30, %v980_v44  ;;  %3121 = vrcp.f32 %v1656_v57  ;;  %v1666_v52 = vand.u32 2147483647, %v1656_v57  ;;  %v1668_v56 = vand.u32 2147483648, %v1656_v57  ;;  %vm4766_vm3 = vmor %vm1622_vm11, %vm1623_vm15 }
 0x206   : > { %v3120_v11 = vpop.eup %3119  ;;  %v1619_v13 = vsub.f32 1.0, %v1618_v55  ;;  %v1053_v23 = vmul.f32 %v1052_v26, %v4357_v16  ;;  %v1689_v61 = vmul.f32 %v1688_v41, %v4398_v9  ;;  %v1029_v0 = vor.u32 1.1754944e-38, %v1028_v62 }
 0x207   : > { %v985_v18 = vsel %vm4745_vm14, %v3116_v30, %v981_v5  ;;  %v1018_v51 = vmul.f32 %v3120_v11, %v4724_v6  ;;  %vm1662_vm1 = vweird.f32 %v1656_v57  ;;  %vm1023_vm2 = vweird.f32 %v3120_v11  ;;  %v5823_v6 = vld [vmem:[#allocation18_spill] sm:$0xff] }
 0x208   : > { %v990_v3 = vsel %vm4726_vm9, %v989_v63, %v985_v18  ;;  %v1620_v15 = vmul.f32 %v3118_v45, %v1619_v13  ;;  %v1054_v47 = vadd.f32 0.4994258, %v1053_v23  ;;  %v1690_v14 = vadd.f32 0.014752088, %v1689_v61  ;;  %vm4782_vm5 = vmor %vm1022_vm13, %vm1023_vm2 }
 0x209   : > { %v991_v24 = vmul.f32 %v990_v3, %v5816_v49  ;;  %v1019_v30 = vsub.f32 1.0, %v1018_v51  ;;  %v1088_v1 = vadd.f32 0.001143296, %v1087_v36  ;;  %vm4770_vm4 = vcmp.eq.f32.partialorder %v1666_v52, 8.507059e+37 }
 0x20a   : > { %v1621_v22 = vadd.f32 %v3118_v45, %v1620_v15  ;;  %v1669_v25 = vor.u32 1.1754944e-38, %v1668_v56  ;;  %v1055_v63 = vmul.f32 %v1054_v47, %v4357_v16  ;;  %v1691_v12 = vmul.f32 %v1690_v14, %v4398_v9 }
 0x20b   : > { %v3122_v35 = vpop.eup %3121  ;;  %v2925_v48 = vclamps-f32 %v991_v24, 1.0  ;;  %v1020_v27 = vmul.f32 %v3120_v11, %v1019_v30  ;;  %v1727_v58 = vmul.f32 3.8918573e-05, %v4455_v37  ;;  %v1089_v16 = vmul.f32 %v1088_v1, %v4425_v19 }
 0x20c   : > { %v1625_v38 = vsel %vm4766_vm3, %v3118_v45, %v1621_v22  ;;  %v1658_v44 = vmul.f32 %v3122_v35, %v1656_v57  ;;  %v4786_v62 = vadd.f32 1.0, %v1055_v63  ;;  %v1692_v41 = vadd.f32 0.112945676, %v1691_v12 }
 0x20d   : > { %v1805_v31 = vadd.f32 1.0, %v2925_v48  ;;  %v1630_v55 = vsel %vm4734_vm12, %v1629_v8, %v1625_v38  ;;  %v1021_v26 = vadd.f32 %v3120_v11, %v1020_v27  ;;  %vm1663_vm6 = vweird.f32 %v3122_v35 }
 0x20e   : > { %v1631_v45 = vmul.f32 %v1630_v55, %v4500_v7  ;;  %v1659_v36 = vsub.f32 1.0, %v1658_v44  ;;  %3123 = vrcp.f32 %v4786_v62  ;;  %vm1062_vm7 = vweird.f32 %v4786_v62  ;;  %vm4803_vm8 = vmor %vm1662_vm1, %vm1663_vm6  ;;  %v5827_v44 = vld [vmem:[#allocation20_spill] sm:$0xff] }
 0x20f   : > { %v1837_v5 = vmul.f32 %v1805_v31, %v5823_v6  ;;  %v1025_v52 = vsel %vm4782_vm5, %v3120_v11, %v1021_v26  ;;  %v1127_v13 = vmul.f32 3.8918573e-05, %v4546_v60  ;;  %v1693_v7 = vmul.f32 %v1692_v41, %v4398_v9 }
 0x210   : > { %v2941_v56 = vclamps-f32 %v1631_v45, 1.0  ;;  %v1030_v33 = vsel %vm4751_vm0, %v1029_v0, %v1025_v52  ;;  %v1660_v8 = vmul.f32 %v3122_v35, %v1659_v36  ;;  %v1066_v11 = vand.u32 2147483647, %v4786_v62 }
 0x211   : > { %1908 = vmatmul.f32.gmra.mxu1 %v1837_v5  ;;  %v1031_v23 = vmul.f32 %v1030_v33, %v4518_v40  ;;  %v1068_v18 = vand.u32 2147483648, %v4786_v62  ;;  %v1090_v51 = vadd.f32 0.014752088, %v1089_v16  ;;  %v1694_v59 = vadd.f32 0.4994258, %v1693_v7  ;;  %v5830_v33 = vld [vmem:[#allocation21_spill] sm:$0xff] }
 0x212   : > { %v1821_v3 = vadd.f32 1.0, %v2941_v56  ;;  %v1661_v15 = vadd.f32 %v3122_v35, %v1660_v8  ;;  %v1728_v0 = vadd.f32 0.001143296, %v1727_v58  ;;  %v1128_v24 = vadd.f32 0.001143296, %v1127_v13 }
 0x213   : > { %v2926_v47 = vclamps-f32 %v1031_v23, 1.0  ;;  %v1091_v49 = vmul.f32 %v1090_v51, %v4425_v19  ;;  %v1767_v40 = vmul.f32 3.8918573e-05, %v4562_v28  ;;  %v1695_v1 = vmul.f32 %v1694_v59, %v4398_v9 }
 0x214   : > { %v3124_v57 = vpop.eup %3123  ;;  %v1853_v30 = vmul.f32 %v1821_v3, %v5826_v29  ;;  %v1665_v14 = vsel %vm4803_vm8, %v3122_v35, %v1661_v15  ;;  %v1729_v22 = vmul.f32 %v1728_v0, %v4455_v37  ;;  %v1129_v9 = vmul.f32 %v1128_v24, %v4546_v60 }
 0x215   : > { %v1806_v63 = vadd.f32 1.0, %v2926_v47  ;;  %v1670_v48 = vsel %vm4770_vm4, %v1669_v25, %v1665_v14  ;;  %v1058_v27 = vmul.f32 %v3124_v57, %v4786_v62  ;;  %vm1063_vm9 = vweird.f32 %v3124_v57 }
 0x216   : > { %1956 = vmatmul.f32.gmra.mxu3 %v1853_v30  ;;  %v1671_v12 = vmul.f32 %v1670_v48, %v4582_v54  ;;  %v4820_v58 = vadd.f32 1.0, %v1695_v1  ;;  %v1092_v38 = vadd.f32 0.112945676, %v1091_v49  ;;  %v1730_v34 = vadd.f32 0.014752088, %v1729_v22  ;;  %vm4834_vm10 = vmor %vm1062_vm7, %vm1063_vm9  ;;  %v1876_v48 = vpop.f32.mrf.mxu1 }
 0x217   : > { %v1838_v35 = vmul.f32 %v1806_v63, %v5827_v44  ;;  %v1059_v16 = vsub.f32 1.0, %v1058_v27  ;;  %v1768_v31 = vadd.f32 0.001143296, %v1767_v40  ;;  %v1724_v42 = vmul.f32 %v4608_v4, %v4455_v37 }
 0x218   : > { %v1121_v25 = vadd.f32 0.05243302, %v4704_v46  ;;  %v2942_v55 = vclamps-f32 %v1671_v12, 1.0  ;;  %3125 = vrcp.f32 %v4820_v58  ;;  %v1761_v54 = vadd.f32 0.05243302, %v4718_v21 }
 0x219   : > { %1911 = vmatmul.f32.gmra.mxu1 %v1838_v35  ;;  %v1060_v26 = vmul.f32 %v3124_v57, %v1059_v16  ;;  %v1093_v41 = vmul.f32 %v1092_v38, %v4425_v19  ;;  %v1731_v45 = vmul.f32 %v1730_v34, %v4455_v37  ;;  %v1069_v4 = vor.u32 1.1754944e-38, %v1068_v18  ;;  %v4858_v34 = vld [vmem:[#allocation8 + $0x1] ss:$0 sm:$0xff] }
 0x21a   : > { %v1822_v36 = vadd.f32 1.0, %v2942_v55  ;;  %v1130_v46 = vadd.f32 0.014752088, %v1129_v9  ;;  %v1769_v5 = vmul.f32 %v1768_v31, %v4562_v28  ;;  %vm1067_vm11 = vcmp.eq.f32.partialorder %v1066_v11, 8.507059e+37 }
 0x21b   : > { %v1061_v52 = vadd.f32 %v3124_v57, %v1060_v26  ;;  %v1094_v21 = vadd.f32 0.4994258, %v1093_v41  ;;  %v1732_v13 = vadd.f32 0.112945676, %v1731_v45  ;;  %v1122_v56 = vmul.f32 %v1121_v25, %v4546_v60  ;;  %v5836_v41 = vld [vmem:[#allocation28_spill] sm:$0xff] }
 0x21c   : > { %v1854_v8 = vmul.f32 %v1822_v36, %v5830_v33  ;;  %v1131_v7 = vmul.f32 %v1130_v46, %v4546_v60  ;;  %v1770_v23 = vadd.f32 0.014752088, %v1769_v5  ;;  %v1762_v62 = vmul.f32 %v1761_v54, %v4562_v28  ;;  %v5835_v54 = vld [vmem:[#allocation25_spill] sm:$0xff] }
 0x21d   : > { %v1065_v61 = vsel %vm4834_vm10, %v3124_v57, %v1061_v52  ;;  %v1095_v18 = vmul.f32 %v1094_v21, %v4425_v19  ;;  %v1733_v51 = vmul.f32 %v1732_v13, %v4455_v37  ;;  %vm1702_vm12 = vweird.f32 %v4820_v58  ;;  %v5837_v36 = vld [vmem:[#allocation29_spill] sm:$0xff] }
 0x21e   : > { %v3126_v3 = vpop.eup %3125  ;;  %1959 = vmatmul.f32.gmra.mxu3 %v1854_v8  ;;  %v1070_v11 = vsel %vm1067_vm11, %v1069_v4, %v1065_v61  ;;  %v1132_v15 = vadd.f32 0.112945676, %v1131_v7  ;;  %v1771_v59 = vmul.f32 %v1770_v23, %v4562_v28  ;;  %v1706_v49 = vand.u32 2147483647, %v4820_v58 }
 0x21f   : > { %v1071_v0 = vmul.f32 %v1070_v11, %v4592_v10  ;;  %v1698_v47 = vmul.f32 %v3126_v3, %v4820_v58  ;;  %v4852_v24 = vadd.f32 1.0, %v1095_v18  ;;  %v1708_v19 = vand.u32 2147483648, %v4820_v58 }
 0x220   : > { %v1734_v40 = vadd.f32 0.4994258, %v1733_v51  ;;  %v1133_v57 = vmul.f32 %v1132_v15, %v4546_v60  ;;  %v1772_v29 = vadd.f32 0.112945676, %v1771_v59  ;;  %vm1703_vm13 = vweird.f32 %v3126_v3 }
 0x221   : > { %v2927_v30 = vclamps-f32 %v1071_v0, 1.0  ;;  %v1699_v14 = vsub.f32 1.0, %v1698_v47  ;;  %3127 = vrcp.f32 %v4852_v24  ;;  %v1725_v1 = vadd.f32 1.1283791, %v1724_v42  ;;  %vm4863_vm14 = vmor %vm1702_vm12, %vm1703_vm13 }
 0x222   : > { %v1123_v22 = vadd.f32 0.18741608, %v1122_v56  ;;  %v1735_v10 = vmul.f32 %v1734_v40, %v4455_v37  ;;  %v1134_v63 = vadd.f32 0.4994258, %v1133_v57  ;;  %v1763_v27 = vadd.f32 0.18741608, %v1762_v62 }
 0x223   : > { %v1807_v12 = vadd.f32 1.0, %v2927_v30  ;;  %v1700_v38 = vmul.f32 %v3126_v3, %v1699_v14  ;;  %v1773_v44 = vmul.f32 %v1772_v29, %v4562_v28  ;;  %vm4867_vm15 = vcmp.eq.f32.partialorder %v1706_v49, 8.507059e+37 }
 0x224   : > { %v1709_v37 = vor.u32 1.1754944e-38, %v1708_v19  ;;  %v4871_v9 = vadd.f32 1.0, %v1735_v10  ;;  %v1135_v31 = vmul.f32 %v1134_v63, %v4546_v60  ;;  %v4876_v55 = vadd.f32 %v4858_v34, %v1876_v48 }
 0x225   : > { %v1839_v42 = vmul.f32 %v1807_v12, %v4521_v50  ;;  %v1701_v25 = vadd.f32 %v3126_v3, %v1700_v38  ;;  %v1774_v58 = vadd.f32 0.4994258, %v1773_v44  ;;  %v1686_v26 = vmul.f32 %v4602_v32, %v5835_v54 }
 0x226   : > { %v1086_v45 = vmul.f32 %v4605_v2, %v5836_v41  ;;  %v4883_v6 = vmul.f32 %v1725_v1, %v5837_v36  ;;  %3129 = vrcp.f32 %v4871_v9  ;;  %v4888_v46 = vadd.f32 1.0, %v1135_v31  ;;  %1972 = vadd.xlane.f32.xlu0 %v4876_v55  ;;  %v1924_v2 = vpop.f32.mrf.mxu3 }
 0x227   : > { %v3128_v4 = vpop.eup %3127  ;;  %1914 = vmatmul.f32.gmra.mxu1 %v1839_v42  ;;  %v1705_v50 = vsel %vm4863_vm14, %v3126_v3, %v1701_v25  ;;  %v1775_v5 = vmul.f32 %v1774_v58, %v4562_v28  ;;  %v2036_v32 = vmul.f32 %v4876_v55, %v4876_v55  ;;  %v1124_v52 = vmul.f32 %v1123_v22, %v4546_v60 }
 0x228   : > { %v1764_v21 = vmul.f32 %v1763_v27, %v4562_v28  ;;  %v1710_v13 = vsel %vm4867_vm15, %v1709_v37, %v1705_v50  ;;  %v1098_v56 = vmul.f32 %v3128_v4, %v4852_v24  ;;  %vm1102_vm0 = vweird.f32 %v4852_v24  ;;  %v1879_v28 = vpop.f32.mrf.mxu1 }
 0x229   : > { %v1711_v33 = vmul.f32 %v1710_v13, %v1686_v26  ;;  %v1108_v8 = vand.u32 2147483648, %v4852_v24  ;;  %3131 = vrcp.f32 %v4888_v46  ;;  %2068 = vadd.xlane.f32.xlu2 %v2036_v32  ;;  %vm1103_vm1 = vweird.f32 %v3128_v4 }
 0x22a   : > { %v1099_v7 = vsub.f32 1.0, %v1098_v56  ;;  %v1106_v23 = vand.u32 2147483647, %v4852_v24  ;;  %v4903_v60 = vadd.f32 1.0, %v1775_v5  ;;  %v1746_v61 = vand.u32 2147483647, %v4871_v9  ;;  %vm4919_vm2 = vmor %vm1102_vm0, %vm1103_vm1 }
 0x22b   : > { %v2943_v62 = vclamps-f32 %v1711_v33, 1.0  ;;  %v4907_v18 = vadd.f32 %v4858_v34, %v1879_v28  ;;  %v4910_v51 = vadd.f32 %v4858_v34, %v1924_v2  ;;  %v1125_v11 = vadd.f32 1.1283791, %v1124_v52  ;;  %v5849_v24 = vld [vmem:[#allocation23_spill] sm:$0xff] }
 0x22c   : > { %v3130_v3 = vpop.eup %3129  ;;  %v1100_v15 = vmul.f32 %v3128_v4, %v1099_v7  ;;  %v1748_v59 = vand.u32 2147483648, %v4871_v9  ;;  %3133 = vrcp.f32 %v4903_v60  ;;  %v4914_v0 = vadd.f32 1.1283791, %v1764_v21 }
 0x22d   : > { %v1823_v47 = vadd.f32 1.0, %v2943_v62  ;;  %v1109_v19 = vor.u32 1.1754944e-38, %v1108_v8  ;;  %v1738_v40 = vmul.f32 %v3130_v3, %v4871_v9  ;;  %2004 = vadd.xlane.f32.xlu1 %v4910_v51  ;;  %vm1107_vm3 = vcmp.eq.f32.partialorder %v1106_v23, 8.507059e+37 }
 0x22e   : > { %v1101_v57 = vadd.f32 %v3128_v4, %v1100_v15  ;;  %vm1742_vm4 = vweird.f32 %v4871_v9  ;;  %v1148_v29 = vand.u32 2147483648, %v4888_v46  ;;  %vm1743_vm5 = vweird.f32 %v3130_v3  ;;  %1974 = vadd.xlane.f32.xlu0 %v4907_v18  ;;  %v1927_v22 = vpop.f32.mrf.mxu3 }
 0x22f   : > { %v3132_v30 = vpop.eup %3131  ;;  %v1855_v14 = vmul.f32 %v1823_v47, %v4585_v43  ;;  %v1739_v1 = vsub.f32 1.0, %v1738_v40  ;;  %vm4928_vm6 = vcmp.eq.f32.partialorder %v1746_v61, 8.507059e+37  ;;  %v1749_v63 = vor.u32 1.1754944e-38, %v1748_v59  ;;  %vm4944_vm8 = vmor %vm1742_vm4, %vm1743_vm5 }
 0x230   : > { %v1105_v10 = vsel %vm4919_vm2, %v3128_v4, %v1101_v57  ;;  %v1138_v48 = vmul.f32 %v3132_v30, %v4888_v46  ;;  %vm1142_vm7 = vweird.f32 %v4888_v46  ;;  %v1146_v12 = vand.u32 2147483647, %v4888_v46  ;;  %v1882_v42 = vpop.f32.mrf.mxu1 }
 0x231   : > { %1962 = vmatmul.f32.gmra.mxu3 %v1855_v14  ;;  %v1110_v27 = vsel %vm1107_vm3, %v1109_v19, %v1105_v10  ;;  %v1740_v43 = vmul.f32 %v3130_v3, %v1739_v1  ;;  %v4939_v38 = vadd.f32 %v4858_v34, %v1927_v22  ;;  %vm1143_vm9 = vweird.f32 %v3132_v30 }
 0x232   : > { %v3134_v44 = vpop.eup %3133  ;;  %v1111_v35 = vmul.f32 %v1110_v27, %v1086_v45  ;;  %v1139_v37 = vsub.f32 1.0, %v1138_v48  ;;  %v1149_v31 = vor.u32 1.1754944e-38, %v1148_v29  ;;  %vm1782_vm10 = vweird.f32 %v4903_v60  ;;  %vm4960_vm11 = vmor %vm1142_vm7, %vm1143_vm9 }
 0x233   : > { %v1741_v25 = vadd.f32 %v3130_v3, %v1740_v43  ;;  %v1778_v58 = vmul.f32 %v3134_v44, %v4903_v60  ;;  %v4951_v54 = vadd.f32 %v4858_v34, %v1882_v42  ;;  %2006 = vadd.xlane.f32.xlu2 %v4939_v38  ;;  %v1786_v41 = vand.u32 2147483647, %v4903_v60 }
 0x234   : > { %v2928_v26 = vclamps-f32 %v1111_v35, 1.0  ;;  %v1140_v9 = vmul.f32 %v3132_v30, %v1139_v37  ;;  %v1788_v45 = vand.u32 2147483648, %v4903_v60  ;;  %vm1783_vm12 = vweird.f32 %v3134_v44 }
 0x235   : > { %v1745_v36 = vsel %vm4944_vm8, %v3130_v3, %v1741_v25  ;;  %v1779_v50 = vsub.f32 1.0, %v1778_v58  ;;  %v2037_v5 = vmul.f32 %v4907_v18, %v4907_v18  ;;  %1976 = vadd.xlane.f32.xlu1 %v4951_v54  ;;  %vm1147_vm13 = vcmp.eq.f32.partialorder %v1146_v12, 8.507059e+37  ;;  %vm4976_vm14 = vmor %vm1782_vm10, %vm1783_vm12 }
 0x236   : > { %v1808_v32 = vadd.f32 1.0, %v2928_v26  ;;  %v1750_v2 = vsel %vm4928_vm6, %v1749_v63, %v1745_v36  ;;  %v1141_v52 = vadd.f32 %v3132_v30, %v1140_v9  ;;  %v1126_v13 = vmul.f32 %v1125_v11, %v4496_v39  ;;  %v1930_v14 = vpop.f32.mrf.mxu3 }
 0x237   : > { %v1751_v21 = vmul.f32 %v1750_v2, %v4883_v6  ;;  %v1780_v46 = vmul.f32 %v3134_v44, %v1779_v50  ;;  %2070 = vadd.xlane.f32.xlu0 %v2037_v5  ;;  %v1789_v7 = vor.u32 1.1754944e-38, %v1788_v45  ;;  %vm1787_vm15 = vcmp.eq.f32.partialorder %v1786_v41, 8.507059e+37  ;;  %v5848_v6 = vld [vmem:[#allocation22_spill] sm:$0xff] }
 0x238   : > { %v1840_v56 = vmul.f32 %v1808_v32, %v4595_v17  ;;  %v1145_v33 = vsel %vm4960_vm11, %v3132_v30, %v1141_v52  ;;  %v480_v61 = vmul.f32 0.5, %v5848_v6  ;;  %v1766_v39 = vmul.f32 %v4914_v0, %v4533_v53  ;;  %v1885_v3 = vpop.f32.mrf.mxu1 }
 0x239   : > { %v2944_v23 = vclamps-f32 %v1751_v21, 1.0  ;;  %v1150_v28 = vsel %vm1147_vm13, %v1149_v31, %v1145_v33  ;;  %v1781_v62 = vadd.f32 %v3134_v44, %v1780_v46  ;;  %v4986_v15 = vadd.f32 %v4858_v34, %v1885_v3 }
 0x23a   : > { %1917 = vmatmul.f32.gmra.mxu1 %v1840_v56  ;;  %v1151_v17 = vmul.f32 %v1150_v28, %v1126_v13  ;;  %v2038_v59 = vmul.f32 %v4951_v54, %v4951_v54  ;;  %v2052_v53 = vmul.f32 %v4910_v51, %v4910_v51  ;;  %v465_v0 = vmul.f32 0.5, %v4484_v20 }
 0x23b   : > { %v1824_v11 = vadd.f32 1.0, %v2944_v23  ;;  %v1785_v60 = vsel %vm4976_vm14, %v3134_v44, %v1781_v62  ;;  %v2039_v29 = vmul.f32 %v4986_v15, %v4986_v15  ;;  %v481_v22 = vmul.f32 0.5, %v5849_v24 }
 0x23c   : > { %v2929_v47 = vclamps-f32 %v1151_v17, 1.0  ;;  %v1790_v49 = vsel %vm1787_vm15, %v1789_v7, %v1785_v60  ;;  %v4997_v63 = vadd.f32 %v4858_v34, %v1930_v14  ;;  %v2053_v20 = vmul.f32 %v4939_v38, %v4939_v38 }
 0x23d   : > { %v1856_v19 = vmul.f32 %v1824_v11, %v480_v61  ;;  %v1791_v40 = vmul.f32 %v1790_v49, %v1766_v39  ;;  %2072 = vadd.xlane.f32.xlu1 %v2038_v59  ;;  %2074 = vadd.xlane.f32.xlu2 %v2039_v29  ;;  %v3406_v49 = vmov 128.0  }
 0x23e   : > { %v1809_v57 = vadd.f32 1.0, %v2929_v47  ;;  %v2054_v43 = vmul.f32 %v4997_v63, %v4997_v63  ;;  %v1933_v35 = vpop.f32.mrf.mxu3  ;;  %3135 = vrcp.f32 %v3406_v49 }
 0x23f   : > { %1965 = vmatmul.f32.gmra.mxu3 %v1856_v19  ;;  %v2945_v30 = vclamps-f32 %v1791_v40, 1.0  ;;  %2100 = vadd.xlane.f32.xlu0 %v2052_v53  ;;  %v5012_v37 = vadd.f32 %v4858_v34, %v1933_v35 }
 0x240   : > { %v1841_v1 = vmul.f32 %v1809_v57, %v465_v0  ;;  %v1888_v27 = vpop.f32.mrf.mxu1 }
 0x241   : > { %v1825_v10 = vadd.f32 1.0, %v2945_v30  ;;  %v5005_v12 = vadd.f32 %v4858_v34, %v1888_v27  ;;  %v2055_v31 = vmul.f32 %v5012_v37, %v5012_v37 }
 0x242   : > { %1920 = vmatmul.f32.gmra.mxu1 %v1841_v1 }
 0x243   : > { %v1857_v48 = vmul.f32 %v1825_v10, %v481_v22  ;;  %v2040_v44 = vmul.f32 %v5005_v12, %v5005_v12 }
 0x244   : > { %v3136_v53 = vpop.eup %3135 }
 0x245   : > { %2102 = vadd.xlane.f32.xlu1 %v2053_v20  ;;  %2104 = vadd.xlane.f32.xlu2 %v2054_v43  ;;  %v2133_v57 = vmul.f32 128.0, %v3136_v53  ;;  %vm2137_vm0 = vweird.f32 %v3136_v53 }
 0x246   : > { %v1936_v25 = vpop.f32.mrf.mxu3 }
 0x247   : > { %1968 = vmatmul.f32.gmra.mxu3 %v1857_v48  ;;  %2008 = vadd.xlane.f32.xlu0 %v4997_v63  ;;  %v5027_v41 = vadd.f32 %v4858_v34, %v1936_v25  ;;  %v2134_v30 = vsub.f32 1.0, %v2133_v57 }
 0x248   : > { %v1891_v16 = vpop.f32.mrf.mxu1 }
 0x249   : > { %v5018_v42 = vadd.f32 %v4858_v34, %v1891_v16  ;;  %v2056_v36 = vmul.f32 %v5027_v41, %v5027_v41  ;;  %v2135_v1 = vmul.f32 %v3136_v53, %v2134_v30 }
 0x24b   : > { %v2041_v26 = vmul.f32 %v5018_v42, %v5018_v42  ;;  %v2136_v10 = vadd.f32 %v3136_v53, %v2135_v1 }
 0x24d   : > { %1978 = vadd.xlane.f32.xlu1 %v4986_v15  ;;  %1980 = vadd.xlane.f32.xlu2 %v5005_v12  ;;  %v5098_v27 = vsel %vm2137_vm0, %v3136_v53, %v2136_v10 }
 0x24e   : > { %v1939_v45 = vpop.f32.mrf.mxu3 }
 0x24f   : > { %2076 = vadd.xlane.f32.xlu0 %v2040_v44  ;;  %v5034_v4 = vadd.f32 %v4858_v34, %v1939_v45 }
 0x250   : > { %v1894_v58 = vpop.f32.mrf.mxu1 }
 0x251   : > { %v5024_v9 = vadd.f32 %v4858_v34, %v1894_v58  ;;  %v2057_v21 = vmul.f32 %v5034_v4, %v5034_v4 }
 0x253   : > { %v2042_v5 = vmul.f32 %v5024_v9, %v5024_v9 }
 0x255   : > { %2010 = vadd.xlane.f32.xlu1 %v5012_v37  ;;  %1982 = vadd.xlane.f32.xlu2 %v5018_v42 }
 0x256   : > { %v1942_v52 = vpop.f32.mrf.mxu3 }
 0x257   : > { %2106 = vadd.xlane.f32.xlu0 %v2055_v31  ;;  %v5048_v13 = vadd.f32 %v4858_v34, %v1942_v52 }
 0x258   : > { %v1897_v50 = vpop.f32.mrf.mxu1 }
 0x259   : > { %v5040_v32 = vadd.f32 %v4858_v34, %v1897_v50  ;;  %v2058_v56 = vmul.f32 %v5048_v13, %v5048_v13 }
 0x25b   : > { %v2043_v2 = vmul.f32 %v5040_v32, %v5040_v32 }
 0x25d   : > { %2078 = vadd.xlane.f32.xlu1 %v2041_v26  ;;  %2012 = vadd.xlane.f32.xlu2 %v5027_v41 }
 0x25e   : > { %v1945_v8 = vpop.f32.mrf.mxu3 }
 0x25f   : > { %1984 = vadd.xlane.f32.xlu0 %v5024_v9  ;;  %v5063_v62 = vadd.f32 %v4858_v34, %v1945_v8 }
 0x260   : > { %v1900_v46 = vpop.f32.mrf.mxu1 }
 0x261   : > { %v5054_v33 = vadd.f32 %v4858_v34, %v1900_v46  ;;  %v2059_v61 = vmul.f32 %v5063_v62, %v5063_v62 }
 0x263   : > { %v2044_v23 = vmul.f32 %v5054_v33, %v5054_v33 }
 0x265   : > { %2108 = vadd.xlane.f32.xlu1 %v2056_v36  ;;  %2080 = vadd.xlane.f32.xlu2 %v2042_v5 }
 0x266   : > { %v1948_v6 = vpop.f32.mrf.mxu3 }
 0x267   : > { %2014 = vadd.xlane.f32.xlu0 %v5034_v4  ;;  %v5070_v39 = vadd.f32 %v4858_v34, %v1948_v6 }
 0x269   : > { %v2060_v47 = vmul.f32 %v5070_v39, %v5070_v39 }
 0x26d   : > { %1986 = vadd.xlane.f32.xlu1 %v5040_v32  ;;  %2110 = vadd.xlane.f32.xlu2 %v2057_v21 }
 0x26f   : > { %2082 = vadd.xlane.f32.xlu0 %v2043_v2 }
 0x271   : > { %v1903_v7 = vpop.f32.mrf.mxu1 }
 0x272   : > { %v5060_v28 = vadd.f32 %v4858_v34, %v1903_v7 }
 0x274   : > { %v2045_v3 = vmul.f32 %v5060_v28, %v5060_v28 }
 0x275   : > { %2016 = vadd.xlane.f32.xlu1 %v5048_v13  ;;  %1988 = vadd.xlane.f32.xlu2 %v5054_v33 }
 0x277   : > { %2112 = vadd.xlane.f32.xlu0 %v2058_v56 }
 0x27a   : > { %v1906_v17 = vpop.f32.mrf.mxu1 }
 0x27b   : > { %v5076_v11 = vadd.f32 %v4858_v34, %v1906_v17 }
 0x27d   : > { %2084 = vadd.xlane.f32.xlu1 %v2044_v23  ;;  %2018 = vadd.xlane.f32.xlu2 %v5063_v62  ;;  %v2046_v60 = vmul.f32 %v5076_v11, %v5076_v11  ;;  %v1951_v59 = vpop.f32.mrf.mxu3 }
 0x27e   : > { %v5084_v40 = vadd.f32 %v4858_v34, %v1951_v59 }
 0x27f   : > { %1990 = vadd.xlane.f32.xlu0 %v5060_v28 }
 0x280   : > { %v2061_v0 = vmul.f32 %v5084_v40, %v5084_v40 }
 0x285   : > { %2114 = vadd.xlane.f32.xlu1 %v2059_v61  ;;  %2086 = vadd.xlane.f32.xlu2 %v2045_v3 }
 0x287   : > { %2020 = vadd.xlane.f32.xlu0 %v5070_v39  ;;  %v1954_v14 = vpop.f32.mrf.mxu3 }
 0x288   : > { %v5101_v43 = vadd.f32 %v4858_v34, %v1954_v14 }
 0x28a   : > { %v2062_v36 = vmul.f32 %v5101_v43, %v5101_v43 }
 0x28d   : > { %1992 = vadd.xlane.f32.xlu1 %v5076_v11  ;;  %2116 = vadd.xlane.f32.xlu2 %v2060_v47 }
 0x28e   : > { %v1909_v19 = vpop.f32.mrf.mxu1 }
 0x28f   : > { %2088 = vadd.xlane.f32.xlu0 %v2046_v60  ;;  %v5090_v29 = vadd.f32 %v4858_v34, %v1909_v19 }
 0x291   : > { %v2047_v48 = vmul.f32 %v5090_v29, %v5090_v29 }
 0x295   : > { %2022 = vadd.xlane.f32.xlu1 %v5084_v40  ;;  %1994 = vadd.xlane.f32.xlu2 %v5090_v29 }
 0x296   : > { %v1912_v24 = vpop.f32.mrf.mxu1 }
 0x297   : > { %2118 = vadd.xlane.f32.xlu0 %v2061_v0  ;;  %v5096_v20 = vadd.f32 %v4858_v34, %v1912_v24 }
 0x299   : > { %v1973_v22 = vpop.xlane.xlu0 %1972  ;;  %v1957_v25 = vpop.f32.mrf.mxu3  ;;  %v2048_v52 = vmul.f32 %v5096_v20, %v5096_v20 }
 0x29a   : > { %v5104_v44 = vmul.f32 %v5098_v27, %v1973_v22  ;;  %v5114_v5 = vadd.f32 %v4858_v34, %v1957_v25 }
 0x29c   : > { %v2069_v35 = vpop.xlane.xlu2 %2068  ;;  %v2203_v16 = vmul.f32 %v5104_v44, %v5104_v44  ;;  %v2063_v47 = vmul.f32 %v5114_v5, %v5114_v5 }
 0x29d   : > { %2090 = vadd.xlane.f32.xlu1 %v2047_v48  ;;  %v2171_v31 = vmul.f32 %v5098_v27, %v2069_v35  ;;  %2024 = vadd.xlane.f32.xlu2 %v5101_v43 }
 0x29f   : > { %1996 = vadd.xlane.f32.xlu0 %v5096_v20  ;;  %v2235_v58 = vsub.f32 %v2171_v31, %v2203_v16 }
 0x2a0   : > { %v2005_v45 = vpop.xlane.xlu1 %2004 }
 0x2a1   : > { %v1975_v26 = vpop.xlane.xlu0 %1974  ;;  %v2267_v50 = vadd.f32 1e-05, %v2235_v58  ;;  %v1960_v60 = vpop.f32.mrf.mxu3  ;;  %v5134_v19 = vmul.f32 %v5098_v27, %v2005_v45  ;;  %v2619_v58 = vsub.f32 %v4876_v55, %v5104_v44 }
 0x2a2   : > { %v5120_v21 = vmul.f32 %v5098_v27, %v1975_v26  ;;  %v5142_v57 = vadd.f32 %v4858_v34, %v1960_v60  ;;  %v5158_v26 = vld [vmem:[#allocation8 + $0x2] ss:$0 sm:$0xff] }
 0x2a3   : > { %3137 = vrsqrt.f32 %v2267_v50  ;;  %v2219_v22 = vmul.f32 %v5134_v19, %v5134_v19  ;;  %vm2305_vm2 = vweird.f32 %v2267_v50 }
 0x2a4   : > { %v1915_v2 = vpop.f32.mrf.mxu1  ;;  %v2204_v23 = vmul.f32 %v5120_v21, %v5120_v21  ;;  %v2064_v25 = vmul.f32 %v5142_v57, %v5142_v57 }
 0x2a5   : > { %2120 = vadd.xlane.f32.xlu1 %v2062_v36  ;;  %2092 = vadd.xlane.f32.xlu2 %v2048_v52  ;;  %v5123_v46 = vadd.f32 %v4858_v34, %v1915_v2 }
 0x2a6   : > { %v2007_v61 = vpop.xlane.xlu2 %2006 }
 0x2a7   : > { %2026 = vadd.xlane.f32.xlu0 %v5114_v5  ;;  %v2049_v3 = vmul.f32 %v5123_v46, %v5123_v46 }
 0x2a8   : > { %v1977_v8 = vpop.xlane.xlu1 %1976 }
 0x2a9   : > { %v3138_v7 = vpop.eup %3137  ;;  %v5139_v0 = vmul.f32 %v5098_v27, %v1977_v8 }
 0x2aa   : > { %v2071_v56 = vpop.xlane.xlu0 %2070  ;;  %v2300_v17 = vmul.f32 %v3138_v7, %v2267_v50  ;;  %vm2306_vm1 = vweird.f32 %v3138_v7 }
 0x2ab   : > { %v2172_v6 = vmul.f32 %v5098_v27, %v2071_v56  ;;  %v2205_v10 = vmul.f32 %v5139_v0, %v5139_v0  ;;  %vm2307_vm3 = vmor %vm2305_vm2, %vm2306_vm1  ;;  %v5161_v56 = vmul.f32 %v5098_v27, %v2007_v61 }
 0x2ac   : > { %v2301_v49 = vmul.f32 %v3138_v7, %v2300_v17 }
 0x2ad   : > { %1998 = vadd.xlane.f32.xlu1 %v5123_v46  ;;  %v2236_v59 = vsub.f32 %v2172_v6, %v2204_v23  ;;  %2122 = vadd.xlane.f32.xlu2 %v2063_v47  ;;  %v5166_v6 = vld [vmem:[#allocation8 + $0x3] ss:$0 sm:$0xff] }
 0x2ae   : > { %v2302_v30 = vmul.f32 0.5, %v2301_v49 }
 0x2af   : > { %2094 = vadd.xlane.f32.xlu0 %v2049_v3  ;;  %v5136_v53 = vadd.f32 1e-05, %v2236_v59 }
 0x2b0   : > { %v2303_v14 = vsub.f32 1.5, %v2302_v30  ;;  %v2073_v24 = vpop.xlane.xlu1 %2072  ;;  %v5151_v16 = vpop.xlane.xlu2 %2074  ;;  %v2220_v30 = vmul.f32 %v5161_v56, %v5161_v56 }
 0x2b1   : > { %3139 = vrsqrt.f32 %v5136_v53  ;;  %v2173_v35 = vmul.f32 %v5098_v27, %v2073_v24  ;;  %vm2315_vm5 = vweird.f32 %v5136_v53 }
 0x2b2   : > { %v2101_v1 = vpop.xlane.xlu0 %2100  ;;  %v2304_v31 = vmul.f32 %v3138_v7, %v2303_v14 }
 0x2b3   : > { %v2187_v48 = vmul.f32 %v5098_v27, %v2101_v1  ;;  %v2237_v36 = vsub.f32 %v2173_v35, %v2205_v10 }
 0x2b4   : > { %v2308_v52 = vsel %vm2307_vm3, %v3138_v7, %v2304_v31  ;;  %v1963_v23 = vpop.f32.mrf.mxu3 }
 0x2b5   : > { %2028 = vadd.xlane.f32.xlu1 %v5142_v57  ;;  %v2251_v45 = vsub.f32 %v2187_v48, %v2219_v22  ;;  %v2651_v17 = vmul.f32 %v2619_v58, %v2308_v52  ;;  %v5170_v44 = vadd.f32 1e-05, %v2237_v36 }
 0x2b7   : > { %v1918_v2 = vpop.f32.mrf.mxu1  ;;  %2124 = vadd.xlane.f32.xlu0 %v2064_v25  ;;  %v3140_v50 = vpop.eup %3139  ;;  %v5168_v55 = vadd.f32 1e-05, %v2251_v45  ;;  %v2684_v7 = vmul.f32 %v5158_v26, %v2651_v17  ;;  %v5197_v45 = vadd.f32 %v4858_v34, %v1963_v23  ;;  %vm2325_vm11 = vweird.f32 %v5170_v44 }
 0x2b8   : > { %v5164_v8 = vadd.f32 %v4858_v34, %v1918_v2  ;;  %v2310_v3 = vmul.f32 %v3140_v50, %v5136_v53  ;;  %v2103_v59 = vpop.xlane.xlu1 %2102  ;;  %v2105_v24 = vpop.xlane.xlu2 %2104  ;;  %vm2316_vm4 = vweird.f32 %v3140_v50 }
 0x2b9   : > { %3141 = vrsqrt.f32 %v5168_v55  ;;  %v2717_v49 = vadd.f32 %v5166_v6, %v2684_v7  ;;  %v2188_v1 = vmul.f32 %v5098_v27, %v2103_v59  ;;  %v2189_v10 = vmul.f32 %v5098_v27, %v2105_v24  ;;  %vm2317_vm6 = vmor %vm2315_vm5, %vm2316_vm4 }
 0x2ba   : > { %2000 = vadd.xlane.f32.xlu2 %v5164_v8  ;;  %v2311_v61 = vmul.f32 %v3140_v50, %v2310_v3  ;;  %3143 = vrsqrt.f32 %v5170_v44  ;;  %v2009_v60 = vpop.xlane.xlu0 %2008  ;;  %v2050_v47 = vmul.f32 %v5164_v8, %v5164_v8  ;;  %vm2465_vm7 = vweird.f32 %v5168_v55 }
 0x2bb   : > { %v5183_v14 = vmul.f32 %v5098_v27, %v2009_v60  ;;  %2749 = vst [vmem:[%s5189_s21] sm:$0xff] %v2717_v49  ;;  %v2252_v35 = vsub.f32 %v2188_v1, %v2220_v30  ;;  %v2620_v60 = vsub.f32 %v4907_v18, %v5120_v21  ;;  %v2635_v18 = vsub.f32 %v4910_v51, %v5134_v19 }
 0x2bc   : > { %v2312_v22 = vmul.f32 0.5, %v2311_v61 }
 0x2bd   : > { %2096 = vadd.xlane.f32.xlu1 %v2050_v47  ;;  %v2221_v48 = vmul.f32 %v5183_v14, %v5183_v14  ;;  %v5202_v2 = vadd.f32 1e-05, %v2252_v35 }
 0x2be   : > { %v2313_v25 = vsub.f32 1.5, %v2312_v22 }
 0x2bf   : > { %v1921_v31 = vpop.f32.mrf.mxu1  ;;  %v5194_v58 = vpop.eup %3141  ;;  %v2253_v52 = vsub.f32 %v2189_v10, %v2221_v48  ;;  %3145 = vrsqrt.f32 %v5202_v2  ;;  %vm2475_vm13 = vweird.f32 %v5202_v2 }
 0x2c0   : > { %v5200_v36 = vadd.f32 %v4858_v34, %v1921_v31  ;;  %v5204_v17 = vpop.eup %3143  ;;  %v2314_v3 = vmul.f32 %v3140_v50, %v2313_v25  ;;  %v2460_v7 = vmul.f32 %v5194_v58, %v5168_v55  ;;  %v1979_v30 = vpop.xlane.xlu1 %1978  ;;  %vm2466_vm8 = vweird.f32 %v5194_v58 }
 0x2c1   : > { %v2320_v23 = vmul.f32 %v5204_v17, %v5170_v44  ;;  %v5217_v47 = vadd.f32 1e-05, %v2253_v52  ;;  %v5223_v24 = vmul.f32 %v5098_v27, %v1979_v30  ;;  %v1981_v10 = vpop.xlane.xlu2 %1980  ;;  %vm2326_vm9 = vweird.f32 %v5204_v17  ;;  %vm2467_vm10 = vmor %vm2465_vm7, %vm2466_vm8 }
 0x2c2   : > { %v1966_v61 = vpop.f32.mrf.mxu3  ;;  %2002 = vadd.xlane.f32.xlu0 %v5200_v36  ;;  %2030 = vadd.xlane.f32.xlu2 %v5197_v45  ;;  %v2318_v59 = vsel %vm2317_vm6, %v3140_v50, %v2314_v3  ;;  %v2461_v53 = vmul.f32 %v5194_v58, %v2460_v7  ;;  %v2077_v49 = vpop.xlane.xlu0 %2076  ;;  %v2174_v50 = vmul.f32 %v5098_v27, %v5151_v16  ;;  %vm2327_vm12 = vmor %vm2325_vm11, %vm2326_vm9 }
 0x2c3   : > { %v2652_v21 = vmul.f32 %v2620_v60, %v2318_v59  ;;  %v2321_v1 = vmul.f32 %v5204_v17, %v2320_v23  ;;  %3147 = vrsqrt.f32 %v5217_v47  ;;  %v2206_v19 = vmul.f32 %v5223_v24, %v5223_v24 }
 0x2c4   : > { %v2462_v22 = vmul.f32 0.5, %v2461_v53  ;;  %v5234_v35 = vadd.f32 %v4858_v34, %v1966_v61  ;;  %v5238_v16 = vmul.f32 %v5098_v27, %v1981_v10  ;;  %v2051_v60 = vmul.f32 %v5200_v36, %v5200_v36 }
 0x2c5   : > { %v2685_v48 = vmul.f32 %v5158_v26, %v2652_v21  ;;  %v2322_v51 = vmul.f32 0.5, %v2321_v1  ;;  %v5240_v25 = vpop.eup %3145  ;;  %v2238_v7 = vsub.f32 %v2174_v50, %v2206_v19  ;;  %v2175_v59 = vmul.f32 %v5098_v27, %v2077_v49 }
 0x2c6   : > { %v2463_v31 = vsub.f32 1.5, %v2462_v22  ;;  %v2470_v61 = vmul.f32 %v5240_v25, %v5202_v2  ;;  %v2207_v53 = vmul.f32 %v5238_v16, %v5238_v16  ;;  %v2621_v21 = vsub.f32 %v4951_v54, %v5139_v0 }
 0x2c7   : > { %v2718_v52 = vadd.f32 %v5166_v6, %v2685_v48  ;;  %v2323_v3 = vsub.f32 1.5, %v2322_v51  ;;  %v5260_v22 = vadd.f32 1e-05, %v2238_v7  ;;  %vm2476_vm14 = vweird.f32 %v5240_v25 }
 0x2c8   : > { %v2464_v23 = vmul.f32 %v5194_v58, %v2463_v31  ;;  %v2471_v0 = vmul.f32 %v5240_v25, %v2470_v61  ;;  %v2239_v55 = vsub.f32 %v2175_v59, %v2207_v53  ;;  %v2011_v48 = vpop.xlane.xlu1 %2010  ;;  %vm2477_vm15 = vmor %vm2475_vm13, %vm2476_vm14  ;;  %vm2485_vm1 = vweird.f32 %v5217_v47 }
 0x2c9   : > { %2750 = vst [vmem:[%s5189_s21 + $0x8] sm:$0xff] %v2718_v52  ;;  %v2324_v1 = vmul.f32 %v5204_v17, %v2323_v3  ;;  %v3148_v49 = vpop.eup %3147  ;;  %3149 = vrsqrt.f32 %v5260_v22  ;;  %vm2335_vm4 = vweird.f32 %v5260_v22 }
 0x2ca   : > { %v1969_v30 = vpop.f32.mrf.mxu3  ;;  %2032 = vadd.xlane.f32.xlu0 %v5234_v35  ;;  %2098 = vadd.xlane.f32.xlu2 %v2051_v60  ;;  %v2468_v54 = vsel %vm2467_vm10, %v5194_v58, %v2464_v23  ;;  %v2107_v10 = vpop.xlane.xlu0 %2106  ;;  %v2480_v19 = vmul.f32 %v3148_v49, %v5217_v47  ;;  %v2472_v52 = vmul.f32 0.5, %v2471_v0  ;;  %v5276_v3 = vadd.f32 1e-05, %v2239_v55 }
 0x2cb   : > { %v5264_v50 = vadd.f32 %v4858_v34, %v1969_v30  ;;  %v2667_v44 = vmul.f32 %v2635_v18, %v2468_v54  ;;  %v2328_v51 = vsel %vm2327_vm12, %v5204_v17, %v2324_v1  ;;  %v2066_v18 = vmul.f32 %v5234_v35, %v5234_v35  ;;  %v1983_v23 = vpop.xlane.xlu2 %1982 }
 0x2cc   : > { %v2653_v31 = vmul.f32 %v2621_v21, %v2328_v51  ;;  %v2481_v58 = vmul.f32 %v3148_v49, %v2480_v19  ;;  %v2473_v7 = vsub.f32 1.5, %v2472_v52  ;;  %v5283_v60 = vmul.f32 %v5098_v27, %v2011_v48 }
 0x2cd   : > { %2034 = vadd.xlane.f32.xlu1 %v5264_v50  ;;  %v2700_v34 = vmul.f32 %v5158_v26, %v2667_v44  ;;  %3151 = vrsqrt.f32 %v5276_v3  ;;  %v2067_v53 = vmul.f32 %v5264_v50, %v5264_v50  ;;  %v2190_v1 = vmul.f32 %v5098_v27, %v2107_v10 }
 0x2ce   : > { %v2686_v17 = vmul.f32 %v5158_v26, %v2653_v31  ;;  %v2482_v59 = vmul.f32 0.5, %v2481_v58  ;;  %v2474_v21 = vmul.f32 %v5240_v25, %v2473_v7  ;;  %v2222_v54 = vmul.f32 %v5283_v60, %v5283_v60 }
 0x2cf   : > { %v2733_v61 = vadd.f32 %v5166_v6, %v2700_v34  ;;  %v2636_v0 = vsub.f32 %v4939_v38, %v5161_v56  ;;  %vm2486_vm0 = vweird.f32 %v3148_v49  ;;  %v3150_v48 = vpop.eup %3149  ;;  %v5302_v10 = vmul.f32 %v5098_v27, %v1983_v23 }
 0x2d0   : > { %v2719_v30 = vadd.f32 %v5166_v6, %v2686_v17  ;;  %v2483_v55 = vsub.f32 1.5, %v2482_v59  ;;  %v2478_v44 = vsel %vm2477_vm15, %v5240_v25, %v2474_v21  ;;  %v2254_v51 = vsub.f32 %v2190_v1, %v2222_v54  ;;  %v2079_v56 = vpop.xlane.xlu1 %2078  ;;  %vm2487_vm2 = vmor %vm2485_vm1, %vm2486_vm0 }
 0x2d1   : > { %2765 = vst [vmem:[%s5189_s21 + $0x80] sm:$0xff] %v2733_v61  ;;  %v2065_v38 = vmul.f32 %v5197_v45, %v5197_v45  ;;  %v2668_v31 = vmul.f32 %v2636_v0, %v2478_v44  ;;  %v2330_v52 = vmul.f32 %v3150_v48, %v5260_v22  ;;  %v2637_v34 = vsub.f32 %v4997_v63, %v5183_v14 }
 0x2d2   : > { %2130 = vadd.xlane.f32.xlu0 %v2067_v53  ;;  %2128 = vadd.xlane.f32.xlu2 %v2066_v18  ;;  %2751 = vst [vmem:[%s5189_s21 + $0x10] sm:$0xff] %v2719_v30  ;;  %v1985_v19 = vpop.xlane.xlu0 %1984  ;;  %v2484_v2 = vmul.f32 %v3148_v49, %v2483_v55  ;;  %v5311_v25 = vadd.f32 1e-05, %v2254_v51  ;;  %v2176_v23 = vmul.f32 %v5098_v27, %v2079_v56  ;;  %vm2336_vm3 = vweird.f32 %v3150_v48 }
 0x2d3   : > { %v3152_v58 = vpop.eup %3151  ;;  %v2701_v18 = vmul.f32 %v5158_v26, %v2668_v31  ;;  %v2331_v7 = vmul.f32 %v3150_v48, %v2330_v52  ;;  %v2208_v63 = vmul.f32 %v5302_v10, %v5302_v10  ;;  %v2013_v14 = vpop.xlane.xlu2 %2012  ;;  %v2622_v55 = vsub.f32 %v4986_v15, %v5223_v24  ;;  %vm2337_vm6 = vmor %vm2335_vm4, %vm2336_vm3 }
 0x2d4   : > { %v2488_v17 = vsel %vm2487_vm2, %v3148_v49, %v2484_v2  ;;  %v2340_v47 = vmul.f32 %v3152_v58, %v5276_v3  ;;  %3153 = vrsqrt.f32 %v5311_v25  ;;  %v5323_v54 = vmul.f32 %v5098_v27, %v2013_v14 }
 0x2d5   : > { %2126 = vadd.xlane.f32.xlu1 %v2065_v38  ;;  %v2669_v61 = vmul.f32 %v2637_v34, %v2488_v17  ;;  %v2734_v59 = vadd.f32 %v5166_v6, %v2701_v18  ;;  %v2332_v53 = vmul.f32 0.5, %v2331_v7  ;;  %v2240_v1 = vsub.f32 %v2176_v23, %v2208_v63 }
 0x2d6   : > { %v2341_v21 = vmul.f32 %v3152_v58, %v2340_v47  ;;  %vm2346_vm5 = vweird.f32 %v3152_v58  ;;  %v5332_v2 = vmul.f32 %v5098_v27, %v1985_v19  ;;  %v2223_v15 = vmul.f32 %v5323_v54, %v5323_v54 }
 0x2d7   : > { %v2702_v30 = vmul.f32 %v5158_v26, %v2669_v61  ;;  %2766 = vst [vmem:[%s5189_s21 + $0x88] sm:$0xff] %v2734_v59  ;;  %v2333_v49 = vsub.f32 1.5, %v2332_v53  ;;  %v5328_v51 = vadd.f32 1e-05, %v2240_v1  ;;  %vm2345_vm7 = vweird.f32 %v5276_v3 }
 0x2d8   : > { %v2342_v44 = vmul.f32 0.5, %v2341_v21  ;;  %v2109_v56 = vpop.xlane.xlu1 %2108  ;;  %vm2347_vm8 = vmor %vm2345_vm7, %vm2346_vm5  ;;  %v2623_v61 = vsub.f32 %v5005_v12, %v5238_v16  ;;  %v2209_v63 = vmul.f32 %v5332_v2, %v5332_v2  ;;  %vm2495_vm10 = vweird.f32 %v5311_v25 }
 0x2d9   : > { %v2735_v0 = vadd.f32 %v5166_v6, %v2702_v30  ;;  %v2334_v31 = vmul.f32 %v3150_v48, %v2333_v49  ;;  %3155 = vrsqrt.f32 %v5328_v51  ;;  %v2191_v24 = vmul.f32 %v5098_v27, %v2109_v56 }
 0x2da   : > { %v2015_v38 = vpop.xlane.xlu0 %2014  ;;  %v3154_v52 = vpop.eup %3153  ;;  %v2343_v34 = vsub.f32 1.5, %v2342_v44  ;;  %vm2355_vm13 = vweird.f32 %v5328_v51 }
 0x2db   : > { %2767 = vst [vmem:[%s5189_s21 + $0x90] sm:$0xff] %v2735_v0  ;;  %v2338_v18 = vsel %vm2337_vm6, %v3150_v48, %v2334_v31  ;;  %v2490_v17 = vmul.f32 %v3154_v52, %v5311_v25  ;;  %v2255_v19 = vsub.f32 %v2191_v24, %v2223_v15  ;;  %v2081_v23 = vpop.xlane.xlu2 %2080  ;;  %v5352_v12 = vmul.f32 %v5098_v27, %v2015_v38 }
 0x2dc   : > { %v2654_v7 = vmul.f32 %v2622_v55, %v2338_v18  ;;  %v2344_v22 = vmul.f32 %v3152_v58, %v2343_v34  ;;  %v2177_v14 = vmul.f32 %v5098_v27, %v2081_v23  ;;  %vm2496_vm9 = vweird.f32 %v3154_v52 }
 0x2dd   : > { %v2491_v47 = vmul.f32 %v3154_v52, %v2490_v17  ;;  %v5348_v53 = vadd.f32 1e-05, %v2255_v19  ;;  %vm2497_vm11 = vmor %vm2495_vm10, %vm2496_vm9  ;;  %v2638_v24 = vsub.f32 %v5012_v37, %v5283_v60  ;;  %v2224_v23 = vmul.f32 %v5352_v12, %v5352_v12 }
 0x2de   : > { %v2687_v48 = vmul.f32 %v5158_v26, %v2654_v7  ;;  %v2348_v59 = vsel %vm2347_vm8, %v3152_v58, %v2344_v22  ;;  %v2241_v21 = vsub.f32 %v2177_v14, %v2209_v63 }
 0x2df   : > { %v2655_v3 = vmul.f32 %v2623_v61, %v2348_v59  ;;  %v2492_v30 = vmul.f32 0.5, %v2491_v47  ;;  %v3156_v1 = vpop.eup %3155  ;;  %3157 = vrsqrt.f32 %v5348_v53  ;;  %vm2505_vm0 = vweird.f32 %v5348_v53 }
 0x2e0   : > { %v2720_v49 = vadd.f32 %v5166_v6, %v2687_v48  ;;  %v1987_v0 = vpop.xlane.xlu1 %1986  ;;  %v2350_v58 = vmul.f32 %v3156_v1, %v5328_v51  ;;  %v5358_v56 = vadd.f32 1e-05, %v2241_v21  ;;  %vm2356_vm12 = vweird.f32 %v3156_v1 }
 0x2e1   : > { %v2688_v55 = vmul.f32 %v5158_v26, %v2655_v3  ;;  %v2493_v44 = vsub.f32 1.5, %v2492_v30  ;;  %v5361_v31 = vmul.f32 %v5098_v27, %v1987_v0  ;;  %vm2357_vm14 = vmor %vm2355_vm13, %vm2356_vm12 }
 0x2e2   : > { %v2083_v16 = vpop.xlane.xlu0 %2082  ;;  %2752 = vst [vmem:[%s5189_s21 + $0x18] sm:$0xff] %v2720_v49  ;;  %v2351_v15 = vmul.f32 %v3156_v1, %v2350_v58  ;;  %3159 = vrsqrt.f32 %v5358_v56  ;;  %vm2365_vm3 = vweird.f32 %v5358_v56 }
 0x2e3   : > { %v2721_v38 = vadd.f32 %v5166_v6, %v2688_v55  ;;  %v2494_v34 = vmul.f32 %v3154_v52, %v2493_v44  ;;  %v2178_v18 = vmul.f32 %v5098_v27, %v2083_v16  ;;  %v2210_v17 = vmul.f32 %v5361_v31, %v5361_v31  ;;  %v2111_v7 = vpop.xlane.xlu2 %2110 }
 0x2e4   : > { %v2352_v19 = vmul.f32 0.5, %v2351_v15  ;;  %v2192_v25 = vmul.f32 %v5098_v27, %v2111_v7  ;;  %v2624_v55 = vsub.f32 %v5018_v42, %v5302_v10 }
 0x2e5   : > { %2753 = vst [vmem:[%s5189_s21 + $0x20] sm:$0xff] %v2721_v38  ;;  %v2498_v22 = vsel %vm2497_vm11, %v3154_v52, %v2494_v34  ;;  %v3158_v61 = vpop.eup %3157  ;;  %v2242_v63 = vsub.f32 %v2178_v18, %v2210_v17 }
 0x2e6   : > { %v2670_v47 = vmul.f32 %v2638_v24, %v2498_v22  ;;  %v2353_v37 = vsub.f32 1.5, %v2352_v19  ;;  %v2500_v60 = vmul.f32 %v3158_v61, %v5348_v53  ;;  %v2256_v14 = vsub.f32 %v2192_v25, %v2224_v23 }
 0x2e7   : > { %v5377_v59 = vadd.f32 1e-05, %v2242_v63  ;;  %vm2506_vm15 = vweird.f32 %v3158_v61  ;;  %v2639_v25 = vsub.f32 %v5027_v41, %v5323_v54 }
 0x2e8   : > { %v2703_v48 = vmul.f32 %v5158_v26, %v2670_v47  ;;  %v2017_v3 = vpop.xlane.xlu1 %2016  ;;  %v2354_v30 = vmul.f32 %v3156_v1, %v2353_v37  ;;  %v2501_v21 = vmul.f32 %v3158_v61, %v2500_v60  ;;  %v5380_v49 = vadd.f32 1e-05, %v2256_v14  ;;  %v3160_v16 = vpop.eup %3159  ;;  %vm2507_vm1 = vmor %vm2505_vm0, %vm2506_vm15 }
 0x2e9   : > { %3161 = vrsqrt.f32 %v5377_v59  ;;  %v5387_v44 = vmul.f32 %v5098_v27, %v2017_v3  ;;  %v2360_v34 = vmul.f32 %v3160_v16, %v5358_v56  ;;  %vm2366_vm2 = vweird.f32 %v3160_v16 }
 0x2ea   : > { %v2113_v52 = vpop.xlane.xlu0 %2112  ;;  %v2736_v0 = vadd.f32 %v5166_v6, %v2703_v48  ;;  %v2358_v58 = vsel %vm2357_vm14, %v3156_v1, %v2354_v30  ;;  %v2502_v38 = vmul.f32 0.5, %v2501_v21  ;;  %3163 = vrsqrt.f32 %v5380_v49  ;;  %vm2367_vm4 = vmor %vm2365_vm3, %vm2366_vm2 }
 0x2eb   : > { %v2656_v51 = vmul.f32 %v2624_v55, %v2358_v58  ;;  %v2193_v15 = vmul.f32 %v5098_v27, %v2113_v52  ;;  %v2225_v24 = vmul.f32 %v5387_v44, %v5387_v44  ;;  %v1989_v42 = vpop.xlane.xlu2 %1988  ;;  %v2361_v18 = vmul.f32 %v3160_v16, %v2360_v34 }
 0x2ec   : > { %2768 = vst [vmem:[%s5189_s21 + $0x98] sm:$0xff] %v2736_v0  ;;  %v2503_v10 = vsub.f32 1.5, %v2502_v38  ;;  %v5403_v63 = vmul.f32 %v5098_v27, %v1989_v42  ;;  %v2625_v21 = vsub.f32 %v5024_v9, %v5332_v2  ;;  %v2626_v2 = vsub.f32 %v5040_v32, %v5361_v31 }
 0x2ed   : > { %v2689_v17 = vmul.f32 %v5158_v26, %v2656_v51  ;;  %v2257_v7 = vsub.f32 %v2193_v15, %v2225_v24  ;;  %v2362_v22 = vmul.f32 0.5, %v2361_v18  ;;  %vm2375_vm6 = vweird.f32 %v5377_v59 }
 0x2ee   : > { %v2504_v1 = vmul.f32 %v3158_v61, %v2503_v10  ;;  %v2211_v0 = vmul.f32 %v5403_v63, %v5403_v63  ;;  %vm2515_vm9 = vweird.f32 %v5380_v49 }
 0x2ef   : > { %v3162_v19 = vpop.eup %3161  ;;  %v2722_v23 = vadd.f32 %v5166_v6, %v2689_v17  ;;  %v5400_v47 = vadd.f32 1e-05, %v2257_v7  ;;  %v2363_v48 = vsub.f32 1.5, %v2362_v22 }
 0x2f0   : > { %v2085_v60 = vpop.xlane.xlu1 %2084  ;;  %v2508_v14 = vsel %vm2507_vm1, %v3158_v61, %v2504_v1  ;;  %v2370_v53 = vmul.f32 %v3162_v19, %v5377_v59  ;;  %v3164_v52 = vpop.eup %3163  ;;  %vm2376_vm5 = vweird.f32 %v3162_v19 }
 0x2f1   : > { %2754 = vst [vmem:[%s5189_s21 + $0x28] sm:$0xff] %v2722_v23  ;;  %v2671_v3 = vmul.f32 %v2639_v25, %v2508_v14  ;;  %3165 = vrsqrt.f32 %v5400_v47  ;;  %v2364_v30 = vmul.f32 %v3160_v16, %v2363_v48  ;;  %v2510_v54 = vmul.f32 %v3164_v52, %v5380_v49  ;;  %vm2377_vm8 = vmor %vm2375_vm6, %vm2376_vm5 }
 0x2f2   : > { %v1991_v37 = vpop.xlane.xlu0 %1990  ;;  %v2371_v41 = vmul.f32 %v3162_v19, %v2370_v53  ;;  %v2179_v55 = vmul.f32 %v5098_v27, %v2085_v60  ;;  %vm2516_vm7 = vweird.f32 %v3164_v52  ;;  %v2640_v53 = vsub.f32 %v5034_v4, %v5352_v12 }
 0x2f3   : > { %v2704_v61 = vmul.f32 %v5158_v26, %v2671_v3  ;;  %v2019_v58 = vpop.xlane.xlu2 %2018  ;;  %v2368_v38 = vsel %vm2367_vm4, %v3160_v16, %v2364_v30  ;;  %v2511_v51 = vmul.f32 %v3164_v52, %v2510_v54  ;;  %v5426_v16 = vmul.f32 %v5098_v27, %v1991_v37  ;;  %vm2517_vm10 = vmor %vm2515_vm9, %vm2516_vm7 }
 0x2f4   : > { %v2372_v34 = vmul.f32 0.5, %v2371_v41  ;;  %v2657_v15 = vmul.f32 %v2625_v21, %v2368_v38  ;;  %v2243_v24 = vsub.f32 %v2179_v55, %v2211_v0  ;;  %v5418_v42 = vmul.f32 %v5098_v27, %v2019_v58 }
 0x2f5   : > { %v2737_v56 = vadd.f32 %v5166_v6, %v2704_v61  ;;  %v2512_v10 = vmul.f32 0.5, %v2511_v51  ;;  %v2212_v30 = vmul.f32 %v5426_v16, %v5426_v16  ;;  %vm2525_vm12 = vweird.f32 %v5400_v47 }
 0x2f6   : > { %v2373_v9 = vsub.f32 1.5, %v2372_v34  ;;  %v2690_v17 = vmul.f32 %v5158_v26, %v2657_v15  ;;  %v5428_v7 = vadd.f32 1e-05, %v2243_v24  ;;  %v2226_v59 = vmul.f32 %v5418_v42, %v5418_v42 }
 0x2f7   : > { %v3166_v18 = vpop.eup %3165  ;;  %2769 = vst [vmem:[%s5189_s21 + $0xa0] sm:$0xff] %v2737_v56  ;;  %v2513_v25 = vsub.f32 1.5, %v2512_v10 }
 0x2f8   : > { %v2115_v22 = vpop.xlane.xlu1 %2114  ;;  %v2374_v23 = vmul.f32 %v3162_v19, %v2373_v9  ;;  %v2520_v32 = vmul.f32 %v3166_v18, %v5400_v47  ;;  %v2723_v31 = vadd.f32 %v5166_v6, %v2690_v17  ;;  %3167 = vrsqrt.f32 %v5428_v7 }
 0x2f9   : > { %v2514_v60 = vmul.f32 %v3164_v52, %v2513_v25  ;;  %v2194_v48 = vmul.f32 %v5098_v27, %v2115_v22  ;;  %vm2526_vm11 = vweird.f32 %v3166_v18  ;;  %vm2385_vm15 = vweird.f32 %v5428_v7 }
 0x2fa   : > { %v2021_v1 = vpop.xlane.xlu0 %2020  ;;  %v2378_v37 = vsel %vm2377_vm8, %v3162_v19, %v2374_v23  ;;  %v2521_v14 = vmul.f32 %v3166_v18, %v2520_v32  ;;  %2755 = vst [vmem:[%s5189_s21 + $0x30] sm:$0xff] %v2723_v31  ;;  %vm2527_vm13 = vmor %vm2525_vm12, %vm2526_vm11 }
 0x2fb   : > { %v2658_v3 = vmul.f32 %v2626_v2, %v2378_v37  ;;  %v2087_v49 = vpop.xlane.xlu2 %2086  ;;  %v2518_v41 = vsel %vm2517_vm10, %v3164_v52, %v2514_v60  ;;  %v2258_v21 = vsub.f32 %v2194_v48, %v2226_v59  ;;  %v5450_v52 = vmul.f32 %v5098_v27, %v2021_v1 }
 0x2fc   : > { %v2522_v54 = vmul.f32 0.5, %v2521_v14  ;;  %v2180_v61 = vmul.f32 %v5098_v27, %v2087_v49  ;;  %v2672_v0 = vmul.f32 %v2640_v53, %v2518_v41  ;;  %v2641_v2 = vsub.f32 %v5048_v13, %v5387_v44 }
 0x2fd   : > { %v2691_v19 = vmul.f32 %v5158_v26, %v2658_v3  ;;  %v5445_v58 = vadd.f32 1e-05, %v2258_v21  ;;  %v2227_v23 = vmul.f32 %v5450_v52, %v5450_v52 }
 0x2fe   : > { %v2523_v55 = vsub.f32 1.5, %v2522_v54  ;;  %v2244_v4 = vsub.f32 %v2180_v61, %v2212_v30  ;;  %v3168_v12 = vpop.eup %3167  ;;  %v2705_v34 = vmul.f32 %v5158_v26, %v2672_v0  ;;  %v2627_v61 = vsub.f32 %v5054_v33, %v5403_v63 }
 0x2ff   : > { %v2724_v38 = vadd.f32 %v5166_v6, %v2691_v19  ;;  %v2380_v24 = vmul.f32 %v3168_v12, %v5428_v7  ;;  %3169 = vrsqrt.f32 %v5445_v58  ;;  %vm2386_vm14 = vweird.f32 %v3168_v12 }
 0x300   : > { %v1993_v56 = vpop.xlane.xlu1 %1992  ;;  %v2524_v15 = vmul.f32 %v3166_v18, %v2523_v55  ;;  %v2738_v9 = vadd.f32 %v5166_v6, %v2705_v34  ;;  %v5460_v10 = vadd.f32 1e-05, %v2244_v4  ;;  %vm2387_vm0 = vmor %vm2385_vm15, %vm2386_vm14  ;;  %vm2535_vm2 = vweird.f32 %v5445_v58 }
 0x301   : > { %2756 = vst [vmem:[%s5189_s21 + $0x38] sm:$0xff] %v2724_v38  ;;  %v2381_v1 = vmul.f32 %v3168_v12, %v2380_v24  ;;  %v5463_v22 = vmul.f32 %v5098_v27, %v1993_v56 }
 0x302   : > { %v2089_v51 = vpop.xlane.xlu0 %2088  ;;  %v2528_v17 = vsel %vm2527_vm13, %v3166_v18, %v2524_v15  ;;  %2770 = vst [vmem:[%s5189_s21 + $0xa8] sm:$0xff] %v2738_v9  ;;  %3171 = vrsqrt.f32 %v5460_v10  ;;  %vm2395_vm5 = vweird.f32 %v5460_v10 }
 0x303   : > { %v2673_v47 = vmul.f32 %v2641_v2, %v2528_v17  ;;  %v2117_v25 = vpop.xlane.xlu2 %2116  ;;  %v2382_v32 = vmul.f32 0.5, %v2381_v1  ;;  %v2181_v31 = vmul.f32 %v5098_v27, %v2089_v51  ;;  %v2213_v13 = vmul.f32 %v5463_v22, %v5463_v22 }
 0x304   : > { %v2195_v44 = vmul.f32 %v5098_v27, %v2117_v25  ;;  %v2642_v25 = vsub.f32 %v5063_v62, %v5418_v42  ;;  %v2628_v62 = vsub.f32 %v5060_v28, %v5426_v16 }
 0x305   : > { %v2706_v18 = vmul.f32 %v5158_v26, %v2673_v47  ;;  %v3170_v59 = vpop.eup %3169  ;;  %v2383_v37 = vsub.f32 1.5, %v2382_v32  ;;  %v2245_v60 = vsub.f32 %v2181_v31, %v2213_v13 }
 0x306   : > { %v2259_v14 = vsub.f32 %v2195_v44, %v2227_v23  ;;  %v2530_v53 = vmul.f32 %v3170_v59, %v5445_v58  ;;  %vm2536_vm1 = vweird.f32 %v3170_v59 }
 0x307   : > { %v2739_v48 = vadd.f32 %v5166_v6, %v2706_v18  ;;  %v2384_v49 = vmul.f32 %v3168_v12, %v2383_v37  ;;  %v5477_v41 = vadd.f32 1e-05, %v2245_v60  ;;  %vm2537_vm3 = vmor %vm2535_vm2, %vm2536_vm1 }
 0x308   : > { %v2023_v30 = vpop.xlane.xlu1 %2022  ;;  %v5479_v54 = vadd.f32 1e-05, %v2259_v14  ;;  %v3172_v21 = vpop.eup %3171  ;;  %v2531_v19 = vmul.f32 %v3170_v59, %v2530_v53 }
 0x309   : > { %2771 = vst [vmem:[%s5189_s21 + $0xb0] sm:$0xff] %v2739_v48  ;;  %v5485_v0 = vmul.f32 %v5098_v27, %v2023_v30  ;;  %v2388_v55 = vsel %vm2387_vm0, %v3168_v12, %v2384_v49  ;;  %v2390_v4 = vmul.f32 %v3172_v21, %v5460_v10  ;;  %3173 = vrsqrt.f32 %v5477_v41 }
 0x30a   : > { %v2119_v3 = vpop.xlane.xlu0 %2118  ;;  %v2659_v7 = vmul.f32 %v2627_v61, %v2388_v55  ;;  %v2532_v38 = vmul.f32 0.5, %v2531_v19  ;;  %3175 = vrsqrt.f32 %v5479_v54  ;;  %vm2396_vm4 = vweird.f32 %v3172_v21 }
 0x30b   : > { %v1995_v34 = vpop.xlane.xlu2 %1994  ;;  %v2391_v51 = vmul.f32 %v3172_v21, %v2390_v4  ;;  %v2196_v56 = vmul.f32 %v5098_v27, %v2119_v3  ;;  %v2228_v33 = vmul.f32 %v5485_v0, %v5485_v0  ;;  %vm2397_vm6 = vmor %vm2395_vm5, %vm2396_vm4  ;;  %vm2405_vm8 = vweird.f32 %v5477_v41 }
 0x30c   : > { %v2692_v63 = vmul.f32 %v5158_v26, %v2659_v7  ;;  %v2533_v15 = vsub.f32 1.5, %v2532_v38  ;;  %v5497_v17 = vmul.f32 %v5098_v27, %v1995_v34  ;;  %vm2545_vm11 = vweird.f32 %v5479_v54 }
 0x30d   : > { %v2392_v12 = vmul.f32 0.5, %v2391_v51  ;;  %v2260_v24 = vsub.f32 %v2196_v56, %v2228_v33 }
 0x30e   : > { %v2725_v9 = vadd.f32 %v5166_v6, %v2692_v63  ;;  %v2534_v2 = vmul.f32 %v3170_v59, %v2533_v15 }
 0x30f   : > { %v3174_v23 = vpop.eup %3173  ;;  %v2393_v32 = vsub.f32 1.5, %v2392_v12  ;;  %v5501_v31 = vadd.f32 1e-05, %v2260_v24  ;;  %v2629_v24 = vsub.f32 %v5076_v11, %v5463_v22 }
 0x310   : > { %v2091_v47 = vpop.xlane.xlu1 %2090  ;;  %v3176_v13 = vpop.eup %3175  ;;  %2757 = vst [vmem:[%s5189_s21 + $0x40] sm:$0xff] %v2725_v9  ;;  %v2538_v44 = vsel %vm2537_vm3, %v3170_v59, %v2534_v2  ;;  %v2400_v18 = vmul.f32 %v3174_v23, %v5477_v41  ;;  %v2214_v59 = vmul.f32 %v5497_v17, %v5497_v17  ;;  %vm2406_vm7 = vweird.f32 %v3174_v23 }
 0x311   : > { %v2182_v58 = vmul.f32 %v5098_v27, %v2091_v47  ;;  %v2674_v37 = vmul.f32 %v2642_v25, %v2538_v44  ;;  %v2394_v60 = vmul.f32 %v3172_v21, %v2393_v32  ;;  %v2540_v14 = vmul.f32 %v3176_v13, %v5479_v54  ;;  %vm2407_vm10 = vmor %vm2405_vm8, %vm2406_vm7 }
 0x312   : > { %v1997_v1 = vpop.xlane.xlu0 %1996  ;;  %v2401_v42 = vmul.f32 %v3174_v23, %v2400_v18  ;;  %3177 = vrsqrt.f32 %v5501_v31  ;;  %vm2546_vm9 = vweird.f32 %v3176_v13  ;;  %v2643_v2 = vsub.f32 %v5070_v39, %v5450_v52 }
 0x313   : > { %v2025_v48 = vpop.xlane.xlu2 %2024  ;;  %v2707_v53 = vmul.f32 %v5158_v26, %v2674_v37  ;;  %v2398_v3 = vsel %vm2397_vm6, %v3172_v21, %v2394_v60  ;;  %v2541_v30 = vmul.f32 %v3176_v13, %v2540_v14  ;;  %v2246_v61 = vsub.f32 %v2182_v58, %v2214_v59  ;;  %vm2547_vm12 = vmor %vm2545_vm11, %vm2546_vm9 }
 0x314   : > { %v2660_v49 = vmul.f32 %v2628_v62, %v2398_v3  ;;  %v2402_v10 = vmul.f32 0.5, %v2401_v42  ;;  %v5515_v19 = vmul.f32 %v5098_v27, %v2025_v48  ;;  %v5519_v55 = vmul.f32 %v5098_v27, %v1997_v1 }
 0x315   : > { %v2740_v28 = vadd.f32 %v5166_v6, %v2707_v53  ;;  %v2542_v16 = vmul.f32 0.5, %v2541_v30  ;;  %v5522_v38 = vadd.f32 1e-05, %v2246_v61  ;;  %vm2555_vm14 = vweird.f32 %v5501_v31 }
 0x316   : > { %v2693_v4 = vmul.f32 %v5158_v26, %v2660_v49  ;;  %v2403_v7 = vsub.f32 1.5, %v2402_v10  ;;  %v2229_v12 = vmul.f32 %v5515_v19, %v5515_v19  ;;  %v2215_v47 = vmul.f32 %v5519_v55, %v5519_v55 }
 0x317   : > { %2772 = vst [vmem:[%s5189_s21 + $0xb8] sm:$0xff] %v2740_v28  ;;  %v2543_v51 = vsub.f32 1.5, %v2542_v16  ;;  %3179 = vrsqrt.f32 %v5522_v38  ;;  %v2644_v10 = vsub.f32 %v5084_v40, %v5485_v0  ;;  %vm2415_vm1 = vweird.f32 %v5522_v38 }
 0x318   : > { %v2121_v34 = vpop.xlane.xlu1 %2120  ;;  %v3178_v33 = vpop.eup %3177  ;;  %v2726_v63 = vadd.f32 %v5166_v6, %v2693_v4  ;;  %v2404_v15 = vmul.f32 %v3174_v23, %v2403_v7 }
 0x319   : > { %v2197_v56 = vmul.f32 %v5098_v27, %v2121_v34  ;;  %v2544_v9 = vmul.f32 %v3176_v13, %v2543_v51  ;;  %v2550_v41 = vmul.f32 %v3178_v33, %v5501_v31  ;;  %vm2556_vm13 = vweird.f32 %v3178_v33 }
 0x31a   : > { %v2027_v21 = vpop.xlane.xlu0 %2026  ;;  %2758 = vst [vmem:[%s5189_s21 + $0x48] sm:$0xff] %v2726_v63  ;;  %v2408_v1 = vsel %vm2407_vm10, %v3174_v23, %v2404_v15  ;;  %vm2557_vm15 = vmor %vm2555_vm14, %vm2556_vm13  ;;  %v5571_v63 = vld [vmem:[#allocation8 + $0x2] ss:$0 sm:$0xff] }
 0x31b   : > { %v2261_v25 = vsub.f32 %v2197_v56, %v2229_v12  ;;  %v2093_v32 = vpop.xlane.xlu2 %2092  ;;  %v2661_v44 = vmul.f32 %v2629_v24, %v2408_v1  ;;  %v2548_v18 = vsel %vm2547_vm12, %v3176_v13, %v2544_v9  ;;  %v2551_v11 = vmul.f32 %v3178_v33, %v2550_v41 }
 0x31c   : > { %v2183_v22 = vmul.f32 %v5098_v27, %v2093_v32  ;;  %v2675_v54 = vmul.f32 %v2643_v2, %v2548_v18  ;;  %v5547_v14 = vmul.f32 %v5098_v27, %v2027_v21  ;;  %v2630_v32 = vsub.f32 %v5090_v29, %v5497_v17 }
 0x31d   : > { %v5542_v58 = vadd.f32 1e-05, %v2261_v25  ;;  %v2694_v37 = vmul.f32 %v5158_v26, %v2661_v44  ;;  %v2552_v39 = vmul.f32 0.5, %v2551_v11  ;;  %v3180_v23 = vpop.eup %3179 }
 0x31e   : > { %v2247_v52 = vsub.f32 %v2183_v22, %v2215_v47  ;;  %v2708_v60 = vmul.f32 %v5158_v26, %v2675_v54  ;;  %v2410_v48 = vmul.f32 %v3180_v23, %v5522_v38  ;;  %v2230_v7 = vmul.f32 %v5547_v14, %v5547_v14  ;;  %v5579_v47 = vld [vmem:[#allocation8 + $0x3] ss:$0 sm:$0xff] }
 0x31f   : > { %3181 = vrsqrt.f32 %v5542_v58  ;;  %v2727_v42 = vadd.f32 %v5166_v6, %v2694_v37  ;;  %v2553_v59 = vsub.f32 1.5, %v2552_v39  ;;  %vm2416_vm0 = vweird.f32 %v3180_v23 }
 0x320   : > { %v1999_v62 = vpop.xlane.xlu1 %1998  ;;  %v2741_v53 = vadd.f32 %v5166_v6, %v2708_v60  ;;  %v5553_v3 = vadd.f32 1e-05, %v2247_v52  ;;  %v2411_v49 = vmul.f32 %v3180_v23, %v2410_v48  ;;  %vm2417_vm2 = vmor %vm2415_vm1, %vm2416_vm0  ;;  %vm2565_vm4 = vweird.f32 %v5542_v58 }
 0x321   : > { %v5556_v26 = vmul.f32 %v5098_v27, %v1999_v62  ;;  %2759 = vst [vmem:[%s5189_s21 + $0x50] sm:$0xff] %v2727_v42  ;;  %v2554_v30 = vmul.f32 %v3178_v33, %v2553_v59  ;;  %v2645_v48 = vsub.f32 %v5101_v43, %v5515_v19 }
 0x322   : > { %v2095_v13 = vpop.xlane.xlu0 %2094  ;;  %2773 = vst [vmem:[%s5189_s21 + $0xc0] sm:$0xff] %v2741_v53  ;;  %3183 = vrsqrt.f32 %v5553_v3  ;;  %v2412_v4 = vmul.f32 0.5, %v2411_v49  ;;  %vm2425_vm7 = vweird.f32 %v5553_v3 }
 0x323   : > { %v2184_v61 = vmul.f32 %v5098_v27, %v2095_v13  ;;  %v2216_v6 = vmul.f32 %v5556_v26, %v5556_v26  ;;  %v2123_v28 = vpop.xlane.xlu2 %2122  ;;  %v2558_v16 = vsel %vm2557_vm15, %v3178_v33, %v2554_v30 }
 0x324   : > { %v2198_v31 = vmul.f32 %v5098_v27, %v2123_v28  ;;  %v2676_v34 = vmul.f32 %v2644_v10, %v2558_v16  ;;  %v2413_v56 = vsub.f32 1.5, %v2412_v4 }
 0x325   : > { %v3182_v21 = vpop.eup %3181  ;;  %v2248_v51 = vsub.f32 %v2184_v61, %v2216_v6 }
 0x326   : > { %v2560_v40 = vmul.f32 %v3182_v21, %v5542_v58  ;;  %v2262_v0 = vsub.f32 %v2198_v31, %v2230_v7  ;;  %v2709_v15 = vmul.f32 %v5571_v63, %v2676_v34  ;;  %v2414_v9 = vmul.f32 %v3180_v23, %v2413_v56 }
 0x327   : > { %v5574_v12 = vadd.f32 1e-05, %v2248_v51  ;;  %vm2566_vm3 = vweird.f32 %v3182_v21  ;;  %v2631_v31 = vsub.f32 %v5096_v20, %v5519_v55 }
 0x328   : > { %v2029_v24 = vpop.xlane.xlu1 %2028  ;;  %v2561_v41 = vmul.f32 %v3182_v21, %v2560_v40  ;;  %v5577_v2 = vadd.f32 1e-05, %v2262_v0  ;;  %v3184_v1 = vpop.eup %3183  ;;  %v2742_v25 = vadd.f32 %v5579_v47, %v2709_v15  ;;  %v2418_v18 = vsel %vm2417_vm2, %v3180_v23, %v2414_v9  ;;  %vm2567_vm5 = vmor %vm2565_vm4, %vm2566_vm3 }
 0x329   : > { %3185 = vrsqrt.f32 %v5574_v12  ;;  %v5587_v44 = vmul.f32 %v5098_v27, %v2029_v24  ;;  %v2420_v11 = vmul.f32 %v3184_v1, %v5553_v3  ;;  %v2662_v22 = vmul.f32 %v2630_v32, %v2418_v18 }
 0x32a   : > { %v2125_v33 = vpop.xlane.xlu0 %2124  ;;  %v2562_v38 = vmul.f32 0.5, %v2561_v41  ;;  %2774 = vst [vmem:[%s5189_s21 + $0xc8] sm:$0xff] %v2742_v25  ;;  %3187 = vrsqrt.f32 %v5577_v2  ;;  %vm2426_vm6 = vweird.f32 %v3184_v1  ;;  %vm2435_vm10 = vweird.f32 %v5574_v12 }
 0x32b   : > { %v2199_v54 = vmul.f32 %v5098_v27, %v2125_v33  ;;  %v2231_v29 = vmul.f32 %v5587_v44, %v5587_v44  ;;  %v2421_v39 = vmul.f32 %v3184_v1, %v2420_v11  ;;  %v2695_v52 = vmul.f32 %v5571_v63, %v2662_v22  ;;  %vm2427_vm8 = vmor %vm2425_vm7, %vm2426_vm6 }
 0x32c   : > { %v2563_v37 = vsub.f32 1.5, %v2562_v38  ;;  %v2632_v18 = vsub.f32 %v5123_v46, %v5556_v26  ;;  %vm2575_vm13 = vweird.f32 %v5577_v2 }
 0x32d   : > { %v2001_v17 = vpop.xlane.xlu2 %2000  ;;  %v2263_v60 = vsub.f32 %v2199_v54, %v2231_v29  ;;  %v2422_v62 = vmul.f32 0.5, %v2421_v39  ;;  %v2728_v59 = vadd.f32 %v5579_v47, %v2695_v52  ;;  %v2646_v29 = vsub.f32 %v5114_v5, %v5547_v14 }
 0x32e   : > { %v5597_v23 = vmul.f32 %v5098_v27, %v2001_v17  ;;  %v2564_v13 = vmul.f32 %v3182_v21, %v2563_v37 }
 0x32f   : > { %v3186_v42 = vpop.eup %3185  ;;  %v5603_v53 = vadd.f32 1e-05, %v2263_v60  ;;  %v2423_v10 = vsub.f32 1.5, %v2422_v62  ;;  %2760 = vst [vmem:[%s5189_s21 + $0x58] sm:$0xff] %v2728_v59 }
 0x330   : > { %v2097_v30 = vpop.xlane.xlu1 %2096  ;;  %v2568_v49 = vsel %vm2567_vm5, %v3182_v21, %v2564_v13  ;;  %v2430_v61 = vmul.f32 %v3186_v42, %v5574_v12  ;;  %v3188_v6 = vpop.eup %3187  ;;  %v2217_v58 = vmul.f32 %v5597_v23, %v5597_v23  ;;  %vm2436_vm9 = vweird.f32 %v3186_v42 }
 0x331   : > { %v2677_v28 = vmul.f32 %v2645_v48, %v2568_v49  ;;  %3189 = vrsqrt.f32 %v5603_v53  ;;  %v2185_v43 = vmul.f32 %v5098_v27, %v2097_v30  ;;  %v2424_v19 = vmul.f32 %v3184_v1, %v2423_v10  ;;  %vm2437_vm12 = vmor %vm2435_vm10, %vm2436_vm9 }
 0x332   : > { %v2431_v4 = vmul.f32 %v3186_v42, %v2430_v61  ;;  %v2570_v7 = vmul.f32 %v3188_v6, %v5577_v2  ;;  %vm2576_vm11 = vweird.f32 %v3188_v6  ;;  %vm2585_vm0 = vweird.f32 %v5603_v53 }
 0x333   : > { %v2710_v21 = vmul.f32 %v5571_v63, %v2677_v28  ;;  %v2249_v34 = vsub.f32 %v2185_v43, %v2217_v58  ;;  %v2428_v56 = vsel %vm2427_vm8, %v3184_v1, %v2424_v19  ;;  %vm2577_vm14 = vmor %vm2575_vm13, %vm2576_vm11 }
 0x334   : > { %v2432_v40 = vmul.f32 0.5, %v2431_v4  ;;  %v2571_v0 = vmul.f32 %v3188_v6, %v2570_v7  ;;  %v2663_v33 = vmul.f32 %v2631_v31, %v2428_v56 }
 0x335   : > { %v2003_v16 = vpop.xlane.xlu0 %2002  ;;  %v2031_v51 = vpop.xlane.xlu2 %2030  ;;  %v2743_v15 = vadd.f32 %v5579_v47, %v2710_v21  ;;  %v5618_v9 = vadd.f32 1e-05, %v2249_v34 }
 0x336   : > { %v2433_v3 = vsub.f32 1.5, %v2432_v40  ;;  %v2572_v24 = vmul.f32 0.5, %v2571_v0  ;;  %v2696_v20 = vmul.f32 %v5571_v63, %v2663_v33  ;;  %v5630_v54 = vmul.f32 %v5098_v27, %v2003_v16 }
 0x337   : > { %v3190_v41 = vpop.eup %3189  ;;  %2775 = vst [vmem:[%s5189_s21 + $0xd0] sm:$0xff] %v2743_v15  ;;  %3191 = vrsqrt.f32 %v5618_v9  ;;  %v5648_v49 = vmul.f32 %v5098_v27, %v2031_v51  ;;  %vm2445_vm3 = vweird.f32 %v5618_v9 }
 0x338   : > { %v2434_v55 = vmul.f32 %v3186_v42, %v2433_v3  ;;  %v2573_v25 = vsub.f32 1.5, %v2572_v24  ;;  %v2580_v1 = vmul.f32 %v3190_v41, %v5603_v53  ;;  %v2729_v32 = vadd.f32 %v5579_v47, %v2696_v20 }
 0x339   : > { %vm2586_vm15 = vweird.f32 %v3190_v41  ;;  %v2218_v5 = vmul.f32 %v5630_v54, %v5630_v54  ;;  %v2232_v34 = vmul.f32 %v5648_v49, %v5648_v49 }
 0x33a   : > { %v2438_v11 = vsel %vm2437_vm12, %v3186_v42, %v2434_v55  ;;  %v2574_v22 = vmul.f32 %v3188_v6, %v2573_v25  ;;  %v2581_v12 = vmul.f32 %v3190_v41, %v2580_v1  ;;  %2761 = vst [vmem:[%s5189_s21 + $0x60] sm:$0xff] %v2729_v32  ;;  %vm2587_vm1 = vmor %vm2585_vm0, %vm2586_vm15  ;;  %v2633_v55 = vsub.f32 %v5164_v8, %v5597_v23 }
 0x33b   : > { %v2664_v17 = vmul.f32 %v2632_v18, %v2438_v11 }
 0x33c   : > { %v2578_v46 = vsel %vm2577_vm14, %v3188_v6, %v2574_v22  ;;  %v2582_v26 = vmul.f32 0.5, %v2581_v12  ;;  %v2647_v6 = vsub.f32 %v5142_v57, %v5587_v44 }
 0x33d   : > { %v2033_v38 = vpop.xlane.xlu0 %2032  ;;  %v2099_v37 = vpop.xlane.xlu2 %2098  ;;  %v2697_v39 = vmul.f32 %v5571_v63, %v2664_v17  ;;  %v2678_v52 = vmul.f32 %v2646_v29, %v2578_v46 }
 0x33e   : > { %v2186_v13 = vmul.f32 %v5098_v27, %v2099_v37  ;;  %v2583_v62 = vsub.f32 1.5, %v2582_v26  ;;  %v3192_v14 = vpop.eup %3191  ;;  %v5655_v28 = vmul.f32 %v5098_v27, %v2033_v38 }
 0x33f   : > { %v2730_v42 = vadd.f32 %v5579_v47, %v2697_v39  ;;  %v2711_v59 = vmul.f32 %v5571_v63, %v2678_v52  ;;  %v2440_v30 = vmul.f32 %v3192_v14, %v5618_v9  ;;  %vm2446_vm2 = vweird.f32 %v3192_v14 }
 0x340   : > { %v2035_v2 = vpop.xlane.xlu1 %2034  ;;  %v2584_v48 = vmul.f32 %v3190_v41, %v2583_v62  ;;  %v2250_v10 = vsub.f32 %v2186_v13, %v2218_v5  ;;  %v2233_v56 = vmul.f32 %v5655_v28, %v5655_v28  ;;  %vm2447_vm4 = vmor %vm2445_vm3, %vm2446_vm2  ;;  %v2634_v13 = vsub.f32 %v5200_v36, %v5630_v54 }
 0x341   : > { %v5638_v60 = vmul.f32 %v5098_v27, %v2035_v2  ;;  %2762 = vst [vmem:[%s5189_s21 + $0x68] sm:$0xff] %v2730_v42  ;;  %v2744_v61 = vadd.f32 %v5579_v47, %v2711_v59  ;;  %v2441_v43 = vmul.f32 %v3192_v14, %v2440_v30 }
 0x342   : > { %v2588_v16 = vsel %vm2587_vm1, %v3190_v41, %v2584_v48  ;;  %v2282_v19 = vadd.f32 1e-05, %v2250_v10 }
 0x343   : > { %v2234_v53 = vmul.f32 %v5638_v60, %v5638_v60  ;;  %2776 = vst [vmem:[%s5189_s21 + $0xd8] sm:$0xff] %v2744_v61  ;;  %v2679_v7 = vmul.f32 %v2647_v6, %v2588_v16  ;;  %v2442_v21 = vmul.f32 0.5, %v2441_v43  ;;  %v2650_v61 = vsub.f32 %v5264_v50, %v5638_v60 }
 0x344   : > { %3193 = vrsqrt.f32 %v2282_v19  ;;  %vm2455_vm6 = vweird.f32 %v2282_v19  ;;  %v2649_v60 = vsub.f32 %v5234_v35, %v5655_v28 }
 0x345   : > { %v2131_v58 = vpop.xlane.xlu0 %2130  ;;  %v2129_v31 = vpop.xlane.xlu2 %2128  ;;  %v2712_v51 = vmul.f32 %v5571_v63, %v2679_v7  ;;  %v2443_v15 = vsub.f32 1.5, %v2442_v21 }
 0x346   : > { %v2202_v4 = vmul.f32 %v5098_v27, %v2131_v58  ;;  %v2201_v0 = vmul.f32 %v5098_v27, %v2129_v31 }
 0x347   : > { %v2745_v3 = vadd.f32 %v5579_v47, %v2712_v51  ;;  %v2444_v20 = vmul.f32 %v3192_v14, %v2443_v15 }
 0x348   : > { %v2266_v57 = vsub.f32 %v2202_v4, %v2234_v53  ;;  %v2127_v44 = vpop.xlane.xlu1 %2126  ;;  %v2265_v41 = vsub.f32 %v2201_v0, %v2233_v56 }
 0x349   : > { %v2200_v40 = vmul.f32 %v5098_v27, %v2127_v44  ;;  %2777 = vst [vmem:[%s5189_s21 + $0xe0] sm:$0xff] %v2745_v3  ;;  %v2448_v32 = vsel %vm2447_vm4, %v3192_v14, %v2444_v20 }
 0x34a   : > { %v2298_v33 = vadd.f32 1e-05, %v2266_v57  ;;  %v2297_v1 = vadd.f32 1e-05, %v2265_v41  ;;  %v3194_v27 = vpop.eup %3193  ;;  %v2665_v18 = vmul.f32 %v2633_v55, %v2448_v32 }
 0x34b   : > { %v2264_v24 = vsub.f32 %v2200_v40, %v2232_v34  ;;  %v2450_v38 = vmul.f32 %v3194_v27, %v2282_v19  ;;  %vm2456_vm5 = vweird.f32 %v3194_v27  ;;  %v2648_v19 = vsub.f32 %v5197_v45, %v5648_v49 }
 0x34c   : > { %3195 = vrsqrt.f32 %v2298_v33  ;;  %v2698_v11 = vmul.f32 %v5571_v63, %v2665_v18  ;;  %vm2457_vm7 = vmor %vm2455_vm6, %vm2456_vm5  ;;  %vm2615_vm9 = vweird.f32 %v2298_v33  ;;  %vm2605_vm15 = vweird.f32 %v2297_v1 }
 0x34d   : > { %v2296_v25 = vadd.f32 1e-05, %v2264_v24  ;;  %v2451_v22 = vmul.f32 %v3194_v27, %v2450_v38 }
 0x34e   : > { %v2731_v9 = vadd.f32 %v5579_v47, %v2698_v11 }
 0x34f   : > { %3197 = vrsqrt.f32 %v2296_v25  ;;  %v2452_v29 = vmul.f32 0.5, %v2451_v22  ;;  %vm2595_vm13 = vweird.f32 %v2296_v25 }
 0x350   : > { %3199 = vrsqrt.f32 %v2297_v1  ;;  %2763 = vst [vmem:[%s5189_s21 + $0x70] sm:$0xff] %v2731_v9 }
 0x351   : > { %v2453_v8 = vsub.f32 1.5, %v2452_v29 }
 0x352   : > { %v3196_v12 = vpop.eup %3195 }
 0x353   : > { %v2610_v17 = vmul.f32 %v3196_v12, %v2298_v33  ;;  %v2454_v2 = vmul.f32 %v3194_v27, %v2453_v8  ;;  %vm2616_vm8 = vweird.f32 %v3196_v12 }
 0x354   : > { %vm2617_vm10 = vmor %vm2615_vm9, %vm2616_vm8 }
 0x355   : > { %v3198_v37 = vpop.eup %3197  ;;  %v2611_v23 = vmul.f32 %v3196_v12, %v2610_v17  ;;  %v2458_v5 = vsel %vm2457_vm7, %v3194_v27, %v2454_v2 }
 0x356   : > { %v3200_v46 = vpop.eup %3199  ;;  %v2590_v26 = vmul.f32 %v3198_v37, %v2296_v25  ;;  %v2666_v59 = vmul.f32 %v2634_v13, %v2458_v5  ;;  %vm2596_vm11 = vweird.f32 %v3198_v37 }
 0x357   : > { %v2612_v39 = vmul.f32 0.5, %v2611_v23  ;;  %v2600_v52 = vmul.f32 %v3200_v46, %v2297_v1  ;;  %vm2606_vm12 = vweird.f32 %v3200_v46  ;;  %vm2597_vm14 = vmor %vm2595_vm13, %vm2596_vm11 }
 0x358   : > { %v2591_v62 = vmul.f32 %v3198_v37, %v2590_v26  ;;  %v2699_v6 = vmul.f32 %v5571_v63, %v2666_v59  ;;  %vm2607_vm0 = vmor %vm2605_vm15, %vm2606_vm12 }
 0x359   : > { %v2613_v14 = vsub.f32 1.5, %v2612_v39  ;;  %v2601_v42 = vmul.f32 %v3200_v46, %v2600_v52 }
 0x35a   : > { %v2592_v48 = vmul.f32 0.5, %v2591_v62  ;;  %v2732_v58 = vadd.f32 %v5579_v47, %v2699_v6 }
 0x35b   : > { %v2614_v30 = vmul.f32 %v3196_v12, %v2613_v14  ;;  %v2602_v10 = vmul.f32 0.5, %v2601_v42 }
 0x35c   : > { %v2593_v53 = vsub.f32 1.5, %v2592_v48  ;;  %2764 = vst [vmem:[%s5189_s21 + $0x78] sm:$0xff] %v2732_v58 }
 0x35d   : > { %v2618_v36 = vsel %vm2617_vm10, %v3196_v12, %v2614_v30  ;;  %v2603_v54 = vsub.f32 1.5, %v2602_v10 }
 0x35e   : > { %v2682_v16 = vmul.f32 %v2650_v61, %v2618_v36  ;;  %v2594_v43 = vmul.f32 %v3198_v37, %v2593_v53 }
 0x35f   : > { %v2604_v50 = vmul.f32 %v3200_v46, %v2603_v54 }
 0x360   : > { %v2715_v4 = vmul.f32 %v5571_v63, %v2682_v16  ;;  %v2598_v7 = vsel %vm2597_vm14, %v3198_v37, %v2594_v43 }
 0x361   : > { %v2680_v45 = vmul.f32 %v2648_v19, %v2598_v7  ;;  %v2608_v49 = vsel %vm2607_vm0, %v3200_v46, %v2604_v50 }
 0x362   : > { %v2748_v31 = vadd.f32 %v5579_v47, %v2715_v4  ;;  %v2681_v21 = vmul.f32 %v2649_v60, %v2608_v49 }
 0x363   : > { %v2713_v34 = vmul.f32 %v5571_v63, %v2680_v45 }
 0x364   : > { %2780 = vst [vmem:[%s5189_s21 + $0xf8] sm:$0xff] %v2748_v31  ;;  %v2714_v35 = vmul.f32 %v5571_v63, %v2681_v21 }
 0x365   : > { %v2746_v28 = vadd.f32 %v5579_v47, %v2713_v34 }
 0x366   : > { %v2747_v57 = vadd.f32 %v5579_v47, %v2714_v35 }
 0x367   : > { %2778 = vst [vmem:[%s5189_s21 + $0xe8] sm:$0xff] %v2746_v28 }
 0x368   : > { %2779 = vst [vmem:[%s5189_s21 + $0xf0] sm:$0xff] %v2747_v57 }
 0x369   : > { %3352 = shalt.err (!%p3349_p10)
}
 0x36a   : > { %s3407_s30 = smov 128   ;;  %s3408_s24 = smov 8  }
 0x36b   : > { %2999 = dma.vmem_to_hbm [thread:$0]  (%p3522_p3), %s2795_s11, 4096, %s2797_s13, %s2782_s14, %s3407_s30, %s3407_s30, %s3408_s24  }
 0x36c PF: > { %s2811_s25 = sand.u32 1, %s3387_s15   ;;  %p5850_p12 = scmp.ge.s32.totalorder %s3399_s18, 2 }
 0x36d   : > { %s2812_s21 = scalar_lea.sflag [#allocation4], %s2811_s25 }
 0x36e   : > { %p3016_p13 = pnand %p5850_p12, %p3469_p6 }
 0x370   : > { %p3017_p0 = pneg %p3016_p13 }
 0x372   : > { %3382 = dma.done.wait (%p3017_p0), %s2812_s21, 4096  }
 0x373   : > { %3384 = vsyncadd (%p3017_p0), %s2812_s21, 4294963200  ;;  %p19_p5 = scmp.ge.s32.totalorder %s3507_s23, 4   ;;  %s5851_s15 = smov %s3391_s16 }
 0x374   : > { %s5852_s16 = smov %s3395_s17  ;;  %s5853_s17 = smov %s3518_s27 }
 0x375   : > { %s5854_s18 = smov %s3507_s23  ;;  %21 = sbr.rel (!%p19_p5) target bundleno = 7 (0x7), region = 93 }
 0x37a   :  { %2818 = vsyncpa [#allocation3], 1 }
 0x37b   :  { %2820 = vsyncpa [#allocation3 + $0x1], 1 }
 0x37c   :  { %2821 = vsyncpa [#allocation6], 1 }
 0x37d   :  { %2822 = vsyncpa [#allocation9], 1 }
 0x37e   :  { %2823 = vsyncpa [#allocation4], 1 }
 0x37f   :  { %2825 = vsyncpa [#allocation4 + $0x1], 1 }

// kernel: tpu_custom_call.1
= control target key start
LH: loop header
LB: loop body
LE: loop exit
PB: predicated region body
PF: predicated region fallthrough
CT: control target
= control target key end

     0   :  { %9 = vsyncpa [#allocation3], 0  ;;  %s5730_s0 = inlined_call_operand.hbm [shape: f32[512,128], index: 0, kind: input, shape index: {}]   ;;  %s5731_s1 = inlined_call_operand.hbm [shape: f32[128,128], index: 1, kind: input, shape index: {}]   ;;  %s5732_s2 = inlined_call_operand.hbm [shape: f32[128,128], index: 2, kind: input, shape index: {}]   ;;  %s5733_s3 = inlined_call_operand.hbm [shape: f32[4,128], index: 3, kind: input, shape index: {}]   ;;  %s5734_s4 = inlined_call_operand.hbm [shape: f32[512,128], index: 4, kind: output, shape index: {}]  }
   0x1   :  { %11 = vsyncpa [#allocation3 + $0x1], 0 }
   0x2   :  { %12 = vsyncpa [#allocation6], 0 }
   0x3   :  { %13 = vsyncpa [#allocation9], 0 }
   0x4   :  { %14 = vsyncpa [#allocation4], 0 }
   0x5   :  { %16 = vsyncpa [#allocation4 + $0x1], 0  ;;  %s3434_s15 = smov 0   ;;  %s3436_s16 = smov 0  }
   0x6   :  { %s3438_s17 = smov 0   ;;  %s3440_s18 = smov 0  }
   0x7 LB: > { %s3455_s19 = sadd.s32 4294967295, %s3399_s18   ;;  %s2899_s20 = sadd.s32 4294967294, %s3399_s18   ;;  %s3399_s18 = sphi %s3440_s18, %s5854_s18   ;;  %s3395_s17 = sphi %s3438_s17, %s5853_s17   ;;  %s3391_s16 = sphi %s3436_s16, %s5852_s16   ;;  %s3387_s15 = sphi %s3434_s15, %s5851_s15  }
   0x8   : > { %p42_p0 = scmp.ne.s32.totalorder %s3391_s16, %s3387_s15  ;;  %p43_p1 = scmp.eq.s32.totalorder %s3455_s19, 0 }
   0x9   : > { %p129_p2 = scmp.eq.s32.totalorder %s3455_s19, 1  ;;  %p135_p3 = scmp.eq.s32.totalorder %s2899_s20, 1 }
   0xa   : > { %p3464_p4 = por %p43_p1, %p42_p0  ;;  %p2900_p5 = scmp.ge.s32.totalorder %s3399_s18, 1 }
   0xb   : > { %p3469_p6 = por %p135_p3, %p42_p0  ;;  %p142_p7 = scmp.lt.s32.totalorder %s3399_s18, 3 }
   0xc   : > { %s153_s25 = sshll.u32 %s5731_s1, 4  ;;  %s3401_s27 = smov [#allocation5]   ;;  %s154_s25 = int_to_ptr.hbm [resolvable:$true] %s153_s25 }
   0xd   : > { %p3477_p8 = pnand %p2900_p5, %p142_p7  ;;  %s155_s28 = sshll.u32 %s3401_s27, 4  ;;  %s156_s28 = int_to_ptr.vmem [resolvable:$true] %s155_s28 }
   0xe   : > { %s167_s6 = sshll.u32 %s5732_s2, 4  ;;  %s3402_s7 = smov 128   ;;  %s168_s6 = int_to_ptr.hbm [resolvable:$true] %s167_s6 }
   0xf   : > { %p3001_p9 = pneg %p3477_p8  ;;  %s3403_s8 = smov 8  }
  0x10   : > { %s3404_s9 = smov [#allocation7]   ;;  %s182_s13 = sshll.u32 %s5733_s3, 4  ;;  %s183_s13 = int_to_ptr.hbm [resolvable:$true] %s182_s13 }
  0x11   : > { %p3485_p10 = pnand %p3001_p9, %p43_p1  ;;  %s169_s10 = sshll.u32 %s3404_s9, 4  ;;  %s170_s10 = int_to_ptr.vmem [resolvable:$true] %s169_s10 }
  0x12   : > { %s3405_s14 = smov [#allocation8]   ;;  %s3507_s23 = sadd.s32 1, %s3399_s18  }
  0x13   : > { %3004 = dma.hbm_to_vmem [thread:$0]  (!%p3485_p10), %s154_s25, 2048, %s156_s28, [#allocation6], %s3402_s7, %s3402_s7, %s3403_s8  }
  0x14   : > { %3007 = dma.hbm_to_vmem [thread:$0]  (!%p3485_p10), %s168_s6, 2048, %s170_s10, [#allocation6], %s3402_s7, %s3402_s7, %s3403_s8  }
  0x15   : > { %s184_s20 = sshll.u32 %s3405_s14, 4  ;;  %s26_s24 = ssub.s32 %s3399_s18, %s3507_s23  ;;  %s185_s20 = int_to_ptr.vmem [resolvable:$true] %s184_s20 }
  0x16   : > { %3010 = dma.hbm_to_vmem [thread:$0]  (!%p3485_p10), %s183_s13, 64, %s185_s20, [#allocation9]  }
  0x17   : > { %s29_s25 = sadd.s32 1, %s3395_s17  ;;  %p27_p12 = scmp.eq.s32.totalorder %s26_s24, 0 }
  0x18   : > { %p36_p13 = scmp.ne.s32.totalorder %s3395_s17, %s3391_s16  ;;  %p37_p0 = scmp.eq.s32.totalorder %s3399_s18, 0 }
  0x19   : > { %s3518_s27 = scalar_select %p27_p12, %s3395_s17, %s29_s25  }
  0x1a   : > { %p3522_p3 = por %p129_p2, %p36_p13  ;;  %p3022_p5 = scmp.lt.s32.totalorder %s3399_s18, 2 }
  0x1b   : > { %s195_s30 = sand.u32 1, %s3395_s17   ;;  %s2951_s5 = sshll.u32 %s3399_s18, 8 }
  0x1c   : > { %p38_p7 = por %p37_p0, %p36_p13  ;;  %s2905_s6 = sshll.u32 %s195_s30, 8 }
  0x1d   : > { %s204_s10 = scalar_lea.hbm %s5730_s0, %s2951_s5  ;;  %s199_s12 = scalar_lea.vmem [#allocation2], %s2905_s6 }
  0x1e   : > { %s205_s11 = sshll.u32 %s204_s10, 4  ;;  %s207_s13 = sshll.u32 %s199_s12, 4  ;;  %s206_s11 = int_to_ptr.hbm [resolvable:$true] %s205_s11  ;;  %s208_s13 = int_to_ptr.vmem [resolvable:$true] %s207_s13 }
  0x1f   : > { %p3532_p9 = pnand %p3022_p5, %p38_p7  ;;  %s196_s20 = scalar_lea.sflag [#allocation3], %s195_s30 }
  0x20   : > { %s3295_s24 = sshra.s32 %s206_s11, 4  ;;  %s3302_s6 = scalar_lea.hbm %s5730_s0, 512  ;;  %s3296_s24 = int_to_ptr.hbm [resolvable:$true] %s3295_s24 }
  0x21   : > { %s3297_s25 = scalar_lea.hbm %s3296_s24, 256  ;;  %p3299_p10 = pneg %p3532_p9 }
  0x22   : > { %p3298_p2 = scmp.ne.s32.totalorder %s3296_s24, %s3297_s25  ;;  %p3303_p0 = scmp.lt.s32.totalorder %s3296_s24, %s5730_s0 }
  0x23   : > { %p3304_p5 = scmp.lt.s32.totalorder %s3302_s6, %s3297_s25 }
  0x24   : > { %p3300_p12 = pnand %p3299_p10, %p3298_p2 }
  0x25   : > { %p3305_p7 = por %p3304_p5, %p3303_p0 }
  0x26   : > { %p3301_p13 = pneg %p3300_p12 }
  0x28   : > { %p3306_p11 = pnand %p3305_p7, %p3301_p13 }
  0x2a   : > { %3309 = shalt.err (!%p3306_p11)
}
  0x2b   : > { %3014 = dma.hbm_to_vmem [thread:$0]  (!%p3532_p9), %s206_s11, 4096, %s208_s13, %s196_s20, %s3402_s7, %s3402_s7, %s3403_s8  }
  0x2c   : > { %219 = sbr.rel (%p3477_p8) target bundleno = 876 (0x36c), region = 36 }
  0x31   : > { %s3552_s30 = sand.u32 1, %s3391_s16  }
  0x32   : > { %s2909_s12 = sshll.u32 %s3552_s30, 8  ;;  %s222_s24 = scalar_lea.sflag [#allocation3], %s3552_s30 }
  0x33   : > { %s3558_s25 = scalar_lea.vmem [#allocation2], %s2909_s12 }
  0x34   : > { %3370 = dma.done.wait (%p3464_p4), %s222_s24, 4096  }
  0x35   : > { %3372 = vsyncadd (%p3464_p4), %s222_s24, 4294963200 }
  0x36   : > { %3374 = dma.done.wait (%p43_p1), [#allocation6], 4096  }
  0x37   : > { %3376 = vsyncadd (%p43_p1), [#allocation6], 4294963200 }
  0x38   : > { %3378 = dma.done.wait (%p43_p1), [#allocation9], 64  }
  0x39   : > { %3380 = vsyncadd (%p43_p1), [#allocation9], 4294967232  ;;  %v315_v0 = vld [vmem:[#allocation5 + $0x78] sm:$0xff]  ;;  %v314_v1 = vld [vmem:[#allocation5 + $0x70] sm:$0xff]  ;;  %s5189_s21 = scalar_lea.vmem [#allocation10], %s2909_s12  ;;  %s2952_s26 = sshll.u32 %s3455_s19, 8 }
  0x3a   : > { %337 = vmatpush.msra.mxu0 %v315_v0  ;;  %2953 = vmatpush.msra.mxu2 %v315_v0  ;;  %v313_v2 = vld [vmem:[#allocation5 + $0x68] sm:$0xff]  ;;  %v312_v3 = vld [vmem:[#allocation5 + $0x60] sm:$0xff]  ;;  %v311_v4 = vld [vmem:[#allocation5 + $0x58] sm:$0xff]  ;;  %s2793_s19 = scalar_lea.hbm %s5734_s4, %s2952_s26  ;;  %s2794_s11 = sshll.u32 %s5189_s21, 4  ;;  %s2795_s11 = int_to_ptr.vmem [resolvable:$true] %s2794_s11 }
  0x3b   : > { %v310_v5 = vld [vmem:[#allocation5 + $0x50] sm:$0xff]  ;;  %v309_v6 = vld [vmem:[#allocation5 + $0x48] sm:$0xff]  ;;  %v308_v7 = vld [vmem:[#allocation5 + $0x40] sm:$0xff]  ;;  %s2796_s13 = sshll.u32 %s2793_s19, 4  ;;  %s2782_s14 = scalar_lea.sflag [#allocation4], %s3552_s30  ;;  %s2797_s13 = int_to_ptr.hbm [resolvable:$true] %s2796_s13 }
  0x3c   : > { %338 = vmatpush.msra.mxu0 %v314_v1  ;;  %2954 = vmatpush.msra.mxu2 %v314_v1  ;;  %v307_v8 = vld [vmem:[#allocation5 + $0x38] sm:$0xff]  ;;  %v306_v9 = vld [vmem:[#allocation5 + $0x30] sm:$0xff]  ;;  %v305_v10 = vld [vmem:[#allocation5 + $0x28] sm:$0xff]  ;;  %s3339_s20 = sshra.s32 %s2797_s13, 4  ;;  %s3345_s9 = scalar_lea.hbm %s5734_s4, 512  ;;  %s3340_s20 = int_to_ptr.hbm [resolvable:$true] %s3339_s20 }
  0x3d   : > { %v304_v11 = vld [vmem:[#allocation5 + $0x20] sm:$0xff]  ;;  %v303_v12 = vld [vmem:[#allocation5 + $0x18] sm:$0xff]  ;;  %v302_v13 = vld [vmem:[#allocation5 + $0x10] sm:$0xff]  ;;  %s3341_s5 = scalar_lea.hbm %s3340_s20, 256  ;;  %p3346_p11 = scmp.lt.s32.totalorder %s3340_s20, %s5734_s4 }
  0x3e   : > { %339 = vmatpush.msra.mxu0 %v313_v2  ;;  %2955 = vmatpush.msra.mxu2 %v313_v2  ;;  %v301_v14 = vld [vmem:[#allocation5 + $0x8] sm:$0xff]  ;;  %v300_v15 = vld [vmem:[#allocation5] sm:$0xff]  ;;  %v270_v20 = vld [vmem:[%s3558_s25 + $0x10] sm:$0xff]  ;;  %p3342_p1 = scmp.ne.s32.totalorder %s3340_s20, %s3341_s5  ;;  %p3347_p9 = scmp.lt.s32.totalorder %s3345_s9, %s3341_s5 }
  0x3f   : > { %v268_v16 = vld [vmem:[%s3558_s25] sm:$0xff]  ;;  %v269_v18 = vld [vmem:[%s3558_s25 + $0x8] sm:$0xff]  ;;  %v286_v21 = vld [vmem:[%s3558_s25 + $0x90] sm:$0xff] }
  0x40   : > { %340 = vmatpush.msra.mxu0 %v312_v3  ;;  %2956 = vmatpush.msra.mxu2 %v312_v3  ;;  %v284_v17 = vld [vmem:[%s3558_s25 + $0x80] sm:$0xff]  ;;  %v285_v19 = vld [vmem:[%s3558_s25 + $0x88] sm:$0xff]  ;;  %v271_v22 = vld [vmem:[%s3558_s25 + $0x18] sm:$0xff]  ;;  %p3343_p4 = pnand %p3342_p1, %p3522_p3  ;;  %p3348_p2 = por %p3347_p9, %p3346_p11 }
  0x41   : > { %v287_v23 = vld [vmem:[%s3558_s25 + $0x98] sm:$0xff]  ;;  %v272_v24 = vld [vmem:[%s3558_s25 + $0x20] sm:$0xff]  ;;  %v273_v26 = vld [vmem:[%s3558_s25 + $0x28] sm:$0xff] }
  0x42   : > { %341 = vmatpush.msra.mxu0 %v311_v4  ;;  %2957 = vmatpush.msra.mxu2 %v311_v4  ;;  %v288_v25 = vld [vmem:[%s3558_s25 + $0xa0] sm:$0xff]  ;;  %v289_v27 = vld [vmem:[%s3558_s25 + $0xa8] sm:$0xff]  ;;  %v274_v28 = vld [vmem:[%s3558_s25 + $0x30] sm:$0xff]  ;;  %p3344_p8 = pneg %p3343_p4 }
  0x43   : > { %v290_v29 = vld [vmem:[%s3558_s25 + $0xb0] sm:$0xff]  ;;  %v275_v30 = vld [vmem:[%s3558_s25 + $0x38] sm:$0xff]  ;;  %v276_v32 = vld [vmem:[%s3558_s25 + $0x40] sm:$0xff] }
  0x44   : > { %342 = vmatpush.msra.mxu0 %v310_v5  ;;  %2958 = vmatpush.msra.mxu2 %v310_v5  ;;  %v291_v31 = vld [vmem:[%s3558_s25 + $0xb8] sm:$0xff]  ;;  %v292_v33 = vld [vmem:[%s3558_s25 + $0xc0] sm:$0xff]  ;;  %v277_v34 = vld [vmem:[%s3558_s25 + $0x48] sm:$0xff]  ;;  %p3349_p10 = pnand %p3348_p2, %p3344_p8 }
  0x45   : > { %v293_v35 = vld [vmem:[%s3558_s25 + $0xc8] sm:$0xff]  ;;  %v278_v36 = vld [vmem:[%s3558_s25 + $0x50] sm:$0xff]  ;;  %v279_v38 = vld [vmem:[%s3558_s25 + $0x58] sm:$0xff] }
  0x46   : > { %343 = vmatpush.msra.mxu0 %v309_v6  ;;  %2959 = vmatpush.msra.mxu2 %v309_v6  ;;  %v294_v37 = vld [vmem:[%s3558_s25 + $0xd0] sm:$0xff]  ;;  %v295_v39 = vld [vmem:[%s3558_s25 + $0xd8] sm:$0xff]  ;;  %v280_v40 = vld [vmem:[%s3558_s25 + $0x60] sm:$0xff] }
  0x47   : > { %v296_v41 = vld [vmem:[%s3558_s25 + $0xe0] sm:$0xff]  ;;  %v281_v42 = vld [vmem:[%s3558_s25 + $0x68] sm:$0xff]  ;;  %v282_v44 = vld [vmem:[%s3558_s25 + $0x70] sm:$0xff] }
  0x48   : > { %344 = vmatpush.msra.mxu0 %v308_v7  ;;  %2960 = vmatpush.msra.mxu2 %v308_v7  ;;  %v297_v43 = vld [vmem:[%s3558_s25 + $0xe8] sm:$0xff]  ;;  %v298_v45 = vld [vmem:[%s3558_s25 + $0xf0] sm:$0xff]  ;;  %v331_v46 = vld [vmem:[#allocation7 + $0x78] sm:$0xff] }
  0x49   : > { %v283_v47 = vld [vmem:[%s3558_s25 + $0x78] sm:$0xff]  ;;  %1859 = vmatpush.msra.mxu1 %v331_v46  ;;  %2969 = vmatpush.msra.mxu3 %v331_v46  ;;  %v330_v49 = vld [vmem:[#allocation7 + $0x70] sm:$0xff]  ;;  %v329_v50 = vld [vmem:[#allocation7 + $0x68] sm:$0xff] }
  0x4a   : > { %345 = vmatpush.msra.mxu0 %v307_v8  ;;  %2961 = vmatpush.msra.mxu2 %v307_v8  ;;  %v299_v48 = vld [vmem:[%s3558_s25 + $0xf8] sm:$0xff]  ;;  %v3604_v51 = vld [vmem:[#allocation8] ss:$0 sm:$0xff]  ;;  %v326_v56 = vld [vmem:[#allocation7 + $0x50] sm:$0xff] }
  0x4b   : > { %1860 = vmatpush.msra.mxu1 %v330_v49  ;;  %2970 = vmatpush.msra.mxu3 %v330_v49  ;;  %v328_v52 = vld [vmem:[#allocation7 + $0x60] sm:$0xff]  ;;  %v327_v54 = vld [vmem:[#allocation7 + $0x58] sm:$0xff]  ;;  %v325_v58 = vld [vmem:[#allocation7 + $0x48] sm:$0xff] }
  0x4c   : > { %346 = vmatpush.msra.mxu0 %v306_v9  ;;  %2962 = vmatpush.msra.mxu2 %v306_v9  ;;  %v324_v61 = vld [vmem:[#allocation7 + $0x40] sm:$0xff]  ;;  %v323_v1 = vld [vmem:[#allocation7 + $0x38] sm:$0xff]  ;;  %v322_v7 = vld [vmem:[#allocation7 + $0x30] sm:$0xff] }
  0x4d   : > { %1861 = vmatpush.msra.mxu1 %v329_v50  ;;  %2971 = vmatpush.msra.mxu3 %v329_v50 }
  0x4e   : > { %347 = vmatpush.msra.mxu0 %v305_v10  ;;  %2963 = vmatpush.msra.mxu2 %v305_v10 }
  0x4f   : > { %1862 = vmatpush.msra.mxu1 %v328_v52  ;;  %2972 = vmatpush.msra.mxu3 %v328_v52 }
  0x50   : > { %348 = vmatpush.msra.mxu0 %v304_v11  ;;  %2964 = vmatpush.msra.mxu2 %v304_v11 }
  0x51   : > { %1863 = vmatpush.msra.mxu1 %v327_v54  ;;  %2973 = vmatpush.msra.mxu3 %v327_v54 }
  0x52   : > { %349 = vmatpush.msra.mxu0 %v303_v12  ;;  %2965 = vmatpush.msra.mxu2 %v303_v12  ;;  %v321_v12 = vld [vmem:[#allocation7 + $0x28] sm:$0xff] }
  0x53   : > { %1864 = vmatpush.msra.mxu1 %v326_v56  ;;  %2974 = vmatpush.msra.mxu3 %v326_v56 }
  0x54   : > { %350 = vmatpush.msra.mxu0 %v302_v13  ;;  %2966 = vmatpush.msra.mxu2 %v302_v13 }
  0x55   : > { %1865 = vmatpush.msra.mxu1 %v325_v58  ;;  %2975 = vmatpush.msra.mxu3 %v325_v58 }
  0x56   : > { %351 = vmatpush.msra.mxu0 %v301_v14  ;;  %2967 = vmatpush.msra.mxu2 %v301_v14 }
  0x57   : > { %1866 = vmatpush.msra.mxu1 %v324_v61  ;;  %2976 = vmatpush.msra.mxu3 %v324_v61 }
  0x58   : > { %352 = vmatpush.msra.mxu0 %v300_v15  ;;  %2968 = vmatpush.msra.mxu2 %v300_v15 }
  0x59   : > { %353 = vmatmul.f32.vlgmr.msra.gmra.mxu0 %v268_v16  ;;  %401 = vmatmul.f32.vlgmr.msra.gmra.mxu2 %v284_v17 }
  0x5a   : > { %1867 = vmatpush.msra.mxu1 %v323_v1  ;;  %2977 = vmatpush.msra.mxu3 %v323_v1 }
  0x5c   : > { %1868 = vmatpush.msra.mxu1 %v322_v7  ;;  %2978 = vmatpush.msra.mxu3 %v322_v7 }
  0x5e   : > { %1869 = vmatpush.msra.mxu1 %v321_v12  ;;  %2979 = vmatpush.msra.mxu3 %v321_v12 }
  0x61   : > { %356 = vmatmul.f32.gmra.mxu0 %v269_v18  ;;  %404 = vmatmul.f32.gmra.mxu2 %v285_v19  ;;  %v320_v18 = vld [vmem:[#allocation7 + $0x20] sm:$0xff] }
  0x62   : > { %1870 = vmatpush.msra.mxu1 %v320_v18  ;;  %2980 = vmatpush.msra.mxu3 %v320_v18 }
  0x69   : > { %359 = vmatmul.f32.gmra.mxu0 %v270_v20  ;;  %407 = vmatmul.f32.gmra.mxu2 %v286_v21 }
  0x71   : > { %362 = vmatmul.f32.gmra.mxu0 %v271_v22  ;;  %410 = vmatmul.f32.gmra.mxu2 %v287_v23  ;;  %v319_v23 = vld [vmem:[#allocation7 + $0x18] sm:$0xff] }
  0x72   : > { %1871 = vmatpush.msra.mxu1 %v319_v23  ;;  %2981 = vmatpush.msra.mxu3 %v319_v23 }
  0x79   : > { %365 = vmatmul.f32.gmra.mxu0 %v272_v24  ;;  %413 = vmatmul.f32.gmra.mxu2 %v288_v25 }
  0x81   : > { %368 = vmatmul.f32.gmra.mxu0 %v273_v26  ;;  %416 = vmatmul.f32.gmra.mxu2 %v289_v27 }
  0x89   : > { %371 = vmatmul.f32.gmra.mxu0 %v274_v28  ;;  %419 = vmatmul.f32.gmra.mxu2 %v290_v29  ;;  %v318_v28 = vld [vmem:[#allocation7 + $0x10] sm:$0xff] }
  0x8a   : > { %1872 = vmatpush.msra.mxu1 %v318_v28  ;;  %2982 = vmatpush.msra.mxu3 %v318_v28 }
  0x91   : > { %374 = vmatmul.f32.gmra.mxu0 %v275_v30  ;;  %422 = vmatmul.f32.gmra.mxu2 %v291_v31 }
  0x99   : > { %377 = vmatmul.f32.gmra.mxu0 %v276_v32  ;;  %425 = vmatmul.f32.gmra.mxu2 %v292_v33 }
  0xa1   : > { %380 = vmatmul.f32.gmra.mxu0 %v277_v34  ;;  %428 = vmatmul.f32.gmra.mxu2 %v293_v35  ;;  %v317_v34 = vld [vmem:[#allocation7 + $0x8] sm:$0xff] }
  0xa2   : > { %1873 = vmatpush.msra.mxu1 %v317_v34  ;;  %2983 = vmatpush.msra.mxu3 %v317_v34 }
  0xa9   : > { %383 = vmatmul.f32.gmra.mxu0 %v278_v36  ;;  %431 = vmatmul.f32.gmra.mxu2 %v294_v37 }
  0xb1   : > { %386 = vmatmul.f32.gmra.mxu0 %v279_v38  ;;  %434 = vmatmul.f32.gmra.mxu2 %v295_v39 }
  0xb9   : > { %389 = vmatmul.f32.gmra.mxu0 %v280_v40  ;;  %437 = vmatmul.f32.gmra.mxu2 %v296_v41  ;;  %v316_v40 = vld [vmem:[#allocation7] sm:$0xff] }
  0xba   : > { %1874 = vmatpush.msra.mxu1 %v316_v40  ;;  %2984 = vmatpush.msra.mxu3 %v316_v40 }
  0xc1   : > { %392 = vmatmul.f32.gmra.mxu0 %v281_v42  ;;  %440 = vmatmul.f32.gmra.mxu2 %v297_v43 }
  0xc9   : > { %395 = vmatmul.f32.gmra.mxu0 %v282_v44  ;;  %443 = vmatmul.f32.gmra.mxu2 %v298_v45 }
  0xd1   : > { %398 = vmatmul.f32.gmra.mxu0 %v283_v47  ;;  %446 = vmatmul.f32.gmra.mxu2 %v299_v48 }
  0xd6   : > { %v354_v53 = vpop.f32.mrf.mxu0 }
  0xd7   : > { %v3607_v55 = vadd.f32 %v3604_v51, %v354_v53 }
  0xd9   : > { %v3610_v57 = vmul.f32 0.70710677, %v3607_v55 }
  0xdb   : > { %v514_v59 = vmul.f32 %v3610_v57, %v3610_v57 }
  0xdc   : > { %v402_v60 = vpop.f32.mrf.mxu2 }
  0xdd   : > { %v3614_v62 = vmin.f32 %v514_v59, 16.0  ;;  %v3617_v63 = vadd.f32 %v3604_v51, %v402_v60 }
  0xde   : > { %v357_v0 = vpop.f32.mrf.mxu0 }
  0xdf   : > { %v3620_v2 = vmul.f32 0.70710677, %v3617_v63  ;;  %v3623_v3 = vadd.f32 %v3604_v51, %v357_v0  ;;  %v527_v4 = vmul.f32 3.8918573e-05, %v3614_v62  ;;  %v516_v9 = vmul.f32 2.1237322e-06, %v3614_v62 }
  0xe1   : > { %v1154_v5 = vmul.f32 %v3620_v2, %v3620_v2  ;;  %v3629_v6 = vmul.f32 0.70710677, %v3623_v3  ;;  %v528_v8 = vadd.f32 0.001143296, %v527_v4  ;;  %v517_v21 = vadd.f32 0.00028619796, %v516_v9 }
  0xe3   : > { %v3632_v10 = vmin.f32 %v1154_v5, 16.0  ;;  %v554_v11 = vmul.f32 %v3629_v6, %v3629_v6  ;;  %v529_v14 = vmul.f32 %v528_v8, %v3614_v62  ;;  %v518_v33 = vmul.f32 %v517_v21, %v3614_v62 }
  0xe4   : > { %v405_v13 = vpop.f32.mrf.mxu2 }
  0xe5   : > { %v1156_v15 = vmul.f32 2.1237322e-06, %v3632_v10  ;;  %v3638_v16 = vmin.f32 %v554_v11, 16.0  ;;  %v3641_v17 = vadd.f32 %v3604_v51, %v405_v13  ;;  %v530_v20 = vadd.f32 0.014752088, %v529_v14 }
  0xe6   : > { %v360_v19 = vpop.f32.mrf.mxu0  ;;  %v519_v46 = vadd.f32 0.0036580483, %v518_v33 }
  0xe7   : > { %v556_v22 = vmul.f32 2.1237322e-06, %v3638_v16  ;;  %v3645_v24 = vmul.f32 0.70710677, %v3641_v17  ;;  %v3648_v25 = vadd.f32 %v3604_v51, %v360_v19  ;;  %v531_v26 = vmul.f32 %v530_v20, %v3614_v62 }
  0xe8   : > { %v1157_v27 = vadd.f32 0.00028619796, %v1156_v15  ;;  %v520_v60 = vmul.f32 %v519_v46, %v3614_v62 }
  0xe9   : > { %v557_v29 = vadd.f32 0.00028619796, %v556_v22  ;;  %v1194_v30 = vmul.f32 %v3645_v24, %v3645_v24  ;;  %v3654_v31 = vmul.f32 0.70710677, %v3648_v25  ;;  %v532_v32 = vadd.f32 0.112945676, %v531_v26 }
  0xea   : > { %v1158_v38 = vmul.f32 %v1157_v27, %v3632_v10  ;;  %v521_v14 = vadd.f32 0.05243302, %v520_v60 }
  0xeb   : > { %v3657_v35 = vmin.f32 %v1194_v30, 16.0  ;;  %v594_v36 = vmul.f32 %v3654_v31, %v3654_v31  ;;  %v558_v41 = vmul.f32 %v557_v29, %v3638_v16  ;;  %v533_v45 = vmul.f32 %v532_v32, %v3614_v62 }
  0xec   : > { %v408_v37 = vpop.f32.mrf.mxu2  ;;  %v1159_v52 = vadd.f32 0.0036580483, %v1158_v38  ;;  %v3713_v30 = vmul.f32 0.5, %v3607_v55  ;;  %v522_v32 = vmul.f32 %v521_v14, %v3614_v62 }
  0xed   : > { %v3663_v39 = vadd.f32 %v3604_v51, %v408_v37  ;;  %v1196_v42 = vmul.f32 2.1237322e-06, %v3657_v35  ;;  %v3667_v43 = vmin.f32 %v594_v36, 16.0  ;;  %v559_v53 = vadd.f32 0.0036580483, %v558_v41 }
  0xee   : > { %v363_v44 = vpop.f32.mrf.mxu0  ;;  %v534_v56 = vadd.f32 0.4994258, %v533_v45  ;;  %v1160_v7 = vmul.f32 %v1159_v52, %v3632_v10  ;;  %v3725_v41 = vmul.f32 0.5, %v3617_v63  ;;  %v523_v52 = vadd.f32 0.18741608, %v522_v32 }
  0xef   : > { %v1197_v47 = vadd.f32 0.00028619796, %v1196_v42  ;;  %v596_v48 = vmul.f32 2.1237322e-06, %v3667_v43  ;;  %v3672_v49 = vmul.f32 0.70710677, %v3663_v39  ;;  %v3675_v50 = vadd.f32 %v3604_v51, %v363_v44 }
  0xf0   : > { %v560_v8 = vmul.f32 %v559_v53, %v3638_v16  ;;  %v535_v11 = vmul.f32 %v534_v56, %v3614_v62  ;;  %v1161_v21 = vadd.f32 0.05243302, %v1160_v7  ;;  %v3737_v53 = vmul.f32 0.5, %v3623_v3 }
  0xf1   : > { %v1234_v54 = vmul.f32 %v3672_v49, %v3672_v49  ;;  %v1198_v58 = vmul.f32 %v1197_v47, %v3657_v35  ;;  %v3681_v59 = vmul.f32 0.70710677, %v3675_v50  ;;  %v597_v61 = vadd.f32 0.00028619796, %v596_v48 }
  0xf2   : > { %v561_v22 = vadd.f32 0.05243302, %v560_v8  ;;  %v3706_v26 = vadd.f32 1.0, %v535_v11  ;;  %v1162_v55 = vmul.f32 %v1161_v21, %v3632_v10  ;;  %v3740_v63 = vmul.f32 0.5, %v3641_v17 }
  0xf3   : > { %v3684_v0 = vmin.f32 %v1234_v54, 16.0  ;;  %v634_v4 = vmul.f32 %v3681_v59, %v3681_v59  ;;  %v1199_v12 = vadd.f32 0.0036580483, %v1198_v58  ;;  %v598_v15 = vmul.f32 %v597_v61, %v3667_v43 }
  0xf4   : > { %v411_v1 = vpop.f32.mrf.mxu2  ;;  %v562_v42 = vmul.f32 %v561_v22, %v3638_v16  ;;  %3071 = vrcp.f32 %v3706_v26  ;;  %v3752_v17 = vmul.f32 0.5, %v3648_v25  ;;  %v3763_v21 = vmul.f32 3.8918573e-05, %v3632_v10 }
  0xf5   : > { %v3689_v5 = vadd.f32 %v3604_v51, %v411_v1  ;;  %v1236_v13 = vmul.f32 2.1237322e-06, %v3684_v0  ;;  %v3699_v19 = vmin.f32 %v634_v4, 16.0  ;;  %v1200_v27 = vmul.f32 %v1199_v12, %v3657_v35 }
  0xf6   : > { %v366_v9 = vpop.f32.mrf.mxu0  ;;  %v599_v33 = vadd.f32 0.0036580483, %v598_v15  ;;  %v1163_v1 = vadd.f32 0.18741608, %v1162_v55  ;;  %v563_v4 = vadd.f32 0.18741608, %v562_v42  ;;  %v524_v12 = vmul.f32 %v523_v52, %v3614_v62 }
  0xf7   : > { %v3697_v18 = vmul.f32 0.70710677, %v3689_v5  ;;  %v3702_v20 = vadd.f32 %v3604_v51, %v366_v9  ;;  %v1237_v28 = vadd.f32 0.00028619796, %v1236_v13  ;;  %v636_v36 = vmul.f32 2.1237322e-06, %v3699_v19 }
  0xf8   : > { %v1201_v45 = vadd.f32 0.05243302, %v1200_v27  ;;  %v600_v54 = vmul.f32 %v599_v33, %v3667_v43  ;;  %v564_v62 = vmul.f32 %v563_v4, %v3638_v16  ;;  %vm542_vm1 = vweird.f32 %v3706_v26 }
  0xf9   : > { %v1274_v23 = vmul.f32 %v3697_v18, %v3697_v18  ;;  %v3710_v29 = vmul.f32 0.70710677, %v3702_v20  ;;  %v1238_v46 = vmul.f32 %v1237_v28, %v3684_v0  ;;  %v637_v56 = vadd.f32 0.00028619796, %v636_v36 }
  0xfa   : > { %v1202_v3 = vmul.f32 %v1201_v45, %v3657_v35  ;;  %v3756_v11 = vpop.eup %3071  ;;  %v601_v13 = vadd.f32 0.05243302, %v600_v54  ;;  %v1164_v28 = vmul.f32 %v1163_v1, %v3632_v10  ;;  %v525_v54 = vadd.f32 1.1283791, %v524_v12 }
  0xfb   : > { %v3717_v37 = vmin.f32 %v1274_v23, 16.0  ;;  %v674_v38 = vmul.f32 %v3710_v29, %v3710_v29  ;;  %v1239_v8 = vadd.f32 0.0036580483, %v1238_v46  ;;  %v638_v22 = vmul.f32 %v637_v56, %v3699_v19 }
  0xfc   : > { %v414_v34 = vpop.f32.mrf.mxu2  ;;  %v1203_v36 = vadd.f32 0.18741608, %v1202_v3  ;;  %v538_v52 = vmul.f32 %v3756_v11, %v3706_v26  ;;  %v565_v1 = vadd.f32 1.1283791, %v564_v62  ;;  %v3803_v62 = vmul.f32 %v525_v54, %v3610_v57 }
  0xfd   : > { %v3722_v40 = vadd.f32 %v3604_v51, %v414_v34  ;;  %v3731_v47 = vmin.f32 %v674_v38, 16.0  ;;  %v1276_v58 = vmul.f32 2.1237322e-06, %v3717_v37  ;;  %v3775_v38 = vmul.f32 0.5, %v3663_v39 }
  0xfe   : > { %v369_v44 = vpop.f32.mrf.mxu0  ;;  %v1240_v55 = vmul.f32 %v1239_v8, %v3684_v0  ;;  %v639_v56 = vadd.f32 0.0036580483, %v638_v22  ;;  %v1204_v3 = vmul.f32 %v1203_v36, %v3657_v35  ;;  %v3797_v22 = vmul.f32 0.5, %v3675_v50 }
  0xff   : > { %v3734_v48 = vmul.f32 0.70710677, %v3722_v40  ;;  %v3747_v61 = vadd.f32 %v3604_v51, %v369_v44  ;;  %v676_v7 = vmul.f32 2.1237322e-06, %v3731_v47  ;;  %v1277_v23 = vadd.f32 0.00028619796, %v1276_v58 }
 0x100   : > { %5746 = vst [vmem:[#allocation15_spill] sm:$0xff] %v3775_v38  ;;  %v602_v44 = vmul.f32 %v601_v13, %v3667_v43  ;;  %v1241_v8 = vadd.f32 0.05243302, %v1240_v55  ;;  %v3807_v36 = vmul.f32 0.5, %v3689_v5  ;;  %vm543_vm0 = vweird.f32 %v3756_v11 }
 0x101   : > { %v1314_v60 = vmul.f32 %v3734_v48, %v3734_v48  ;;  %v3760_v14 = vmul.f32 0.70710677, %v3747_v61  ;;  %v677_v32 = vadd.f32 0.00028619796, %v676_v7  ;;  %v1278_v58 = vmul.f32 %v1277_v23, %v3717_v37  ;;  %5747 = vst [vmem:[#allocation16_spill] sm:$0xff] %v3797_v22  ;;  %vm3856_vm2 = vmor %vm542_vm1, %vm543_vm0 }
 0x102   : > { %5748 = vst [vmem:[#allocation17_spill] sm:$0xff] %v3807_v36  ;;  %v1242_v22 = vmul.f32 %v1241_v8, %v3684_v0 }
 0x103   : > { %v3754_v9 = vmin.f32 %v1314_v60, 16.0  ;;  %v714_v33 = vmul.f32 %v3760_v14, %v3760_v14  ;;  %v1165_v60 = vadd.f32 1.1283791, %v1164_v28  ;;  %v678_v4 = vmul.f32 %v677_v32, %v3731_v47 }
 0x104   : > { %v417_v15 = vpop.f32.mrf.mxu2  ;;  %v539_v28 = vsub.f32 1.0, %v538_v52  ;;  %v640_v32 = vmul.f32 %v639_v56, %v3699_v19  ;;  %v3821_v56 = vmul.f32 %v565_v1, %v3629_v6  ;;  %v3835_v6 = vmul.f32 0.5, %v3722_v40 }
 0x105   : > { %v1316_v25 = vmul.f32 2.1237322e-06, %v3754_v9  ;;  %v3768_v27 = vadd.f32 %v3604_v51, %v417_v15  ;;  %v3779_v45 = vmin.f32 %v714_v33, 16.0  ;;  %v603_v15 = vadd.f32 0.18741608, %v602_v44 }
 0x106   : > { %v372_v34 = vpop.f32.mrf.mxu0  ;;  %v1279_v33 = vadd.f32 0.0036580483, %v1278_v58  ;;  %v679_v55 = vadd.f32 0.0036580483, %v678_v4  ;;  %v1205_v44 = vadd.f32 1.1283791, %v1204_v3  ;;  %v3818_v54 = vmul.f32 %v1165_v60, %v3620_v2 }
 0x107   : > { %v1317_v42 = vadd.f32 0.00028619796, %v1316_v25  ;;  %v3782_v46 = vadd.f32 %v3604_v51, %v372_v34  ;;  %v3788_v39 = vmul.f32 0.70710677, %v3768_v27  ;;  %v716_v7 = vmul.f32 2.1237322e-06, %v3779_v45 }
 0x108   : > { %v604_v5 = vmul.f32 %v603_v15, %v3667_v43  ;;  %v540_v58 = vmul.f32 %v3756_v11, %v539_v28  ;;  %v641_v4 = vadd.f32 0.05243302, %v640_v32  ;;  %v680_v2 = vmul.f32 %v679_v55, %v3731_v47  ;;  %5750 = vst [vmem:[#allocation19_spill] sm:$0xff] %v3835_v6 }
 0x109   : > { %v1318_v13 = vmul.f32 %v1317_v42, %v3754_v9  ;;  %v1354_v12 = vmul.f32 %v3788_v39, %v3788_v39  ;;  %v3800_v23 = vmul.f32 0.70710677, %v3782_v46  ;;  %v717_v34 = vadd.f32 0.00028619796, %v716_v7 }
 0x10a   : > { %v1280_v7 = vmul.f32 %v1279_v33, %v3717_v37  ;;  %v3839_v1 = vmul.f32 %v1205_v44, %v3645_v24  ;;  %v605_v28 = vadd.f32 1.1283791, %v604_v5  ;;  %v541_v32 = vadd.f32 %v3756_v11, %v540_v58 }
 0x10b   : > { %v3809_v42 = vmin.f32 %v1354_v12, 16.0  ;;  %v1319_v52 = vadd.f32 0.0036580483, %v1318_v13  ;;  %v754_v57 = vmul.f32 %v3800_v23, %v3800_v23  ;;  %v718_v3 = vmul.f32 %v717_v34, %v3779_v45 }
 0x10c   : > { %v420_v25 = vpop.f32.mrf.mxu2  ;;  %v3831_v13 = vmul.f32 0.5, %v3702_v20  ;;  %v1243_v12 = vadd.f32 0.18741608, %v1242_v22  ;;  %v642_v40 = vmul.f32 %v641_v4, %v3699_v19  ;;  %v1281_v33 = vadd.f32 0.05243302, %v1280_v7 }
 0x10d   : > { %v3812_v50 = vadd.f32 %v3604_v51, %v420_v25  ;;  %v1356_v60 = vmul.f32 2.1237322e-06, %v3809_v42  ;;  %v1320_v15 = vmul.f32 %v1319_v52, %v3754_v9  ;;  %v3842_v25 = vmin.f32 %v754_v57, 16.0 }
 0x10e   : > { %5749 = vst [vmem:[#allocation18_spill] sm:$0xff] %v3831_v13  ;;  %v3850_v34 = vmul.f32 0.5, %v3747_v61  ;;  %v719_v24 = vadd.f32 0.0036580483, %v718_v3  ;;  %v375_v22 = vpop.f32.mrf.mxu0  ;;  %v681_v55 = vadd.f32 0.05243302, %v680_v2  ;;  %v1244_v57 = vmul.f32 %v1243_v12, %v3684_v0 }
 0x10f   : > { %v3828_v8 = vmul.f32 0.70710677, %v3812_v50  ;;  %v1357_v44 = vadd.f32 0.00028619796, %v1356_v60  ;;  %v546_v52 = vand.u32 2147483647, %v3706_v26  ;;  %v545_v7 = vsel %vm3856_vm2, %v3756_v11, %v541_v32 }
 0x110   : > { %5751 = vst [vmem:[#allocation20_spill] sm:$0xff] %v3850_v34  ;;  %v1321_v5 = vadd.f32 0.05243302, %v1320_v15  ;;  %v756_v58 = vmul.f32 2.1237322e-06, %v3842_v25  ;;  %v548_v61 = vand.u32 2147483648, %v3706_v26  ;;  %v3867_v3 = vadd.f32 %v3604_v51, %v375_v22 }
 0x111   : > { %v1394_v20 = vmul.f32 %v3828_v8, %v3828_v8  ;;  %v1168_v2 = vadd.f32 0.001143296, %v3763_v21  ;;  %v643_v60 = vadd.f32 0.18741608, %v642_v40  ;;  %v1282_v12 = vmul.f32 %v1281_v33, %v3717_v37 }
 0x112   : > { %v720_v15 = vmul.f32 %v719_v24, %v3779_v45  ;;  %v549_v34 = vor.u32 1.1754944e-38, %v548_v61  ;;  %v682_v13 = vmul.f32 %v681_v55, %v3731_v47  ;;  %v1358_v26 = vmul.f32 %v1357_v44, %v3809_v42 }
 0x113   : > { %v3861_v4 = vmin.f32 %v1394_v20, 16.0  ;;  %vm547_vm3 = vcmp.eq.f32.partialorder %v546_v52, 8.507059e+37  ;;  %v3875_v20 = vmul.f32 0.70710677, %v3867_v3  ;;  %v1322_v11 = vmul.f32 %v1321_v5, %v3754_v9 }
 0x114   : > { %v757_v6 = vadd.f32 0.00028619796, %v756_v58  ;;  %v550_v32 = vsel %vm547_vm3, %v549_v34, %v545_v7  ;;  %v1169_v21 = vmul.f32 %v1168_v2, %v3632_v10  ;;  %v1245_v40 = vadd.f32 1.1283791, %v1244_v57 }
 0x115   : > { %v1396_v33 = vmul.f32 2.1237322e-06, %v3861_v4  ;;  %v551_v24 = vmul.f32 %v550_v32, %v3803_v62  ;;  %v794_v22 = vmul.f32 %v3875_v20, %v3875_v20  ;;  %v644_v55 = vmul.f32 %v643_v60, %v3699_v19 }
 0x116   : > { %v1283_v44 = vadd.f32 0.18741608, %v1282_v12  ;;  %v721_v52 = vadd.f32 0.05243302, %v720_v15  ;;  %v1170_v61 = vadd.f32 0.014752088, %v1169_v21  ;;  %v3885_v36 = vmul.f32 %v605_v28, %v3654_v31 }
 0x117   : > { %v683_v5 = vadd.f32 0.18741608, %v682_v13  ;;  %v1359_v34 = vadd.f32 0.0036580483, %v1358_v26  ;;  %v2914_v58 = vclamps-f32 %v551_v24, 1.0  ;;  %v758_v57 = vmul.f32 %v757_v6, %v3842_v25 }
 0x118   : > { %v1323_v7 = vadd.f32 0.18741608, %v1322_v11  ;;  %v1171_v2 = vmul.f32 %v1170_v61, %v3632_v10  ;;  %v567_v62 = vmul.f32 3.8918573e-05, %v3638_v16  ;;  %v3891_v32 = vmul.f32 0.5, %v3768_v27 }
 0x119   : > { %v1397_v60 = vadd.f32 0.00028619796, %v1396_v33  ;;  %v1794_v12 = vadd.f32 1.0, %v2914_v58  ;;  %v3893_v15 = vmin.f32 %v794_v22, 16.0  ;;  %v645_v21 = vadd.f32 1.1283791, %v644_v55 }
 0x11a   : > { %5754 = vst [vmem:[#allocation21_spill] sm:$0xff] %v3891_v32  ;;  %v1284_v31 = vmul.f32 %v1283_v44, %v3717_v37  ;;  %v722_v13 = vmul.f32 %v721_v52, %v3779_v45  ;;  %v1172_v28 = vadd.f32 0.112945676, %v1171_v2  ;;  %v684_v26 = vmul.f32 %v683_v5, %v3731_v47  ;;  %v423_v52 = vpop.f32.mrf.mxu2 }
 0x11b   : > { %v1360_v11 = vmul.f32 %v1359_v34, %v3809_v42  ;;  %v1826_v6 = vmul.f32 %v1794_v12, %v3713_v30  ;;  %v568_v24 = vadd.f32 0.001143296, %v567_v62  ;;  %v1324_v27 = vmul.f32 %v1323_v7, %v3754_v9 }
 0x11c   : > { %v759_v61 = vadd.f32 0.0036580483, %v758_v57  ;;  %v1173_v33 = vmul.f32 %v1172_v28, %v3632_v10  ;;  %v1207_v22 = vmul.f32 3.8918573e-05, %v3657_v35  ;;  %v1398_v55 = vmul.f32 %v1397_v60, %v3861_v4 }
 0x11d   : > { %1875 = vmatmul.f32.vlgmr.msra.gmra.mxu1 %v1826_v6  ;;  %v796_v44 = vmul.f32 2.1237322e-06, %v3893_v15  ;;  %v569_v5 = vmul.f32 %v568_v24, %v3638_v16  ;;  %v607_v34 = vmul.f32 3.8918573e-05, %v3667_v43  ;;  %v723_v58 = vadd.f32 0.18741608, %v722_v13 }
 0x11e   : > { %v1174_v30 = vadd.f32 0.4994258, %v1173_v33  ;;  %v3908_v2 = vadd.f32 %v3604_v51, %v423_v52  ;;  %v1208_v7 = vadd.f32 0.001143296, %v1207_v22  ;;  %v3911_v57 = vmul.f32 %v1245_v40, %v3672_v49 }
 0x11f   : > { %v1361_v62 = vadd.f32 0.05243302, %v1360_v11  ;;  %v570_v12 = vadd.f32 0.014752088, %v569_v5  ;;  %v608_v60 = vadd.f32 0.001143296, %v607_v34  ;;  %v760_v6 = vmul.f32 %v759_v61, %v3842_v25 }
 0x120   : > { %v1285_v28 = vadd.f32 1.1283791, %v1284_v31  ;;  %v1175_v32 = vmul.f32 %v1174_v30, %v3632_v10  ;;  %v3916_v24 = vmul.f32 0.70710677, %v3908_v2  ;;  %v1399_v13 = vadd.f32 0.0036580483, %v1398_v55 }
 0x121   : > { %v797_v33 = vadd.f32 0.00028619796, %v796_v44  ;;  %v571_v52 = vmul.f32 %v570_v12, %v3638_v16  ;;  %v1209_v22 = vmul.f32 %v1208_v7, %v3657_v35  ;;  %v685_v38 = vadd.f32 1.1283791, %v684_v26 }
 0x122   : > { %v1325_v49 = vadd.f32 1.1283791, %v1324_v27  ;;  %v724_v40 = vmul.f32 %v723_v58, %v3779_v45  ;;  %v3921_v11 = vadd.f32 1.0, %v1175_v32  ;;  %v1362_v31 = vmul.f32 %v1361_v62, %v3809_v42 }
 0x123   : > { %v572_v61 = vadd.f32 0.112945676, %v571_v52  ;;  %v1210_v5 = vadd.f32 0.014752088, %v1209_v22  ;;  %v609_v10 = vmul.f32 %v608_v60, %v3667_v43  ;;  %v3926_v34 = vmul.f32 %v645_v21, %v3681_v59  ;;  %v378_v60 = vpop.f32.mrf.mxu0 }
 0x124   : > { %v3929_v55 = vmul.f32 0.5, %v3782_v46  ;;  %3073 = vrcp.f32 %v3921_v11  ;;  %v1434_v26 = vmul.f32 %v3916_v24, %v3916_v24  ;;  %v761_v27 = vadd.f32 0.05243302, %v760_v6 }
 0x125   : > { %v1400_v32 = vmul.f32 %v1399_v13, %v3861_v4  ;;  %v798_v44 = vmul.f32 %v797_v33, %v3893_v15  ;;  %v573_v58 = vmul.f32 %v572_v61, %v3638_v16  ;;  %v3938_v30 = vmul.f32 %v1285_v28, %v3697_v18 }
 0x126   : > { %5755 = vst [vmem:[#allocation22_spill] sm:$0xff] %v3929_v55  ;;  %v725_v59 = vadd.f32 1.1283791, %v724_v40  ;;  %v3941_v21 = vmul.f32 0.5, %v3812_v50  ;;  %v1211_v46 = vmul.f32 %v1210_v5, %v3657_v35  ;;  %v3945_v7 = vmul.f32 %v685_v38, %v3710_v29 }
 0x127   : > { %v3948_v62 = vmul.f32 %v1325_v49, %v3734_v48  ;;  %v1363_v12 = vadd.f32 0.18741608, %v1362_v31  ;;  %v610_v6 = vadd.f32 0.014752088, %v609_v10  ;;  %v3950_v13 = vmin.f32 %v1434_v26, 16.0 }
 0x128   : > { %5756 = vst [vmem:[#allocation23_spill] sm:$0xff] %v3941_v21  ;;  %v574_v33 = vadd.f32 0.4994258, %v573_v58  ;;  %v3953_v18 = vadd.f32 %v3604_v51, %v378_v60  ;;  %v1212_v28 = vadd.f32 0.112945676, %v1211_v46  ;;  %v762_v50 = vmul.f32 %v761_v27, %v3842_v25  ;;  %v426_v46 = vpop.f32.mrf.mxu2 }
 0x129   : > { %v1401_v52 = vadd.f32 0.05243302, %v1400_v32  ;;  %v3957_v22 = vmul.f32 0.5, %v3867_v3  ;;  %v799_v29 = vadd.f32 0.0036580483, %v798_v44  ;;  %v3960_v48 = vmul.f32 %v725_v59, %v3760_v14 }
 0x12a   : > { %v3074_v38 = vpop.eup %3073  ;;  %v575_v49 = vmul.f32 %v574_v33, %v3638_v16  ;;  %v3964_v40 = vmul.f32 0.70710677, %v3953_v18  ;;  %v1213_v31 = vmul.f32 %v1212_v28, %v3657_v35  ;;  %v1364_v61 = vmul.f32 %v1363_v12, %v3809_v42 }
 0x12b   : > { %5757 = vst [vmem:[#allocation24_spill] sm:$0xff] %v3957_v22  ;;  %v1178_v5 = vmul.f32 %v3074_v38, %v3921_v11  ;;  %v611_v10 = vmul.f32 %v610_v6, %v3667_v43  ;;  %v1247_v3 = vmul.f32 3.8918573e-05, %v3684_v0  ;;  %v1436_v26 = vmul.f32 2.1237322e-06, %v3950_v13 }
 0x12c   : > { %5758 = vst [vmem:[#allocation25_spill] sm:$0xff] %v3960_v48  ;;  %v3972_v27 = vadd.f32 1.0, %v575_v49  ;;  %v834_v16 = vmul.f32 %v3964_v40, %v3964_v40  ;;  %v1214_v14 = vadd.f32 0.4994258, %v1213_v31  ;;  %v763_v32 = vadd.f32 0.18741608, %v762_v50 }
 0x12d   : > { %v1402_v44 = vmul.f32 %v1401_v52, %v3861_v4  ;;  %v800_v58 = vmul.f32 %v799_v29, %v3893_v15  ;;  %v1179_v59 = vsub.f32 1.0, %v1178_v5  ;;  %vm1183_vm4 = vweird.f32 %v3074_v38 }
 0x12e   : > { %v1186_v12 = vand.u32 2147483647, %v3921_v11  ;;  %v1188_v60 = vand.u32 2147483648, %v3921_v11  ;;  %3075 = vrcp.f32 %v3972_v27  ;;  %v3981_v33 = vmin.f32 %v834_v16, 16.0 }
 0x12f   : > { %v1180_v6 = vmul.f32 %v3074_v38, %v1179_v59  ;;  %v1215_v28 = vmul.f32 %v1214_v14, %v3657_v35  ;;  %v612_v49 = vadd.f32 0.112945676, %v611_v10  ;;  %v1365_v50 = vadd.f32 1.1283791, %v1364_v61 }
 0x130   : > { %v1437_v31 = vadd.f32 0.00028619796, %v1436_v26  ;;  %v3985_v52 = vadd.f32 %v3604_v51, %v426_v46  ;;  %v1248_v29 = vadd.f32 0.001143296, %v1247_v3  ;;  %v1403_v5 = vadd.f32 0.18741608, %v1402_v44 }
 0x131   : > { %v1181_v22 = vadd.f32 %v3074_v38, %v1180_v6  ;;  %vm1182_vm5 = vweird.f32 %v3921_v11  ;;  %v3988_v21 = vadd.f32 1.0, %v1215_v28  ;;  %v3991_v55 = vmul.f32 %v763_v32, %v3842_v25 }
 0x132   : > { %v801_v16 = vadd.f32 0.05243302, %v800_v58  ;;  %vm1184_vm6 = vmor %vm1182_vm5, %vm1183_vm4  ;;  %v1189_v35 = vor.u32 1.1754944e-38, %v1188_v60  ;;  %v836_v61 = vmul.f32 2.1237322e-06, %v3981_v33  ;;  %vm1187_vm7 = vcmp.eq.f32.partialorder %v1186_v12, 8.507059e+37 }
 0x133   : > { %v1185_v10 = vsel %vm1184_vm6, %v3074_v38, %v1181_v22  ;;  %3077 = vrcp.f32 %v3988_v21  ;;  %v613_v3 = vmul.f32 %v612_v49, %v3667_v43  ;;  %v1438_v11 = vmul.f32 %v1437_v31, %v3950_v13 }
 0x134   : > { %v3076_v26 = vpop.eup %3075  ;;  %v1190_v14 = vsel %vm1187_vm7, %v1189_v35, %v1185_v10  ;;  %v3999_v44 = vmul.f32 0.70710677, %v3985_v52  ;;  %v1249_v32 = vmul.f32 %v1248_v29, %v3684_v0  ;;  %v4003_v58 = vmul.f32 %v1365_v50, %v3788_v39  ;;  %v381_v29 = vpop.f32.mrf.mxu0 }
 0x135   : > { %v4006_v59 = vmul.f32 %v1403_v5, %v3861_v4  ;;  %v1191_v22 = vmul.f32 %v1190_v14, %v3818_v54  ;;  %v578_v38 = vmul.f32 %v3076_v26, %v3972_v27  ;;  %v802_v46 = vmul.f32 %v801_v16, %v3893_v15 }
 0x136   : > { %5759 = vst [vmem:[#allocation26_spill] sm:$0xff] %v4003_v58  ;;  %v586_v12 = vand.u32 2147483647, %v3972_v27  ;;  %v588_v60 = vand.u32 2147483648, %v3972_v27  ;;  %v837_v6 = vadd.f32 0.00028619796, %v836_v61  ;;  %vm582_vm8 = vweird.f32 %v3972_v27 }
 0x137   : > { %v2930_v28 = vclamps-f32 %v1191_v22, 1.0  ;;  %v579_v49 = vsub.f32 1.0, %v578_v38  ;;  %v614_v31 = vadd.f32 0.4994258, %v613_v3  ;;  %v647_v39 = vmul.f32 3.8918573e-05, %v3699_v19 }
 0x138   : > { %v1439_v50 = vadd.f32 0.0036580483, %v1438_v11  ;;  %v1474_v54 = vmul.f32 %v3999_v44, %v3999_v44  ;;  %v1250_v5 = vadd.f32 0.014752088, %v1249_v32  ;;  %vm583_vm9 = vweird.f32 %v3076_v26 }
 0x139   : > { %v3078_v35 = vpop.eup %3077  ;;  %v1810_v16 = vadd.f32 1.0, %v2930_v28  ;;  %v580_v10 = vmul.f32 %v3076_v26, %v579_v49  ;;  %v615_v14 = vmul.f32 %v614_v31, %v3667_v43  ;;  %vm4018_vm10 = vcmp.eq.f32.partialorder %v586_v12, 8.507059e+37  ;;  %vm584_vm11 = vmor %vm582_vm8, %vm583_vm9 }
 0x13a   : > { %v589_v3 = vor.u32 1.1754944e-38, %v588_v60  ;;  %v838_v11 = vmul.f32 %v837_v6, %v3981_v33  ;;  %v1218_v22 = vmul.f32 %v3078_v35, %v3988_v21  ;;  %v4028_v32 = vadd.f32 %v3604_v51, %v381_v29 }
 0x13b   : > { %v1842_v38 = vmul.f32 %v1810_v16, %v3725_v41  ;;  %v581_v58 = vadd.f32 %v3076_v26, %v580_v10  ;;  %v4025_v48 = vadd.f32 1.0, %v615_v14  ;;  %v1228_v12 = vand.u32 2147483648, %v3988_v21 }
 0x13c   : > { %v1219_v43 = vsub.f32 1.0, %v1218_v22  ;;  %v1251_v60 = vmul.f32 %v1250_v5, %v3684_v0  ;;  %v648_v28 = vadd.f32 0.001143296, %v647_v39  ;;  %v1226_v49 = vand.u32 2147483647, %v3988_v21 }
 0x13d   : > { %1923 = vmatmul.f32.vlgmr.msra.gmra.mxu3 %v1842_v38  ;;  %v585_v6 = vsel %vm584_vm11, %v3076_v26, %v581_v58  ;;  %v4035_v41 = vmin.f32 %v1474_v54, 16.0  ;;  %3079 = vrcp.f32 %v4025_v48  ;;  %v839_v29 = vadd.f32 0.0036580483, %v838_v11 }
 0x13e   : > { %v590_v31 = vsel %vm4018_vm10, %v589_v3, %v585_v6  ;;  %v1220_v27 = vmul.f32 %v3078_v35, %v1219_v43  ;;  %vm1223_vm12 = vweird.f32 %v3078_v35  ;;  %v803_v16 = vadd.f32 0.18741608, %v802_v46 }
 0x13f   : > { %v1440_v10 = vmul.f32 %v1439_v50, %v3950_v13  ;;  %v591_v5 = vmul.f32 %v590_v31, %v3821_v56  ;;  %v4043_v39 = vmul.f32 0.70710677, %v4028_v32  ;;  %vm1222_vm13 = vweird.f32 %v3988_v21 }
 0x140   : > { %v1221_v26 = vadd.f32 %v3078_v35, %v1220_v27  ;;  %v1229_v58 = vor.u32 1.1754944e-38, %v1228_v12  ;;  %v1252_v54 = vadd.f32 0.112945676, %v1251_v60  ;;  %vm1224_vm14 = vmor %vm1222_vm13, %vm1223_vm12  ;;  %v1476_v61 = vmul.f32 2.1237322e-06, %v4035_v41 }
 0x141   : > { %v2915_v14 = vclamps-f32 %v591_v5, 1.0  ;;  %v874_v3 = vmul.f32 %v4043_v39, %v4043_v39  ;;  %v649_v46 = vmul.f32 %v648_v28, %v3699_v19  ;;  %v840_v50 = vmul.f32 %v839_v29, %v3981_v33 }
 0x142   : > { %v1225_v56 = vsel %vm1224_vm14, %v3078_v35, %v1221_v26  ;;  %vm1227_vm15 = vcmp.eq.f32.partialorder %v1226_v49, 8.507059e+37  ;;  %v1253_v11 = vmul.f32 %v1252_v54, %v3684_v0  ;;  %v765_v60 = vadd.f32 1.1283791, %v3991_v55 }
 0x143   : > { %v3080_v22 = vpop.eup %3079  ;;  %v1795_v38 = vadd.f32 1.0, %v2915_v14  ;;  %v1230_v21 = vsel %vm1227_vm15, %v1229_v58, %v1225_v56  ;;  %v4052_v43 = vmin.f32 %v874_v3, 16.0  ;;  %v650_v12 = vadd.f32 0.014752088, %v649_v46  ;;  %v429_v14 = vpop.f32.mrf.mxu2 }
 0x144   : > { %v1405_v6 = vadd.f32 1.1283791, %v4006_v59  ;;  %v1231_v31 = vmul.f32 %v1230_v21, %v3839_v1  ;;  %v618_v28 = vmul.f32 %v3080_v22, %v4025_v48  ;;  %v804_v29 = vmul.f32 %v803_v16, %v3893_v15 }
 0x145   : > { %v1827_v35 = vmul.f32 %v1795_v38, %v3737_v53  ;;  %v1477_v49 = vadd.f32 0.00028619796, %v1476_v61  ;;  %v1254_v27 = vadd.f32 0.4994258, %v1253_v11  ;;  %v1441_v5 = vadd.f32 0.05243302, %v1440_v10 }
 0x146   : > { %v841_v26 = vadd.f32 0.05243302, %v840_v50  ;;  %v2931_v58 = vclamps-f32 %v1231_v31, 1.0  ;;  %v619_v54 = vsub.f32 1.0, %v618_v28  ;;  %v628_v55 = vand.u32 2147483648, %v4025_v48 }
 0x147   : > { %1878 = vmatmul.f32.gmra.mxu1 %v1827_v35  ;;  %v876_v59 = vmul.f32 2.1237322e-06, %v4052_v43  ;;  %v1255_v1 = vmul.f32 %v1254_v27, %v3684_v0  ;;  %v651_v3 = vmul.f32 %v650_v12, %v3699_v19  ;;  %vm623_vm0 = vweird.f32 %v3080_v22 }
 0x148   : > { %v1811_v46 = vadd.f32 1.0, %v2931_v58  ;;  %v620_v16 = vmul.f32 %v3080_v22, %v619_v54  ;;  %v626_v53 = vand.u32 2147483647, %v4025_v48  ;;  %v1478_v10 = vmul.f32 %v1477_v49, %v4035_v41 }
 0x149   : > { %vm622_vm1 = vweird.f32 %v4025_v48  ;;  %v4067_v61 = vadd.f32 1.0, %v1255_v1  ;;  %v4070_v50 = vadd.f32 %v3604_v51, %v429_v14  ;;  %v652_v0 = vadd.f32 0.112945676, %v651_v3 }
 0x14a   : > { %v1843_v56 = vmul.f32 %v1811_v46, %v3740_v63  ;;  %v621_v11 = vadd.f32 %v3080_v22, %v620_v16  ;;  %v1287_v38 = vmul.f32 3.8918573e-05, %v3717_v37  ;;  %v1442_v21 = vmul.f32 %v1441_v5, %v3950_v13  ;;  %vm624_vm2 = vmor %vm622_vm1, %vm623_vm0 }
 0x14b   : > { %v629_v12 = vor.u32 1.1754944e-38, %v628_v55  ;;  %v877_v31 = vadd.f32 0.00028619796, %v876_v59  ;;  %3081 = vrcp.f32 %v4067_v61  ;;  %v4077_v48 = vmul.f32 %v765_v60, %v3800_v23  ;;  %v384_v23 = vpop.f32.mrf.mxu0 }
 0x14c   : > { %v4080_v28 = vmul.f32 0.5, %v3908_v2  ;;  %1926 = vmatmul.f32.gmra.mxu3 %v1843_v56  ;;  %v625_v51 = vsel %vm624_vm2, %v3080_v22, %v621_v11  ;;  %vm627_vm3 = vcmp.eq.f32.partialorder %v626_v53, 8.507059e+37  ;;  %v805_v63 = vadd.f32 1.1283791, %v804_v29 }
 0x14d   : > { %v1479_v35 = vadd.f32 0.0036580483, %v1478_v10  ;;  %v630_v49 = vsel %vm627_vm3, %v629_v12, %v625_v51  ;;  %v653_v27 = vmul.f32 %v652_v0, %v3699_v19  ;;  %v842_v5 = vmul.f32 %v841_v26, %v3981_v33 }
 0x14e   : > { %v631_v58 = vmul.f32 %v630_v49, %v3885_v36  ;;  %v4086_v54 = vmul.f32 0.70710677, %v4070_v50  ;;  %v1288_v60 = vadd.f32 0.001143296, %v1287_v38  ;;  %v4089_v2 = vmul.f32 %v1405_v6, %v3828_v8  ;;  %v4102_v6 = vld [vmem:[#allocation8] ss:$0 sm:$0xff] }
 0x14f   : > { %v1443_v14 = vadd.f32 0.18741608, %v1442_v21  ;;  %v878_v22 = vmul.f32 %v877_v31, %v4052_v43  ;;  %v654_v29 = vadd.f32 0.4994258, %v653_v27  ;;  %v4093_v55 = vmul.f32 0.5, %v3953_v18 }
 0x150   : > { %v2916_v59 = vclamps-f32 %v631_v58, 1.0  ;;  %v1289_v26 = vmul.f32 %v1288_v60, %v3717_v37  ;;  %v687_v36 = vmul.f32 3.8918573e-05, %v3731_v47  ;;  %v4098_v3 = vmul.f32 %v805_v63, %v3875_v20 }
 0x151   : > { %v3082_v1 = vpop.eup %3081  ;;  %v1480_v46 = vmul.f32 %v1479_v35, %v4035_v41  ;;  %v655_v8 = vmul.f32 %v654_v29, %v3699_v19  ;;  %v4105_v16 = vadd.f32 %v4102_v6, %v384_v23  ;;  %v843_v18 = vadd.f32 0.18741608, %v842_v5 }
 0x152   : > { %v1796_v53 = vadd.f32 1.0, %v2916_v59  ;;  %v1258_v10 = vmul.f32 %v3082_v1, %v4067_v61  ;;  %v1514_v56 = vmul.f32 %v4086_v54, %v4086_v54  ;;  %v1444_v11 = vmul.f32 %v1443_v14, %v3950_v13 }
 0x153   : > { %v879_v20 = vadd.f32 0.0036580483, %v878_v22  ;;  %v4111_v0 = vadd.f32 1.0, %v655_v8  ;;  %v1290_v38 = vadd.f32 0.014752088, %v1289_v26  ;;  %v1268_v12 = vand.u32 2147483648, %v4067_v61 }
 0x154   : > { %v1828_v19 = vmul.f32 %v1796_v53, %v3752_v17  ;;  %v1259_v21 = vsub.f32 1.0, %v1258_v10  ;;  %v688_v31 = vadd.f32 0.001143296, %v687_v36  ;;  %v1481_v51 = vadd.f32 0.05243302, %v1480_v46 }
 0x155   : > { %3083 = vrcp.f32 %v4111_v0  ;;  %v4117_v63 = vmul.f32 0.70710677, %v4105_v16  ;;  %v1327_v35 = vmul.f32 3.8918573e-05, %v3754_v9  ;;  %vm1263_vm4 = vweird.f32 %v3082_v1 }
 0x156   : > { %1881 = vmatmul.f32.gmra.mxu1 %v1828_v19  ;;  %v1260_v49 = vmul.f32 %v3082_v1, %v1259_v21  ;;  %v1266_v27 = vand.u32 2147483647, %v4067_v61  ;;  %v4121_v5 = vmin.f32 %v1514_v56, 16.0  ;;  %v1445_v17 = vadd.f32 1.1283791, %v1444_v11 }
 0x157   : > { %v880_v58 = vmul.f32 %v879_v20, %v4052_v43  ;;  %v1291_v23 = vmul.f32 %v1290_v38, %v3717_v37  ;;  %v689_v60 = vmul.f32 %v688_v31, %v3731_v47  ;;  %vm1262_vm5 = vweird.f32 %v4067_v61  ;;  %v432_v31 = vpop.f32.mrf.mxu2 }
 0x158   : > { %v1261_v14 = vadd.f32 %v3082_v1, %v1260_v49  ;;  %v1269_v22 = vor.u32 1.1754944e-38, %v1268_v12  ;;  %v1516_v29 = vmul.f32 2.1237322e-06, %v4121_v5  ;;  %vm1264_vm6 = vmor %vm1262_vm5, %vm1263_vm4  ;;  %v914_v59 = vmul.f32 %v4117_v63, %v4117_v63 }
 0x159   : > { %v1292_v26 = vadd.f32 0.112945676, %v1291_v23  ;;  %v690_v36 = vadd.f32 0.014752088, %v689_v60  ;;  %v1328_v46 = vadd.f32 0.001143296, %v1327_v35  ;;  %v844_v8 = vmul.f32 %v843_v18, %v3981_v33 }
 0x15a   : > { %v1482_v53 = vmul.f32 %v1481_v51, %v4035_v41  ;;  %v1265_v10 = vsel %vm1264_vm6, %v3082_v1, %v1261_v14  ;;  %vm1267_vm7 = vcmp.eq.f32.partialorder %v1266_v27, 8.507059e+37  ;;  %v881_v11 = vadd.f32 0.05243302, %v880_v58 }
 0x15b   : > { %v3084_v56 = vpop.eup %3083  ;;  %v1270_v20 = vsel %vm1267_vm7, %v1269_v22, %v1265_v10  ;;  %v1293_v61 = vmul.f32 %v1292_v26, %v3717_v37  ;;  %v691_v38 = vmul.f32 %v690_v36, %v3731_v47  ;;  %v1517_v21 = vadd.f32 0.00028619796, %v1516_v29 }
 0x15c   : > { %v1271_v19 = vmul.f32 %v1270_v20, %v3911_v57  ;;  %v658_v12 = vmul.f32 %v3084_v56, %v4111_v0  ;;  %v1329_v35 = vmul.f32 %v1328_v46, %v3754_v9  ;;  %v4137_v18 = vmin.f32 %v914_v59, 16.0 }
 0x15d   : > { %v1294_v51 = vadd.f32 0.4994258, %v1293_v61  ;;  %v4140_v1 = vadd.f32 %v4102_v6, %v432_v31  ;;  %v692_v49 = vadd.f32 0.112945676, %v691_v38  ;;  %v666_v23 = vand.u32 2147483647, %v4111_v0 }
 0x15e   : > { %v2932_v27 = vclamps-f32 %v1271_v19, 1.0  ;;  %v659_v58 = vsub.f32 1.0, %v658_v12  ;;  %v668_v60 = vand.u32 2147483648, %v4111_v0  ;;  %vm663_vm8 = vweird.f32 %v3084_v56  ;;  %v5762_v38 = vld [vmem:[#allocation15_spill] sm:$0xff] }
 0x15f   : > { %v916_v57 = vmul.f32 2.1237322e-06, %v4137_v18  ;;  %v1295_v14 = vmul.f32 %v1294_v51, %v3717_v37  ;;  %v4147_v22 = vmul.f32 0.70710677, %v4140_v1  ;;  %v693_v26 = vmul.f32 %v692_v49, %v3731_v47 }
 0x160   : > { %v1812_v29 = vadd.f32 1.0, %v2932_v27  ;;  %v660_v59 = vmul.f32 %v3084_v56, %v659_v58  ;;  %v1330_v36 = vadd.f32 0.014752088, %v1329_v35  ;;  %v1483_v46 = vadd.f32 0.18741608, %v1482_v53 }
 0x161   : > { %v882_v10 = vmul.f32 %v881_v11, %v4052_v43  ;;  %v1518_v20 = vmul.f32 %v1517_v21, %v4121_v5  ;;  %v4152_v61 = vadd.f32 1.0, %v1295_v14  ;;  %vm662_vm9 = vweird.f32 %v4111_v0  ;;  %v387_v11 = vpop.f32.mrf.mxu0 }
 0x162   : > { %v1844_v19 = vmul.f32 %v1812_v29, %v5762_v38  ;;  %v661_v12 = vadd.f32 %v3084_v56, %v660_v59  ;;  %v694_v37 = vadd.f32 0.4994258, %v693_v26  ;;  %vm664_vm10 = vmor %vm662_vm9, %vm663_vm8  ;;  %v669_v31 = vor.u32 1.1754944e-38, %v668_v60 }
 0x163   : > { %v917_v51 = vadd.f32 0.00028619796, %v916_v57  ;;  %3085 = vrcp.f32 %v4152_v61  ;;  %v1554_v53 = vmul.f32 %v4147_v22, %v4147_v22  ;;  %v4161_v21 = vmul.f32 0.5, %v3985_v52 }
 0x164   : > { %1929 = vmatmul.f32.gmra.mxu3 %v1844_v19  ;;  %v665_v35 = vsel %vm664_vm10, %v3084_v56, %v661_v12  ;;  %vm667_vm11 = vcmp.eq.f32.partialorder %v666_v23, 8.507059e+37  ;;  %v1331_v49 = vmul.f32 %v1330_v36, %v3754_v9  ;;  %v4165_v0 = vmul.f32 %v1445_v17, %v3916_v24 }
 0x165   : > { %v845_v27 = vadd.f32 1.1283791, %v844_v8  ;;  %v670_v58 = vsel %vm667_vm11, %v669_v31, %v665_v35  ;;  %v695_v60 = vmul.f32 %v694_v37, %v3731_v47  ;;  %v1484_v57 = vmul.f32 %v1483_v46, %v4035_v41 }
 0x166   : > { %v1519_v14 = vadd.f32 0.0036580483, %v1518_v20  ;;  %v671_v29 = vmul.f32 %v670_v58, %v3926_v34  ;;  %v4171_v52 = vadd.f32 %v4102_v6, %v387_v11  ;;  %v883_v59 = vadd.f32 0.18741608, %v882_v10 }
 0x167   : > { %v918_v56 = vmul.f32 %v917_v51, %v4137_v18  ;;  %v4174_v23 = vmin.f32 %v1554_v53, 16.0  ;;  %v4176_v26 = vadd.f32 1.0, %v695_v60  ;;  %v4179_v24 = vmul.f32 0.5, %v4028_v32  ;;  %v5765_v51 = vld [vmem:[#allocation16_spill] sm:$0xff] }
 0x168   : > { %v2917_v17 = vclamps-f32 %v671_v29, 1.0  ;;  %v4182_v47 = vmul.f32 0.70710677, %v4171_v52  ;;  %v1332_v8 = vadd.f32 0.112945676, %v1331_v49  ;;  %v4185_v34 = vmul.f32 %v845_v27, %v3964_v40 }
 0x169   : > { %5763 = vst [vmem:[#allocation15_spill] sm:$0xff] %v4179_v24  ;;  %v3086_v36 = vpop.eup %3085  ;;  %v1556_v46 = vmul.f32 2.1237322e-06, %v4174_v23  ;;  %3087 = vrcp.f32 %v4176_v26  ;;  %v727_v10 = vmul.f32 3.8918573e-05, %v3779_v45  ;;  %v4191_v20 = vmul.f32 0.5, %v4070_v50 }
 0x16a   : > { %v1520_v32 = vmul.f32 %v1519_v14, %v4121_v5  ;;  %v1797_v38 = vadd.f32 1.0, %v2917_v17  ;;  %v1298_v19 = vmul.f32 %v3086_v36, %v4152_v61  ;;  %v4195_v12 = vadd.f32 1.1283791, %v1484_v57 }
 0x16b   : > { %5764 = vst [vmem:[#allocation27_spill] sm:$0xff] %v4191_v20  ;;  %v884_v37 = vmul.f32 %v883_v59, %v4052_v43  ;;  %v919_v40 = vadd.f32 0.0036580483, %v918_v56  ;;  %v954_v31 = vmul.f32 %v4182_v47, %v4182_v47  ;;  %v1306_v35 = vand.u32 2147483647, %v4152_v61  ;;  %v435_v59 = vpop.f32.mrf.mxu2 }
 0x16c   : > { %v1829_v53 = vmul.f32 %v1797_v38, %v5765_v51  ;;  %v1299_v11 = vsub.f32 1.0, %v1298_v19  ;;  %v1333_v50 = vmul.f32 %v1332_v8, %v3754_v9  ;;  %v1308_v49 = vand.u32 2147483648, %v4152_v61 }
 0x16d   : > { %v1557_v27 = vadd.f32 0.00028619796, %v1556_v46  ;;  %v4204_v58 = vmin.f32 %v954_v31, 16.0  ;;  %v728_v60 = vadd.f32 0.001143296, %v727_v10  ;;  %vm1303_vm12 = vweird.f32 %v3086_v36 }
 0x16e   : > { %v1521_v57 = vadd.f32 0.05243302, %v1520_v32  ;;  %1884 = vmatmul.f32.gmra.mxu1 %v1829_v53  ;;  %v1300_v14 = vmul.f32 %v3086_v36, %v1299_v11  ;;  %v1334_v29 = vadd.f32 0.4994258, %v1333_v50  ;;  %v920_v17 = vmul.f32 %v919_v40, %v4137_v18 }
 0x16f   : > { %v3088_v56 = vpop.eup %3087  ;;  %v956_v38 = vmul.f32 2.1237322e-06, %v4204_v58  ;;  %v4209_v19 = vadd.f32 %v4102_v6, %v435_v59  ;;  %v729_v8 = vmul.f32 %v728_v60, %v3779_v45  ;;  %vm1302_vm13 = vweird.f32 %v4152_v61 }
 0x170   : > { %v1301_v46 = vadd.f32 %v3086_v36, %v1300_v14  ;;  %vm1307_vm14 = vcmp.eq.f32.partialorder %v1306_v35, 8.507059e+37  ;;  %v698_v10 = vmul.f32 %v3088_v56, %v4176_v26  ;;  %vm1304_vm15 = vmor %vm1302_vm13, %vm1303_vm12  ;;  %v1309_v32 = vor.u32 1.1754944e-38, %v1308_v49 }
 0x171   : > { %v1558_v31 = vmul.f32 %v1557_v27, %v4174_v23  ;;  %v706_v51 = vand.u32 2147483647, %v4176_v26  ;;  %v1335_v40 = vmul.f32 %v1334_v29, %v3754_v9  ;;  %v708_v50 = vand.u32 2147483648, %v4176_v26 }
 0x172   : > { %v1305_v53 = vsel %vm1304_vm15, %v3086_v36, %v1301_v46  ;;  %v699_v11 = vsub.f32 1.0, %v698_v10  ;;  %v730_v59 = vadd.f32 0.014752088, %v729_v8  ;;  %v957_v14 = vadd.f32 0.00028619796, %v956_v38 }
 0x173   : > { %v1310_v60 = vsel %vm1307_vm14, %v1309_v32, %v1305_v53  ;;  %v4218_v20 = vadd.f32 1.0, %v1335_v40  ;;  %v4221_v61 = vmul.f32 0.70710677, %v4209_v19  ;;  %vm703_vm0 = vweird.f32 %v3088_v56 }
 0x174   : > { %v1311_v35 = vmul.f32 %v1310_v60, %v3938_v30  ;;  %v700_v49 = vmul.f32 %v3088_v56, %v699_v11  ;;  %v731_v27 = vmul.f32 %v730_v59, %v3779_v45  ;;  %v885_v24 = vadd.f32 1.1283791, %v884_v37  ;;  %v5766_v59 = vld [vmem:[#allocation17_spill] sm:$0xff] }
 0x175   : > { %v1522_v9 = vmul.f32 %v1521_v57, %v4121_v5  ;;  %v1559_v36 = vadd.f32 0.0036580483, %v1558_v31  ;;  %3089 = vrcp.f32 %v4218_v20  ;;  %vm702_vm1 = vweird.f32 %v4176_v26 }
 0x176   : > { %v2933_v29 = vclamps-f32 %v1311_v35, 1.0  ;;  %v701_v8 = vadd.f32 %v3088_v56, %v700_v49  ;;  %v1367_v38 = vmul.f32 3.8918573e-05, %v3809_v42  ;;  %vm704_vm2 = vmor %vm702_vm1, %vm703_vm0  ;;  %v709_v46 = vor.u32 1.1754944e-38, %v708_v50 }
 0x177   : > { %v958_v30 = vmul.f32 %v957_v14, %v4204_v58  ;;  %v1594_v10 = vmul.f32 %v4221_v61, %v4221_v61  ;;  %v732_v32 = vadd.f32 0.112945676, %v731_v27  ;;  %v921_v37 = vadd.f32 0.05243302, %v920_v17 }
 0x178   : > { %v1813_v40 = vadd.f32 1.0, %v2933_v29  ;;  %v705_v57 = vsel %vm704_vm2, %v3088_v56, %v701_v8  ;;  %vm707_vm3 = vcmp.eq.f32.partialorder %v706_v51, 8.507059e+37  ;;  %v1523_v31 = vadd.f32 0.18741608, %v1522_v9  ;;  %v390_v9 = vpop.f32.mrf.mxu0 }
 0x179   : > { %v1560_v53 = vmul.f32 %v1559_v36, %v4174_v23  ;;  %v710_v11 = vsel %vm707_vm3, %v709_v46, %v705_v57  ;;  %v733_v26 = vmul.f32 %v732_v32, %v3779_v45  ;;  %v1368_v35 = vadd.f32 0.001143296, %v1367_v38 }
 0x17a   : > { %v1845_v60 = vmul.f32 %v1813_v40, %v5766_v59  ;;  %v711_v50 = vmul.f32 %v710_v11, %v3945_v7  ;;  %v767_v14 = vmul.f32 3.8918573e-05, %v3842_v25  ;;  %v4239_v17 = vmul.f32 %v4195_v12, %v3999_v44 }
 0x17b   : > { %v3090_v49 = vpop.eup %3089  ;;  %v959_v56 = vadd.f32 0.0036580483, %v958_v30  ;;  %v4241_v51 = vmin.f32 %v1594_v10, 16.0  ;;  %v734_v27 = vadd.f32 0.4994258, %v733_v26  ;;  %v922_v36 = vmul.f32 %v921_v37, %v4137_v18 }
 0x17c   : > { %1932 = vmatmul.f32.gmra.mxu3 %v1845_v60  ;;  %v2918_v29 = vclamps-f32 %v711_v50, 1.0  ;;  %v1338_v8 = vmul.f32 %v3090_v49, %v4218_v20  ;;  %v1369_v7 = vmul.f32 %v1368_v35, %v3809_v42  ;;  %v1561_v38 = vadd.f32 0.05243302, %v1560_v53  ;;  %v5767_v53 = vld [vmem:[#allocation18_spill] sm:$0xff] }
 0x17d   : > { %v1346_v46 = vand.u32 2147483647, %v4218_v20  ;;  %v1596_v32 = vmul.f32 2.1237322e-06, %v4241_v51  ;;  %v735_v44 = vmul.f32 %v734_v27, %v3779_v45  ;;  %v4250_v10 = vadd.f32 %v4102_v6, %v390_v9 }
 0x17e   : > { %v1798_v12 = vadd.f32 1.0, %v2918_v29  ;;  %v1339_v30 = vsub.f32 1.0, %v1338_v8  ;;  %v1370_v40 = vadd.f32 0.014752088, %v1369_v7  ;;  %v960_v37 = vmul.f32 %v959_v56, %v4204_v58 }
 0x17f   : > { %v1348_v57 = vand.u32 2147483648, %v4218_v20  ;;  %v4254_v11 = vadd.f32 1.0, %v735_v44  ;;  %v768_v26 = vadd.f32 0.001143296, %v767_v14  ;;  %vm1343_vm4 = vweird.f32 %v3090_v49 }
 0x180   : > { %v1830_v59 = vmul.f32 %v1798_v12, %v5767_v53  ;;  %v1340_v60 = vmul.f32 %v3090_v49, %v1339_v30  ;;  %v1371_v50 = vmul.f32 %v1370_v40, %v3809_v42  ;;  %v4259_v45 = vmul.f32 %v885_v24, %v4043_v39 }
 0x181   : > { %v4262_v35 = vmul.f32 0.5, %v4105_v16  ;;  %v1597_v27 = vadd.f32 0.00028619796, %v1596_v32  ;;  %3091 = vrcp.f32 %v4254_v11  ;;  %v1524_v56 = vmul.f32 %v1523_v31, %v4121_v5 }
 0x182   : > { %1887 = vmatmul.f32.gmra.mxu1 %v1830_v59  ;;  %v1341_v9 = vadd.f32 %v3090_v49, %v1340_v60  ;;  %vm1342_vm5 = vweird.f32 %v4218_v20  ;;  %v4268_v14 = vmul.f32 0.70710677, %v4250_v10  ;;  %v923_v29 = vadd.f32 0.18741608, %v922_v36 }
 0x183   : > { %5768 = vst [vmem:[#allocation16_spill] sm:$0xff] %v4262_v35  ;;  %vm1344_vm6 = vmor %vm1342_vm5, %vm1343_vm4  ;;  %v1349_v8 = vor.u32 1.1754944e-38, %v1348_v57  ;;  %v1372_v39 = vadd.f32 0.112945676, %v1371_v50  ;;  %v769_v24 = vmul.f32 %v768_v26, %v3842_v25  ;;  %v1562_v16 = vmul.f32 %v1561_v38, %v4174_v23  ;;  %v438_v26 = vpop.f32.mrf.mxu2 }
 0x184   : > { %v961_v7 = vadd.f32 0.05243302, %v960_v37  ;;  %v1345_v32 = vsel %vm1344_vm6, %v3090_v49, %v1341_v9  ;;  %vm1347_vm7 = vcmp.eq.f32.partialorder %v1346_v46, 8.507059e+37  ;;  %v1598_v31 = vmul.f32 %v1597_v27, %v4241_v51 }
 0x185   : > { %v1350_v44 = vsel %vm1347_vm7, %v1349_v8, %v1345_v32  ;;  %v1373_v12 = vmul.f32 %v1372_v39, %v3809_v42  ;;  %v770_v20 = vadd.f32 0.014752088, %v769_v24  ;;  %v1525_v30 = vadd.f32 1.1283791, %v1524_v56 }
 0x186   : > { %v4275_v40 = vmul.f32 0.5, %v4140_v1  ;;  %v1351_v36 = vmul.f32 %v1350_v44, %v3948_v62  ;;  %v994_v57 = vmul.f32 %v4268_v14, %v4268_v14  ;;  %v4281_v49 = vadd.f32 %v4102_v6, %v438_v26 }
 0x187   : > { %v3092_v38 = vpop.eup %3091  ;;  %v1374_v37 = vadd.f32 0.4994258, %v1373_v12  ;;  %v771_v46 = vmul.f32 %v770_v20, %v3842_v25  ;;  %v1407_v53 = vmul.f32 3.8918573e-05, %v3861_v4  ;;  %v924_v59 = vmul.f32 %v923_v29, %v4137_v18  ;;  %v5770_v20 = vld [vmem:[#allocation19_spill] sm:$0xff] }
 0x188   : > { %5769 = vst [vmem:[#allocation17_spill] sm:$0xff] %v4275_v40  ;;  %v1563_v60 = vadd.f32 0.18741608, %v1562_v16  ;;  %v2934_v1 = vclamps-f32 %v1351_v36, 1.0  ;;  %v738_v50 = vmul.f32 %v3092_v38, %v4254_v11  ;;  %v962_v62 = vmul.f32 %v961_v7, %v4204_v58 }
 0x189   : > { %v1599_v27 = vadd.f32 0.0036580483, %v1598_v31  ;;  %v746_v56 = vand.u32 2147483647, %v4254_v11  ;;  %v1375_v9 = vmul.f32 %v1374_v37, %v3809_v42  ;;  %v4291_v24 = vmul.f32 0.70710677, %v4281_v49 }
 0x18a   : > { %v1814_v8 = vadd.f32 1.0, %v2934_v1  ;;  %v739_v39 = vsub.f32 1.0, %v738_v50  ;;  %v772_v32 = vadd.f32 0.112945676, %v771_v46  ;;  %v748_v44 = vand.u32 2147483648, %v4254_v11  ;;  %v393_v1 = vpop.f32.mrf.mxu0 }
 0x18b   : > { %v4294_v29 = vmin.f32 %v994_v57, 16.0  ;;  %v4296_v16 = vadd.f32 1.0, %v1375_v9  ;;  %v1408_v12 = vadd.f32 0.001143296, %v1407_v53  ;;  %vm743_vm8 = vweird.f32 %v3092_v38  ;;  %v441_v40 = vpop.f32.mrf.mxu2 }
 0x18c   : > { %v1846_v7 = vmul.f32 %v1814_v8, %v5770_v20  ;;  %v740_v31 = vmul.f32 %v3092_v38, %v739_v39  ;;  %v773_v36 = vmul.f32 %v772_v32, %v3842_v25  ;;  %v4301_v42 = vmul.f32 %v1525_v30, %v4086_v54 }
 0x18d   : > { %v925_v26 = vadd.f32 1.1283791, %v924_v59  ;;  %v4304_v37 = vmul.f32 0.5, %v4171_v52  ;;  %3093 = vrcp.f32 %v4296_v16  ;;  %vm742_vm9 = vweird.f32 %v4254_v11 }
 0x18e   : > { %1935 = vmatmul.f32.gmra.mxu3 %v1846_v7  ;;  %v741_v57 = vadd.f32 %v3092_v38, %v740_v31  ;;  %v996_v46 = vmul.f32 2.1237322e-06, %v4294_v29  ;;  %v1634_v53 = vmul.f32 %v4291_v24, %v4291_v24  ;;  %v963_v50 = vadd.f32 0.18741608, %v962_v62  ;;  %vm744_vm10 = vmor %vm742_vm9, %vm743_vm8 }
 0x18f   : > { %5771 = vst [vmem:[#allocation18_spill] sm:$0xff] %v4304_v37  ;;  %v749_v54 = vor.u32 1.1754944e-38, %v748_v44  ;;  %v774_v30 = vadd.f32 0.4994258, %v773_v36  ;;  %v1409_v59 = vmul.f32 %v1408_v12, %v3861_v4  ;;  %v1564_v52 = vmul.f32 %v1563_v60, %v4174_v23  ;;  %v5772_v44 = vld [vmem:[#allocation25_spill] sm:$0xff] }
 0x190   : > { %v1600_v9 = vmul.f32 %v1599_v27, %v4241_v51  ;;  %v745_v8 = vsel %vm744_vm10, %v3092_v38, %v741_v57  ;;  %vm747_vm11 = vcmp.eq.f32.partialorder %v746_v56, 8.507059e+37  ;;  %v4316_v32 = vadd.f32 %v4102_v6, %v393_v1 }
 0x191   : > { %v750_v39 = vsel %vm747_vm11, %v749_v54, %v745_v8  ;;  %v775_v11 = vmul.f32 %v774_v30, %v3842_v25  ;;  %v807_v20 = vmul.f32 3.8918573e-05, %v3893_v15  ;;  %v4320_v62 = vmul.f32 %v925_v26, %v4117_v63 }
 0x192   : > { %v751_v7 = vmul.f32 %v750_v39, %v5772_v44  ;;  %v997_v12 = vadd.f32 0.00028619796, %v996_v46  ;;  %v4323_v31 = vmin.f32 %v1634_v53, 16.0  ;;  %v964_v38 = vmul.f32 %v963_v50, %v4204_v58  ;;  %v5774_v39 = vld [vmem:[#allocation20_spill] sm:$0xff] }
 0x193   : > { %v3094_v60 = vpop.eup %3093  ;;  %v4327_v27 = vmul.f32 0.5, %v4209_v19  ;;  %v4329_v25 = vadd.f32 1.0, %v775_v11  ;;  %v1410_v56 = vadd.f32 0.014752088, %v1409_v59  ;;  %v4331_v36 = vadd.f32 1.1283791, %v1564_v52 }
 0x194   : > { %v2919_v57 = vclamps-f32 %v751_v7, 1.0  ;;  %v1378_v63 = vmul.f32 %v3094_v60, %v4296_v16  ;;  %v1636_v26 = vmul.f32 2.1237322e-06, %v4323_v31  ;;  %v1601_v1 = vadd.f32 0.05243302, %v1600_v9 }
 0x195   : > { %5773 = vst [vmem:[#allocation19_spill] sm:$0xff] %v4327_v27  ;;  %3095 = vrcp.f32 %v4329_v25  ;;  %v4337_v46 = vmul.f32 0.70710677, %v4316_v32  ;;  %v808_v53 = vadd.f32 0.001143296, %v807_v20  ;;  %v998_v19 = vmul.f32 %v997_v12, %v4294_v29 }
 0x196   : > { %v1799_v50 = vadd.f32 1.0, %v2919_v57  ;;  %v1379_v54 = vsub.f32 1.0, %v1378_v63  ;;  %v1447_v30 = vmul.f32 3.8918573e-05, %v3950_v13  ;;  %v4341_v59 = vadd.f32 1.1283791, %v964_v38 }
 0x197   : > { %v1386_v52 = vand.u32 2147483647, %v4296_v16  ;;  %v1388_v8 = vand.u32 2147483648, %v4296_v16  ;;  %v1411_v9 = vmul.f32 %v1410_v56, %v3861_v4  ;;  %vm1383_vm12 = vweird.f32 %v3094_v60 }
 0x198   : > { %v1831_v11 = vmul.f32 %v1799_v50, %v5774_v39  ;;  %v1380_v44 = vmul.f32 %v3094_v60, %v1379_v54  ;;  %v1637_v7 = vadd.f32 0.00028619796, %v1636_v26  ;;  %v1602_v20 = vmul.f32 %v1601_v1, %v4241_v51 }
 0x199   : > { %v1034_v12 = vmul.f32 %v4337_v46, %v4337_v46  ;;  %v1412_v57 = vadd.f32 0.112945676, %v1411_v9  ;;  %v809_v38 = vmul.f32 %v808_v53, %v3893_v15  ;;  %v999_v63 = vadd.f32 0.0036580483, %v998_v19 }
 0x19a   : > { %1890 = vmatmul.f32.gmra.mxu1 %v1831_v11  ;;  %v1381_v27 = vadd.f32 %v3094_v60, %v1380_v44  ;;  %vm1382_vm13 = vweird.f32 %v4296_v16  ;;  %v1448_v37 = vadd.f32 0.001143296, %v1447_v30  ;;  %vm1387_vm15 = vcmp.eq.f32.partialorder %v1386_v52, 8.507059e+37  ;;  %v5775_v44 = vld [vmem:[#allocation26_spill] sm:$0xff] }
 0x19b   : > { %v3096_v56 = vpop.eup %3095  ;;  %vm1384_vm14 = vmor %vm1382_vm13, %vm1383_vm12  ;;  %v1389_v50 = vor.u32 1.1754944e-38, %v1388_v8  ;;  %v1413_v26 = vmul.f32 %v1412_v57, %v3861_v4  ;;  %v810_v54 = vadd.f32 0.014752088, %v809_v38  ;;  %v1638_v39 = vmul.f32 %v1637_v7, %v4323_v31 }
 0x19c   : > { %v1385_v1 = vsel %vm1384_vm14, %v3094_v60, %v1381_v27  ;;  %v778_v9 = vmul.f32 %v3096_v56, %v4329_v25  ;;  %v1449_v53 = vmul.f32 %v1448_v37, %v3950_v13  ;;  %v786_v11 = vand.u32 2147483647, %v4329_v25 }
 0x19d   : > { %v1390_v19 = vsel %vm1387_vm15, %v1389_v50, %v1385_v1  ;;  %v4357_v16 = vmin.f32 %v1034_v12, 16.0  ;;  %v1414_v30 = vadd.f32 0.4994258, %v1413_v26  ;;  %v4361_v57 = vadd.f32 %v4102_v6, %v441_v40 }
 0x19e   : > { %v1391_v52 = vmul.f32 %v1390_v19, %v5775_v44  ;;  %v779_v8 = vsub.f32 1.0, %v778_v9  ;;  %v811_v60 = vmul.f32 %v810_v54, %v3893_v15  ;;  %v788_v27 = vand.u32 2147483648, %v4329_v25 }
 0x19f   : > { %v1036_v7 = vmul.f32 2.1237322e-06, %v4357_v16  ;;  %v1415_v37 = vmul.f32 %v1414_v30, %v3861_v4  ;;  %v1450_v38 = vadd.f32 0.014752088, %v1449_v53  ;;  %vm783_vm0 = vweird.f32 %v3096_v56 }
 0x1a0   : > { %v2935_v50 = vclamps-f32 %v1391_v52, 1.0  ;;  %v780_v1 = vmul.f32 %v3096_v56, %v779_v8  ;;  %v4368_v12 = vmul.f32 0.70710677, %v4361_v57  ;;  %v1603_v26 = vadd.f32 0.18741608, %v1602_v20  ;;  %v5777_v52 = vld [vmem:[#allocation21_spill] sm:$0xff] }
 0x1a1   : > { %v1000_v9 = vmul.f32 %v999_v63, %v4294_v29  ;;  %vm782_vm1 = vweird.f32 %v4329_v25  ;;  %v4372_v40 = vadd.f32 1.0, %v1415_v37  ;;  %v1639_v19 = vadd.f32 0.0036580483, %v1638_v39 }
 0x1a2   : > { %5776 = vst [vmem:[#allocation25_spill] sm:$0xff] %v4368_v12  ;;  %v1815_v54 = vadd.f32 1.0, %v2935_v50  ;;  %v781_v44 = vadd.f32 %v3096_v56, %v780_v1  ;;  %v812_v35 = vadd.f32 0.112945676, %v811_v60  ;;  %vm784_vm2 = vmor %vm782_vm1, %vm783_vm0  ;;  %v789_v4 = vor.u32 1.1754944e-38, %v788_v27 }
 0x1a3   : > { %v1037_v53 = vadd.f32 0.00028619796, %v1036_v7  ;;  %3097 = vrcp.f32 %v4372_v40  ;;  %v1451_v30 = vmul.f32 %v1450_v38, %v3950_v13  ;;  %vm787_vm3 = vcmp.eq.f32.partialorder %v786_v11, 8.507059e+37 }
 0x1a4   : > { %v1847_v8 = vmul.f32 %v1815_v54, %v5777_v52  ;;  %v785_v20 = vsel %vm784_vm2, %v3096_v56, %v781_v44  ;;  %v1674_v25 = vmul.f32 %v4368_v12, %v4368_v12  ;;  %v4381_v63 = vmul.f32 %v4331_v36, %v4147_v22  ;;  %v396_v36 = vpop.f32.mrf.mxu0 }
 0x1a5   : > { %v4384_v39 = vmul.f32 0.5, %v4250_v10  ;;  %v1001_v60 = vadd.f32 0.05243302, %v1000_v9  ;;  %v790_v27 = vsel %vm787_vm3, %v789_v4, %v785_v20  ;;  %v4388_v7 = vmul.f32 %v4341_v59, %v4182_v47  ;;  %v5782_v20 = vld [vmem:[#allocation22_spill] sm:$0xff] }
 0x1a6   : > { %v1604_v37 = vmul.f32 %v1603_v26, %v4241_v51  ;;  %1938 = vmatmul.f32.gmra.mxu3 %v1847_v8  ;;  %v791_v56 = vmul.f32 %v790_v27, %v4077_v48  ;;  %v813_v11 = vmul.f32 %v812_v35, %v3893_v15  ;;  %v4394_v38 = vmul.f32 0.5, %v4281_v49 }
 0x1a7   : > { %5778 = vst [vmem:[#allocation20_spill] sm:$0xff] %v4384_v39  ;;  %v1640_v22 = vmul.f32 %v1639_v19, %v4323_v31  ;;  %v1038_v10 = vmul.f32 %v1037_v53, %v4357_v16  ;;  %v1452_v50 = vadd.f32 0.112945676, %v1451_v30  ;;  %v4398_v9 = vmin.f32 %v1674_v25, 16.0 }
 0x1a8   : > { %5779 = vst [vmem:[#allocation26_spill] sm:$0xff] %v4388_v7  ;;  %v2920_v1 = vclamps-f32 %v791_v56, 1.0  ;;  %v814_v47 = vadd.f32 0.4994258, %v813_v11  ;;  %v4401_v59 = vadd.f32 %v4102_v6, %v396_v36  ;;  %v1002_v48 = vmul.f32 %v1001_v60, %v4294_v29  ;;  %v444_v11 = vpop.f32.mrf.mxu2 }
 0x1a9   : > { %5780 = vst [vmem:[#allocation21_spill] sm:$0xff] %v4394_v38  ;;  %v3098_v26 = vpop.eup %3097  ;;  %v1453_v35 = vmul.f32 %v1452_v50, %v3950_v13  ;;  %v847_v49 = vmul.f32 3.8918573e-05, %v3981_v33  ;;  %v1487_v54 = vmul.f32 3.8918573e-05, %v4035_v41  ;;  %vm1422_vm4 = vweird.f32 %v4372_v40 }
 0x1aa   : > { %v1800_v19 = vadd.f32 1.0, %v2920_v1  ;;  %v1418_v44 = vmul.f32 %v3098_v26, %v4372_v40  ;;  %v1676_v4 = vmul.f32 2.1237322e-06, %v4398_v9  ;;  %v815_v53 = vmul.f32 %v814_v47, %v3893_v15 }
 0x1ab   : > { %v1641_v30 = vadd.f32 0.05243302, %v1640_v22  ;;  %v1039_v52 = vadd.f32 0.0036580483, %v1038_v10  ;;  %v4412_v8 = vmul.f32 0.70710677, %v4401_v59  ;;  %v4422_v22 = vadd.f32 %v4102_v6, %v444_v11 }
 0x1ac   : > { %v1832_v25 = vmul.f32 %v1800_v19, %v5782_v20  ;;  %v1419_v60 = vsub.f32 1.0, %v1418_v44  ;;  %v4415_v27 = vadd.f32 1.0, %v815_v53  ;;  %v1454_v56 = vadd.f32 0.4994258, %v1453_v35 }
 0x1ad   : > { %5781 = vst [vmem:[#allocation28_spill] sm:$0xff] %v4412_v8  ;;  %v1426_v36 = vand.u32 2147483647, %v4372_v40  ;;  %v1428_v50 = vand.u32 2147483648, %v4372_v40  ;;  %v1074_v15 = vmul.f32 %v4412_v8, %v4412_v8  ;;  %vm1423_vm5 = vweird.f32 %v3098_v26 }
 0x1ae   : > { %5783 = vst [vmem:[#allocation22_spill] sm:$0xff] %v4422_v22  ;;  %1893 = vmatmul.f32.gmra.mxu1 %v1832_v25  ;;  %v1420_v10 = vmul.f32 %v3098_v26, %v1419_v60  ;;  %v1677_v1 = vadd.f32 0.00028619796, %v1676_v4  ;;  %3099 = vrcp.f32 %v4415_v27  ;;  %v1003_v47 = vadd.f32 0.18741608, %v1002_v48  ;;  %vm1424_vm6 = vmor %vm1422_vm4, %vm1423_vm5 }
 0x1af   : > { %v4425_v19 = vmin.f32 %v1074_v15, 16.0  ;;  %v1455_v35 = vmul.f32 %v1454_v56, %v3950_v13  ;;  %v848_v44 = vadd.f32 0.001143296, %v847_v49  ;;  %v1040_v53 = vmul.f32 %v1039_v52, %v4357_v16 }
 0x1b0   : > { %v1421_v20 = vadd.f32 %v3098_v26, %v1420_v10  ;;  %v4430_v8 = vmul.f32 0.70710677, %v4422_v22  ;;  %v1488_v11 = vadd.f32 0.001143296, %v1487_v54  ;;  %v1642_v25 = vmul.f32 %v1641_v30, %v4323_v31 }
 0x1b1   : > { %v1429_v4 = vor.u32 1.1754944e-38, %v1428_v50  ;;  %v1076_v48 = vmul.f32 2.1237322e-06, %v4425_v19  ;;  %v4436_v60 = vadd.f32 1.0, %v1455_v35  ;;  %vm1427_vm7 = vcmp.eq.f32.partialorder %v1426_v36, 8.507059e+37 }
 0x1b2   : > { %5784 = vst [vmem:[#allocation29_spill] sm:$0xff] %v4430_v8  ;;  %v1425_v15 = vsel %vm1424_vm6, %v3098_v26, %v1421_v20  ;;  %v1678_v13 = vmul.f32 %v1677_v1, %v4398_v9  ;;  %v1714_v49 = vmul.f32 %v4430_v8, %v4430_v8  ;;  %v849_v54 = vmul.f32 %v848_v44, %v3981_v33 }
 0x1b3   : > { %v1430_v52 = vsel %vm1427_vm7, %v1429_v4, %v1425_v15  ;;  %v1077_v56 = vadd.f32 0.00028619796, %v1076_v48  ;;  %3101 = vrcp.f32 %v4436_v60  ;;  %v4443_v30 = vadd.f32 1.1283791, %v1604_v37 }
 0x1b4   : > { %v3100_v40 = vpop.eup %3099  ;;  %v1041_v50 = vadd.f32 0.05243302, %v1040_v53  ;;  %v1431_v10 = vmul.f32 %v1430_v52, %v4089_v2  ;;  %v1489_v26 = vmul.f32 %v1488_v11, %v4035_v41  ;;  %v4448_v36 = vmul.f32 %v1003_v47, %v4294_v29 }
 0x1b5   : > { %v4450_v1 = vadd.f32 0.18741608, %v1642_v25  ;;  %v818_v35 = vmul.f32 %v3100_v40, %v4415_v27  ;;  %v1078_v20 = vmul.f32 %v1077_v56, %v4425_v19  ;;  %v1679_v48 = vadd.f32 0.0036580483, %v1678_v13 }
 0x1b6   : > { %v2936_v4 = vclamps-f32 %v1431_v10, 1.0  ;;  %v826_v44 = vand.u32 2147483647, %v4415_v27  ;;  %v4455_v37 = vmin.f32 %v1714_v49, 16.0  ;;  %v828_v2 = vand.u32 2147483648, %v4415_v27  ;;  %v5785_v49 = vld [vmem:[#allocation23_spill] sm:$0xff] }
 0x1b7   : > { %v819_v53 = vsub.f32 1.0, %v818_v35  ;;  %v1079_v15 = vadd.f32 0.0036580483, %v1078_v20  ;;  %v850_v11 = vadd.f32 0.014752088, %v849_v54  ;;  %v1042_v47 = vmul.f32 %v1041_v50, %v4357_v16 }
 0x1b8   : > { %v1816_v52 = vadd.f32 1.0, %v2936_v4  ;;  %v1716_v25 = vmul.f32 2.1237322e-06, %v4455_v37  ;;  %v1490_v22 = vadd.f32 0.014752088, %v1489_v26  ;;  %vm822_vm8 = vweird.f32 %v4415_v27 }
 0x1b9   : > { %v3102_v8 = vpop.eup %3101  ;;  %v820_v12 = vmul.f32 %v3100_v40, %v819_v53  ;;  %vm823_vm9 = vweird.f32 %v3100_v40  ;;  %v851_v13 = vmul.f32 %v850_v11, %v3981_v33  ;;  %v1680_v10 = vmul.f32 %v1679_v48, %v4398_v9 }
 0x1ba   : > { %v1848_v56 = vmul.f32 %v1816_v52, %v5785_v49  ;;  %vm4464_vm10 = vcmp.eq.f32.partialorder %v826_v44, 8.507059e+37  ;;  %v1458_v54 = vmul.f32 %v3102_v8, %v4436_v60  ;;  %v829_v20 = vor.u32 1.1754944e-38, %v828_v2  ;;  %vm824_vm11 = vmor %vm822_vm8, %vm823_vm9 }
 0x1bb   : > { %v821_v50 = vadd.f32 %v3100_v40, %v820_v12  ;;  %v1468_v26 = vand.u32 2147483648, %v4436_v60  ;;  %v852_v4 = vadd.f32 0.112945676, %v851_v13  ;;  %v1080_v27 = vmul.f32 %v1079_v15, %v4425_v19  ;;  %v399_v13 = vpop.f32.mrf.mxu0 }
 0x1bc   : > { %1941 = vmatmul.f32.gmra.mxu3 %v1848_v56  ;;  %v1459_v53 = vsub.f32 1.0, %v1458_v54  ;;  %v1717_v11 = vadd.f32 0.00028619796, %v1716_v25  ;;  %v1491_v52 = vmul.f32 %v1490_v22, %v4035_v41  ;;  %vm1462_vm12 = vweird.f32 %v4436_v60 }
 0x1bd   : > { %v825_v48 = vsel %vm824_vm11, %v3100_v40, %v821_v50  ;;  %v1466_v44 = vand.u32 2147483647, %v4436_v60  ;;  %v853_v49 = vmul.f32 %v852_v4, %v3981_v33  ;;  %vm1463_vm13 = vweird.f32 %v3102_v8 }
 0x1be   : > { %v830_v12 = vsel %vm4464_vm10, %v829_v20, %v825_v48  ;;  %v1460_v2 = vmul.f32 %v3102_v8, %v1459_v53  ;;  %v1492_v56 = vadd.f32 0.112945676, %v1491_v52  ;;  %v1681_v38 = vadd.f32 0.05243302, %v1680_v10  ;;  %vm1464_vm14 = vmor %vm1462_vm12, %vm1463_vm13 }
 0x1bf   : > { %v831_v15 = vmul.f32 %v830_v12, %v4098_v3  ;;  %v1469_v25 = vor.u32 1.1754944e-38, %v1468_v26  ;;  %v854_v54 = vadd.f32 0.4994258, %v853_v49  ;;  %v1081_v22 = vadd.f32 0.05243302, %v1080_v27  ;;  %v447_v49 = vpop.f32.mrf.mxu2  ;;  %v5788_v12 = vld [vmem:[#allocation24_spill] sm:$0xff] }
 0x1c0   : > { %v1461_v40 = vadd.f32 %v3102_v8, %v1460_v2  ;;  %v1718_v50 = vmul.f32 %v1717_v11, %v4455_v37  ;;  %v1493_v39 = vmul.f32 %v1492_v56, %v4035_v41  ;;  %v4484_v20 = vadd.f32 %v4102_v6, %v399_v13  ;;  %v3202_v56 = vld [vmem:[#allocation8] ss:$0 sm:$0xff] }
 0x1c1   : > { %v2921_v7 = vclamps-f32 %v831_v15, 1.0  ;;  %v855_v35 = vmul.f32 %v854_v54, %v3981_v33  ;;  %v887_v10 = vmul.f32 3.8918573e-05, %v4052_v43  ;;  %v1043_v3 = vadd.f32 0.18741608, %v1042_v47 }
 0x1c2   : > { %v1465_v26 = vsel %vm1464_vm14, %v3102_v8, %v1461_v40  ;;  %vm1467_vm15 = vcmp.eq.f32.partialorder %v1466_v44, 8.507059e+37  ;;  %v1494_v4 = vadd.f32 0.4994258, %v1493_v39  ;;  %v1682_v27 = vmul.f32 %v1681_v38, %v4398_v9 }
 0x1c3   : > { %v1801_v53 = vadd.f32 1.0, %v2921_v7  ;;  %v1470_v11 = vsel %vm1467_vm15, %v1469_v25, %v1465_v26  ;;  %v4488_v52 = vadd.f32 1.0, %v855_v35  ;;  %v1082_v60 = vmul.f32 %v1081_v22, %v4425_v19 }
 0x1c4   : > { %v1471_v48 = vmul.f32 %v1470_v11, %v4165_v0  ;;  %v1719_v33 = vadd.f32 0.0036580483, %v1718_v50  ;;  %v1495_v6 = vmul.f32 %v1494_v4, %v4035_v41  ;;  %v4496_v39 = vmul.f32 0.70710677, %v4484_v20 }
 0x1c5   : > { %v1833_v2 = vmul.f32 %v1801_v53, %v5788_v12  ;;  %3103 = vrcp.f32 %v4488_v52  ;;  %v888_v38 = vadd.f32 0.001143296, %v887_v10  ;;  %v4500_v7 = vmul.f32 %v4443_v30, %v4221_v61 }
 0x1c6   : > { %v1005_v8 = vadd.f32 1.1283791, %v4448_v36  ;;  %v1644_v0 = vmul.f32 %v4450_v1, %v4323_v31  ;;  %v2937_v47 = vclamps-f32 %v1471_v48, 1.0  ;;  %v1044_v41 = vmul.f32 %v1043_v3, %v4357_v16 }
 0x1c7   : > { %v1683_v44 = vadd.f32 0.18741608, %v1682_v27  ;;  %1896 = vmatmul.f32.gmra.mxu1 %v1833_v2  ;;  %v4506_v13 = vadd.f32 1.0, %v1495_v6  ;;  %v4508_v15 = vadd.f32 %v3202_v56, %v447_v49  ;;  %v1083_v25 = vadd.f32 0.18741608, %v1082_v60 }
 0x1c8   : > { %v1817_v54 = vadd.f32 1.0, %v2937_v47  ;;  %v1720_v61 = vmul.f32 %v1719_v33, %v4455_v37  ;;  %v1527_v30 = vmul.f32 3.8918573e-05, %v4121_v5  ;;  %v866_v36 = vand.u32 2147483647, %v4488_v52 }
 0x1c9   : > { %5789 = vst [vmem:[#allocation23_spill] sm:$0xff] %v4508_v15  ;;  %v1114_v1 = vmul.f32 %v4496_v39, %v4496_v39  ;;  %3105 = vrcp.f32 %v4506_v13  ;;  %v889_v22 = vmul.f32 %v888_v38, %v4052_v43  ;;  %v4518_v40 = vmul.f32 %v1005_v8, %v4268_v14 }
 0x1ca   : > { %v4521_v50 = vmul.f32 0.5, %v4316_v32  ;;  %v1849_v35 = vmul.f32 %v1817_v54, %v4080_v28  ;;  %v868_v10 = vand.u32 2147483648, %v4488_v52  ;;  %v4525_v26 = vadd.f32 1.1283791, %v1644_v0 }
 0x1cb   : > { %v3104_v3 = vpop.eup %3103  ;;  %v4527_v4 = vadd.f32 1.1283791, %v1044_v41  ;;  %v4530_v27 = vmul.f32 %v1683_v44, %v4398_v9  ;;  %v4533_v53 = vmul.f32 0.70710677, %v4508_v15  ;;  %v4536_v14 = vmul.f32 %v1083_v25, %v4425_v19 }
 0x1cc   : > { %1944 = vmatmul.f32.gmra.mxu3 %v1849_v35  ;;  %v4538_v32 = vadd.f32 0.05243302, %v1720_v61  ;;  %v858_v28 = vmul.f32 %v3104_v3, %v4488_v52  ;;  %vm862_vm0 = vweird.f32 %v4488_v52  ;;  %vm4542_vm1 = vcmp.eq.f32.partialorder %v866_v36, 8.507059e+37 }
 0x1cd   : > { %v4546_v60 = vmin.f32 %v1114_v1, 16.0  ;;  %v890_v48 = vadd.f32 0.014752088, %v889_v22  ;;  %v1528_v33 = vadd.f32 0.001143296, %v1527_v30  ;;  %v869_v49 = vor.u32 1.1754944e-38, %v868_v10 }
 0x1ce   : > { %v859_v6 = vsub.f32 1.0, %v858_v28  ;;  %v927_v12 = vmul.f32 3.8918573e-05, %v4137_v18  ;;  %v1567_v2 = vmul.f32 3.8918573e-05, %v4174_v23  ;;  %v1754_v0 = vmul.f32 %v4533_v53, %v4533_v53 }
 0x1cf   : > { %v3106_v38 = vpop.eup %3105  ;;  %v1116_v8 = vmul.f32 2.1237322e-06, %v4546_v60  ;;  %v891_v47 = vmul.f32 %v890_v48, %v4052_v43  ;;  %v1529_v41 = vmul.f32 %v1528_v33, %v4121_v5  ;;  %vm863_vm2 = vweird.f32 %v3104_v3 }
 0x1d0   : > { %v860_v44 = vmul.f32 %v3104_v3, %v859_v6  ;;  %v1498_v56 = vmul.f32 %v3106_v38, %v4506_v13  ;;  %v928_v25 = vadd.f32 0.001143296, %v927_v12  ;;  %vm1502_vm3 = vweird.f32 %v4506_v13  ;;  %vm864_vm4 = vmor %vm862_vm0, %vm863_vm2 }
 0x1d1   : > { %v1506_v54 = vand.u32 2147483647, %v4506_v13  ;;  %v892_v61 = vadd.f32 0.112945676, %v891_v47  ;;  %v1530_v30 = vadd.f32 0.014752088, %v1529_v41  ;;  %vm1503_vm5 = vweird.f32 %v3106_v38 }
 0x1d2   : > { %v861_v36 = vadd.f32 %v3104_v3, %v860_v44  ;;  %v1499_v1 = vsub.f32 1.0, %v1498_v56  ;;  %v929_v22 = vmul.f32 %v928_v25, %v4137_v18  ;;  %v1568_v35 = vadd.f32 0.001143296, %v1567_v2  ;;  %vm1504_vm6 = vmor %vm1502_vm3, %vm1503_vm5 }
 0x1d3   : > { %v1508_v10 = vand.u32 2147483648, %v4506_v13  ;;  %v4562_v28 = vmin.f32 %v1754_v0, 16.0  ;;  %v893_v48 = vmul.f32 %v892_v61, %v4052_v43  ;;  %v1531_v33 = vmul.f32 %v1530_v30, %v4121_v5 }
 0x1d4   : > { %v865_v6 = vsel %vm864_vm4, %v3104_v3, %v861_v36  ;;  %v1500_v12 = vmul.f32 %v3106_v38, %v1499_v1  ;;  %v930_v47 = vadd.f32 0.014752088, %v929_v22  ;;  %v1569_v52 = vmul.f32 %v1568_v35, %v4174_v23 }
 0x1d5   : > { %v870_v41 = vsel %vm4542_vm1, %v869_v49, %v865_v6  ;;  %v1756_v2 = vmul.f32 2.1237322e-06, %v4562_v28  ;;  %v894_v44 = vadd.f32 0.4994258, %v893_v48  ;;  %v1532_v25 = vadd.f32 0.112945676, %v1531_v33 }
 0x1d6   : > { %v871_v56 = vmul.f32 %v870_v41, %v4185_v34  ;;  %v1501_v0 = vadd.f32 %v3106_v38, %v1500_v12  ;;  %v931_v61 = vmul.f32 %v930_v47, %v4137_v18  ;;  %v1117_v15 = vadd.f32 0.00028619796, %v1116_v8 }
 0x1d7   : > { %vm1507_vm7 = vcmp.eq.f32.partialorder %v1506_v54, 8.507059e+37  ;;  %v1509_v3 = vor.u32 1.1754944e-38, %v1508_v10  ;;  %v895_v11 = vmul.f32 %v894_v44, %v4052_v43  ;;  %v1533_v36 = vmul.f32 %v1532_v25, %v4121_v5 }
 0x1d8   : > { %v2922_v49 = vclamps-f32 %v871_v56, 1.0  ;;  %v1505_v30 = vsel %vm1504_vm6, %v3106_v38, %v1501_v0  ;;  %v932_v1 = vadd.f32 0.112945676, %v931_v61  ;;  %v1757_v35 = vadd.f32 0.00028619796, %v1756_v2 }
 0x1d9   : > { %v1510_v22 = vsel %vm1507_vm7, %v1509_v3, %v1505_v30  ;;  %v4576_v34 = vadd.f32 1.0, %v895_v11  ;;  %v1570_v48 = vadd.f32 0.014752088, %v1569_v52  ;;  %v1534_v6 = vadd.f32 0.4994258, %v1533_v36 }
 0x1da   : > { %v1802_v33 = vadd.f32 1.0, %v2922_v49  ;;  %v1511_v8 = vmul.f32 %v1510_v22, %v4239_v17  ;;  %v933_v13 = vmul.f32 %v932_v1, %v4137_v18  ;;  %v4582_v54 = vmul.f32 %v4525_v26, %v4291_v24 }
 0x1db   : > { %v4585_v43 = vmul.f32 0.5, %v4361_v57  ;;  %v1722_v38 = vmul.f32 %v4538_v32, %v4455_v37  ;;  %3107 = vrcp.f32 %v4576_v34  ;;  %v4592_v10 = vmul.f32 %v4527_v4, %v4337_v46 }
 0x1dc   : > { %v4595_v17 = vmul.f32 0.5, %v4401_v59  ;;  %v1834_v12 = vmul.f32 %v1802_v33, %v4093_v55  ;;  %v2938_v47 = vclamps-f32 %v1511_v8, 1.0  ;;  %v1118_v24 = vmul.f32 %v1117_v15, %v4546_v60 }
 0x1dd   : > { %v1758_v57 = vmul.f32 %v1757_v35, %v4562_v28  ;;  %v1535_v26 = vmul.f32 %v1534_v6, %v4121_v5  ;;  %v934_v41 = vadd.f32 0.4994258, %v933_v13  ;;  %v4602_v32 = vadd.f32 1.1283791, %v4530_v27 }
 0x1de   : > { %v4605_v2 = vadd.f32 1.1283791, %v4536_v14  ;;  %1899 = vmatmul.f32.gmra.mxu1 %v1834_v12  ;;  %v1818_v46 = vadd.f32 1.0, %v2938_v47  ;;  %v1571_v59 = vmul.f32 %v1570_v48, %v4174_v23  ;;  %v4608_v4 = vadd.f32 0.18741608, %v1722_v38 }
 0x1df   : > { %v1536_v55 = vadd.f32 1.0, %v1535_v26  ;;  %v935_v15 = vmul.f32 %v934_v41, %v4137_v18  ;;  %v967_v44 = vmul.f32 3.8918573e-05, %v4204_v58  ;;  %v906_v52 = vand.u32 2147483647, %v4576_v34 }
 0x1e0   : > { %v1850_v5 = vmul.f32 %v1818_v46, %v4161_v21  ;;  %v908_v27 = vand.u32 2147483648, %v4576_v34  ;;  %v1572_v56 = vadd.f32 0.112945676, %v1571_v59  ;;  %v4615_v0 = vadd.f32 0.0036580483, %v1118_v24 }
 0x1e1   : > { %v3108_v14 = vpop.eup %3107  ;;  %v4617_v25 = vadd.f32 0.0036580483, %v1758_v57  ;;  %3109 = vrcp.f32 %v1536_v55  ;;  %v1607_v61 = vmul.f32 3.8918573e-05, %v4241_v51  ;;  %v1546_v3 = vand.u32 2147483647, %v1536_v55 }
 0x1e2   : > { %1947 = vmatmul.f32.gmra.mxu3 %v1850_v5  ;;  %v898_v18 = vmul.f32 %v3108_v14, %v4576_v34  ;;  %v4621_v11 = vadd.f32 1.0, %v935_v15  ;;  %v1007_v21 = vmul.f32 3.8918573e-05, %v4294_v29  ;;  %vm902_vm8 = vweird.f32 %v4576_v34 }
 0x1e3   : > { %v1548_v49 = vand.u32 2147483648, %v1536_v55  ;;  %v1573_v30 = vmul.f32 %v1572_v56, %v4174_v23  ;;  %v968_v36 = vadd.f32 0.001143296, %v967_v44  ;;  %vm4626_vm9 = vcmp.eq.f32.partialorder %v906_v52, 8.507059e+37 }
 0x1e4   : > { %v899_v1 = vsub.f32 1.0, %v898_v18  ;;  %v909_v35 = vor.u32 1.1754944e-38, %v908_v27  ;;  %3111 = vrcp.f32 %v4621_v11  ;;  %vm903_vm10 = vweird.f32 %v3108_v14 }
 0x1e5   : > { %vm1542_vm11 = vweird.f32 %v1536_v55  ;;  %v948_v48 = vand.u32 2147483648, %v4621_v11  ;;  %v1574_v33 = vadd.f32 0.4994258, %v1573_v30  ;;  %vm4632_vm12 = vcmp.eq.f32.partialorder %v1546_v3, 8.507059e+37  ;;  %vm904_vm14 = vmor %vm902_vm8, %vm903_vm10 }
 0x1e6   : > { %v900_v8 = vmul.f32 %v3108_v14, %v899_v1  ;;  %v969_v13 = vmul.f32 %v968_v36, %v4204_v58  ;;  %v1608_v38 = vadd.f32 0.001143296, %v1607_v61  ;;  %v1008_v12 = vadd.f32 0.001143296, %v1007_v21 }
 0x1e7   : > { %v3110_v47 = vpop.eup %3109  ;;  %v1549_v24 = vor.u32 1.1754944e-38, %v1548_v49  ;;  %v946_v57 = vand.u32 2147483647, %v4621_v11  ;;  %v1575_v26 = vmul.f32 %v1574_v33, %v4174_v23  ;;  %v1647_v41 = vmul.f32 3.8918573e-05, %v4323_v31 }
 0x1e8   : > { %v901_v46 = vadd.f32 %v3108_v14, %v900_v8  ;;  %v1538_v59 = vmul.f32 %v3110_v47, %v1536_v55  ;;  %vm942_vm13 = vweird.f32 %v4621_v11  ;;  %v970_v15 = vadd.f32 0.014752088, %v969_v13 }
 0x1e9   : > { %vm1543_vm15 = vweird.f32 %v3110_v47  ;;  %v949_v44 = vor.u32 1.1754944e-38, %v948_v48  ;;  %v4644_v5 = vadd.f32 1.0, %v1575_v26  ;;  %v1609_v52 = vmul.f32 %v1608_v38, %v4241_v51 }
 0x1ea   : > { %v3112_v27 = vpop.eup %3111  ;;  %v905_v56 = vsel %vm904_vm14, %v3108_v14, %v901_v46  ;;  %v1539_v23 = vsub.f32 1.0, %v1538_v59  ;;  %v971_v61 = vmul.f32 %v970_v15, %v4204_v58  ;;  %v1009_v18 = vmul.f32 %v1008_v12, %v4294_v29  ;;  %vm4661_vm2 = vmor %vm1542_vm11, %vm1543_vm15 }
 0x1eb   : > { %v910_v3 = vsel %vm4626_vm9, %v909_v35, %v905_v56  ;;  %v938_v21 = vmul.f32 %v3112_v27, %v4621_v11  ;;  %vm4652_vm0 = vcmp.eq.f32.partialorder %v946_v57, 8.507059e+37  ;;  %3113 = vrcp.f32 %v4644_v5 }
 0x1ec   : > { %v1648_v49 = vadd.f32 0.001143296, %v1647_v41  ;;  %v911_v30 = vmul.f32 %v910_v3, %v4259_v45  ;;  %v1540_v14 = vmul.f32 %v3110_v47, %v1539_v23  ;;  %vm943_vm1 = vweird.f32 %v3112_v27 }
 0x1ed   : > { %v1047_v36 = vmul.f32 3.8918573e-05, %v4357_v16  ;;  %v939_v22 = vsub.f32 1.0, %v938_v21  ;;  %vm1582_vm3 = vweird.f32 %v4644_v5  ;;  %v972_v35 = vadd.f32 0.112945676, %v971_v61  ;;  %vm944_vm4 = vmor %vm942_vm13, %vm943_vm1 }
 0x1ee   : > { %v1610_v48 = vadd.f32 0.014752088, %v1609_v52  ;;  %v2923_v33 = vclamps-f32 %v911_v30, 1.0  ;;  %v1541_v8 = vadd.f32 %v3110_v47, %v1540_v14  ;;  %v1586_v13 = vand.u32 2147483647, %v4644_v5 }
 0x1ef   : > { %v1010_v45 = vadd.f32 0.014752088, %v1009_v18  ;;  %v940_v38 = vmul.f32 %v3112_v27, %v939_v22  ;;  %v1588_v12 = vand.u32 2147483648, %v4644_v5  ;;  %v973_v57 = vmul.f32 %v972_v35, %v4204_v58  ;;  %v5800_v18 = vld [vmem:[#allocation15_spill] sm:$0xff] }
 0x1f0   : > { %v1611_v55 = vmul.f32 %v1610_v48, %v4241_v51  ;;  %v1803_v26 = vadd.f32 1.0, %v2923_v33  ;;  %v1545_v41 = vsel %vm4661_vm2, %v3110_v47, %v1541_v8  ;;  %v1649_v59 = vmul.f32 %v1648_v49, %v4323_v31 }
 0x1f1   : > { %v1011_v46 = vmul.f32 %v1010_v45, %v4294_v29  ;;  %v3114_v15 = vpop.eup %3113  ;;  %v1550_v52 = vsel %vm4632_vm12, %v1549_v24, %v1545_v41  ;;  %v941_v56 = vadd.f32 %v3112_v27, %v940_v38  ;;  %v974_v23 = vadd.f32 0.4994258, %v973_v57  ;;  %v5805_v57 = vld [vmem:[#allocation27_spill] sm:$0xff] }
 0x1f2   : > { %v1612_v61 = vadd.f32 0.112945676, %v1611_v55  ;;  %v1835_v3 = vmul.f32 %v1803_v26, %v5800_v18  ;;  %v1551_v21 = vmul.f32 %v1550_v52, %v4301_v42  ;;  %v1578_v47 = vmul.f32 %v3114_v15, %v4644_v5 }
 0x1f3   : > { %vm1583_vm5 = vweird.f32 %v3114_v15  ;;  %v945_v30 = vsel %vm944_vm4, %v3112_v27, %v941_v56  ;;  %v975_v49 = vmul.f32 %v974_v23, %v4204_v58  ;;  %v1012_v24 = vadd.f32 0.112945676, %v1011_v46 }
 0x1f4   : > { %v1613_v6 = vmul.f32 %v1612_v61, %v4241_v51  ;;  %1902 = vmatmul.f32.gmra.mxu1 %v1835_v3  ;;  %v2939_v14 = vclamps-f32 %v1551_v21, 1.0  ;;  %v950_v1 = vsel %vm4652_vm0, %v949_v44, %v945_v30  ;;  %v1579_v22 = vsub.f32 1.0, %v1578_v47  ;;  %vm4692_vm6 = vmor %vm1582_vm3, %vm1583_vm5  ;;  %v5806_v61 = vld [vmem:[#allocation16_spill] sm:$0xff] }
 0x1f5   : > { %v1650_v42 = vadd.f32 0.014752088, %v1649_v59  ;;  %v951_v35 = vmul.f32 %v950_v1, %v4320_v62  ;;  %v976_v11 = vadd.f32 1.0, %v975_v49  ;;  %v1013_v33 = vmul.f32 %v1012_v24, %v4294_v29 }
 0x1f6   : > { %v1614_v48 = vadd.f32 0.4994258, %v1613_v6  ;;  %v1819_v8 = vadd.f32 1.0, %v2939_v14  ;;  %v1580_v27 = vmul.f32 %v3114_v15, %v1579_v22  ;;  %v1048_v45 = vadd.f32 0.001143296, %v1047_v36 }
 0x1f7   : > { %v1651_v58 = vmul.f32 %v1650_v42, %v4323_v31  ;;  %v2924_v38 = vclamps-f32 %v951_v35, 1.0  ;;  %vm4696_vm7 = vcmp.eq.f32.partialorder %v1586_v13, 8.507059e+37  ;;  %v1589_v62 = vor.u32 1.1754944e-38, %v1588_v12 }
 0x1f8   : > { %3115 = vrcp.f32 %v976_v11  ;;  %v1851_v55 = vmul.f32 %v1819_v8, %v5805_v57  ;;  %v1581_v26 = vadd.f32 %v3114_v15, %v1580_v27  ;;  %v986_v41 = vand.u32 2147483647, %v976_v11 }
 0x1f9   : > { %v1615_v36 = vmul.f32 %v1614_v48, %v4241_v51  ;;  %v4704_v46 = vmul.f32 %v4615_v0, %v4546_v60  ;;  %v1804_v5 = vadd.f32 1.0, %v2924_v38  ;;  %v1014_v59 = vadd.f32 0.4994258, %v1013_v33  ;;  %v5811_v38 = vld [vmem:[#allocation17_spill] sm:$0xff] }
 0x1fa   : > { %v1652_v52 = vadd.f32 0.112945676, %v1651_v58  ;;  %1950 = vmatmul.f32.gmra.mxu3 %v1851_v55  ;;  %v1585_v13 = vsel %vm4692_vm6, %v3114_v15, %v1581_v26  ;;  %v988_v56 = vand.u32 2147483648, %v976_v11  ;;  %v1049_v23 = vmul.f32 %v1048_v45, %v4357_v16 }
 0x1fb   : > { %v4708_v12 = vadd.f32 1.0, %v1615_v36  ;;  %v1836_v18 = vmul.f32 %v1804_v5, %v5806_v61  ;;  %v1590_v51 = vsel %vm4696_vm7, %v1589_v62, %v1585_v13  ;;  %v1015_v0 = vmul.f32 %v1014_v59, %v4294_v29 }
 0x1fc   : > { %v1653_v3 = vmul.f32 %v1652_v52, %v4323_v31  ;;  %v4718_v21 = vmul.f32 %v4617_v25, %v4562_v28  ;;  %v1591_v15 = vmul.f32 %v1590_v51, %v4381_v63  ;;  %v1050_v29 = vadd.f32 0.014752088, %v1049_v23 }
 0x1fd   : > { %3117 = vrcp.f32 %v4708_v12  ;;  %v1626_v47 = vand.u32 2147483647, %v4708_v12  ;;  %1905 = vmatmul.f32.gmra.mxu1 %v1836_v18  ;;  %v1628_v49 = vand.u32 2147483648, %v4708_v12  ;;  %v4724_v6 = vadd.f32 1.0, %v1015_v0 }
 0x1fe   : > { %v3116_v30 = vpop.eup %3115  ;;  %v1654_v24 = vadd.f32 0.4994258, %v1653_v3  ;;  %v2940_v14 = vclamps-f32 %v1591_v15, 1.0  ;;  %vm982_vm8 = vweird.f32 %v976_v11  ;;  %vm4726_vm9 = vcmp.eq.f32.partialorder %v986_v41, 8.507059e+37 }
 0x1ff   : > { %v978_v1 = vmul.f32 %v3116_v30, %v976_v11  ;;  %vm983_vm10 = vweird.f32 %v3116_v30  ;;  %v989_v63 = vor.u32 1.1754944e-38, %v988_v56  ;;  %vm1622_vm11 = vweird.f32 %v4708_v12 }
 0x200   : > { %3119 = vrcp.f32 %v4724_v6  ;;  %v1820_v22 = vadd.f32 1.0, %v2940_v14  ;;  %v1026_v35 = vand.u32 2147483647, %v4724_v6  ;;  %v1655_v48 = vmul.f32 %v1654_v24, %v4323_v31  ;;  %vm4745_vm14 = vmor %vm982_vm8, %vm983_vm10 }
 0x201   : > { %v979_v42 = vsub.f32 1.0, %v978_v1  ;;  %vm4734_vm12 = vcmp.eq.f32.partialorder %v1626_v47, 8.507059e+37  ;;  %v1629_v8 = vor.u32 1.1754944e-38, %v1628_v49  ;;  %vm1022_vm13 = vweird.f32 %v4724_v6  ;;  %v5816_v49 = vld [vmem:[#allocation26_spill] sm:$0xff] }
 0x202   : > { %v1051_v27 = vmul.f32 %v1050_v29, %v4357_v16  ;;  %v1687_v58 = vmul.f32 3.8918573e-05, %v4398_v9  ;;  %v1852_v34 = vmul.f32 %v1820_v22, %v5811_v38  ;;  %v1028_v62 = vand.u32 2147483648, %v4724_v6  ;;  %v5826_v29 = vld [vmem:[#allocation19_spill] sm:$0xff] }
 0x203   : > { %v3118_v45 = vpop.eup %3117  ;;  %v980_v44 = vmul.f32 %v3116_v30, %v979_v42  ;;  %v1656_v57 = vadd.f32 1.0, %v1655_v48  ;;  %v1087_v36 = vmul.f32 3.8918573e-05, %v4425_v19  ;;  %vm4751_vm0 = vcmp.eq.f32.partialorder %v1026_v35, 8.507059e+37 }
 0x204   : > { %v1618_v55 = vmul.f32 %v3118_v45, %v4708_v12  ;;  %v1052_v26 = vadd.f32 0.112945676, %v1051_v27  ;;  %v1688_v41 = vadd.f32 0.001143296, %v1687_v58  ;;  %1953 = vmatmul.f32.gmra.mxu3 %v1852_v34  ;;  %vm1623_vm15 = vweird.f32 %v3118_v45 }
 0x205   : > { %v981_v5 = vadd.f32 %v3116_v30, %v980_v44  ;;  %3121 = vrcp.f32 %v1656_v57  ;;  %v1666_v52 = vand.u32 2147483647, %v1656_v57  ;;  %v1668_v56 = vand.u32 2147483648, %v1656_v57  ;;  %vm4766_vm3 = vmor %vm1622_vm11, %vm1623_vm15 }
 0x206   : > { %v3120_v11 = vpop.eup %3119  ;;  %v1619_v13 = vsub.f32 1.0, %v1618_v55  ;;  %v1053_v23 = vmul.f32 %v1052_v26, %v4357_v16  ;;  %v1689_v61 = vmul.f32 %v1688_v41, %v4398_v9  ;;  %v1029_v0 = vor.u32 1.1754944e-38, %v1028_v62 }
 0x207   : > { %v985_v18 = vsel %vm4745_vm14, %v3116_v30, %v981_v5  ;;  %v1018_v51 = vmul.f32 %v3120_v11, %v4724_v6  ;;  %vm1662_vm1 = vweird.f32 %v1656_v57  ;;  %vm1023_vm2 = vweird.f32 %v3120_v11  ;;  %v5823_v6 = vld [vmem:[#allocation18_spill] sm:$0xff] }
 0x208   : > { %v990_v3 = vsel %vm4726_vm9, %v989_v63, %v985_v18  ;;  %v1620_v15 = vmul.f32 %v3118_v45, %v1619_v13  ;;  %v1054_v47 = vadd.f32 0.4994258, %v1053_v23  ;;  %v1690_v14 = vadd.f32 0.014752088, %v1689_v61  ;;  %vm4782_vm5 = vmor %vm1022_vm13, %vm1023_vm2 }
 0x209   : > { %v991_v24 = vmul.f32 %v990_v3, %v5816_v49  ;;  %v1019_v30 = vsub.f32 1.0, %v1018_v51  ;;  %v1088_v1 = vadd.f32 0.001143296, %v1087_v36  ;;  %vm4770_vm4 = vcmp.eq.f32.partialorder %v1666_v52, 8.507059e+37 }
 0x20a   : > { %v1621_v22 = vadd.f32 %v3118_v45, %v1620_v15  ;;  %v1669_v25 = vor.u32 1.1754944e-38, %v1668_v56  ;;  %v1055_v63 = vmul.f32 %v1054_v47, %v4357_v16  ;;  %v1691_v12 = vmul.f32 %v1690_v14, %v4398_v9 }
 0x20b   : > { %v3122_v35 = vpop.eup %3121  ;;  %v2925_v48 = vclamps-f32 %v991_v24, 1.0  ;;  %v1020_v27 = vmul.f32 %v3120_v11, %v1019_v30  ;;  %v1727_v58 = vmul.f32 3.8918573e-05, %v4455_v37  ;;  %v1089_v16 = vmul.f32 %v1088_v1, %v4425_v19 }
 0x20c   : > { %v1625_v38 = vsel %vm4766_vm3, %v3118_v45, %v1621_v22  ;;  %v1658_v44 = vmul.f32 %v3122_v35, %v1656_v57  ;;  %v4786_v62 = vadd.f32 1.0, %v1055_v63  ;;  %v1692_v41 = vadd.f32 0.112945676, %v1691_v12 }
 0x20d   : > { %v1805_v31 = vadd.f32 1.0, %v2925_v48  ;;  %v1630_v55 = vsel %vm4734_vm12, %v1629_v8, %v1625_v38  ;;  %v1021_v26 = vadd.f32 %v3120_v11, %v1020_v27  ;;  %vm1663_vm6 = vweird.f32 %v3122_v35 }
 0x20e   : > { %v1631_v45 = vmul.f32 %v1630_v55, %v4500_v7  ;;  %v1659_v36 = vsub.f32 1.0, %v1658_v44  ;;  %3123 = vrcp.f32 %v4786_v62  ;;  %vm1062_vm7 = vweird.f32 %v4786_v62  ;;  %vm4803_vm8 = vmor %vm1662_vm1, %vm1663_vm6  ;;  %v5827_v44 = vld [vmem:[#allocation20_spill] sm:$0xff] }
 0x20f   : > { %v1837_v5 = vmul.f32 %v1805_v31, %v5823_v6  ;;  %v1025_v52 = vsel %vm4782_vm5, %v3120_v11, %v1021_v26  ;;  %v1127_v13 = vmul.f32 3.8918573e-05, %v4546_v60  ;;  %v1693_v7 = vmul.f32 %v1692_v41, %v4398_v9 }
 0x210   : > { %v2941_v56 = vclamps-f32 %v1631_v45, 1.0  ;;  %v1030_v33 = vsel %vm4751_vm0, %v1029_v0, %v1025_v52  ;;  %v1660_v8 = vmul.f32 %v3122_v35, %v1659_v36  ;;  %v1066_v11 = vand.u32 2147483647, %v4786_v62 }
 0x211   : > { %1908 = vmatmul.f32.gmra.mxu1 %v1837_v5  ;;  %v1031_v23 = vmul.f32 %v1030_v33, %v4518_v40  ;;  %v1068_v18 = vand.u32 2147483648, %v4786_v62  ;;  %v1090_v51 = vadd.f32 0.014752088, %v1089_v16  ;;  %v1694_v59 = vadd.f32 0.4994258, %v1693_v7  ;;  %v5830_v33 = vld [vmem:[#allocation21_spill] sm:$0xff] }
 0x212   : > { %v1821_v3 = vadd.f32 1.0, %v2941_v56  ;;  %v1661_v15 = vadd.f32 %v3122_v35, %v1660_v8  ;;  %v1728_v0 = vadd.f32 0.001143296, %v1727_v58  ;;  %v1128_v24 = vadd.f32 0.001143296, %v1127_v13 }
 0x213   : > { %v2926_v47 = vclamps-f32 %v1031_v23, 1.0  ;;  %v1091_v49 = vmul.f32 %v1090_v51, %v4425_v19  ;;  %v1767_v40 = vmul.f32 3.8918573e-05, %v4562_v28  ;;  %v1695_v1 = vmul.f32 %v1694_v59, %v4398_v9 }
 0x214   : > { %v3124_v57 = vpop.eup %3123  ;;  %v1853_v30 = vmul.f32 %v1821_v3, %v5826_v29  ;;  %v1665_v14 = vsel %vm4803_vm8, %v3122_v35, %v1661_v15  ;;  %v1729_v22 = vmul.f32 %v1728_v0, %v4455_v37  ;;  %v1129_v9 = vmul.f32 %v1128_v24, %v4546_v60 }
 0x215   : > { %v1806_v63 = vadd.f32 1.0, %v2926_v47  ;;  %v1670_v48 = vsel %vm4770_vm4, %v1669_v25, %v1665_v14  ;;  %v1058_v27 = vmul.f32 %v3124_v57, %v4786_v62  ;;  %vm1063_vm9 = vweird.f32 %v3124_v57 }
 0x216   : > { %1956 = vmatmul.f32.gmra.mxu3 %v1853_v30  ;;  %v1671_v12 = vmul.f32 %v1670_v48, %v4582_v54  ;;  %v4820_v58 = vadd.f32 1.0, %v1695_v1  ;;  %v1092_v38 = vadd.f32 0.112945676, %v1091_v49  ;;  %v1730_v34 = vadd.f32 0.014752088, %v1729_v22  ;;  %vm4834_vm10 = vmor %vm1062_vm7, %vm1063_vm9  ;;  %v1876_v48 = vpop.f32.mrf.mxu1 }
 0x217   : > { %v1838_v35 = vmul.f32 %v1806_v63, %v5827_v44  ;;  %v1059_v16 = vsub.f32 1.0, %v1058_v27  ;;  %v1768_v31 = vadd.f32 0.001143296, %v1767_v40  ;;  %v1724_v42 = vmul.f32 %v4608_v4, %v4455_v37 }
 0x218   : > { %v1121_v25 = vadd.f32 0.05243302, %v4704_v46  ;;  %v2942_v55 = vclamps-f32 %v1671_v12, 1.0  ;;  %3125 = vrcp.f32 %v4820_v58  ;;  %v1761_v54 = vadd.f32 0.05243302, %v4718_v21 }
 0x219   : > { %1911 = vmatmul.f32.gmra.mxu1 %v1838_v35  ;;  %v1060_v26 = vmul.f32 %v3124_v57, %v1059_v16  ;;  %v1093_v41 = vmul.f32 %v1092_v38, %v4425_v19  ;;  %v1731_v45 = vmul.f32 %v1730_v34, %v4455_v37  ;;  %v1069_v4 = vor.u32 1.1754944e-38, %v1068_v18  ;;  %v4858_v34 = vld [vmem:[#allocation8 + $0x1] ss:$0 sm:$0xff] }
 0x21a   : > { %v1822_v36 = vadd.f32 1.0, %v2942_v55  ;;  %v1130_v46 = vadd.f32 0.014752088, %v1129_v9  ;;  %v1769_v5 = vmul.f32 %v1768_v31, %v4562_v28  ;;  %vm1067_vm11 = vcmp.eq.f32.partialorder %v1066_v11, 8.507059e+37 }
 0x21b   : > { %v1061_v52 = vadd.f32 %v3124_v57, %v1060_v26  ;;  %v1094_v21 = vadd.f32 0.4994258, %v1093_v41  ;;  %v1732_v13 = vadd.f32 0.112945676, %v1731_v45  ;;  %v1122_v56 = vmul.f32 %v1121_v25, %v4546_v60  ;;  %v5836_v41 = vld [vmem:[#allocation28_spill] sm:$0xff] }
 0x21c   : > { %v1854_v8 = vmul.f32 %v1822_v36, %v5830_v33  ;;  %v1131_v7 = vmul.f32 %v1130_v46, %v4546_v60  ;;  %v1770_v23 = vadd.f32 0.014752088, %v1769_v5  ;;  %v1762_v62 = vmul.f32 %v1761_v54, %v4562_v28  ;;  %v5835_v54 = vld [vmem:[#allocation25_spill] sm:$0xff] }
 0x21d   : > { %v1065_v61 = vsel %vm4834_vm10, %v3124_v57, %v1061_v52  ;;  %v1095_v18 = vmul.f32 %v1094_v21, %v4425_v19  ;;  %v1733_v51 = vmul.f32 %v1732_v13, %v4455_v37  ;;  %vm1702_vm12 = vweird.f32 %v4820_v58  ;;  %v5837_v36 = vld [vmem:[#allocation29_spill] sm:$0xff] }
 0x21e   : > { %v3126_v3 = vpop.eup %3125  ;;  %1959 = vmatmul.f32.gmra.mxu3 %v1854_v8  ;;  %v1070_v11 = vsel %vm1067_vm11, %v1069_v4, %v1065_v61  ;;  %v1132_v15 = vadd.f32 0.112945676, %v1131_v7  ;;  %v1771_v59 = vmul.f32 %v1770_v23, %v4562_v28  ;;  %v1706_v49 = vand.u32 2147483647, %v4820_v58 }
 0x21f   : > { %v1071_v0 = vmul.f32 %v1070_v11, %v4592_v10  ;;  %v1698_v47 = vmul.f32 %v3126_v3, %v4820_v58  ;;  %v4852_v24 = vadd.f32 1.0, %v1095_v18  ;;  %v1708_v19 = vand.u32 2147483648, %v4820_v58 }
 0x220   : > { %v1734_v40 = vadd.f32 0.4994258, %v1733_v51  ;;  %v1133_v57 = vmul.f32 %v1132_v15, %v4546_v60  ;;  %v1772_v29 = vadd.f32 0.112945676, %v1771_v59  ;;  %vm1703_vm13 = vweird.f32 %v3126_v3 }
 0x221   : > { %v2927_v30 = vclamps-f32 %v1071_v0, 1.0  ;;  %v1699_v14 = vsub.f32 1.0, %v1698_v47  ;;  %3127 = vrcp.f32 %v4852_v24  ;;  %v1725_v1 = vadd.f32 1.1283791, %v1724_v42  ;;  %vm4863_vm14 = vmor %vm1702_vm12, %vm1703_vm13 }
 0x222   : > { %v1123_v22 = vadd.f32 0.18741608, %v1122_v56  ;;  %v1735_v10 = vmul.f32 %v1734_v40, %v4455_v37  ;;  %v1134_v63 = vadd.f32 0.4994258, %v1133_v57  ;;  %v1763_v27 = vadd.f32 0.18741608, %v1762_v62 }
 0x223   : > { %v1807_v12 = vadd.f32 1.0, %v2927_v30  ;;  %v1700_v38 = vmul.f32 %v3126_v3, %v1699_v14  ;;  %v1773_v44 = vmul.f32 %v1772_v29, %v4562_v28  ;;  %vm4867_vm15 = vcmp.eq.f32.partialorder %v1706_v49, 8.507059e+37 }
 0x224   : > { %v1709_v37 = vor.u32 1.1754944e-38, %v1708_v19  ;;  %v4871_v9 = vadd.f32 1.0, %v1735_v10  ;;  %v1135_v31 = vmul.f32 %v1134_v63, %v4546_v60  ;;  %v4876_v55 = vadd.f32 %v4858_v34, %v1876_v48 }
 0x225   : > { %v1839_v42 = vmul.f32 %v1807_v12, %v4521_v50  ;;  %v1701_v25 = vadd.f32 %v3126_v3, %v1700_v38  ;;  %v1774_v58 = vadd.f32 0.4994258, %v1773_v44  ;;  %v1686_v26 = vmul.f32 %v4602_v32, %v5835_v54 }
 0x226   : > { %v1086_v45 = vmul.f32 %v4605_v2, %v5836_v41  ;;  %v4883_v6 = vmul.f32 %v1725_v1, %v5837_v36  ;;  %3129 = vrcp.f32 %v4871_v9  ;;  %v4888_v46 = vadd.f32 1.0, %v1135_v31  ;;  %1972 = vadd.xlane.f32.xlu0 %v4876_v55  ;;  %v1924_v2 = vpop.f32.mrf.mxu3 }
 0x227   : > { %v3128_v4 = vpop.eup %3127  ;;  %1914 = vmatmul.f32.gmra.mxu1 %v1839_v42  ;;  %v1705_v50 = vsel %vm4863_vm14, %v3126_v3, %v1701_v25  ;;  %v1775_v5 = vmul.f32 %v1774_v58, %v4562_v28  ;;  %v2036_v32 = vmul.f32 %v4876_v55, %v4876_v55  ;;  %v1124_v52 = vmul.f32 %v1123_v22, %v4546_v60 }
 0x228   : > { %v1764_v21 = vmul.f32 %v1763_v27, %v4562_v28  ;;  %v1710_v13 = vsel %vm4867_vm15, %v1709_v37, %v1705_v50  ;;  %v1098_v56 = vmul.f32 %v3128_v4, %v4852_v24  ;;  %vm1102_vm0 = vweird.f32 %v4852_v24  ;;  %v1879_v28 = vpop.f32.mrf.mxu1 }
 0x229   : > { %v1711_v33 = vmul.f32 %v1710_v13, %v1686_v26  ;;  %v1108_v8 = vand.u32 2147483648, %v4852_v24  ;;  %3131 = vrcp.f32 %v4888_v46  ;;  %2068 = vadd.xlane.f32.xlu2 %v2036_v32  ;;  %vm1103_vm1 = vweird.f32 %v3128_v4 }
 0x22a   : > { %v1099_v7 = vsub.f32 1.0, %v1098_v56  ;;  %v1106_v23 = vand.u32 2147483647, %v4852_v24  ;;  %v4903_v60 = vadd.f32 1.0, %v1775_v5  ;;  %v1746_v61 = vand.u32 2147483647, %v4871_v9  ;;  %vm4919_vm2 = vmor %vm1102_vm0, %vm1103_vm1 }
 0x22b   : > { %v2943_v62 = vclamps-f32 %v1711_v33, 1.0  ;;  %v4907_v18 = vadd.f32 %v4858_v34, %v1879_v28  ;;  %v4910_v51 = vadd.f32 %v4858_v34, %v1924_v2  ;;  %v1125_v11 = vadd.f32 1.1283791, %v1124_v52  ;;  %v5849_v24 = vld [vmem:[#allocation23_spill] sm:$0xff] }
 0x22c   : > { %v3130_v3 = vpop.eup %3129  ;;  %v1100_v15 = vmul.f32 %v3128_v4, %v1099_v7  ;;  %v1748_v59 = vand.u32 2147483648, %v4871_v9  ;;  %3133 = vrcp.f32 %v4903_v60  ;;  %v4914_v0 = vadd.f32 1.1283791, %v1764_v21 }
 0x22d   : > { %v1823_v47 = vadd.f32 1.0, %v2943_v62  ;;  %v1109_v19 = vor.u32 1.1754944e-38, %v1108_v8  ;;  %v1738_v40 = vmul.f32 %v3130_v3, %v4871_v9  ;;  %2004 = vadd.xlane.f32.xlu1 %v4910_v51  ;;  %vm1107_vm3 = vcmp.eq.f32.partialorder %v1106_v23, 8.507059e+37 }
 0x22e   : > { %v1101_v57 = vadd.f32 %v3128_v4, %v1100_v15  ;;  %vm1742_vm4 = vweird.f32 %v4871_v9  ;;  %v1148_v29 = vand.u32 2147483648, %v4888_v46  ;;  %vm1743_vm5 = vweird.f32 %v3130_v3  ;;  %1974 = vadd.xlane.f32.xlu0 %v4907_v18  ;;  %v1927_v22 = vpop.f32.mrf.mxu3 }
 0x22f   : > { %v3132_v30 = vpop.eup %3131  ;;  %v1855_v14 = vmul.f32 %v1823_v47, %v4585_v43  ;;  %v1739_v1 = vsub.f32 1.0, %v1738_v40  ;;  %vm4928_vm6 = vcmp.eq.f32.partialorder %v1746_v61, 8.507059e+37  ;;  %v1749_v63 = vor.u32 1.1754944e-38, %v1748_v59  ;;  %vm4944_vm8 = vmor %vm1742_vm4, %vm1743_vm5 }
 0x230   : > { %v1105_v10 = vsel %vm4919_vm2, %v3128_v4, %v1101_v57  ;;  %v1138_v48 = vmul.f32 %v3132_v30, %v4888_v46  ;;  %vm1142_vm7 = vweird.f32 %v4888_v46  ;;  %v1146_v12 = vand.u32 2147483647, %v4888_v46  ;;  %v1882_v42 = vpop.f32.mrf.mxu1 }
 0x231   : > { %1962 = vmatmul.f32.gmra.mxu3 %v1855_v14  ;;  %v1110_v27 = vsel %vm1107_vm3, %v1109_v19, %v1105_v10  ;;  %v1740_v43 = vmul.f32 %v3130_v3, %v1739_v1  ;;  %v4939_v38 = vadd.f32 %v4858_v34, %v1927_v22  ;;  %vm1143_vm9 = vweird.f32 %v3132_v30 }
 0x232   : > { %v3134_v44 = vpop.eup %3133  ;;  %v1111_v35 = vmul.f32 %v1110_v27, %v1086_v45  ;;  %v1139_v37 = vsub.f32 1.0, %v1138_v48  ;;  %v1149_v31 = vor.u32 1.1754944e-38, %v1148_v29  ;;  %vm1782_vm10 = vweird.f32 %v4903_v60  ;;  %vm4960_vm11 = vmor %vm1142_vm7, %vm1143_vm9 }
 0x233   : > { %v1741_v25 = vadd.f32 %v3130_v3, %v1740_v43  ;;  %v1778_v58 = vmul.f32 %v3134_v44, %v4903_v60  ;;  %v4951_v54 = vadd.f32 %v4858_v34, %v1882_v42  ;;  %2006 = vadd.xlane.f32.xlu2 %v4939_v38  ;;  %v1786_v41 = vand.u32 2147483647, %v4903_v60 }
 0x234   : > { %v2928_v26 = vclamps-f32 %v1111_v35, 1.0  ;;  %v1140_v9 = vmul.f32 %v3132_v30, %v1139_v37  ;;  %v1788_v45 = vand.u32 2147483648, %v4903_v60  ;;  %vm1783_vm12 = vweird.f32 %v3134_v44 }
 0x235   : > { %v1745_v36 = vsel %vm4944_vm8, %v3130_v3, %v1741_v25  ;;  %v1779_v50 = vsub.f32 1.0, %v1778_v58  ;;  %v2037_v5 = vmul.f32 %v4907_v18, %v4907_v18  ;;  %1976 = vadd.xlane.f32.xlu1 %v4951_v54  ;;  %vm1147_vm13 = vcmp.eq.f32.partialorder %v1146_v12, 8.507059e+37  ;;  %vm4976_vm14 = vmor %vm1782_vm10, %vm1783_vm12 }
 0x236   : > { %v1808_v32 = vadd.f32 1.0, %v2928_v26  ;;  %v1750_v2 = vsel %vm4928_vm6, %v1749_v63, %v1745_v36  ;;  %v1141_v52 = vadd.f32 %v3132_v30, %v1140_v9  ;;  %v1126_v13 = vmul.f32 %v1125_v11, %v4496_v39  ;;  %v1930_v14 = vpop.f32.mrf.mxu3 }
 0x237   : > { %v1751_v21 = vmul.f32 %v1750_v2, %v4883_v6  ;;  %v1780_v46 = vmul.f32 %v3134_v44, %v1779_v50  ;;  %2070 = vadd.xlane.f32.xlu0 %v2037_v5  ;;  %v1789_v7 = vor.u32 1.1754944e-38, %v1788_v45  ;;  %vm1787_vm15 = vcmp.eq.f32.partialorder %v1786_v41, 8.507059e+37  ;;  %v5848_v6 = vld [vmem:[#allocation22_spill] sm:$0xff] }
 0x238   : > { %v1840_v56 = vmul.f32 %v1808_v32, %v4595_v17  ;;  %v1145_v33 = vsel %vm4960_vm11, %v3132_v30, %v1141_v52  ;;  %v480_v61 = vmul.f32 0.5, %v5848_v6  ;;  %v1766_v39 = vmul.f32 %v4914_v0, %v4533_v53  ;;  %v1885_v3 = vpop.f32.mrf.mxu1 }
 0x239   : > { %v2944_v23 = vclamps-f32 %v1751_v21, 1.0  ;;  %v1150_v28 = vsel %vm1147_vm13, %v1149_v31, %v1145_v33  ;;  %v1781_v62 = vadd.f32 %v3134_v44, %v1780_v46  ;;  %v4986_v15 = vadd.f32 %v4858_v34, %v1885_v3 }
 0x23a   : > { %1917 = vmatmul.f32.gmra.mxu1 %v1840_v56  ;;  %v1151_v17 = vmul.f32 %v1150_v28, %v1126_v13  ;;  %v2038_v59 = vmul.f32 %v4951_v54, %v4951_v54  ;;  %v2052_v53 = vmul.f32 %v4910_v51, %v4910_v51  ;;  %v465_v0 = vmul.f32 0.5, %v4484_v20 }
 0x23b   : > { %v1824_v11 = vadd.f32 1.0, %v2944_v23  ;;  %v1785_v60 = vsel %vm4976_vm14, %v3134_v44, %v1781_v62  ;;  %v2039_v29 = vmul.f32 %v4986_v15, %v4986_v15  ;;  %v481_v22 = vmul.f32 0.5, %v5849_v24 }
 0x23c   : > { %v2929_v47 = vclamps-f32 %v1151_v17, 1.0  ;;  %v1790_v49 = vsel %vm1787_vm15, %v1789_v7, %v1785_v60  ;;  %v4997_v63 = vadd.f32 %v4858_v34, %v1930_v14  ;;  %v2053_v20 = vmul.f32 %v4939_v38, %v4939_v38 }
 0x23d   : > { %v1856_v19 = vmul.f32 %v1824_v11, %v480_v61  ;;  %v1791_v40 = vmul.f32 %v1790_v49, %v1766_v39  ;;  %2072 = vadd.xlane.f32.xlu1 %v2038_v59  ;;  %2074 = vadd.xlane.f32.xlu2 %v2039_v29  ;;  %v3406_v49 = vmov 128.0  }
 0x23e   : > { %v1809_v57 = vadd.f32 1.0, %v2929_v47  ;;  %v2054_v43 = vmul.f32 %v4997_v63, %v4997_v63  ;;  %v1933_v35 = vpop.f32.mrf.mxu3  ;;  %3135 = vrcp.f32 %v3406_v49 }
 0x23f   : > { %1965 = vmatmul.f32.gmra.mxu3 %v1856_v19  ;;  %v2945_v30 = vclamps-f32 %v1791_v40, 1.0  ;;  %2100 = vadd.xlane.f32.xlu0 %v2052_v53  ;;  %v5012_v37 = vadd.f32 %v4858_v34, %v1933_v35 }
 0x240   : > { %v1841_v1 = vmul.f32 %v1809_v57, %v465_v0  ;;  %v1888_v27 = vpop.f32.mrf.mxu1 }
 0x241   : > { %v1825_v10 = vadd.f32 1.0, %v2945_v30  ;;  %v5005_v12 = vadd.f32 %v4858_v34, %v1888_v27  ;;  %v2055_v31 = vmul.f32 %v5012_v37, %v5012_v37 }
 0x242   : > { %1920 = vmatmul.f32.gmra.mxu1 %v1841_v1 }
 0x243   : > { %v1857_v48 = vmul.f32 %v1825_v10, %v481_v22  ;;  %v2040_v44 = vmul.f32 %v5005_v12, %v5005_v12 }
 0x244   : > { %v3136_v53 = vpop.eup %3135 }
 0x245   : > { %2102 = vadd.xlane.f32.xlu1 %v2053_v20  ;;  %2104 = vadd.xlane.f32.xlu2 %v2054_v43  ;;  %v2133_v57 = vmul.f32 128.0, %v3136_v53  ;;  %vm2137_vm0 = vweird.f32 %v3136_v53 }
 0x246   : > { %v1936_v25 = vpop.f32.mrf.mxu3 }
 0x247   : > { %1968 = vmatmul.f32.gmra.mxu3 %v1857_v48  ;;  %2008 = vadd.xlane.f32.xlu0 %v4997_v63  ;;  %v5027_v41 = vadd.f32 %v4858_v34, %v1936_v25  ;;  %v2134_v30 = vsub.f32 1.0, %v2133_v57 }
 0x248   : > { %v1891_v16 = vpop.f32.mrf.mxu1 }
 0x249   : > { %v5018_v42 = vadd.f32 %v4858_v34, %v1891_v16  ;;  %v2056_v36 = vmul.f32 %v5027_v41, %v5027_v41  ;;  %v2135_v1 = vmul.f32 %v3136_v53, %v2134_v30 }
 0x24b   : > { %v2041_v26 = vmul.f32 %v5018_v42, %v5018_v42  ;;  %v2136_v10 = vadd.f32 %v3136_v53, %v2135_v1 }
 0x24d   : > { %1978 = vadd.xlane.f32.xlu1 %v4986_v15  ;;  %1980 = vadd.xlane.f32.xlu2 %v5005_v12  ;;  %v5098_v27 = vsel %vm2137_vm0, %v3136_v53, %v2136_v10 }
 0x24e   : > { %v1939_v45 = vpop.f32.mrf.mxu3 }
 0x24f   : > { %2076 = vadd.xlane.f32.xlu0 %v2040_v44  ;;  %v5034_v4 = vadd.f32 %v4858_v34, %v1939_v45 }
 0x250   : > { %v1894_v58 = vpop.f32.mrf.mxu1 }
 0x251   : > { %v5024_v9 = vadd.f32 %v4858_v34, %v1894_v58  ;;  %v2057_v21 = vmul.f32 %v5034_v4, %v5034_v4 }
 0x253   : > { %v2042_v5 = vmul.f32 %v5024_v9, %v5024_v9 }
 0x255   : > { %2010 = vadd.xlane.f32.xlu1 %v5012_v37  ;;  %1982 = vadd.xlane.f32.xlu2 %v5018_v42 }
 0x256   : > { %v1942_v52 = vpop.f32.mrf.mxu3 }
 0x257   : > { %2106 = vadd.xlane.f32.xlu0 %v2055_v31  ;;  %v5048_v13 = vadd.f32 %v4858_v34, %v1942_v52 }
 0x258   : > { %v1897_v50 = vpop.f32.mrf.mxu1 }
 0x259   : > { %v5040_v32 = vadd.f32 %v4858_v34, %v1897_v50  ;;  %v2058_v56 = vmul.f32 %v5048_v13, %v5048_v13 }
 0x25b   : > { %v2043_v2 = vmul.f32 %v5040_v32, %v5040_v32 }
 0x25d   : > { %2078 = vadd.xlane.f32.xlu1 %v2041_v26  ;;  %2012 = vadd.xlane.f32.xlu2 %v5027_v41 }
 0x25e   : > { %v1945_v8 = vpop.f32.mrf.mxu3 }
 0x25f   : > { %1984 = vadd.xlane.f32.xlu0 %v5024_v9  ;;  %v5063_v62 = vadd.f32 %v4858_v34, %v1945_v8 }
 0x260   : > { %v1900_v46 = vpop.f32.mrf.mxu1 }
 0x261   : > { %v5054_v33 = vadd.f32 %v4858_v34, %v1900_v46  ;;  %v2059_v61 = vmul.f32 %v5063_v62, %v5063_v62 }
 0x263   : > { %v2044_v23 = vmul.f32 %v5054_v33, %v5054_v33 }
 0x265   : > { %2108 = vadd.xlane.f32.xlu1 %v2056_v36  ;;  %2080 = vadd.xlane.f32.xlu2 %v2042_v5 }
 0x266   : > { %v1948_v6 = vpop.f32.mrf.mxu3 }
 0x267   : > { %2014 = vadd.xlane.f32.xlu0 %v5034_v4  ;;  %v5070_v39 = vadd.f32 %v4858_v34, %v1948_v6 }
 0x269   : > { %v2060_v47 = vmul.f32 %v5070_v39, %v5070_v39 }
 0x26d   : > { %1986 = vadd.xlane.f32.xlu1 %v5040_v32  ;;  %2110 = vadd.xlane.f32.xlu2 %v2057_v21 }
 0x26f   : > { %2082 = vadd.xlane.f32.xlu0 %v2043_v2 }
 0x271   : > { %v1903_v7 = vpop.f32.mrf.mxu1 }
 0x272   : > { %v5060_v28 = vadd.f32 %v4858_v34, %v1903_v7 }
 0x274   : > { %v2045_v3 = vmul.f32 %v5060_v28, %v5060_v28 }
 0x275   : > { %2016 = vadd.xlane.f32.xlu1 %v5048_v13  ;;  %1988 = vadd.xlane.f32.xlu2 %v5054_v33 }
 0x277   : > { %2112 = vadd.xlane.f32.xlu0 %v2058_v56 }
 0x27a   : > { %v1906_v17 = vpop.f32.mrf.mxu1 }
 0x27b   : > { %v5076_v11 = vadd.f32 %v4858_v34, %v1906_v17 }
 0x27d   : > { %2084 = vadd.xlane.f32.xlu1 %v2044_v23  ;;  %2018 = vadd.xlane.f32.xlu2 %v5063_v62  ;;  %v2046_v60 = vmul.f32 %v5076_v11, %v5076_v11  ;;  %v1951_v59 = vpop.f32.mrf.mxu3 }
 0x27e   : > { %v5084_v40 = vadd.f32 %v4858_v34, %v1951_v59 }
 0x27f   : > { %1990 = vadd.xlane.f32.xlu0 %v5060_v28 }
 0x280   : > { %v2061_v0 = vmul.f32 %v5084_v40, %v5084_v40 }
 0x285   : > { %2114 = vadd.xlane.f32.xlu1 %v2059_v61  ;;  %2086 = vadd.xlane.f32.xlu2 %v2045_v3 }
 0x287   : > { %2020 = vadd.xlane.f32.xlu0 %v5070_v39  ;;  %v1954_v14 = vpop.f32.mrf.mxu3 }
 0x288   : > { %v5101_v43 = vadd.f32 %v4858_v34, %v1954_v14 }
 0x28a   : > { %v2062_v36 = vmul.f32 %v5101_v43, %v5101_v43 }
 0x28d   : > { %1992 = vadd.xlane.f32.xlu1 %v5076_v11  ;;  %2116 = vadd.xlane.f32.xlu2 %v2060_v47 }
 0x28e   : > { %v1909_v19 = vpop.f32.mrf.mxu1 }
 0x28f   : > { %2088 = vadd.xlane.f32.xlu0 %v2046_v60  ;;  %v5090_v29 = vadd.f32 %v4858_v34, %v1909_v19 }
 0x291   : > { %v2047_v48 = vmul.f32 %v5090_v29, %v5090_v29 }
 0x295   : > { %2022 = vadd.xlane.f32.xlu1 %v5084_v40  ;;  %1994 = vadd.xlane.f32.xlu2 %v5090_v29 }
 0x296   : > { %v1912_v24 = vpop.f32.mrf.mxu1 }
 0x297   : > { %2118 = vadd.xlane.f32.xlu0 %v2061_v0  ;;  %v5096_v20 = vadd.f32 %v4858_v34, %v1912_v24 }
 0x299   : > { %v1973_v22 = vpop.xlane.xlu0 %1972  ;;  %v1957_v25 = vpop.f32.mrf.mxu3  ;;  %v2048_v52 = vmul.f32 %v5096_v20, %v5096_v20 }
 0x29a   : > { %v5104_v44 = vmul.f32 %v5098_v27, %v1973_v22  ;;  %v5114_v5 = vadd.f32 %v4858_v34, %v1957_v25 }
 0x29c   : > { %v2069_v35 = vpop.xlane.xlu2 %2068  ;;  %v2203_v16 = vmul.f32 %v5104_v44, %v5104_v44  ;;  %v2063_v47 = vmul.f32 %v5114_v5, %v5114_v5 }
 0x29d   : > { %2090 = vadd.xlane.f32.xlu1 %v2047_v48  ;;  %v2171_v31 = vmul.f32 %v5098_v27, %v2069_v35  ;;  %2024 = vadd.xlane.f32.xlu2 %v5101_v43 }
 0x29f   : > { %1996 = vadd.xlane.f32.xlu0 %v5096_v20  ;;  %v2235_v58 = vsub.f32 %v2171_v31, %v2203_v16 }
 0x2a0   : > { %v2005_v45 = vpop.xlane.xlu1 %2004 }
 0x2a1   : > { %v1975_v26 = vpop.xlane.xlu0 %1974  ;;  %v2267_v50 = vadd.f32 1e-05, %v2235_v58  ;;  %v1960_v60 = vpop.f32.mrf.mxu3  ;;  %v5134_v19 = vmul.f32 %v5098_v27, %v2005_v45  ;;  %v2619_v58 = vsub.f32 %v4876_v55, %v5104_v44 }
 0x2a2   : > { %v5120_v21 = vmul.f32 %v5098_v27, %v1975_v26  ;;  %v5142_v57 = vadd.f32 %v4858_v34, %v1960_v60  ;;  %v5158_v26 = vld [vmem:[#allocation8 + $0x2] ss:$0 sm:$0xff] }
 0x2a3   : > { %3137 = vrsqrt.f32 %v2267_v50  ;;  %v2219_v22 = vmul.f32 %v5134_v19, %v5134_v19  ;;  %vm2305_vm2 = vweird.f32 %v2267_v50 }
 0x2a4   : > { %v1915_v2 = vpop.f32.mrf.mxu1  ;;  %v2204_v23 = vmul.f32 %v5120_v21, %v5120_v21  ;;  %v2064_v25 = vmul.f32 %v5142_v57, %v5142_v57 }
 0x2a5   : > { %2120 = vadd.xlane.f32.xlu1 %v2062_v36  ;;  %2092 = vadd.xlane.f32.xlu2 %v2048_v52  ;;  %v5123_v46 = vadd.f32 %v4858_v34, %v1915_v2 }
 0x2a6   : > { %v2007_v61 = vpop.xlane.xlu2 %2006 }
 0x2a7   : > { %2026 = vadd.xlane.f32.xlu0 %v5114_v5  ;;  %v2049_v3 = vmul.f32 %v5123_v46, %v5123_v46 }
 0x2a8   : > { %v1977_v8 = vpop.xlane.xlu1 %1976 }
 0x2a9   : > { %v3138_v7 = vpop.eup %3137  ;;  %v5139_v0 = vmul.f32 %v5098_v27, %v1977_v8 }
 0x2aa   : > { %v2071_v56 = vpop.xlane.xlu0 %2070  ;;  %v2300_v17 = vmul.f32 %v3138_v7, %v2267_v50  ;;  %vm2306_vm1 = vweird.f32 %v3138_v7 }
 0x2ab   : > { %v2172_v6 = vmul.f32 %v5098_v27, %v2071_v56  ;;  %v2205_v10 = vmul.f32 %v5139_v0, %v5139_v0  ;;  %vm2307_vm3 = vmor %vm2305_vm2, %vm2306_vm1  ;;  %v5161_v56 = vmul.f32 %v5098_v27, %v2007_v61 }
 0x2ac   : > { %v2301_v49 = vmul.f32 %v3138_v7, %v2300_v17 }
 0x2ad   : > { %1998 = vadd.xlane.f32.xlu1 %v5123_v46  ;;  %v2236_v59 = vsub.f32 %v2172_v6, %v2204_v23  ;;  %2122 = vadd.xlane.f32.xlu2 %v2063_v47  ;;  %v5166_v6 = vld [vmem:[#allocation8 + $0x3] ss:$0 sm:$0xff] }
 0x2ae   : > { %v2302_v30 = vmul.f32 0.5, %v2301_v49 }
 0x2af   : > { %2094 = vadd.xlane.f32.xlu0 %v2049_v3  ;;  %v5136_v53 = vadd.f32 1e-05, %v2236_v59 }
 0x2b0   : > { %v2303_v14 = vsub.f32 1.5, %v2302_v30  ;;  %v2073_v24 = vpop.xlane.xlu1 %2072  ;;  %v5151_v16 = vpop.xlane.xlu2 %2074  ;;  %v2220_v30 = vmul.f32 %v5161_v56, %v5161_v56 }
 0x2b1   : > { %3139 = vrsqrt.f32 %v5136_v53  ;;  %v2173_v35 = vmul.f32 %v5098_v27, %v2073_v24  ;;  %vm2315_vm5 = vweird.f32 %v5136_v53 }
 0x2b2   : > { %v2101_v1 = vpop.xlane.xlu0 %2100  ;;  %v2304_v31 = vmul.f32 %v3138_v7, %v2303_v14 }
 0x2b3   : > { %v2187_v48 = vmul.f32 %v5098_v27, %v2101_v1  ;;  %v2237_v36 = vsub.f32 %v2173_v35, %v2205_v10 }
 0x2b4   : > { %v2308_v52 = vsel %vm2307_vm3, %v3138_v7, %v2304_v31  ;;  %v1963_v23 = vpop.f32.mrf.mxu3 }
 0x2b5   : > { %2028 = vadd.xlane.f32.xlu1 %v5142_v57  ;;  %v2251_v45 = vsub.f32 %v2187_v48, %v2219_v22  ;;  %v2651_v17 = vmul.f32 %v2619_v58, %v2308_v52  ;;  %v5170_v44 = vadd.f32 1e-05, %v2237_v36 }
 0x2b7   : > { %v1918_v2 = vpop.f32.mrf.mxu1  ;;  %2124 = vadd.xlane.f32.xlu0 %v2064_v25  ;;  %v3140_v50 = vpop.eup %3139  ;;  %v5168_v55 = vadd.f32 1e-05, %v2251_v45  ;;  %v2684_v7 = vmul.f32 %v5158_v26, %v2651_v17  ;;  %v5197_v45 = vadd.f32 %v4858_v34, %v1963_v23  ;;  %vm2325_vm11 = vweird.f32 %v5170_v44 }
 0x2b8   : > { %v5164_v8 = vadd.f32 %v4858_v34, %v1918_v2  ;;  %v2310_v3 = vmul.f32 %v3140_v50, %v5136_v53  ;;  %v2103_v59 = vpop.xlane.xlu1 %2102  ;;  %v2105_v24 = vpop.xlane.xlu2 %2104  ;;  %vm2316_vm4 = vweird.f32 %v3140_v50 }
 0x2b9   : > { %3141 = vrsqrt.f32 %v5168_v55  ;;  %v2717_v49 = vadd.f32 %v5166_v6, %v2684_v7  ;;  %v2188_v1 = vmul.f32 %v5098_v27, %v2103_v59  ;;  %v2189_v10 = vmul.f32 %v5098_v27, %v2105_v24  ;;  %vm2317_vm6 = vmor %vm2315_vm5, %vm2316_vm4 }
 0x2ba   : > { %2000 = vadd.xlane.f32.xlu2 %v5164_v8  ;;  %v2311_v61 = vmul.f32 %v3140_v50, %v2310_v3  ;;  %3143 = vrsqrt.f32 %v5170_v44  ;;  %v2009_v60 = vpop.xlane.xlu0 %2008  ;;  %v2050_v47 = vmul.f32 %v5164_v8, %v5164_v8  ;;  %vm2465_vm7 = vweird.f32 %v5168_v55 }
 0x2bb   : > { %v5183_v14 = vmul.f32 %v5098_v27, %v2009_v60  ;;  %2749 = vst [vmem:[%s5189_s21] sm:$0xff] %v2717_v49  ;;  %v2252_v35 = vsub.f32 %v2188_v1, %v2220_v30  ;;  %v2620_v60 = vsub.f32 %v4907_v18, %v5120_v21  ;;  %v2635_v18 = vsub.f32 %v4910_v51, %v5134_v19 }
 0x2bc   : > { %v2312_v22 = vmul.f32 0.5, %v2311_v61 }
 0x2bd   : > { %2096 = vadd.xlane.f32.xlu1 %v2050_v47  ;;  %v2221_v48 = vmul.f32 %v5183_v14, %v5183_v14  ;;  %v5202_v2 = vadd.f32 1e-05, %v2252_v35 }
 0x2be   : > { %v2313_v25 = vsub.f32 1.5, %v2312_v22 }
 0x2bf   : > { %v1921_v31 = vpop.f32.mrf.mxu1  ;;  %v5194_v58 = vpop.eup %3141  ;;  %v2253_v52 = vsub.f32 %v2189_v10, %v2221_v48  ;;  %3145 = vrsqrt.f32 %v5202_v2  ;;  %vm2475_vm13 = vweird.f32 %v5202_v2 }
 0x2c0   : > { %v5200_v36 = vadd.f32 %v4858_v34, %v1921_v31  ;;  %v5204_v17 = vpop.eup %3143  ;;  %v2314_v3 = vmul.f32 %v3140_v50, %v2313_v25  ;;  %v2460_v7 = vmul.f32 %v5194_v58, %v5168_v55  ;;  %v1979_v30 = vpop.xlane.xlu1 %1978  ;;  %vm2466_vm8 = vweird.f32 %v5194_v58 }
 0x2c1   : > { %v2320_v23 = vmul.f32 %v5204_v17, %v5170_v44  ;;  %v5217_v47 = vadd.f32 1e-05, %v2253_v52  ;;  %v5223_v24 = vmul.f32 %v5098_v27, %v1979_v30  ;;  %v1981_v10 = vpop.xlane.xlu2 %1980  ;;  %vm2326_vm9 = vweird.f32 %v5204_v17  ;;  %vm2467_vm10 = vmor %vm2465_vm7, %vm2466_vm8 }
 0x2c2   : > { %v1966_v61 = vpop.f32.mrf.mxu3  ;;  %2002 = vadd.xlane.f32.xlu0 %v5200_v36  ;;  %2030 = vadd.xlane.f32.xlu2 %v5197_v45  ;;  %v2318_v59 = vsel %vm2317_vm6, %v3140_v50, %v2314_v3  ;;  %v2461_v53 = vmul.f32 %v5194_v58, %v2460_v7  ;;  %v2077_v49 = vpop.xlane.xlu0 %2076  ;;  %v2174_v50 = vmul.f32 %v5098_v27, %v5151_v16  ;;  %vm2327_vm12 = vmor %vm2325_vm11, %vm2326_vm9 }
 0x2c3   : > { %v2652_v21 = vmul.f32 %v2620_v60, %v2318_v59  ;;  %v2321_v1 = vmul.f32 %v5204_v17, %v2320_v23  ;;  %3147 = vrsqrt.f32 %v5217_v47  ;;  %v2206_v19 = vmul.f32 %v5223_v24, %v5223_v24 }
 0x2c4   : > { %v2462_v22 = vmul.f32 0.5, %v2461_v53  ;;  %v5234_v35 = vadd.f32 %v4858_v34, %v1966_v61  ;;  %v5238_v16 = vmul.f32 %v5098_v27, %v1981_v10  ;;  %v2051_v60 = vmul.f32 %v5200_v36, %v5200_v36 }
 0x2c5   : > { %v2685_v48 = vmul.f32 %v5158_v26, %v2652_v21  ;;  %v2322_v51 = vmul.f32 0.5, %v2321_v1  ;;  %v5240_v25 = vpop.eup %3145  ;;  %v2238_v7 = vsub.f32 %v2174_v50, %v2206_v19  ;;  %v2175_v59 = vmul.f32 %v5098_v27, %v2077_v49 }
 0x2c6   : > { %v2463_v31 = vsub.f32 1.5, %v2462_v22  ;;  %v2470_v61 = vmul.f32 %v5240_v25, %v5202_v2  ;;  %v2207_v53 = vmul.f32 %v5238_v16, %v5238_v16  ;;  %v2621_v21 = vsub.f32 %v4951_v54, %v5139_v0 }
 0x2c7   : > { %v2718_v52 = vadd.f32 %v5166_v6, %v2685_v48  ;;  %v2323_v3 = vsub.f32 1.5, %v2322_v51  ;;  %v5260_v22 = vadd.f32 1e-05, %v2238_v7  ;;  %vm2476_vm14 = vweird.f32 %v5240_v25 }
 0x2c8   : > { %v2464_v23 = vmul.f32 %v5194_v58, %v2463_v31  ;;  %v2471_v0 = vmul.f32 %v5240_v25, %v2470_v61  ;;  %v2239_v55 = vsub.f32 %v2175_v59, %v2207_v53  ;;  %v2011_v48 = vpop.xlane.xlu1 %2010  ;;  %vm2477_vm15 = vmor %vm2475_vm13, %vm2476_vm14  ;;  %vm2485_vm1 = vweird.f32 %v5217_v47 }
 0x2c9   : > { %2750 = vst [vmem:[%s5189_s21 + $0x8] sm:$0xff] %v2718_v52  ;;  %v2324_v1 = vmul.f32 %v5204_v17, %v2323_v3  ;;  %v3148_v49 = vpop.eup %3147  ;;  %3149 = vrsqrt.f32 %v5260_v22  ;;  %vm2335_vm4 = vweird.f32 %v5260_v22 }
 0x2ca   : > { %v1969_v30 = vpop.f32.mrf.mxu3  ;;  %2032 = vadd.xlane.f32.xlu0 %v5234_v35  ;;  %2098 = vadd.xlane.f32.xlu2 %v2051_v60  ;;  %v2468_v54 = vsel %vm2467_vm10, %v5194_v58, %v2464_v23  ;;  %v2107_v10 = vpop.xlane.xlu0 %2106  ;;  %v2480_v19 = vmul.f32 %v3148_v49, %v5217_v47  ;;  %v2472_v52 = vmul.f32 0.5, %v2471_v0  ;;  %v5276_v3 = vadd.f32 1e-05, %v2239_v55 }
 0x2cb   : > { %v5264_v50 = vadd.f32 %v4858_v34, %v1969_v30  ;;  %v2667_v44 = vmul.f32 %v2635_v18, %v2468_v54  ;;  %v2328_v51 = vsel %vm2327_vm12, %v5204_v17, %v2324_v1  ;;  %v2066_v18 = vmul.f32 %v5234_v35, %v5234_v35  ;;  %v1983_v23 = vpop.xlane.xlu2 %1982 }
 0x2cc   : > { %v2653_v31 = vmul.f32 %v2621_v21, %v2328_v51  ;;  %v2481_v58 = vmul.f32 %v3148_v49, %v2480_v19  ;;  %v2473_v7 = vsub.f32 1.5, %v2472_v52  ;;  %v5283_v60 = vmul.f32 %v5098_v27, %v2011_v48 }
 0x2cd   : > { %2034 = vadd.xlane.f32.xlu1 %v5264_v50  ;;  %v2700_v34 = vmul.f32 %v5158_v26, %v2667_v44  ;;  %3151 = vrsqrt.f32 %v5276_v3  ;;  %v2067_v53 = vmul.f32 %v5264_v50, %v5264_v50  ;;  %v2190_v1 = vmul.f32 %v5098_v27, %v2107_v10 }
 0x2ce   : > { %v2686_v17 = vmul.f32 %v5158_v26, %v2653_v31  ;;  %v2482_v59 = vmul.f32 0.5, %v2481_v58  ;;  %v2474_v21 = vmul.f32 %v5240_v25, %v2473_v7  ;;  %v2222_v54 = vmul.f32 %v5283_v60, %v5283_v60 }
 0x2cf   : > { %v2733_v61 = vadd.f32 %v5166_v6, %v2700_v34  ;;  %v2636_v0 = vsub.f32 %v4939_v38, %v5161_v56  ;;  %vm2486_vm0 = vweird.f32 %v3148_v49  ;;  %v3150_v48 = vpop.eup %3149  ;;  %v5302_v10 = vmul.f32 %v5098_v27, %v1983_v23 }
 0x2d0   : > { %v2719_v30 = vadd.f32 %v5166_v6, %v2686_v17  ;;  %v2483_v55 = vsub.f32 1.5, %v2482_v59  ;;  %v2478_v44 = vsel %vm2477_vm15, %v5240_v25, %v2474_v21  ;;  %v2254_v51 = vsub.f32 %v2190_v1, %v2222_v54  ;;  %v2079_v56 = vpop.xlane.xlu1 %2078  ;;  %vm2487_vm2 = vmor %vm2485_vm1, %vm2486_vm0 }
 0x2d1   : > { %2765 = vst [vmem:[%s5189_s21 + $0x80] sm:$0xff] %v2733_v61  ;;  %v2065_v38 = vmul.f32 %v5197_v45, %v5197_v45  ;;  %v2668_v31 = vmul.f32 %v2636_v0, %v2478_v44  ;;  %v2330_v52 = vmul.f32 %v3150_v48, %v5260_v22  ;;  %v2637_v34 = vsub.f32 %v4997_v63, %v5183_v14 }
 0x2d2   : > { %2130 = vadd.xlane.f32.xlu0 %v2067_v53  ;;  %2128 = vadd.xlane.f32.xlu2 %v2066_v18  ;;  %2751 = vst [vmem:[%s5189_s21 + $0x10] sm:$0xff] %v2719_v30  ;;  %v1985_v19 = vpop.xlane.xlu0 %1984  ;;  %v2484_v2 = vmul.f32 %v3148_v49, %v2483_v55  ;;  %v5311_v25 = vadd.f32 1e-05, %v2254_v51  ;;  %v2176_v23 = vmul.f32 %v5098_v27, %v2079_v56  ;;  %vm2336_vm3 = vweird.f32 %v3150_v48 }
 0x2d3   : > { %v3152_v58 = vpop.eup %3151  ;;  %v2701_v18 = vmul.f32 %v5158_v26, %v2668_v31  ;;  %v2331_v7 = vmul.f32 %v3150_v48, %v2330_v52  ;;  %v2208_v63 = vmul.f32 %v5302_v10, %v5302_v10  ;;  %v2013_v14 = vpop.xlane.xlu2 %2012  ;;  %v2622_v55 = vsub.f32 %v4986_v15, %v5223_v24  ;;  %vm2337_vm6 = vmor %vm2335_vm4, %vm2336_vm3 }
 0x2d4   : > { %v2488_v17 = vsel %vm2487_vm2, %v3148_v49, %v2484_v2  ;;  %v2340_v47 = vmul.f32 %v3152_v58, %v5276_v3  ;;  %3153 = vrsqrt.f32 %v5311_v25  ;;  %v5323_v54 = vmul.f32 %v5098_v27, %v2013_v14 }
 0x2d5   : > { %2126 = vadd.xlane.f32.xlu1 %v2065_v38  ;;  %v2669_v61 = vmul.f32 %v2637_v34, %v2488_v17  ;;  %v2734_v59 = vadd.f32 %v5166_v6, %v2701_v18  ;;  %v2332_v53 = vmul.f32 0.5, %v2331_v7  ;;  %v2240_v1 = vsub.f32 %v2176_v23, %v2208_v63 }
 0x2d6   : > { %v2341_v21 = vmul.f32 %v3152_v58, %v2340_v47  ;;  %vm2346_vm5 = vweird.f32 %v3152_v58  ;;  %v5332_v2 = vmul.f32 %v5098_v27, %v1985_v19  ;;  %v2223_v15 = vmul.f32 %v5323_v54, %v5323_v54 }
 0x2d7   : > { %v2702_v30 = vmul.f32 %v5158_v26, %v2669_v61  ;;  %2766 = vst [vmem:[%s5189_s21 + $0x88] sm:$0xff] %v2734_v59  ;;  %v2333_v49 = vsub.f32 1.5, %v2332_v53  ;;  %v5328_v51 = vadd.f32 1e-05, %v2240_v1  ;;  %vm2345_vm7 = vweird.f32 %v5276_v3 }
 0x2d8   : > { %v2342_v44 = vmul.f32 0.5, %v2341_v21  ;;  %v2109_v56 = vpop.xlane.xlu1 %2108  ;;  %vm2347_vm8 = vmor %vm2345_vm7, %vm2346_vm5  ;;  %v2623_v61 = vsub.f32 %v5005_v12, %v5238_v16  ;;  %v2209_v63 = vmul.f32 %v5332_v2, %v5332_v2  ;;  %vm2495_vm10 = vweird.f32 %v5311_v25 }
 0x2d9   : > { %v2735_v0 = vadd.f32 %v5166_v6, %v2702_v30  ;;  %v2334_v31 = vmul.f32 %v3150_v48, %v2333_v49  ;;  %3155 = vrsqrt.f32 %v5328_v51  ;;  %v2191_v24 = vmul.f32 %v5098_v27, %v2109_v56 }
 0x2da   : > { %v2015_v38 = vpop.xlane.xlu0 %2014  ;;  %v3154_v52 = vpop.eup %3153  ;;  %v2343_v34 = vsub.f32 1.5, %v2342_v44  ;;  %vm2355_vm13 = vweird.f32 %v5328_v51 }
 0x2db   : > { %2767 = vst [vmem:[%s5189_s21 + $0x90] sm:$0xff] %v2735_v0  ;;  %v2338_v18 = vsel %vm2337_vm6, %v3150_v48, %v2334_v31  ;;  %v2490_v17 = vmul.f32 %v3154_v52, %v5311_v25  ;;  %v2255_v19 = vsub.f32 %v2191_v24, %v2223_v15  ;;  %v2081_v23 = vpop.xlane.xlu2 %2080  ;;  %v5352_v12 = vmul.f32 %v5098_v27, %v2015_v38 }
 0x2dc   : > { %v2654_v7 = vmul.f32 %v2622_v55, %v2338_v18  ;;  %v2344_v22 = vmul.f32 %v3152_v58, %v2343_v34  ;;  %v2177_v14 = vmul.f32 %v5098_v27, %v2081_v23  ;;  %vm2496_vm9 = vweird.f32 %v3154_v52 }
 0x2dd   : > { %v2491_v47 = vmul.f32 %v3154_v52, %v2490_v17  ;;  %v5348_v53 = vadd.f32 1e-05, %v2255_v19  ;;  %vm2497_vm11 = vmor %vm2495_vm10, %vm2496_vm9  ;;  %v2638_v24 = vsub.f32 %v5012_v37, %v5283_v60  ;;  %v2224_v23 = vmul.f32 %v5352_v12, %v5352_v12 }
 0x2de   : > { %v2687_v48 = vmul.f32 %v5158_v26, %v2654_v7  ;;  %v2348_v59 = vsel %vm2347_vm8, %v3152_v58, %v2344_v22  ;;  %v2241_v21 = vsub.f32 %v2177_v14, %v2209_v63 }
 0x2df   : > { %v2655_v3 = vmul.f32 %v2623_v61, %v2348_v59  ;;  %v2492_v30 = vmul.f32 0.5, %v2491_v47  ;;  %v3156_v1 = vpop.eup %3155  ;;  %3157 = vrsqrt.f32 %v5348_v53  ;;  %vm2505_vm0 = vweird.f32 %v5348_v53 }
 0x2e0   : > { %v2720_v49 = vadd.f32 %v5166_v6, %v2687_v48  ;;  %v1987_v0 = vpop.xlane.xlu1 %1986  ;;  %v2350_v58 = vmul.f32 %v3156_v1, %v5328_v51  ;;  %v5358_v56 = vadd.f32 1e-05, %v2241_v21  ;;  %vm2356_vm12 = vweird.f32 %v3156_v1 }
 0x2e1   : > { %v2688_v55 = vmul.f32 %v5158_v26, %v2655_v3  ;;  %v2493_v44 = vsub.f32 1.5, %v2492_v30  ;;  %v5361_v31 = vmul.f32 %v5098_v27, %v1987_v0  ;;  %vm2357_vm14 = vmor %vm2355_vm13, %vm2356_vm12 }
 0x2e2   : > { %v2083_v16 = vpop.xlane.xlu0 %2082  ;;  %2752 = vst [vmem:[%s5189_s21 + $0x18] sm:$0xff] %v2720_v49  ;;  %v2351_v15 = vmul.f32 %v3156_v1, %v2350_v58  ;;  %3159 = vrsqrt.f32 %v5358_v56  ;;  %vm2365_vm3 = vweird.f32 %v5358_v56 }
 0x2e3   : > { %v2721_v38 = vadd.f32 %v5166_v6, %v2688_v55  ;;  %v2494_v34 = vmul.f32 %v3154_v52, %v2493_v44  ;;  %v2178_v18 = vmul.f32 %v5098_v27, %v2083_v16  ;;  %v2210_v17 = vmul.f32 %v5361_v31, %v5361_v31  ;;  %v2111_v7 = vpop.xlane.xlu2 %2110 }
 0x2e4   : > { %v2352_v19 = vmul.f32 0.5, %v2351_v15  ;;  %v2192_v25 = vmul.f32 %v5098_v27, %v2111_v7  ;;  %v2624_v55 = vsub.f32 %v5018_v42, %v5302_v10 }
 0x2e5   : > { %2753 = vst [vmem:[%s5189_s21 + $0x20] sm:$0xff] %v2721_v38  ;;  %v2498_v22 = vsel %vm2497_vm11, %v3154_v52, %v2494_v34  ;;  %v3158_v61 = vpop.eup %3157  ;;  %v2242_v63 = vsub.f32 %v2178_v18, %v2210_v17 }
 0x2e6   : > { %v2670_v47 = vmul.f32 %v2638_v24, %v2498_v22  ;;  %v2353_v37 = vsub.f32 1.5, %v2352_v19  ;;  %v2500_v60 = vmul.f32 %v3158_v61, %v5348_v53  ;;  %v2256_v14 = vsub.f32 %v2192_v25, %v2224_v23 }
 0x2e7   : > { %v5377_v59 = vadd.f32 1e-05, %v2242_v63  ;;  %vm2506_vm15 = vweird.f32 %v3158_v61  ;;  %v2639_v25 = vsub.f32 %v5027_v41, %v5323_v54 }
 0x2e8   : > { %v2703_v48 = vmul.f32 %v5158_v26, %v2670_v47  ;;  %v2017_v3 = vpop.xlane.xlu1 %2016  ;;  %v2354_v30 = vmul.f32 %v3156_v1, %v2353_v37  ;;  %v2501_v21 = vmul.f32 %v3158_v61, %v2500_v60  ;;  %v5380_v49 = vadd.f32 1e-05, %v2256_v14  ;;  %v3160_v16 = vpop.eup %3159  ;;  %vm2507_vm1 = vmor %vm2505_vm0, %vm2506_vm15 }
 0x2e9   : > { %3161 = vrsqrt.f32 %v5377_v59  ;;  %v5387_v44 = vmul.f32 %v5098_v27, %v2017_v3  ;;  %v2360_v34 = vmul.f32 %v3160_v16, %v5358_v56  ;;  %vm2366_vm2 = vweird.f32 %v3160_v16 }
 0x2ea   : > { %v2113_v52 = vpop.xlane.xlu0 %2112  ;;  %v2736_v0 = vadd.f32 %v5166_v6, %v2703_v48  ;;  %v2358_v58 = vsel %vm2357_vm14, %v3156_v1, %v2354_v30  ;;  %v2502_v38 = vmul.f32 0.5, %v2501_v21  ;;  %3163 = vrsqrt.f32 %v5380_v49  ;;  %vm2367_vm4 = vmor %vm2365_vm3, %vm2366_vm2 }
 0x2eb   : > { %v2656_v51 = vmul.f32 %v2624_v55, %v2358_v58  ;;  %v2193_v15 = vmul.f32 %v5098_v27, %v2113_v52  ;;  %v2225_v24 = vmul.f32 %v5387_v44, %v5387_v44  ;;  %v1989_v42 = vpop.xlane.xlu2 %1988  ;;  %v2361_v18 = vmul.f32 %v3160_v16, %v2360_v34 }
 0x2ec   : > { %2768 = vst [vmem:[%s5189_s21 + $0x98] sm:$0xff] %v2736_v0  ;;  %v2503_v10 = vsub.f32 1.5, %v2502_v38  ;;  %v5403_v63 = vmul.f32 %v5098_v27, %v1989_v42  ;;  %v2625_v21 = vsub.f32 %v5024_v9, %v5332_v2  ;;  %v2626_v2 = vsub.f32 %v5040_v32, %v5361_v31 }
 0x2ed   : > { %v2689_v17 = vmul.f32 %v5158_v26, %v2656_v51  ;;  %v2257_v7 = vsub.f32 %v2193_v15, %v2225_v24  ;;  %v2362_v22 = vmul.f32 0.5, %v2361_v18  ;;  %vm2375_vm6 = vweird.f32 %v5377_v59 }
 0x2ee   : > { %v2504_v1 = vmul.f32 %v3158_v61, %v2503_v10  ;;  %v2211_v0 = vmul.f32 %v5403_v63, %v5403_v63  ;;  %vm2515_vm9 = vweird.f32 %v5380_v49 }
 0x2ef   : > { %v3162_v19 = vpop.eup %3161  ;;  %v2722_v23 = vadd.f32 %v5166_v6, %v2689_v17  ;;  %v5400_v47 = vadd.f32 1e-05, %v2257_v7  ;;  %v2363_v48 = vsub.f32 1.5, %v2362_v22 }
 0x2f0   : > { %v2085_v60 = vpop.xlane.xlu1 %2084  ;;  %v2508_v14 = vsel %vm2507_vm1, %v3158_v61, %v2504_v1  ;;  %v2370_v53 = vmul.f32 %v3162_v19, %v5377_v59  ;;  %v3164_v52 = vpop.eup %3163  ;;  %vm2376_vm5 = vweird.f32 %v3162_v19 }
 0x2f1   : > { %2754 = vst [vmem:[%s5189_s21 + $0x28] sm:$0xff] %v2722_v23  ;;  %v2671_v3 = vmul.f32 %v2639_v25, %v2508_v14  ;;  %3165 = vrsqrt.f32 %v5400_v47  ;;  %v2364_v30 = vmul.f32 %v3160_v16, %v2363_v48  ;;  %v2510_v54 = vmul.f32 %v3164_v52, %v5380_v49  ;;  %vm2377_vm8 = vmor %vm2375_vm6, %vm2376_vm5 }
 0x2f2   : > { %v1991_v37 = vpop.xlane.xlu0 %1990  ;;  %v2371_v41 = vmul.f32 %v3162_v19, %v2370_v53  ;;  %v2179_v55 = vmul.f32 %v5098_v27, %v2085_v60  ;;  %vm2516_vm7 = vweird.f32 %v3164_v52  ;;  %v2640_v53 = vsub.f32 %v5034_v4, %v5352_v12 }
 0x2f3   : > { %v2704_v61 = vmul.f32 %v5158_v26, %v2671_v3  ;;  %v2019_v58 = vpop.xlane.xlu2 %2018  ;;  %v2368_v38 = vsel %vm2367_vm4, %v3160_v16, %v2364_v30  ;;  %v2511_v51 = vmul.f32 %v3164_v52, %v2510_v54  ;;  %v5426_v16 = vmul.f32 %v5098_v27, %v1991_v37  ;;  %vm2517_vm10 = vmor %vm2515_vm9, %vm2516_vm7 }
 0x2f4   : > { %v2372_v34 = vmul.f32 0.5, %v2371_v41  ;;  %v2657_v15 = vmul.f32 %v2625_v21, %v2368_v38  ;;  %v2243_v24 = vsub.f32 %v2179_v55, %v2211_v0  ;;  %v5418_v42 = vmul.f32 %v5098_v27, %v2019_v58 }
 0x2f5   : > { %v2737_v56 = vadd.f32 %v5166_v6, %v2704_v61  ;;  %v2512_v10 = vmul.f32 0.5, %v2511_v51  ;;  %v2212_v30 = vmul.f32 %v5426_v16, %v5426_v16  ;;  %vm2525_vm12 = vweird.f32 %v5400_v47 }
 0x2f6   : > { %v2373_v9 = vsub.f32 1.5, %v2372_v34  ;;  %v2690_v17 = vmul.f32 %v5158_v26, %v2657_v15  ;;  %v5428_v7 = vadd.f32 1e-05, %v2243_v24  ;;  %v2226_v59 = vmul.f32 %v5418_v42, %v5418_v42 }
 0x2f7   : > { %v3166_v18 = vpop.eup %3165  ;;  %2769 = vst [vmem:[%s5189_s21 + $0xa0] sm:$0xff] %v2737_v56  ;;  %v2513_v25 = vsub.f32 1.5, %v2512_v10 }
 0x2f8   : > { %v2115_v22 = vpop.xlane.xlu1 %2114  ;;  %v2374_v23 = vmul.f32 %v3162_v19, %v2373_v9  ;;  %v2520_v32 = vmul.f32 %v3166_v18, %v5400_v47  ;;  %v2723_v31 = vadd.f32 %v5166_v6, %v2690_v17  ;;  %3167 = vrsqrt.f32 %v5428_v7 }
 0x2f9   : > { %v2514_v60 = vmul.f32 %v3164_v52, %v2513_v25  ;;  %v2194_v48 = vmul.f32 %v5098_v27, %v2115_v22  ;;  %vm2526_vm11 = vweird.f32 %v3166_v18  ;;  %vm2385_vm15 = vweird.f32 %v5428_v7 }
 0x2fa   : > { %v2021_v1 = vpop.xlane.xlu0 %2020  ;;  %v2378_v37 = vsel %vm2377_vm8, %v3162_v19, %v2374_v23  ;;  %v2521_v14 = vmul.f32 %v3166_v18, %v2520_v32  ;;  %2755 = vst [vmem:[%s5189_s21 + $0x30] sm:$0xff] %v2723_v31  ;;  %vm2527_vm13 = vmor %vm2525_vm12, %vm2526_vm11 }
 0x2fb   : > { %v2658_v3 = vmul.f32 %v2626_v2, %v2378_v37  ;;  %v2087_v49 = vpop.xlane.xlu2 %2086  ;;  %v2518_v41 = vsel %vm2517_vm10, %v3164_v52, %v2514_v60  ;;  %v2258_v21 = vsub.f32 %v2194_v48, %v2226_v59  ;;  %v5450_v52 = vmul.f32 %v5098_v27, %v2021_v1 }
 0x2fc   : > { %v2522_v54 = vmul.f32 0.5, %v2521_v14  ;;  %v2180_v61 = vmul.f32 %v5098_v27, %v2087_v49  ;;  %v2672_v0 = vmul.f32 %v2640_v53, %v2518_v41  ;;  %v2641_v2 = vsub.f32 %v5048_v13, %v5387_v44 }
 0x2fd   : > { %v2691_v19 = vmul.f32 %v5158_v26, %v2658_v3  ;;  %v5445_v58 = vadd.f32 1e-05, %v2258_v21  ;;  %v2227_v23 = vmul.f32 %v5450_v52, %v5450_v52 }
 0x2fe   : > { %v2523_v55 = vsub.f32 1.5, %v2522_v54  ;;  %v2244_v4 = vsub.f32 %v2180_v61, %v2212_v30  ;;  %v3168_v12 = vpop.eup %3167  ;;  %v2705_v34 = vmul.f32 %v5158_v26, %v2672_v0  ;;  %v2627_v61 = vsub.f32 %v5054_v33, %v5403_v63 }
 0x2ff   : > { %v2724_v38 = vadd.f32 %v5166_v6, %v2691_v19  ;;  %v2380_v24 = vmul.f32 %v3168_v12, %v5428_v7  ;;  %3169 = vrsqrt.f32 %v5445_v58  ;;  %vm2386_vm14 = vweird.f32 %v3168_v12 }
 0x300   : > { %v1993_v56 = vpop.xlane.xlu1 %1992  ;;  %v2524_v15 = vmul.f32 %v3166_v18, %v2523_v55  ;;  %v2738_v9 = vadd.f32 %v5166_v6, %v2705_v34  ;;  %v5460_v10 = vadd.f32 1e-05, %v2244_v4  ;;  %vm2387_vm0 = vmor %vm2385_vm15, %vm2386_vm14  ;;  %vm2535_vm2 = vweird.f32 %v5445_v58 }
 0x301   : > { %2756 = vst [vmem:[%s5189_s21 + $0x38] sm:$0xff] %v2724_v38  ;;  %v2381_v1 = vmul.f32 %v3168_v12, %v2380_v24  ;;  %v5463_v22 = vmul.f32 %v5098_v27, %v1993_v56 }
 0x302   : > { %v2089_v51 = vpop.xlane.xlu0 %2088  ;;  %v2528_v17 = vsel %vm2527_vm13, %v3166_v18, %v2524_v15  ;;  %2770 = vst [vmem:[%s5189_s21 + $0xa8] sm:$0xff] %v2738_v9  ;;  %3171 = vrsqrt.f32 %v5460_v10  ;;  %vm2395_vm5 = vweird.f32 %v5460_v10 }
 0x303   : > { %v2673_v47 = vmul.f32 %v2641_v2, %v2528_v17  ;;  %v2117_v25 = vpop.xlane.xlu2 %2116  ;;  %v2382_v32 = vmul.f32 0.5, %v2381_v1  ;;  %v2181_v31 = vmul.f32 %v5098_v27, %v2089_v51  ;;  %v2213_v13 = vmul.f32 %v5463_v22, %v5463_v22 }
 0x304   : > { %v2195_v44 = vmul.f32 %v5098_v27, %v2117_v25  ;;  %v2642_v25 = vsub.f32 %v5063_v62, %v5418_v42  ;;  %v2628_v62 = vsub.f32 %v5060_v28, %v5426_v16 }
 0x305   : > { %v2706_v18 = vmul.f32 %v5158_v26, %v2673_v47  ;;  %v3170_v59 = vpop.eup %3169  ;;  %v2383_v37 = vsub.f32 1.5, %v2382_v32  ;;  %v2245_v60 = vsub.f32 %v2181_v31, %v2213_v13 }
 0x306   : > { %v2259_v14 = vsub.f32 %v2195_v44, %v2227_v23  ;;  %v2530_v53 = vmul.f32 %v3170_v59, %v5445_v58  ;;  %vm2536_vm1 = vweird.f32 %v3170_v59 }
 0x307   : > { %v2739_v48 = vadd.f32 %v5166_v6, %v2706_v18  ;;  %v2384_v49 = vmul.f32 %v3168_v12, %v2383_v37  ;;  %v5477_v41 = vadd.f32 1e-05, %v2245_v60  ;;  %vm2537_vm3 = vmor %vm2535_vm2, %vm2536_vm1 }
 0x308   : > { %v2023_v30 = vpop.xlane.xlu1 %2022  ;;  %v5479_v54 = vadd.f32 1e-05, %v2259_v14  ;;  %v3172_v21 = vpop.eup %3171  ;;  %v2531_v19 = vmul.f32 %v3170_v59, %v2530_v53 }
 0x309   : > { %2771 = vst [vmem:[%s5189_s21 + $0xb0] sm:$0xff] %v2739_v48  ;;  %v5485_v0 = vmul.f32 %v5098_v27, %v2023_v30  ;;  %v2388_v55 = vsel %vm2387_vm0, %v3168_v12, %v2384_v49  ;;  %v2390_v4 = vmul.f32 %v3172_v21, %v5460_v10  ;;  %3173 = vrsqrt.f32 %v5477_v41 }
 0x30a   : > { %v2119_v3 = vpop.xlane.xlu0 %2118  ;;  %v2659_v7 = vmul.f32 %v2627_v61, %v2388_v55  ;;  %v2532_v38 = vmul.f32 0.5, %v2531_v19  ;;  %3175 = vrsqrt.f32 %v5479_v54  ;;  %vm2396_vm4 = vweird.f32 %v3172_v21 }
 0x30b   : > { %v1995_v34 = vpop.xlane.xlu2 %1994  ;;  %v2391_v51 = vmul.f32 %v3172_v21, %v2390_v4  ;;  %v2196_v56 = vmul.f32 %v5098_v27, %v2119_v3  ;;  %v2228_v33 = vmul.f32 %v5485_v0, %v5485_v0  ;;  %vm2397_vm6 = vmor %vm2395_vm5, %vm2396_vm4  ;;  %vm2405_vm8 = vweird.f32 %v5477_v41 }
 0x30c   : > { %v2692_v63 = vmul.f32 %v5158_v26, %v2659_v7  ;;  %v2533_v15 = vsub.f32 1.5, %v2532_v38  ;;  %v5497_v17 = vmul.f32 %v5098_v27, %v1995_v34  ;;  %vm2545_vm11 = vweird.f32 %v5479_v54 }
 0x30d   : > { %v2392_v12 = vmul.f32 0.5, %v2391_v51  ;;  %v2260_v24 = vsub.f32 %v2196_v56, %v2228_v33 }
 0x30e   : > { %v2725_v9 = vadd.f32 %v5166_v6, %v2692_v63  ;;  %v2534_v2 = vmul.f32 %v3170_v59, %v2533_v15 }
 0x30f   : > { %v3174_v23 = vpop.eup %3173  ;;  %v2393_v32 = vsub.f32 1.5, %v2392_v12  ;;  %v5501_v31 = vadd.f32 1e-05, %v2260_v24  ;;  %v2629_v24 = vsub.f32 %v5076_v11, %v5463_v22 }
 0x310   : > { %v2091_v47 = vpop.xlane.xlu1 %2090  ;;  %v3176_v13 = vpop.eup %3175  ;;  %2757 = vst [vmem:[%s5189_s21 + $0x40] sm:$0xff] %v2725_v9  ;;  %v2538_v44 = vsel %vm2537_vm3, %v3170_v59, %v2534_v2  ;;  %v2400_v18 = vmul.f32 %v3174_v23, %v5477_v41  ;;  %v2214_v59 = vmul.f32 %v5497_v17, %v5497_v17  ;;  %vm2406_vm7 = vweird.f32 %v3174_v23 }
 0x311   : > { %v2182_v58 = vmul.f32 %v5098_v27, %v2091_v47  ;;  %v2674_v37 = vmul.f32 %v2642_v25, %v2538_v44  ;;  %v2394_v60 = vmul.f32 %v3172_v21, %v2393_v32  ;;  %v2540_v14 = vmul.f32 %v3176_v13, %v5479_v54  ;;  %vm2407_vm10 = vmor %vm2405_vm8, %vm2406_vm7 }
 0x312   : > { %v1997_v1 = vpop.xlane.xlu0 %1996  ;;  %v2401_v42 = vmul.f32 %v3174_v23, %v2400_v18  ;;  %3177 = vrsqrt.f32 %v5501_v31  ;;  %vm2546_vm9 = vweird.f32 %v3176_v13  ;;  %v2643_v2 = vsub.f32 %v5070_v39, %v5450_v52 }
 0x313   : > { %v2025_v48 = vpop.xlane.xlu2 %2024  ;;  %v2707_v53 = vmul.f32 %v5158_v26, %v2674_v37  ;;  %v2398_v3 = vsel %vm2397_vm6, %v3172_v21, %v2394_v60  ;;  %v2541_v30 = vmul.f32 %v3176_v13, %v2540_v14  ;;  %v2246_v61 = vsub.f32 %v2182_v58, %v2214_v59  ;;  %vm2547_vm12 = vmor %vm2545_vm11, %vm2546_vm9 }
 0x314   : > { %v2660_v49 = vmul.f32 %v2628_v62, %v2398_v3  ;;  %v2402_v10 = vmul.f32 0.5, %v2401_v42  ;;  %v5515_v19 = vmul.f32 %v5098_v27, %v2025_v48  ;;  %v5519_v55 = vmul.f32 %v5098_v27, %v1997_v1 }
 0x315   : > { %v2740_v28 = vadd.f32 %v5166_v6, %v2707_v53  ;;  %v2542_v16 = vmul.f32 0.5, %v2541_v30  ;;  %v5522_v38 = vadd.f32 1e-05, %v2246_v61  ;;  %vm2555_vm14 = vweird.f32 %v5501_v31 }
 0x316   : > { %v2693_v4 = vmul.f32 %v5158_v26, %v2660_v49  ;;  %v2403_v7 = vsub.f32 1.5, %v2402_v10  ;;  %v2229_v12 = vmul.f32 %v5515_v19, %v5515_v19  ;;  %v2215_v47 = vmul.f32 %v5519_v55, %v5519_v55 }
 0x317   : > { %2772 = vst [vmem:[%s5189_s21 + $0xb8] sm:$0xff] %v2740_v28  ;;  %v2543_v51 = vsub.f32 1.5, %v2542_v16  ;;  %3179 = vrsqrt.f32 %v5522_v38  ;;  %v2644_v10 = vsub.f32 %v5084_v40, %v5485_v0  ;;  %vm2415_vm1 = vweird.f32 %v5522_v38 }
 0x318   : > { %v2121_v34 = vpop.xlane.xlu1 %2120  ;;  %v3178_v33 = vpop.eup %3177  ;;  %v2726_v63 = vadd.f32 %v5166_v6, %v2693_v4  ;;  %v2404_v15 = vmul.f32 %v3174_v23, %v2403_v7 }
 0x319   : > { %v2197_v56 = vmul.f32 %v5098_v27, %v2121_v34  ;;  %v2544_v9 = vmul.f32 %v3176_v13, %v2543_v51  ;;  %v2550_v41 = vmul.f32 %v3178_v33, %v5501_v31  ;;  %vm2556_vm13 = vweird.f32 %v3178_v33 }
 0x31a   : > { %v2027_v21 = vpop.xlane.xlu0 %2026  ;;  %2758 = vst [vmem:[%s5189_s21 + $0x48] sm:$0xff] %v2726_v63  ;;  %v2408_v1 = vsel %vm2407_vm10, %v3174_v23, %v2404_v15  ;;  %vm2557_vm15 = vmor %vm2555_vm14, %vm2556_vm13  ;;  %v5571_v63 = vld [vmem:[#allocation8 + $0x2] ss:$0 sm:$0xff] }
 0x31b   : > { %v2261_v25 = vsub.f32 %v2197_v56, %v2229_v12  ;;  %v2093_v32 = vpop.xlane.xlu2 %2092  ;;  %v2661_v44 = vmul.f32 %v2629_v24, %v2408_v1  ;;  %v2548_v18 = vsel %vm2547_vm12, %v3176_v13, %v2544_v9  ;;  %v2551_v11 = vmul.f32 %v3178_v33, %v2550_v41 }
 0x31c   : > { %v2183_v22 = vmul.f32 %v5098_v27, %v2093_v32  ;;  %v2675_v54 = vmul.f32 %v2643_v2, %v2548_v18  ;;  %v5547_v14 = vmul.f32 %v5098_v27, %v2027_v21  ;;  %v2630_v32 = vsub.f32 %v5090_v29, %v5497_v17 }
 0x31d   : > { %v5542_v58 = vadd.f32 1e-05, %v2261_v25  ;;  %v2694_v37 = vmul.f32 %v5158_v26, %v2661_v44  ;;  %v2552_v39 = vmul.f32 0.5, %v2551_v11  ;;  %v3180_v23 = vpop.eup %3179 }
 0x31e   : > { %v2247_v52 = vsub.f32 %v2183_v22, %v2215_v47  ;;  %v2708_v60 = vmul.f32 %v5158_v26, %v2675_v54  ;;  %v2410_v48 = vmul.f32 %v3180_v23, %v5522_v38  ;;  %v2230_v7 = vmul.f32 %v5547_v14, %v5547_v14  ;;  %v5579_v47 = vld [vmem:[#allocation8 + $0x3] ss:$0 sm:$0xff] }
 0x31f   : > { %3181 = vrsqrt.f32 %v5542_v58  ;;  %v2727_v42 = vadd.f32 %v5166_v6, %v2694_v37  ;;  %v2553_v59 = vsub.f32 1.5, %v2552_v39  ;;  %vm2416_vm0 = vweird.f32 %v3180_v23 }
 0x320   : > { %v1999_v62 = vpop.xlane.xlu1 %1998  ;;  %v2741_v53 = vadd.f32 %v5166_v6, %v2708_v60  ;;  %v5553_v3 = vadd.f32 1e-05, %v2247_v52  ;;  %v2411_v49 = vmul.f32 %v3180_v23, %v2410_v48  ;;  %vm2417_vm2 = vmor %vm2415_vm1, %vm2416_vm0  ;;  %vm2565_vm4 = vweird.f32 %v5542_v58 }
 0x321   : > { %v5556_v26 = vmul.f32 %v5098_v27, %v1999_v62  ;;  %2759 = vst [vmem:[%s5189_s21 + $0x50] sm:$0xff] %v2727_v42  ;;  %v2554_v30 = vmul.f32 %v3178_v33, %v2553_v59  ;;  %v2645_v48 = vsub.f32 %v5101_v43, %v5515_v19 }
 0x322   : > { %v2095_v13 = vpop.xlane.xlu0 %2094  ;;  %2773 = vst [vmem:[%s5189_s21 + $0xc0] sm:$0xff] %v2741_v53  ;;  %3183 = vrsqrt.f32 %v5553_v3  ;;  %v2412_v4 = vmul.f32 0.5, %v2411_v49  ;;  %vm2425_vm7 = vweird.f32 %v5553_v3 }
 0x323   : > { %v2184_v61 = vmul.f32 %v5098_v27, %v2095_v13  ;;  %v2216_v6 = vmul.f32 %v5556_v26, %v5556_v26  ;;  %v2123_v28 = vpop.xlane.xlu2 %2122  ;;  %v2558_v16 = vsel %vm2557_vm15, %v3178_v33, %v2554_v30 }
 0x324   : > { %v2198_v31 = vmul.f32 %v5098_v27, %v2123_v28  ;;  %v2676_v34 = vmul.f32 %v2644_v10, %v2558_v16  ;;  %v2413_v56 = vsub.f32 1.5, %v2412_v4 }
 0x325   : > { %v3182_v21 = vpop.eup %3181  ;;  %v2248_v51 = vsub.f32 %v2184_v61, %v2216_v6 }
 0x326   : > { %v2560_v40 = vmul.f32 %v3182_v21, %v5542_v58  ;;  %v2262_v0 = vsub.f32 %v2198_v31, %v2230_v7  ;;  %v2709_v15 = vmul.f32 %v5571_v63, %v2676_v34  ;;  %v2414_v9 = vmul.f32 %v3180_v23, %v2413_v56 }
 0x327   : > { %v5574_v12 = vadd.f32 1e-05, %v2248_v51  ;;  %vm2566_vm3 = vweird.f32 %v3182_v21  ;;  %v2631_v31 = vsub.f32 %v5096_v20, %v5519_v55 }
 0x328   : > { %v2029_v24 = vpop.xlane.xlu1 %2028  ;;  %v2561_v41 = vmul.f32 %v3182_v21, %v2560_v40  ;;  %v5577_v2 = vadd.f32 1e-05, %v2262_v0  ;;  %v3184_v1 = vpop.eup %3183  ;;  %v2742_v25 = vadd.f32 %v5579_v47, %v2709_v15  ;;  %v2418_v18 = vsel %vm2417_vm2, %v3180_v23, %v2414_v9  ;;  %vm2567_vm5 = vmor %vm2565_vm4, %vm2566_vm3 }
 0x329   : > { %3185 = vrsqrt.f32 %v5574_v12  ;;  %v5587_v44 = vmul.f32 %v5098_v27, %v2029_v24  ;;  %v2420_v11 = vmul.f32 %v3184_v1, %v5553_v3  ;;  %v2662_v22 = vmul.f32 %v2630_v32, %v2418_v18 }
 0x32a   : > { %v2125_v33 = vpop.xlane.xlu0 %2124  ;;  %v2562_v38 = vmul.f32 0.5, %v2561_v41  ;;  %2774 = vst [vmem:[%s5189_s21 + $0xc8] sm:$0xff] %v2742_v25  ;;  %3187 = vrsqrt.f32 %v5577_v2  ;;  %vm2426_vm6 = vweird.f32 %v3184_v1  ;;  %vm2435_vm10 = vweird.f32 %v5574_v12 }
 0x32b   : > { %v2199_v54 = vmul.f32 %v5098_v27, %v2125_v33  ;;  %v2231_v29 = vmul.f32 %v5587_v44, %v5587_v44  ;;  %v2421_v39 = vmul.f32 %v3184_v1, %v2420_v11  ;;  %v2695_v52 = vmul.f32 %v5571_v63, %v2662_v22  ;;  %vm2427_vm8 = vmor %vm2425_vm7, %vm2426_vm6 }
 0x32c   : > { %v2563_v37 = vsub.f32 1.5, %v2562_v38  ;;  %v2632_v18 = vsub.f32 %v5123_v46, %v5556_v26  ;;  %vm2575_vm13 = vweird.f32 %v5577_v2 }
 0x32d   : > { %v2001_v17 = vpop.xlane.xlu2 %2000  ;;  %v2263_v60 = vsub.f32 %v2199_v54, %v2231_v29  ;;  %v2422_v62 = vmul.f32 0.5, %v2421_v39  ;;  %v2728_v59 = vadd.f32 %v5579_v47, %v2695_v52  ;;  %v2646_v29 = vsub.f32 %v5114_v5, %v5547_v14 }
 0x32e   : > { %v5597_v23 = vmul.f32 %v5098_v27, %v2001_v17  ;;  %v2564_v13 = vmul.f32 %v3182_v21, %v2563_v37 }
 0x32f   : > { %v3186_v42 = vpop.eup %3185  ;;  %v5603_v53 = vadd.f32 1e-05, %v2263_v60  ;;  %v2423_v10 = vsub.f32 1.5, %v2422_v62  ;;  %2760 = vst [vmem:[%s5189_s21 + $0x58] sm:$0xff] %v2728_v59 }
 0x330   : > { %v2097_v30 = vpop.xlane.xlu1 %2096  ;;  %v2568_v49 = vsel %vm2567_vm5, %v3182_v21, %v2564_v13  ;;  %v2430_v61 = vmul.f32 %v3186_v42, %v5574_v12  ;;  %v3188_v6 = vpop.eup %3187  ;;  %v2217_v58 = vmul.f32 %v5597_v23, %v5597_v23  ;;  %vm2436_vm9 = vweird.f32 %v3186_v42 }
 0x331   : > { %v2677_v28 = vmul.f32 %v2645_v48, %v2568_v49  ;;  %3189 = vrsqrt.f32 %v5603_v53  ;;  %v2185_v43 = vmul.f32 %v5098_v27, %v2097_v30  ;;  %v2424_v19 = vmul.f32 %v3184_v1, %v2423_v10  ;;  %vm2437_vm12 = vmor %vm2435_vm10, %vm2436_vm9 }
 0x332   : > { %v2431_v4 = vmul.f32 %v3186_v42, %v2430_v61  ;;  %v2570_v7 = vmul.f32 %v3188_v6, %v5577_v2  ;;  %vm2576_vm11 = vweird.f32 %v3188_v6  ;;  %vm2585_vm0 = vweird.f32 %v5603_v53 }
 0x333   : > { %v2710_v21 = vmul.f32 %v5571_v63, %v2677_v28  ;;  %v2249_v34 = vsub.f32 %v2185_v43, %v2217_v58  ;;  %v2428_v56 = vsel %vm2427_vm8, %v3184_v1, %v2424_v19  ;;  %vm2577_vm14 = vmor %vm2575_vm13, %vm2576_vm11 }
 0x334   : > { %v2432_v40 = vmul.f32 0.5, %v2431_v4  ;;  %v2571_v0 = vmul.f32 %v3188_v6, %v2570_v7  ;;  %v2663_v33 = vmul.f32 %v2631_v31, %v2428_v56 }
 0x335   : > { %v2003_v16 = vpop.xlane.xlu0 %2002  ;;  %v2031_v51 = vpop.xlane.xlu2 %2030  ;;  %v2743_v15 = vadd.f32 %v5579_v47, %v2710_v21  ;;  %v5618_v9 = vadd.f32 1e-05, %v2249_v34 }
 0x336   : > { %v2433_v3 = vsub.f32 1.5, %v2432_v40  ;;  %v2572_v24 = vmul.f32 0.5, %v2571_v0  ;;  %v2696_v20 = vmul.f32 %v5571_v63, %v2663_v33  ;;  %v5630_v54 = vmul.f32 %v5098_v27, %v2003_v16 }
 0x337   : > { %v3190_v41 = vpop.eup %3189  ;;  %2775 = vst [vmem:[%s5189_s21 + $0xd0] sm:$0xff] %v2743_v15  ;;  %3191 = vrsqrt.f32 %v5618_v9  ;;  %v5648_v49 = vmul.f32 %v5098_v27, %v2031_v51  ;;  %vm2445_vm3 = vweird.f32 %v5618_v9 }
 0x338   : > { %v2434_v55 = vmul.f32 %v3186_v42, %v2433_v3  ;;  %v2573_v25 = vsub.f32 1.5, %v2572_v24  ;;  %v2580_v1 = vmul.f32 %v3190_v41, %v5603_v53  ;;  %v2729_v32 = vadd.f32 %v5579_v47, %v2696_v20 }
 0x339   : > { %vm2586_vm15 = vweird.f32 %v3190_v41  ;;  %v2218_v5 = vmul.f32 %v5630_v54, %v5630_v54  ;;  %v2232_v34 = vmul.f32 %v5648_v49, %v5648_v49 }
 0x33a   : > { %v2438_v11 = vsel %vm2437_vm12, %v3186_v42, %v2434_v55  ;;  %v2574_v22 = vmul.f32 %v3188_v6, %v2573_v25  ;;  %v2581_v12 = vmul.f32 %v3190_v41, %v2580_v1  ;;  %2761 = vst [vmem:[%s5189_s21 + $0x60] sm:$0xff] %v2729_v32  ;;  %vm2587_vm1 = vmor %vm2585_vm0, %vm2586_vm15  ;;  %v2633_v55 = vsub.f32 %v5164_v8, %v5597_v23 }
 0x33b   : > { %v2664_v17 = vmul.f32 %v2632_v18, %v2438_v11 }
 0x33c   : > { %v2578_v46 = vsel %vm2577_vm14, %v3188_v6, %v2574_v22  ;;  %v2582_v26 = vmul.f32 0.5, %v2581_v12  ;;  %v2647_v6 = vsub.f32 %v5142_v57, %v5587_v44 }
 0x33d   : > { %v2033_v38 = vpop.xlane.xlu0 %2032  ;;  %v2099_v37 = vpop.xlane.xlu2 %2098  ;;  %v2697_v39 = vmul.f32 %v5571_v63, %v2664_v17  ;;  %v2678_v52 = vmul.f32 %v2646_v29, %v2578_v46 }
 0x33e   : > { %v2186_v13 = vmul.f32 %v5098_v27, %v2099_v37  ;;  %v2583_v62 = vsub.f32 1.5, %v2582_v26  ;;  %v3192_v14 = vpop.eup %3191  ;;  %v5655_v28 = vmul.f32 %v5098_v27, %v2033_v38 }
 0x33f   : > { %v2730_v42 = vadd.f32 %v5579_v47, %v2697_v39  ;;  %v2711_v59 = vmul.f32 %v5571_v63, %v2678_v52  ;;  %v2440_v30 = vmul.f32 %v3192_v14, %v5618_v9  ;;  %vm2446_vm2 = vweird.f32 %v3192_v14 }
 0x340   : > { %v2035_v2 = vpop.xlane.xlu1 %2034  ;;  %v2584_v48 = vmul.f32 %v3190_v41, %v2583_v62  ;;  %v2250_v10 = vsub.f32 %v2186_v13, %v2218_v5  ;;  %v2233_v56 = vmul.f32 %v5655_v28, %v5655_v28  ;;  %vm2447_vm4 = vmor %vm2445_vm3, %vm2446_vm2  ;;  %v2634_v13 = vsub.f32 %v5200_v36, %v5630_v54 }
 0x341   : > { %v5638_v60 = vmul.f32 %v5098_v27, %v2035_v2  ;;  %2762 = vst [vmem:[%s5189_s21 + $0x68] sm:$0xff] %v2730_v42  ;;  %v2744_v61 = vadd.f32 %v5579_v47, %v2711_v59  ;;  %v2441_v43 = vmul.f32 %v3192_v14, %v2440_v30 }
 0x342   : > { %v2588_v16 = vsel %vm2587_vm1, %v3190_v41, %v2584_v48  ;;  %v2282_v19 = vadd.f32 1e-05, %v2250_v10 }
 0x343   : > { %v2234_v53 = vmul.f32 %v5638_v60, %v5638_v60  ;;  %2776 = vst [vmem:[%s5189_s21 + $0xd8] sm:$0xff] %v2744_v61  ;;  %v2679_v7 = vmul.f32 %v2647_v6, %v2588_v16  ;;  %v2442_v21 = vmul.f32 0.5, %v2441_v43  ;;  %v2650_v61 = vsub.f32 %v5264_v50, %v5638_v60 }
 0x344   : > { %3193 = vrsqrt.f32 %v2282_v19  ;;  %vm2455_vm6 = vweird.f32 %v2282_v19  ;;  %v2649_v60 = vsub.f32 %v5234_v35, %v5655_v28 }
 0x345   : > { %v2131_v58 = vpop.xlane.xlu0 %2130  ;;  %v2129_v31 = vpop.xlane.xlu2 %2128  ;;  %v2712_v51 = vmul.f32 %v5571_v63, %v2679_v7  ;;  %v2443_v15 = vsub.f32 1.5, %v2442_v21 }
 0x346   : > { %v2202_v4 = vmul.f32 %v5098_v27, %v2131_v58  ;;  %v2201_v0 = vmul.f32 %v5098_v27, %v2129_v31 }
 0x347   : > { %v2745_v3 = vadd.f32 %v5579_v47, %v2712_v51  ;;  %v2444_v20 = vmul.f32 %v3192_v14, %v2443_v15 }
 0x348   : > { %v2266_v57 = vsub.f32 %v2202_v4, %v2234_v53  ;;  %v2127_v44 = vpop.xlane.xlu1 %2126  ;;  %v2265_v41 = vsub.f32 %v2201_v0, %v2233_v56 }
 0x349   : > { %v2200_v40 = vmul.f32 %v5098_v27, %v2127_v44  ;;  %2777 = vst [vmem:[%s5189_s21 + $0xe0] sm:$0xff] %v2745_v3  ;;  %v2448_v32 = vsel %vm2447_vm4, %v3192_v14, %v2444_v20 }
 0x34a   : > { %v2298_v33 = vadd.f32 1e-05, %v2266_v57  ;;  %v2297_v1 = vadd.f32 1e-05, %v2265_v41  ;;  %v3194_v27 = vpop.eup %3193  ;;  %v2665_v18 = vmul.f32 %v2633_v55, %v2448_v32 }
 0x34b   : > { %v2264_v24 = vsub.f32 %v2200_v40, %v2232_v34  ;;  %v2450_v38 = vmul.f32 %v3194_v27, %v2282_v19  ;;  %vm2456_vm5 = vweird.f32 %v3194_v27  ;;  %v2648_v19 = vsub.f32 %v5197_v45, %v5648_v49 }
 0x34c   : > { %3195 = vrsqrt.f32 %v2298_v33  ;;  %v2698_v11 = vmul.f32 %v5571_v63, %v2665_v18  ;;  %vm2457_vm7 = vmor %vm2455_vm6, %vm2456_vm5  ;;  %vm2615_vm9 = vweird.f32 %v2298_v33  ;;  %vm2605_vm15 = vweird.f32 %v2297_v1 }
 0x34d   : > { %v2296_v25 = vadd.f32 1e-05, %v2264_v24  ;;  %v2451_v22 = vmul.f32 %v3194_v27, %v2450_v38 }
 0x34e   : > { %v2731_v9 = vadd.f32 %v5579_v47, %v2698_v11 }
 0x34f   : > { %3197 = vrsqrt.f32 %v2296_v25  ;;  %v2452_v29 = vmul.f32 0.5, %v2451_v22  ;;  %vm2595_vm13 = vweird.f32 %v2296_v25 }
 0x350   : > { %3199 = vrsqrt.f32 %v2297_v1  ;;  %2763 = vst [vmem:[%s5189_s21 + $0x70] sm:$0xff] %v2731_v9 }
 0x351   : > { %v2453_v8 = vsub.f32 1.5, %v2452_v29 }
 0x352   : > { %v3196_v12 = vpop.eup %3195 }
 0x353   : > { %v2610_v17 = vmul.f32 %v3196_v12, %v2298_v33  ;;  %v2454_v2 = vmul.f32 %v3194_v27, %v2453_v8  ;;  %vm2616_vm8 = vweird.f32 %v3196_v12 }
 0x354   : > { %vm2617_vm10 = vmor %vm2615_vm9, %vm2616_vm8 }
 0x355   : > { %v3198_v37 = vpop.eup %3197  ;;  %v2611_v23 = vmul.f32 %v3196_v12, %v2610_v17  ;;  %v2458_v5 = vsel %vm2457_vm7, %v3194_v27, %v2454_v2 }
 0x356   : > { %v3200_v46 = vpop.eup %3199  ;;  %v2590_v26 = vmul.f32 %v3198_v37, %v2296_v25  ;;  %v2666_v59 = vmul.f32 %v2634_v13, %v2458_v5  ;;  %vm2596_vm11 = vweird.f32 %v3198_v37 }
 0x357   : > { %v2612_v39 = vmul.f32 0.5, %v2611_v23  ;;  %v2600_v52 = vmul.f32 %v3200_v46, %v2297_v1  ;;  %vm2606_vm12 = vweird.f32 %v3200_v46  ;;  %vm2597_vm14 = vmor %vm2595_vm13, %vm2596_vm11 }
 0x358   : > { %v2591_v62 = vmul.f32 %v3198_v37, %v2590_v26  ;;  %v2699_v6 = vmul.f32 %v5571_v63, %v2666_v59  ;;  %vm2607_vm0 = vmor %vm2605_vm15, %vm2606_vm12 }
 0x359   : > { %v2613_v14 = vsub.f32 1.5, %v2612_v39  ;;  %v2601_v42 = vmul.f32 %v3200_v46, %v2600_v52 }
 0x35a   : > { %v2592_v48 = vmul.f32 0.5, %v2591_v62  ;;  %v2732_v58 = vadd.f32 %v5579_v47, %v2699_v6 }
 0x35b   : > { %v2614_v30 = vmul.f32 %v3196_v12, %v2613_v14  ;;  %v2602_v10 = vmul.f32 0.5, %v2601_v42 }
 0x35c   : > { %v2593_v53 = vsub.f32 1.5, %v2592_v48  ;;  %2764 = vst [vmem:[%s5189_s21 + $0x78] sm:$0xff] %v2732_v58 }
 0x35d   : > { %v2618_v36 = vsel %vm2617_vm10, %v3196_v12, %v2614_v30  ;;  %v2603_v54 = vsub.f32 1.5, %v2602_v10 }
 0x35e   : > { %v2682_v16 = vmul.f32 %v2650_v61, %v2618_v36  ;;  %v2594_v43 = vmul.f32 %v3198_v37, %v2593_v53 }
 0x35f   : > { %v2604_v50 = vmul.f32 %v3200_v46, %v2603_v54 }
 0x360   : > { %v2715_v4 = vmul.f32 %v5571_v63, %v2682_v16  ;;  %v2598_v7 = vsel %vm2597_vm14, %v3198_v37, %v2594_v43 }
 0x361   : > { %v2680_v45 = vmul.f32 %v2648_v19, %v2598_v7  ;;  %v2608_v49 = vsel %vm2607_vm0, %v3200_v46, %v2604_v50 }
 0x362   : > { %v2748_v31 = vadd.f32 %v5579_v47, %v2715_v4  ;;  %v2681_v21 = vmul.f32 %v2649_v60, %v2608_v49 }
 0x363   : > { %v2713_v34 = vmul.f32 %v5571_v63, %v2680_v45 }
 0x364   : > { %2780 = vst [vmem:[%s5189_s21 + $0xf8] sm:$0xff] %v2748_v31  ;;  %v2714_v35 = vmul.f32 %v5571_v63, %v2681_v21 }
 0x365   : > { %v2746_v28 = vadd.f32 %v5579_v47, %v2713_v34 }
 0x366   : > { %v2747_v57 = vadd.f32 %v5579_v47, %v2714_v35 }
 0x367   : > { %2778 = vst [vmem:[%s5189_s21 + $0xe8] sm:$0xff] %v2746_v28 }
 0x368   : > { %2779 = vst [vmem:[%s5189_s21 + $0xf0] sm:$0xff] %v2747_v57 }
 0x369   : > { %3352 = shalt.err (!%p3349_p10)
}
 0x36a   : > { %s3407_s30 = smov 128   ;;  %s3408_s24 = smov 8  }
 0x36b   : > { %2999 = dma.vmem_to_hbm [thread:$0]  (%p3522_p3), %s2795_s11, 4096, %s2797_s13, %s2782_s14, %s3407_s30, %s3407_s30, %s3408_s24  }
 0x36c PF: > { %s2811_s25 = sand.u32 1, %s3387_s15   ;;  %p5850_p12 = scmp.ge.s32.totalorder %s3399_s18, 2 }
 0x36d   : > { %s2812_s21 = scalar_lea.sflag [#allocation4], %s2811_s25 }
 0x36e   : > { %p3016_p13 = pnand %p5850_p12, %p3469_p6 }
 0x370   : > { %p3017_p0 = pneg %p3016_p13 }
 0x372   : > { %3382 = dma.done.wait (%p3017_p0), %s2812_s21, 4096  }
 0x373   : > { %3384 = vsyncadd (%p3017_p0), %s2812_s21, 4294963200  ;;  %p19_p5 = scmp.ge.s32.totalorder %s3507_s23, 4   ;;  %s5851_s15 = smov %s3391_s16 }
 0x374   : > { %s5852_s16 = smov %s3395_s17  ;;  %s5853_s17 = smov %s3518_s27 }
 0x375   : > { %s5854_s18 = smov %s3507_s23  ;;  %21 = sbr.rel (!%p19_p5) target bundleno = 7 (0x7), region = 93 }
 0x37a   :  { %2818 = vsyncpa [#allocation3], 1 }
 0x37b   :  { %2820 = vsyncpa [#allocation3 + $0x1], 1 }
 0x37c   :  { %2821 = vsyncpa [#allocation6], 1 }
 0x37d   :  { %2822 = vsyncpa [#allocation9], 1 }
 0x37e   :  { %2823 = vsyncpa [#allocation4], 1 }
 0x37f   :  { %2825 = vsyncpa [#allocation4 + $0x1], 1 }

</bundles_post_ra>
